<compile_context>
chip_gen: v7x
topology: tpu7x:2x2x1
jax: 0.10.0
libtpu: 0.0.40
codegen_flags: <defaults>
</compile_context>

<pallas_src>
import functools

import numpy as np
import jax
import jax.numpy as jnp
from jax.experimental import pallas as pl
from jax.experimental.pallas import tpu as pltpu

_BP = 8     # batch padded to one full sublane tile -> aligned, unmasked row blocks
_FCP = 128  # fc head output lane-padded to one full lane tile (wrapper slices [:2])
_CP = 8     # image channels padded for tile alignment (extra weight rows are zero)


def _lstm_cell(gates, c, width):
    i = jax.nn.sigmoid(gates[:, 0 * width:1 * width])
    f = jax.nn.sigmoid(gates[:, 1 * width:2 * width])
    g = jnp.tanh(gates[:, 2 * width:3 * width])
    o = jax.nn.sigmoid(gates[:, 3 * width:4 * width])
    c = f * c + i * g
    return o * jnp.tanh(c), c


# -----------------------------------------------------------------------------
# Single fused kernel: encoders + CNN stand-in + stacked decoder + fc head.
# -----------------------------------------------------------------------------
def _vtp_kernel(x0_ref, img_ref,
                wih0_ref, whh0_ref, b0_ref, wih_r_ref, whh_r_ref, b_r_ref,
                wproj_ref, wfc_ref, bfc_ref,
                wih0c_ref, wih0e_ref, whh0d_ref, b0d_ref, wl_r_ref, bl_r_ref,
                fcw_ref, fcb_ref,
                out_ref,
                xg_sc, seq_sc, xgd_sc, dh_sc,
                *, T, TL, BP, H, L):
    SW = 4 * H          # fused encoder state width: [tf | sf | tb | sb]
    H2 = 2 * H          # forward-direction half:    [tf | sf]
    GENC = 16 * H       # fused encoder gate width, gate-major (i|f|g|o) x SW
    DH = 2 * H          # decoder hidden size
    GDEC = 4 * DH       # decoder gate width
    unroll = 8

    # ------------- Encoders: both LSTMs x both directions x all layers -------------
    col = jax.lax.broadcasted_iota(jnp.int32, (BP, GENC), 1)
    fwd_cols = (col % SW) < H2          # forward-stream lanes inside every gate slab

    def enc_layer(whh_bf16):
        def step(s, carry):
            h, c = carry
            rf = pl.multiple_of(s * BP, BP)              # fwd streams: time s
            rb = pl.multiple_of((T - 1 - s) * BP, BP)    # bwd streams: time T-1-s
            # Aligned 8-row loads; the select does not depend on the carry, so under
            # full unroll it sits off the serial critical path.
            xg = jnp.where(fwd_cols,
                           xg_sc[pl.ds(rf, BP), :],
                           xg_sc[pl.ds(rb, BP), :])
            gates = xg + jnp.dot(h.astype(jnp.bfloat16), whh_bf16,
                                 preferred_element_type=jnp.float32)
            h, c = _lstm_cell(gates, c, SW)
            seq_sc[pl.ds(rf, BP), 0:H2] = h[:, 0:H2]         # fwd outputs at time s
            seq_sc[pl.ds(rb, BP), H2:SW] = h[:, H2:SW]       # bwd outputs at T-1-s
            return h, c

        z = jnp.zeros((BP, SW), jnp.float32)
        return jax.lax.fori_loop(0, T, step, (z, z), unroll=min(T, unroll))

    # Layer 0: one hoisted time-parallel input-projection GEMM, then the recurrence.
    xg_sc[...] = (jnp.dot(x0_ref[...].astype(jnp.bfloat16), wih0_ref[...],
                          preferred_element_type=jnp.float32) + b0_ref[...])
    h, c = enc_layer(whh0_ref[...])

    # Layers 1..L-1 (input = previous layer's fwd||bwd sequence, already in VMEM).
    for l in range(1, L):
        xg_sc[...] = (jnp.dot(seq_sc[...].astype(jnp.bfloat16), wih_r_ref[l - 1],
                              preferred_element_type=jnp.float32) + b_r_ref[l - 1])
        h, c = enc_layer(whh_r_ref[l - 1])

    # PyTorch hidden/cell[-2] == forward direction of the LAST layer for each encoder;
    # cat(traj_fwd, status_fwd) = first 2H columns of the fused state.
    h_init = h[:, 0:DH]
    c_init = c[:, 0:DH]

    # ------------- CNN stand-in + stacked decoder LSTM + fc head -------------------
    pooled = jnp.mean(img_ref[...], axis=2)                                   # [BP, CP]
    feat = jnp.maximum(jnp.dot(pooled, wproj_ref[...],
                               preferred_element_type=jnp.float32), 0.0)
    cnn_out = (jnp.dot(feat, wfc_ref[...], preferred_element_type=jnp.float32)
               + bfc_ref[...])                                                # [BP, 128]
    cnn_g = jnp.dot(cnn_out.astype(jnp.bfloat16), wih0c_ref[...],
                    preferred_element_type=jnp.float32)                       # [BP, GDEC]

    # Hoisted decoder layer-0 input projection over ONLY the TL decoded steps, with
    # the time-invariant cnn contribution and the bias folded in once.
    xgd_sc[...] = (jnp.dot(seq_sc[0:TL * BP, :].astype(jnp.bfloat16), wih0e_ref[...],
                           preferred_element_type=jnp.float32)
                   + b0d_ref[...]
                   + jnp.concatenate([cnn_g] * TL, axis=0))

    whh0d = whh0d_ref[...]
    wl = [wl_r_ref[i] for i in range(L - 1)]      # stacked [W_ih; W_hh], bf16
    bl = [bl_r_ref[i] for i in range(L - 1)]

    def dec_step(t, carry):
        hs, cs = carry
        r = pl.multiple_of(t * BP, BP)
        h_new = list(hs)
        c_new = list(cs)
        g0 = xgd_sc[pl.ds(r, BP), :] + jnp.dot(hs[0].astype(jnp.bfloat16), whh0d,
                                               preferred_element_type=jnp.float32)
        h_new[0], c_new[0] = _lstm_cell(g0, cs[0], DH)
        for l in range(1, L):
            # One fused (W_ih | W_hh) matmul per layer on the concatenated input.
            inp = jnp.concatenate([h_new[l - 1], hs[l]], axis=1).astype(jnp.bfloat16)
            gl = (jnp.dot(inp, wl[l - 1], preferred_element_type=jnp.float32)
                  + bl[l - 1])
            h_new[l], c_new[l] = _lstm_cell(gl, cs[l], DH)
        dh_sc[pl.ds(r, BP), :] = h_new[L - 1]
        return tuple(h_new), tuple(c_new)

    init = (tuple(h_init for _ in range(L)), tuple(c_init for _ in range(L)))
    jax.lax.fori_loop(0, TL, dec_step, init, unroll=min(TL, unroll))

    # Fused fc head: one lane-dense GEMM over all TL decoded steps; output is
    # lane-padded to 128 so the HBM writeback is an unmasked full-tile store.
    out_ref[...] = (jnp.dot(dh_sc[...], fcw_ref[...],
                            preferred_element_type=jnp.float32) + fcb_ref[...])


# -----------------------------------------------------------------------------
# Wrapper: tiny padding / concat / transpose glue around ONE pallas_call.
# -----------------------------------------------------------------------------
def vtp_forward(params, images, inputs_trajectory, inputs_status, *,
                hidden_size, num_layers, target_lengths):
    B, T, _ = inputs_trajectory.shape
    H, L, TL = hidden_size, num_layers, target_lengths
    BP = _BP
    assert TL <= T and B <= BP

    # Time-major, feature(6->8)- and batch(B->8)-padded raw encoder input [T*BP, 8].
    x = jnp.concatenate([inputs_trajectory, inputs_status], axis=-1)      # (B, T, 6)
    x = jnp.transpose(x, (1, 0, 2))                                       # (T, B, 6)
    x0 = (jnp.zeros((T, BP, 8), jnp.float32).at[:, :B, :6].set(x)
          .reshape(T * BP, 8))

    # Batch- and channel-padded flattened images for the CNN stand-in.
    Bi, C, Hh, W = images.shape
    img = (jnp.zeros((BP, _CP, Hh * W), jnp.float32)
           .at[:Bi, :C].set(images.reshape(Bi, C, Hh * W)))

    enc, dec, cnn = params["enc"], params["dec"], params["cnn"]
    args = (x0, img,
            enc["wih0"], enc["whh0"], enc["b0"],
            enc["wih_r"], enc["whh_r"], enc["b_r"],
            cnn["wproj"], cnn["wfc"], cnn["bfc"],
            dec["wih0_cnn"], dec["wih0_enc"], dec["whh0"], dec["b0"],
            dec["wl_r"], dec["b_r"],
            params["fc_w"], params["fc_b"])

    vmem = pl.BlockSpec(memory_space=pltpu.MemorySpace.VMEM)
    kernel = functools.partial(_vtp_kernel, T=T, TL=TL, BP=BP, H=H, L=L)
    out = pl.pallas_call(
        kernel,
        out_shape=jax.ShapeDtypeStruct((TL * BP, _FCP), jnp.float32),
        in_specs=[vmem] * len(args),
        out_specs=vmem,
        scratch_shapes=[pltpu.VMEM((T * BP, 16 * H), jnp.float32),   # hoisted enc x@W_ih
                        pltpu.VMEM((T * BP, 4 * H), jnp.float32),    # inter-layer seq
                        pltpu.VMEM((TL * BP, 8 * H), jnp.float32),   # hoisted dec proj
                        pltpu.VMEM((TL * BP, 2 * H), jnp.float32)],  # decoder outputs
    )(*args)

    out = out.reshape(TL, BP, _FCP)[:, :B, :2]      # drop batch pad and lane pad
    return jnp.transpose(out, (1, 0, 2))            # (B, TL, 2)


# -----------------------------------------------------------------------------
# Deterministic parameter init (block-structured fused encoder weights).
# -----------------------------------------------------------------------------
def _uniform(key, shape, scale):
    return jax.random.uniform(key, shape, jnp.float32, minval=-scale, maxval=scale)


def _build_encoder_layer(key, layer, H):
    """Fused weights for one (traj+status, fwd+bwd) bidirectional encoder layer.

    Stream order [traj_fwd, status_fwd, traj_bwd, status_bwd]; gate order (i, f, g, o);
    gate-major columns: gate g / stream s occupies cols [g*4H + s*H : g*4H + (s+1)*H].
    Cross-stream blocks are zero, so the two encoders stay independent.
    """
    G = 16 * H
    k = 1.0 / np.sqrt(H)
    if layer == 0:
        row_slices = [[(0, 2)], [(2, 6)], [(0, 2)], [(2, 6)]]
        din = 8     # traj(2) | status(4) | pad(2) (pad rows stay zero)
    else:
        row_slices = [[(0, H), (2 * H, 3 * H)], [(H, 2 * H), (3 * H, 4 * H)],
                      [(0, H), (2 * H, 3 * H)], [(H, 2 * H), (3 * H, 4 * H)]]
        din = 4 * H
    wih = np.zeros((din, G), np.float32)
    whh = np.zeros((4 * H, G), np.float32)
    b = np.zeros((1, G), np.float32)
    kih, khh, kb = jax.random.split(key, 3)
    kihs, khhs, kbs = (jax.random.split(kih, 4), jax.random.split(khh, 4),
                       jax.random.split(kb, 4))
    for s in range(4):
        din_s = sum(e - a for a, e in row_slices[s])
        w_s = np.asarray(_uniform(kihs[s], (din_s, 4 * H), k))
        r0 = 0
        for a, e in row_slices[s]:
            n = e - a
            for g in range(4):
                wih[a:e, g * 4 * H + s * H:g * 4 * H + (s + 1) * H] = (
                    w_s[r0:r0 + n, g * H:(g + 1) * H])
            r0 += n
        wh_s = np.asarray(_uniform(khhs[s], (H, 4 * H), k))
        b_s = np.asarray(_uniform(kbs[s], (4 * H,), k))
        for g in range(4):
            whh[s * H:(s + 1) * H, g * 4 * H + s * H:g * 4 * H + (s + 1) * H] = (
                wh_s[:, g * H:(g + 1) * H])
            b[0, g * 4 * H + s * H:g * 4 * H + (s + 1) * H] = b_s[g * H:(g + 1) * H]
    return wih, whh, b


def init_params(key, H, L):
    ks = iter(jax.random.split(key, 40))
    GENC = 16 * H
    DH = 2 * H
    GDEC = 4 * DH

    wih0, whh0, b0 = _build_encoder_layer(next(ks), 0, H)
    wr, hr, br = [], [], []
    for _ in range(1, L):
        w, wh, bb = _build_encoder_layer(next(ks), 1, H)
        wr.append(w); hr.append(wh); br.append(bb)
    if L > 1:
        wih_r, whh_r, b_r = np.stack(wr), np.stack(hr), np.stack(br)
    else:  # unused dummies so the kernel signature stays fixed
        wih_r = np.zeros((1, 4 * H, GENC), np.float32)
        whh_r = np.zeros((1, 4 * H, GENC), np.float32)
        b_r = np.zeros((1, 1, GENC), np.float32)
    enc = dict(wih0=jnp.asarray(wih0, jnp.bfloat16),
               whh0=jnp.asarray(whh0, jnp.bfloat16),
               b0=jnp.asarray(b0, jnp.float32),
               wih_r=jnp.asarray(wih_r, jnp.bfloat16),
               whh_r=jnp.asarray(whh_r, jnp.bfloat16),
               b_r=jnp.asarray(b_r, jnp.float32))

    kd = 1.0 / np.sqrt(DH)
    dec = dict(
        wih0_cnn=_uniform(next(ks), (128, GDEC), kd).astype(jnp.bfloat16),
        wih0_enc=_uniform(next(ks), (4 * H, GDEC), kd).astype(jnp.bfloat16),
        whh0=_uniform(next(ks), (DH, GDEC), kd).astype(jnp.bfloat16),
        b0=_uniform(next(ks), (1, GDEC), kd))
    wl, bl = [], []
    for _ in range(1, L):
        wl.append(_uniform(next(ks), (2 * DH, GDEC), kd))   # stacked [W_ih; W_hh]
        bl.append(_uniform(next(ks), (1, GDEC), kd))
    if L > 1:
        dec["wl_r"] = jnp.stack(wl).astype(jnp.bfloat16)
        dec["b_r"] = jnp.stack(bl)
    else:
        dec["wl_r"] = jnp.zeros((1, 2 * DH, GDEC), jnp.bfloat16)
        dec["b_r"] = jnp.zeros((1, 1, GDEC), jnp.float32)

    kfc = 1.0 / np.sqrt(DH)
    fc_w = np.zeros((DH, _FCP), np.float32)
    fc_w[:, :2] = np.asarray(_uniform(next(ks), (DH, 2), kfc))
    fc_b = np.zeros((1, _FCP), np.float32)
    fc_b[0, :2] = np.asarray(_uniform(next(ks), (2,), kfc))

    wproj = np.zeros((_CP, 512), np.float32)
    wproj[:3] = np.asarray(_uniform(next(ks), (3, 512), 1.0 / np.sqrt(3)))
    cnn = dict(wproj=jnp.asarray(wproj),
               wfc=_uniform(next(ks), (512, 128), 1.0 / np.sqrt(512)),
               bfc=_uniform(next(ks), (1, 128), 1.0 / np.sqrt(512)))

    return dict(enc=enc, dec=dec,
                fc_w=jnp.asarray(fc_w), fc_b=jnp.asarray(fc_b), cnn=cnn)


# -----------------------------------------------------------------------------
if __name__ == "__main__":
    HIDDEN = 32
    NUM_LAYERS = 2
    TARGET_LENGTHS = 5
    B, T, IMG = 2, 8, 32

    k1, k2, k3 = jax.random.split(jax.random.PRNGKey(0), 3)
    images = jax.random.normal(k1, (B, 3, IMG, IMG), jnp.float32)
    inputs_trajectory = jax.random.normal(k2, (B, T, 2), jnp.float32)
    inputs_status = jax.random.normal(k3, (B, T, 4), jnp.float32)

    params = init_params(jax.random.PRNGKey(42), HIDDEN, NUM_LAYERS)

    fwd = jax.jit(functools.partial(vtp_forward, hidden_size=HIDDEN,
                                    num_layers=NUM_LAYERS,
                                    target_lengths=TARGET_LENGTHS))
    out = jax.block_until_ready(fwd(params, images, inputs_trajectory, inputs_status))
    assert out.shape == (B, TARGET_LENGTHS, 2), out.shape
    assert bool(jnp.all(jnp.isfinite(out)))
    print("KERNEL_OK")
</pallas_src>

<mosaic_0001>
module attributes {stable_mosaic.version = 11 : i64} {
  func.func @_vtp_kernel(%arg0: memref<64x8xf32, #tpu.memory_space<vmem>>, %arg1: memref<8x8x1024xf32, #tpu.memory_space<vmem>>, %arg2: memref<8x512xbf16, #tpu.memory_space<vmem>>, %arg3: memref<128x512xbf16, #tpu.memory_space<vmem>>, %arg4: memref<1x512xf32, #tpu.memory_space<vmem>>, %arg5: memref<1x128x512xbf16, #tpu.memory_space<vmem>>, %arg6: memref<1x128x512xbf16, #tpu.memory_space<vmem>>, %arg7: memref<1x1x512xf32, #tpu.memory_space<vmem>>, %arg8: memref<8x512xf32, #tpu.memory_space<vmem>>, %arg9: memref<512x128xf32, #tpu.memory_space<vmem>>, %arg10: memref<1x128xf32, #tpu.memory_space<vmem>>, %arg11: memref<128x256xbf16, #tpu.memory_space<vmem>>, %arg12: memref<128x256xbf16, #tpu.memory_space<vmem>>, %arg13: memref<64x256xbf16, #tpu.memory_space<vmem>>, %arg14: memref<1x256xf32, #tpu.memory_space<vmem>>, %arg15: memref<1x128x256xbf16, #tpu.memory_space<vmem>>, %arg16: memref<1x1x256xf32, #tpu.memory_space<vmem>>, %arg17: memref<64x128xf32, #tpu.memory_space<vmem>>, %arg18: memref<1x128xf32, #tpu.memory_space<vmem>>, %arg19: memref<40x128xf32, #tpu.memory_space<vmem>>, %arg20: memref<64x512xf32, #tpu.memory_space<vmem>>, %arg21: memref<64x128xf32, #tpu.memory_space<vmem>>, %arg22: memref<40x256xf32, #tpu.memory_space<vmem>>, %arg23: memref<40x64xf32, #tpu.memory_space<vmem>>) attributes {dimension_semantics = [], scalar_prefetch = 0 : i64, scratch_operands = 4 : i64, tpu.core_type = #tpu.core_type<tc>} {
    %0 = tpu.iota {dimensions = array<i32: 1>} : vector<8x512xi32>
    %c128_i32 = arith.constant 128 : i32
    %c0_i32 = arith.constant 0 : i32
    %1 = arith.cmpi eq, %c128_i32, %c0_i32 : i32
    %c1_i32 = arith.constant 1 : i32
    %2 = arith.select %1, %c1_i32, %c128_i32 : i32
    %3 = vector.broadcast %2 : i32 to vector<8x512xi32>
    %4 = arith.remsi %0, %3 : vector<8x512xi32>
    %c0_i32_0 = arith.constant 0 : i32
    %5 = vector.broadcast %c0_i32_0 : i32 to vector<8x512xi32>
    %6 = arith.cmpi ne, %4, %5 : vector<8x512xi32>
    %c0_i32_1 = arith.constant 0 : i32
    %7 = vector.broadcast %c0_i32_1 : i32 to vector<8x512xi32>
    %8 = arith.cmpi slt, %4, %7 : vector<8x512xi32>
    %c0_i32_2 = arith.constant 0 : i32
    %9 = arith.cmpi slt, %2, %c0_i32_2 : i32
    %10 = vector.broadcast %9 : i1 to vector<8x512xi1>
    %11 = vector.broadcast %10 : vector<8x512xi1> to vector<8x512xi1>
    %12 = arith.xori %8, %11 : vector<8x512xi1>
    %13 = arith.andi %12, %6 : vector<8x512xi1>
    %14 = vector.broadcast %2 : i32 to vector<8x512xi32>
    %15 = arith.addi %4, %14 : vector<8x512xi32>
    %16 = arith.select %13, %15, %4 : vector<8x512xi1>, vector<8x512xi32>
    %c64_i32 = arith.constant 64 : i32
    %17 = vector.broadcast %c64_i32 : i32 to vector<8x512xi32>
    %18 = arith.cmpi slt, %16, %17 : vector<8x512xi32>
    %c0 = arith.constant 0 : index
    %c0_3 = arith.constant 0 : index
    %19 = vector.load %arg0[%c0, %c0_3] : memref<64x8xf32, #tpu.memory_space<vmem>>, vector<64x8xf32>
    %20 = arith.truncf %19 : vector<64x8xf32> to vector<64x8xbf16>
    %c0_4 = arith.constant 0 : index
    %c0_5 = arith.constant 0 : index
    %21 = vector.load %arg2[%c0_4, %c0_5] : memref<8x512xbf16, #tpu.memory_space<vmem>>, vector<8x512xbf16>
    %cst = arith.constant dense<0.000000e+00> : vector<64x512xf32>
    %22 = tpu.matmul %20, %21, %cst {dimension_numbers = #tpu.dot_dimension_numbers<[1], [0], [0], [1], [0, 0, 1, 1], [], []>} : vector<64x8xbf16>, vector<8x512xbf16>, vector<64x512xf32> -> vector<64x512xf32>
    %c0_6 = arith.constant 0 : index
    %c0_7 = arith.constant 0 : index
    %23 = vector.load %arg4[%c0_6, %c0_7] : memref<1x512xf32, #tpu.memory_space<vmem>>, vector<1x512xf32>
    %24 = vector.broadcast %23 : vector<1x512xf32> to vector<64x512xf32>
    %25 = arith.addf %22, %24 : vector<64x512xf32>
    %c0_8 = arith.constant 0 : index
    %c0_9 = arith.constant 0 : index
    %26 = vector.load %arg20[%c0_8, %c0_9] : memref<64x512xf32, #tpu.memory_space<vmem>>, vector<64x512xf32>
    tpu.vector_store %arg20[%c0_8, %c0_9], %25 {strides = array<i32>} : memref<64x512xf32, #tpu.memory_space<vmem>>, vector<64x512xf32>,
    %c0_10 = arith.constant 0 : index
    %c0_11 = arith.constant 0 : index
    %27 = vector.load %arg3[%c0_10, %c0_11] : memref<128x512xbf16, #tpu.memory_space<vmem>>, vector<128x512xbf16>
    %cst_12 = arith.constant 0.000000e+00 : f32
    %28 = vector.broadcast %cst_12 : f32 to vector<8x128xf32>
    %c0_i32_13 = arith.constant 0 : i32
    %c8_i32 = arith.constant 8 : i32
    %29 = arith.muli %c0_i32_13, %c8_i32 : i32
    %30 = tpu.assume_multiple %29, 8 : i32
    %c7_i32 = arith.constant 7 : i32
    %31 = arith.subi %c7_i32, %c0_i32_13 : i32
    %c8_i32_14 = arith.constant 8 : i32
    %32 = arith.muli %31, %c8_i32_14 : i32
    %33 = tpu.assume_multiple %32, 8 : i32
    %34 = arith.index_cast %30 : i32 to index
    %c0_15 = arith.constant 0 : index
    %35 = vector.load %arg20[%34, %c0_15] : memref<64x512xf32, #tpu.memory_space<vmem>>, vector<8x512xf32>
    %36 = arith.index_cast %33 : i32 to index
    %c0_16 = arith.constant 0 : index
    %37 = vector.load %arg20[%36, %c0_16] : memref<64x512xf32, #tpu.memory_space<vmem>>, vector<8x512xf32>
    %38 = arith.select %18, %35, %37 : vector<8x512xi1>, vector<8x512xf32>
    %39 = arith.truncf %28 : vector<8x128xf32> to vector<8x128xbf16>
    %cst_17 = arith.constant dense<0.000000e+00> : vector<8x512xf32>
    %40 = tpu.matmul %39, %27, %cst_17 {dimension_numbers = #tpu.dot_dimension_numbers<[1], [0], [0], [1], [0, 0, 1, 1], [], []>} : vector<8x128xbf16>, vector<128x512xbf16>, vector<8x512xf32> -> vector<8x512xf32>
    %41 = arith.addf %38, %40 : vector<8x512xf32>
    %42 = vector.extract_strided_slice %41 {offsets = [0, 0], sizes = [8, 128], strides = [1, 1]} : vector<8x512xf32> to vector<8x128xf32>
    %43 = arith.negf %42 : vector<8x128xf32>
    %44 = math.exp %43 : vector<8x128xf32>
    %cst_18 = arith.constant 1.000000e+00 : f32
    %45 = vector.broadcast %cst_18 : f32 to vector<8x128xf32>
    %46 = arith.addf %45, %44 : vector<8x128xf32>
    %47 = arith.divf %45, %46 : vector<8x128xf32>
    %48 = vector.extract_strided_slice %41 {offsets = [0, 128], sizes = [8, 128], strides = [1, 1]} : vector<8x512xf32> to vector<8x128xf32>
    %49 = arith.negf %48 : vector<8x128xf32>
    %50 = math.exp %49 : vector<8x128xf32>
    %cst_19 = arith.constant 1.000000e+00 : f32
    %51 = vector.broadcast %cst_19 : f32 to vector<8x128xf32>
    %52 = arith.addf %51, %50 : vector<8x128xf32>
    %53 = arith.divf %51, %52 : vector<8x128xf32>
    %54 = vector.extract_strided_slice %41 {offsets = [0, 256], sizes = [8, 128], strides = [1, 1]} : vector<8x512xf32> to vector<8x128xf32>
    %55 = math.tanh %54 : vector<8x128xf32>
    %56 = vector.extract_strided_slice %41 {offsets = [0, 384], sizes = [8, 128], strides = [1, 1]} : vector<8x512xf32> to vector<8x128xf32>
    %57 = arith.negf %56 : vector<8x128xf32>
    %58 = math.exp %57 : vector<8x128xf32>
    %cst_20 = arith.constant 1.000000e+00 : f32
    %59 = vector.broadcast %cst_20 : f32 to vector<8x128xf32>
    %60 = arith.addf %59, %58 : vector<8x128xf32>
    %61 = arith.divf %59, %60 : vector<8x128xf32>
    %62 = arith.mulf %53, %28 : vector<8x128xf32>
    %63 = arith.mulf %47, %55 : vector<8x128xf32>
    %64 = arith.addf %62, %63 : vector<8x128xf32>
    %65 = math.tanh %64 : vector<8x128xf32>
    %66 = arith.mulf %61, %65 : vector<8x128xf32>
    %67 = vector.extract_strided_slice %66 {offsets = [0, 0], sizes = [8, 64], strides = [1, 1]} : vector<8x128xf32> to vector<8x64xf32>
    %68 = arith.index_cast %30 : i32 to index
    %c0_21 = arith.constant 0 : index
    %69 = vector.load %arg21[%68, %c0_21] : memref<64x128xf32, #tpu.memory_space<vmem>>, vector<8x64xf32>
    tpu.vector_store %arg21[%68, %c0_21], %67 {strides = array<i32>} : memref<64x128xf32, #tpu.memory_space<vmem>>, vector<8x64xf32>,
    %70 = vector.extract_strided_slice %66 {offsets = [0, 64], sizes = [8, 64], strides = [1, 1]} : vector<8x128xf32> to vector<8x64xf32>
    %71 = arith.index_cast %33 : i32 to index
    %c64 = arith.constant 64 : index
    %72 = vector.load %arg21[%71, %c64] : memref<64x128xf32, #tpu.memory_space<vmem>>, vector<8x64xf32>
    tpu.vector_store %arg21[%71, %c64], %70 {strides = array<i32>} : memref<64x128xf32, #tpu.memory_space<vmem>>, vector<8x64xf32>,
    %c1_i32_22 = arith.constant 1 : i32
    %c8_i32_23 = arith.constant 8 : i32
    %73 = arith.muli %c1_i32_22, %c8_i32_23 : i32
    %74 = tpu.assume_multiple %73, 8 : i32
    %c7_i32_24 = arith.constant 7 : i32
    %75 = arith.subi %c7_i32_24, %c1_i32_22 : i32
    %c8_i32_25 = arith.constant 8 : i32
    %76 = arith.muli %75, %c8_i32_25 : i32
    %77 = tpu.assume_multiple %76, 8 : i32
    %78 = arith.index_cast %74 : i32 to index
    %c0_26 = arith.constant 0 : index
    %79 = vector.load %arg20[%78, %c0_26] : memref<64x512xf32, #tpu.memory_space<vmem>>, vector<8x512xf32>
    %80 = arith.index_cast %77 : i32 to index
    %c0_27 = arith.constant 0 : index
    %81 = vector.load %arg20[%80, %c0_27] : memref<64x512xf32, #tpu.memory_space<vmem>>, vector<8x512xf32>
    %82 = arith.select %18, %79, %81 : vector<8x512xi1>, vector<8x512xf32>
    %83 = arith.truncf %66 : vector<8x128xf32> to vector<8x128xbf16>
    %cst_28 = arith.constant dense<0.000000e+00> : vector<8x512xf32>
    %84 = tpu.matmul %83, %27, %cst_28 {dimension_numbers = #tpu.dot_dimension_numbers<[1], [0], [0], [1], [0, 0, 1, 1], [], []>} : vector<8x128xbf16>, vector<128x512xbf16>, vector<8x512xf32> -> vector<8x512xf32>
    %85 = arith.addf %82, %84 : vector<8x512xf32>
    %86 = vector.extract_strided_slice %85 {offsets = [0, 0], sizes = [8, 128], strides = [1, 1]} : vector<8x512xf32> to vector<8x128xf32>
    %87 = arith.negf %86 : vector<8x128xf32>
    %88 = math.exp %87 : vector<8x128xf32>
    %cst_29 = arith.constant 1.000000e+00 : f32
    %89 = vector.broadcast %cst_29 : f32 to vector<8x128xf32>
    %90 = arith.addf %89, %88 : vector<8x128xf32>
    %91 = arith.divf %89, %90 : vector<8x128xf32>
    %92 = vector.extract_strided_slice %85 {offsets = [0, 128], sizes = [8, 128], strides = [1, 1]} : vector<8x512xf32> to vector<8x128xf32>
    %93 = arith.negf %92 : vector<8x128xf32>
    %94 = math.exp %93 : vector<8x128xf32>
    %cst_30 = arith.constant 1.000000e+00 : f32
    %95 = vector.broadcast %cst_30 : f32 to vector<8x128xf32>
    %96 = arith.addf %95, %94 : vector<8x128xf32>
    %97 = arith.divf %95, %96 : vector<8x128xf32>
    %98 = vector.extract_strided_slice %85 {offsets = [0, 256], sizes = [8, 128], strides = [1, 1]} : vector<8x512xf32> to vector<8x128xf32>
    %99 = math.tanh %98 : vector<8x128xf32>
    %100 = vector.extract_strided_slice %85 {offsets = [0, 384], sizes = [8, 128], strides = [1, 1]} : vector<8x512xf32> to vector<8x128xf32>
    %101 = arith.negf %100 : vector<8x128xf32>
    %102 = math.exp %101 : vector<8x128xf32>
    %cst_31 = arith.constant 1.000000e+00 : f32
    %103 = vector.broadcast %cst_31 : f32 to vector<8x128xf32>
    %104 = arith.addf %103, %102 : vector<8x128xf32>
    %105 = arith.divf %103, %104 : vector<8x128xf32>
    %106 = arith.mulf %97, %64 : vector<8x128xf32>
    %107 = arith.mulf %91, %99 : vector<8x128xf32>
    %108 = arith.addf %106, %107 : vector<8x128xf32>
    %109 = math.tanh %108 : vector<8x128xf32>
    %110 = arith.mulf %105, %109 : vector<8x128xf32>
    %111 = vector.extract_strided_slice %110 {offsets = [0, 0], sizes = [8, 64], strides = [1, 1]} : vector<8x128xf32> to vector<8x64xf32>
    %112 = arith.index_cast %74 : i32 to index
    %c0_32 = arith.constant 0 : index
    %113 = vector.load %arg21[%112, %c0_32] : memref<64x128xf32, #tpu.memory_space<vmem>>, vector<8x64xf32>
    tpu.vector_store %arg21[%112, %c0_32], %111 {strides = array<i32>} : memref<64x128xf32, #tpu.memory_space<vmem>>, vector<8x64xf32>,
    %114 = vector.extract_strided_slice %110 {offsets = [0, 64], sizes = [8, 64], strides = [1, 1]} : vector<8x128xf32> to vector<8x64xf32>
    %115 = arith.index_cast %77 : i32 to index
    %c64_33 = arith.constant 64 : index
    %116 = vector.load %arg21[%115, %c64_33] : memref<64x128xf32, #tpu.memory_space<vmem>>, vector<8x64xf32>
    tpu.vector_store %arg21[%115, %c64_33], %114 {strides = array<i32>} : memref<64x128xf32, #tpu.memory_space<vmem>>, vector<8x64xf32>,
    %c2_i32 = arith.constant 2 : i32
    %c8_i32_34 = arith.constant 8 : i32
    %117 = arith.muli %c2_i32, %c8_i32_34 : i32
    %118 = tpu.assume_multiple %117, 8 : i32
    %c7_i32_35 = arith.constant 7 : i32
    %119 = arith.subi %c7_i32_35, %c2_i32 : i32
    %c8_i32_36 = arith.constant 8 : i32
    %120 = arith.muli %119, %c8_i32_36 : i32
    %121 = tpu.assume_multiple %120, 8 : i32
    %122 = arith.index_cast %118 : i32 to index
    %c0_37 = arith.constant 0 : index
    %123 = vector.load %arg20[%122, %c0_37] : memref<64x512xf32, #tpu.memory_space<vmem>>, vector<8x512xf32>
    %124 = arith.index_cast %121 : i32 to index
    %c0_38 = arith.constant 0 : index
    %125 = vector.load %arg20[%124, %c0_38] : memref<64x512xf32, #tpu.memory_space<vmem>>, vector<8x512xf32>
    %126 = arith.select %18, %123, %125 : vector<8x512xi1>, vector<8x512xf32>
    %127 = arith.truncf %110 : vector<8x128xf32> to vector<8x128xbf16>
    %cst_39 = arith.constant dense<0.000000e+00> : vector<8x512xf32>
    %128 = tpu.matmul %127, %27, %cst_39 {dimension_numbers = #tpu.dot_dimension_numbers<[1], [0], [0], [1], [0, 0, 1, 1], [], []>} : vector<8x128xbf16>, vector<128x512xbf16>, vector<8x512xf32> -> vector<8x512xf32>
    %129 = arith.addf %126, %128 : vector<8x512xf32>
    %130 = vector.extract_strided_slice %129 {offsets = [0, 0], sizes = [8, 128], strides = [1, 1]} : vector<8x512xf32> to vector<8x128xf32>
    %131 = arith.negf %130 : vector<8x128xf32>
    %132 = math.exp %131 : vector<8x128xf32>
    %cst_40 = arith.constant 1.000000e+00 : f32
    %133 = vector.broadcast %cst_40 : f32 to vector<8x128xf32>
    %134 = arith.addf %133, %132 : vector<8x128xf32>
    %135 = arith.divf %133, %134 : vector<8x128xf32>
    %136 = vector.extract_strided_slice %129 {offsets = [0, 128], sizes = [8, 128], strides = [1, 1]} : vector<8x512xf32> to vector<8x128xf32>
    %137 = arith.negf %136 : vector<8x128xf32>
    %138 = math.exp %137 : vector<8x128xf32>
    %cst_41 = arith.constant 1.000000e+00 : f32
    %139 = vector.broadcast %cst_41 : f32 to vector<8x128xf32>
    %140 = arith.addf %139, %138 : vector<8x128xf32>
    %141 = arith.divf %139, %140 : vector<8x128xf32>
    %142 = vector.extract_strided_slice %129 {offsets = [0, 256], sizes = [8, 128], strides = [1, 1]} : vector<8x512xf32> to vector<8x128xf32>
    %143 = math.tanh %142 : vector<8x128xf32>
    %144 = vector.extract_strided_slice %129 {offsets = [0, 384], sizes = [8, 128], strides = [1, 1]} : vector<8x512xf32> to vector<8x128xf32>
    %145 = arith.negf %144 : vector<8x128xf32>
    %146 = math.exp %145 : vector<8x128xf32>
    %cst_42 = arith.constant 1.000000e+00 : f32
    %147 = vector.broadcast %cst_42 : f32 to vector<8x128xf32>
    %148 = arith.addf %147, %146 : vector<8x128xf32>
    %149 = arith.divf %147, %148 : vector<8x128xf32>
    %150 = arith.mulf %141, %108 : vector<8x128xf32>
    %151 = arith.mulf %135, %143 : vector<8x128xf32>
    %152 = arith.addf %150, %151 : vector<8x128xf32>
    %153 = math.tanh %152 : vector<8x128xf32>
    %154 = arith.mulf %149, %153 : vector<8x128xf32>
    %155 = vector.extract_strided_slice %154 {offsets = [0, 0], sizes = [8, 64], strides = [1, 1]} : vector<8x128xf32> to vector<8x64xf32>
    %156 = arith.index_cast %118 : i32 to index
    %c0_43 = arith.constant 0 : index
    %157 = vector.load %arg21[%156, %c0_43] : memref<64x128xf32, #tpu.memory_space<vmem>>, vector<8x64xf32>
    tpu.vector_store %arg21[%156, %c0_43], %155 {strides = array<i32>} : memref<64x128xf32, #tpu.memory_space<vmem>>, vector<8x64xf32>,
    %158 = vector.extract_strided_slice %154 {offsets = [0, 64], sizes = [8, 64], strides = [1, 1]} : vector<8x128xf32> to vector<8x64xf32>
    %159 = arith.index_cast %121 : i32 to index
    %c64_44 = arith.constant 64 : index
    %160 = vector.load %arg21[%159, %c64_44] : memref<64x128xf32, #tpu.memory_space<vmem>>, vector<8x64xf32>
    tpu.vector_store %arg21[%159, %c64_44], %158 {strides = array<i32>} : memref<64x128xf32, #tpu.memory_space<vmem>>, vector<8x64xf32>,
    %c3_i32 = arith.constant 3 : i32
    %c8_i32_45 = arith.constant 8 : i32
    %161 = arith.muli %c3_i32, %c8_i32_45 : i32
    %162 = tpu.assume_multiple %161, 8 : i32
    %c7_i32_46 = arith.constant 7 : i32
    %163 = arith.subi %c7_i32_46, %c3_i32 : i32
    %c8_i32_47 = arith.constant 8 : i32
    %164 = arith.muli %163, %c8_i32_47 : i32
    %165 = tpu.assume_multiple %164, 8 : i32
    %166 = arith.index_cast %162 : i32 to index
    %c0_48 = arith.constant 0 : index
    %167 = vector.load %arg20[%166, %c0_48] : memref<64x512xf32, #tpu.memory_space<vmem>>, vector<8x512xf32>
    %168 = arith.index_cast %165 : i32 to index
    %c0_49 = arith.constant 0 : index
    %169 = vector.load %arg20[%168, %c0_49] : memref<64x512xf32, #tpu.memory_space<vmem>>, vector<8x512xf32>
    %170 = arith.select %18, %167, %169 : vector<8x512xi1>, vector<8x512xf32>
    %171 = arith.truncf %154 : vector<8x128xf32> to vector<8x128xbf16>
    %cst_50 = arith.constant dense<0.000000e+00> : vector<8x512xf32>
    %172 = tpu.matmul %171, %27, %cst_50 {dimension_numbers = #tpu.dot_dimension_numbers<[1], [0], [0], [1], [0, 0, 1, 1], [], []>} : vector<8x128xbf16>, vector<128x512xbf16>, vector<8x512xf32> -> vector<8x512xf32>
    %173 = arith.addf %170, %172 : vector<8x512xf32>
    %174 = vector.extract_strided_slice %173 {offsets = [0, 0], sizes = [8, 128], strides = [1, 1]} : vector<8x512xf32> to vector<8x128xf32>
    %175 = arith.negf %174 : vector<8x128xf32>
    %176 = math.exp %175 : vector<8x128xf32>
    %cst_51 = arith.constant 1.000000e+00 : f32
    %177 = vector.broadcast %cst_51 : f32 to vector<8x128xf32>
    %178 = arith.addf %177, %176 : vector<8x128xf32>
    %179 = arith.divf %177, %178 : vector<8x128xf32>
    %180 = vector.extract_strided_slice %173 {offsets = [0, 128], sizes = [8, 128], strides = [1, 1]} : vector<8x512xf32> to vector<8x128xf32>
    %181 = arith.negf %180 : vector<8x128xf32>
    %182 = math.exp %181 : vector<8x128xf32>
    %cst_52 = arith.constant 1.000000e+00 : f32
    %183 = vector.broadcast %cst_52 : f32 to vector<8x128xf32>
    %184 = arith.addf %183, %182 : vector<8x128xf32>
    %185 = arith.divf %183, %184 : vector<8x128xf32>
    %186 = vector.extract_strided_slice %173 {offsets = [0, 256], sizes = [8, 128], strides = [1, 1]} : vector<8x512xf32> to vector<8x128xf32>
    %187 = math.tanh %186 : vector<8x128xf32>
    %188 = vector.extract_strided_slice %173 {offsets = [0, 384], sizes = [8, 128], strides = [1, 1]} : vector<8x512xf32> to vector<8x128xf32>
    %189 = arith.negf %188 : vector<8x128xf32>
    %190 = math.exp %189 : vector<8x128xf32>
    %cst_53 = arith.constant 1.000000e+00 : f32
    %191 = vector.broadcast %cst_53 : f32 to vector<8x128xf32>
    %192 = arith.addf %191, %190 : vector<8x128xf32>
    %193 = arith.divf %191, %192 : vector<8x128xf32>
    %194 = arith.mulf %185, %152 : vector<8x128xf32>
    %195 = arith.mulf %179, %187 : vector<8x128xf32>
    %196 = arith.addf %194, %195 : vector<8x128xf32>
    %197 = math.tanh %196 : vector<8x128xf32>
    %198 = arith.mulf %193, %197 : vector<8x128xf32>
    %199 = vector.extract_strided_slice %198 {offsets = [0, 0], sizes = [8, 64], strides = [1, 1]} : vector<8x128xf32> to vector<8x64xf32>
    %200 = arith.index_cast %162 : i32 to index
    %c0_54 = arith.constant 0 : index
    %201 = vector.load %arg21[%200, %c0_54] : memref<64x128xf32, #tpu.memory_space<vmem>>, vector<8x64xf32>
    tpu.vector_store %arg21[%200, %c0_54], %199 {strides = array<i32>} : memref<64x128xf32, #tpu.memory_space<vmem>>, vector<8x64xf32>,
    %202 = vector.extract_strided_slice %198 {offsets = [0, 64], sizes = [8, 64], strides = [1, 1]} : vector<8x128xf32> to vector<8x64xf32>
    %203 = arith.index_cast %165 : i32 to index
    %c64_55 = arith.constant 64 : index
    %204 = vector.load %arg21[%203, %c64_55] : memref<64x128xf32, #tpu.memory_space<vmem>>, vector<8x64xf32>
    tpu.vector_store %arg21[%203, %c64_55], %202 {strides = array<i32>} : memref<64x128xf32, #tpu.memory_space<vmem>>, vector<8x64xf32>,
    %c4_i32 = arith.constant 4 : i32
    %c8_i32_56 = arith.constant 8 : i32
    %205 = arith.muli %c4_i32, %c8_i32_56 : i32
    %206 = tpu.assume_multiple %205, 8 : i32
    %c7_i32_57 = arith.constant 7 : i32
    %207 = arith.subi %c7_i32_57, %c4_i32 : i32
    %c8_i32_58 = arith.constant 8 : i32
    %208 = arith.muli %207, %c8_i32_58 : i32
    %209 = tpu.assume_multiple %208, 8 : i32
    %210 = arith.index_cast %206 : i32 to index
    %c0_59 = arith.constant 0 : index
    %211 = vector.load %arg20[%210, %c0_59] : memref<64x512xf32, #tpu.memory_space<vmem>>, vector<8x512xf32>
    %212 = arith.index_cast %209 : i32 to index
    %c0_60 = arith.constant 0 : index
    %213 = vector.load %arg20[%212, %c0_60] : memref<64x512xf32, #tpu.memory_space<vmem>>, vector<8x512xf32>
    %214 = arith.select %18, %211, %213 : vector<8x512xi1>, vector<8x512xf32>
    %215 = arith.truncf %198 : vector<8x128xf32> to vector<8x128xbf16>
    %cst_61 = arith.constant dense<0.000000e+00> : vector<8x512xf32>
    %216 = tpu.matmul %215, %27, %cst_61 {dimension_numbers = #tpu.dot_dimension_numbers<[1], [0], [0], [1], [0, 0, 1, 1], [], []>} : vector<8x128xbf16>, vector<128x512xbf16>, vector<8x512xf32> -> vector<8x512xf32>
    %217 = arith.addf %214, %216 : vector<8x512xf32>
    %218 = vector.extract_strided_slice %217 {offsets = [0, 0], sizes = [8, 128], strides = [1, 1]} : vector<8x512xf32> to vector<8x128xf32>
    %219 = arith.negf %218 : vector<8x128xf32>
    %220 = math.exp %219 : vector<8x128xf32>
    %cst_62 = arith.constant 1.000000e+00 : f32
    %221 = vector.broadcast %cst_62 : f32 to vector<8x128xf32>
    %222 = arith.addf %221, %220 : vector<8x128xf32>
    %223 = arith.divf %221, %222 : vector<8x128xf32>
    %224 = vector.extract_strided_slice %217 {offsets = [0, 128], sizes = [8, 128], strides = [1, 1]} : vector<8x512xf32> to vector<8x128xf32>
    %225 = arith.negf %224 : vector<8x128xf32>
    %226 = math.exp %225 : vector<8x128xf32>
    %cst_63 = arith.constant 1.000000e+00 : f32
    %227 = vector.broadcast %cst_63 : f32 to vector<8x128xf32>
    %228 = arith.addf %227, %226 : vector<8x128xf32>
    %229 = arith.divf %227, %228 : vector<8x128xf32>
    %230 = vector.extract_strided_slice %217 {offsets = [0, 256], sizes = [8, 128], strides = [1, 1]} : vector<8x512xf32> to vector<8x128xf32>
    %231 = math.tanh %230 : vector<8x128xf32>
    %232 = vector.extract_strided_slice %217 {offsets = [0, 384], sizes = [8, 128], strides = [1, 1]} : vector<8x512xf32> to vector<8x128xf32>
    %233 = arith.negf %232 : vector<8x128xf32>
    %234 = math.exp %233 : vector<8x128xf32>
    %cst_64 = arith.constant 1.000000e+00 : f32
    %235 = vector.broadcast %cst_64 : f32 to vector<8x128xf32>
    %236 = arith.addf %235, %234 : vector<8x128xf32>
    %237 = arith.divf %235, %236 : vector<8x128xf32>
    %238 = arith.mulf %229, %196 : vector<8x128xf32>
    %239 = arith.mulf %223, %231 : vector<8x128xf32>
    %240 = arith.addf %238, %239 : vector<8x128xf32>
    %241 = math.tanh %240 : vector<8x128xf32>
    %242 = arith.mulf %237, %241 : vector<8x128xf32>
    %243 = vector.extract_strided_slice %242 {offsets = [0, 0], sizes = [8, 64], strides = [1, 1]} : vector<8x128xf32> to vector<8x64xf32>
    %244 = arith.index_cast %206 : i32 to index
    %c0_65 = arith.constant 0 : index
    %245 = vector.load %arg21[%244, %c0_65] : memref<64x128xf32, #tpu.memory_space<vmem>>, vector<8x64xf32>
    tpu.vector_store %arg21[%244, %c0_65], %243 {strides = array<i32>} : memref<64x128xf32, #tpu.memory_space<vmem>>, vector<8x64xf32>,
    %246 = vector.extract_strided_slice %242 {offsets = [0, 64], sizes = [8, 64], strides = [1, 1]} : vector<8x128xf32> to vector<8x64xf32>
    %247 = arith.index_cast %209 : i32 to index
    %c64_66 = arith.constant 64 : index
    %248 = vector.load %arg21[%247, %c64_66] : memref<64x128xf32, #tpu.memory_space<vmem>>, vector<8x64xf32>
    tpu.vector_store %arg21[%247, %c64_66], %246 {strides = array<i32>} : memref<64x128xf32, #tpu.memory_space<vmem>>, vector<8x64xf32>,
    %c5_i32 = arith.constant 5 : i32
    %c8_i32_67 = arith.constant 8 : i32
    %249 = arith.muli %c5_i32, %c8_i32_67 : i32
    %250 = tpu.assume_multiple %249, 8 : i32
    %c7_i32_68 = arith.constant 7 : i32
    %251 = arith.subi %c7_i32_68, %c5_i32 : i32
    %c8_i32_69 = arith.constant 8 : i32
    %252 = arith.muli %251, %c8_i32_69 : i32
    %253 = tpu.assume_multiple %252, 8 : i32
    %254 = arith.index_cast %250 : i32 to index
    %c0_70 = arith.constant 0 : index
    %255 = vector.load %arg20[%254, %c0_70] : memref<64x512xf32, #tpu.memory_space<vmem>>, vector<8x512xf32>
    %256 = arith.index_cast %253 : i32 to index
    %c0_71 = arith.constant 0 : index
    %257 = vector.load %arg20[%256, %c0_71] : memref<64x512xf32, #tpu.memory_space<vmem>>, vector<8x512xf32>
    %258 = arith.select %18, %255, %257 : vector<8x512xi1>, vector<8x512xf32>
    %259 = arith.truncf %242 : vector<8x128xf32> to vector<8x128xbf16>
    %cst_72 = arith.constant dense<0.000000e+00> : vector<8x512xf32>
    %260 = tpu.matmul %259, %27, %cst_72 {dimension_numbers = #tpu.dot_dimension_numbers<[1], [0], [0], [1], [0, 0, 1, 1], [], []>} : vector<8x128xbf16>, vector<128x512xbf16>, vector<8x512xf32> -> vector<8x512xf32>
    %261 = arith.addf %258, %260 : vector<8x512xf32>
    %262 = vector.extract_strided_slice %261 {offsets = [0, 0], sizes = [8, 128], strides = [1, 1]} : vector<8x512xf32> to vector<8x128xf32>
    %263 = arith.negf %262 : vector<8x128xf32>
    %264 = math.exp %263 : vector<8x128xf32>
    %cst_73 = arith.constant 1.000000e+00 : f32
    %265 = vector.broadcast %cst_73 : f32 to vector<8x128xf32>
    %266 = arith.addf %265, %264 : vector<8x128xf32>
    %267 = arith.divf %265, %266 : vector<8x128xf32>
    %268 = vector.extract_strided_slice %261 {offsets = [0, 128], sizes = [8, 128], strides = [1, 1]} : vector<8x512xf32> to vector<8x128xf32>
    %269 = arith.negf %268 : vector<8x128xf32>
    %270 = math.exp %269 : vector<8x128xf32>
    %cst_74 = arith.constant 1.000000e+00 : f32
    %271 = vector.broadcast %cst_74 : f32 to vector<8x128xf32>
    %272 = arith.addf %271, %270 : vector<8x128xf32>
    %273 = arith.divf %271, %272 : vector<8x128xf32>
    %274 = vector.extract_strided_slice %261 {offsets = [0, 256], sizes = [8, 128], strides = [1, 1]} : vector<8x512xf32> to vector<8x128xf32>
    %275 = math.tanh %274 : vector<8x128xf32>
    %276 = vector.extract_strided_slice %261 {offsets = [0, 384], sizes = [8, 128], strides = [1, 1]} : vector<8x512xf32> to vector<8x128xf32>
    %277 = arith.negf %276 : vector<8x128xf32>
    %278 = math.exp %277 : vector<8x128xf32>
    %cst_75 = arith.constant 1.000000e+00 : f32
    %279 = vector.broadcast %cst_75 : f32 to vector<8x128xf32>
    %280 = arith.addf %279, %278 : vector<8x128xf32>
    %281 = arith.divf %279, %280 : vector<8x128xf32>
    %282 = arith.mulf %273, %240 : vector<8x128xf32>
    %283 = arith.mulf %267, %275 : vector<8x128xf32>
    %284 = arith.addf %282, %283 : vector<8x128xf32>
    %285 = math.tanh %284 : vector<8x128xf32>
    %286 = arith.mulf %281, %285 : vector<8x128xf32>
    %287 = vector.extract_strided_slice %286 {offsets = [0, 0], sizes = [8, 64], strides = [1, 1]} : vector<8x128xf32> to vector<8x64xf32>
    %288 = arith.index_cast %250 : i32 to index
    %c0_76 = arith.constant 0 : index
    %289 = vector.load %arg21[%288, %c0_76] : memref<64x128xf32, #tpu.memory_space<vmem>>, vector<8x64xf32>
    tpu.vector_store %arg21[%288, %c0_76], %287 {strides = array<i32>} : memref<64x128xf32, #tpu.memory_space<vmem>>, vector<8x64xf32>,
    %290 = vector.extract_strided_slice %286 {offsets = [0, 64], sizes = [8, 64], strides = [1, 1]} : vector<8x128xf32> to vector<8x64xf32>
    %291 = arith.index_cast %253 : i32 to index
    %c64_77 = arith.constant 64 : index
    %292 = vector.load %arg21[%291, %c64_77] : memref<64x128xf32, #tpu.memory_space<vmem>>, vector<8x64xf32>
    tpu.vector_store %arg21[%291, %c64_77], %290 {strides = array<i32>} : memref<64x128xf32, #tpu.memory_space<vmem>>, vector<8x64xf32>,
    %c6_i32 = arith.constant 6 : i32
    %c8_i32_78 = arith.constant 8 : i32
    %293 = arith.muli %c6_i32, %c8_i32_78 : i32
    %294 = tpu.assume_multiple %293, 8 : i32
    %c7_i32_79 = arith.constant 7 : i32
    %295 = arith.subi %c7_i32_79, %c6_i32 : i32
    %c8_i32_80 = arith.constant 8 : i32
    %296 = arith.muli %295, %c8_i32_80 : i32
    %297 = tpu.assume_multiple %296, 8 : i32
    %298 = arith.index_cast %294 : i32 to index
    %c0_81 = arith.constant 0 : index
    %299 = vector.load %arg20[%298, %c0_81] : memref<64x512xf32, #tpu.memory_space<vmem>>, vector<8x512xf32>
    %300 = arith.index_cast %297 : i32 to index
    %c0_82 = arith.constant 0 : index
    %301 = vector.load %arg20[%300, %c0_82] : memref<64x512xf32, #tpu.memory_space<vmem>>, vector<8x512xf32>
    %302 = arith.select %18, %299, %301 : vector<8x512xi1>, vector<8x512xf32>
    %303 = arith.truncf %286 : vector<8x128xf32> to vector<8x128xbf16>
    %cst_83 = arith.constant dense<0.000000e+00> : vector<8x512xf32>
    %304 = tpu.matmul %303, %27, %cst_83 {dimension_numbers = #tpu.dot_dimension_numbers<[1], [0], [0], [1], [0, 0, 1, 1], [], []>} : vector<8x128xbf16>, vector<128x512xbf16>, vector<8x512xf32> -> vector<8x512xf32>
    %305 = arith.addf %302, %304 : vector<8x512xf32>
    %306 = vector.extract_strided_slice %305 {offsets = [0, 0], sizes = [8, 128], strides = [1, 1]} : vector<8x512xf32> to vector<8x128xf32>
    %307 = arith.negf %306 : vector<8x128xf32>
    %308 = math.exp %307 : vector<8x128xf32>
    %cst_84 = arith.constant 1.000000e+00 : f32
    %309 = vector.broadcast %cst_84 : f32 to vector<8x128xf32>
    %310 = arith.addf %309, %308 : vector<8x128xf32>
    %311 = arith.divf %309, %310 : vector<8x128xf32>
    %312 = vector.extract_strided_slice %305 {offsets = [0, 128], sizes = [8, 128], strides = [1, 1]} : vector<8x512xf32> to vector<8x128xf32>
    %313 = arith.negf %312 : vector<8x128xf32>
    %314 = math.exp %313 : vector<8x128xf32>
    %cst_85 = arith.constant 1.000000e+00 : f32
    %315 = vector.broadcast %cst_85 : f32 to vector<8x128xf32>
    %316 = arith.addf %315, %314 : vector<8x128xf32>
    %317 = arith.divf %315, %316 : vector<8x128xf32>
    %318 = vector.extract_strided_slice %305 {offsets = [0, 256], sizes = [8, 128], strides = [1, 1]} : vector<8x512xf32> to vector<8x128xf32>
    %319 = math.tanh %318 : vector<8x128xf32>
    %320 = vector.extract_strided_slice %305 {offsets = [0, 384], sizes = [8, 128], strides = [1, 1]} : vector<8x512xf32> to vector<8x128xf32>
    %321 = arith.negf %320 : vector<8x128xf32>
    %322 = math.exp %321 : vector<8x128xf32>
    %cst_86 = arith.constant 1.000000e+00 : f32
    %323 = vector.broadcast %cst_86 : f32 to vector<8x128xf32>
    %324 = arith.addf %323, %322 : vector<8x128xf32>
    %325 = arith.divf %323, %324 : vector<8x128xf32>
    %326 = arith.mulf %317, %284 : vector<8x128xf32>
    %327 = arith.mulf %311, %319 : vector<8x128xf32>
    %328 = arith.addf %326, %327 : vector<8x128xf32>
    %329 = math.tanh %328 : vector<8x128xf32>
    %330 = arith.mulf %325, %329 : vector<8x128xf32>
    %331 = vector.extract_strided_slice %330 {offsets = [0, 0], sizes = [8, 64], strides = [1, 1]} : vector<8x128xf32> to vector<8x64xf32>
    %332 = arith.index_cast %294 : i32 to index
    %c0_87 = arith.constant 0 : index
    %333 = vector.load %arg21[%332, %c0_87] : memref<64x128xf32, #tpu.memory_space<vmem>>, vector<8x64xf32>
    tpu.vector_store %arg21[%332, %c0_87], %331 {strides = array<i32>} : memref<64x128xf32, #tpu.memory_space<vmem>>, vector<8x64xf32>,
    %334 = vector.extract_strided_slice %330 {offsets = [0, 64], sizes = [8, 64], strides = [1, 1]} : vector<8x128xf32> to vector<8x64xf32>
    %335 = arith.index_cast %297 : i32 to index
    %c64_88 = arith.constant 64 : index
    %336 = vector.load %arg21[%335, %c64_88] : memref<64x128xf32, #tpu.memory_space<vmem>>, vector<8x64xf32>
    tpu.vector_store %arg21[%335, %c64_88], %334 {strides = array<i32>} : memref<64x128xf32, #tpu.memory_space<vmem>>, vector<8x64xf32>,
    %c7_i32_89 = arith.constant 7 : i32
    %c8_i32_90 = arith.constant 8 : i32
    %337 = arith.muli %c7_i32_89, %c8_i32_90 : i32
    %338 = tpu.assume_multiple %337, 8 : i32
    %c7_i32_91 = arith.constant 7 : i32
    %339 = arith.subi %c7_i32_91, %c7_i32_89 : i32
    %c8_i32_92 = arith.constant 8 : i32
    %340 = arith.muli %339, %c8_i32_92 : i32
    %341 = tpu.assume_multiple %340, 8 : i32
    %342 = arith.index_cast %338 : i32 to index
    %c0_93 = arith.constant 0 : index
    %343 = vector.load %arg20[%342, %c0_93] : memref<64x512xf32, #tpu.memory_space<vmem>>, vector<8x512xf32>
    %344 = arith.index_cast %341 : i32 to index
    %c0_94 = arith.constant 0 : index
    %345 = vector.load %arg20[%344, %c0_94] : memref<64x512xf32, #tpu.memory_space<vmem>>, vector<8x512xf32>
    %346 = arith.select %18, %343, %345 : vector<8x512xi1>, vector<8x512xf32>
    %347 = arith.truncf %330 : vector<8x128xf32> to vector<8x128xbf16>
    %cst_95 = arith.constant dense<0.000000e+00> : vector<8x512xf32>
    %348 = tpu.matmul %347, %27, %cst_95 {dimension_numbers = #tpu.dot_dimension_numbers<[1], [0], [0], [1], [0, 0, 1, 1], [], []>} : vector<8x128xbf16>, vector<128x512xbf16>, vector<8x512xf32> -> vector<8x512xf32>
    %349 = arith.addf %346, %348 : vector<8x512xf32>
    %350 = vector.extract_strided_slice %349 {offsets = [0, 0], sizes = [8, 128], strides = [1, 1]} : vector<8x512xf32> to vector<8x128xf32>
    %351 = arith.negf %350 : vector<8x128xf32>
    %352 = math.exp %351 : vector<8x128xf32>
    %cst_96 = arith.constant 1.000000e+00 : f32
    %353 = vector.broadcast %cst_96 : f32 to vector<8x128xf32>
    %354 = arith.addf %353, %352 : vector<8x128xf32>
    %355 = arith.divf %353, %354 : vector<8x128xf32>
    %356 = vector.extract_strided_slice %349 {offsets = [0, 128], sizes = [8, 128], strides = [1, 1]} : vector<8x512xf32> to vector<8x128xf32>
    %357 = arith.negf %356 : vector<8x128xf32>
    %358 = math.exp %357 : vector<8x128xf32>
    %cst_97 = arith.constant 1.000000e+00 : f32
    %359 = vector.broadcast %cst_97 : f32 to vector<8x128xf32>
    %360 = arith.addf %359, %358 : vector<8x128xf32>
    %361 = arith.divf %359, %360 : vector<8x128xf32>
    %362 = vector.extract_strided_slice %349 {offsets = [0, 256], sizes = [8, 128], strides = [1, 1]} : vector<8x512xf32> to vector<8x128xf32>
    %363 = math.tanh %362 : vector<8x128xf32>
    %364 = vector.extract_strided_slice %349 {offsets = [0, 384], sizes = [8, 128], strides = [1, 1]} : vector<8x512xf32> to vector<8x128xf32>
    %365 = arith.negf %364 : vector<8x128xf32>
    %366 = math.exp %365 : vector<8x128xf32>
    %cst_98 = arith.constant 1.000000e+00 : f32
    %367 = vector.broadcast %cst_98 : f32 to vector<8x128xf32>
    %368 = arith.addf %367, %366 : vector<8x128xf32>
    %369 = arith.divf %367, %368 : vector<8x128xf32>
    %370 = arith.mulf %361, %328 : vector<8x128xf32>
    %371 = arith.mulf %355, %363 : vector<8x128xf32>
    %372 = arith.addf %370, %371 : vector<8x128xf32>
    %373 = math.tanh %372 : vector<8x128xf32>
    %374 = arith.mulf %369, %373 : vector<8x128xf32>
    %375 = vector.extract_strided_slice %374 {offsets = [0, 0], sizes = [8, 64], strides = [1, 1]} : vector<8x128xf32> to vector<8x64xf32>
    %376 = arith.index_cast %338 : i32 to index
    %c0_99 = arith.constant 0 : index
    %377 = vector.load %arg21[%376, %c0_99] : memref<64x128xf32, #tpu.memory_space<vmem>>, vector<8x64xf32>
    tpu.vector_store %arg21[%376, %c0_99], %375 {strides = array<i32>} : memref<64x128xf32, #tpu.memory_space<vmem>>, vector<8x64xf32>,
    %378 = vector.extract_strided_slice %374 {offsets = [0, 64], sizes = [8, 64], strides = [1, 1]} : vector<8x128xf32> to vector<8x64xf32>
    %379 = arith.index_cast %341 : i32 to index
    %c64_100 = arith.constant 64 : index
    %380 = vector.load %arg21[%379, %c64_100] : memref<64x128xf32, #tpu.memory_space<vmem>>, vector<8x64xf32>
    tpu.vector_store %arg21[%379, %c64_100], %378 {strides = array<i32>} : memref<64x128xf32, #tpu.memory_space<vmem>>, vector<8x64xf32>,
    %c8_i32_101 = arith.constant 8 : i32
    %c0_102 = arith.constant 0 : index
    %c0_103 = arith.constant 0 : index
    %381 = vector.load %arg21[%c0_102, %c0_103] : memref<64x128xf32, #tpu.memory_space<vmem>>, vector<64x128xf32>
    %382 = arith.truncf %381 : vector<64x128xf32> to vector<64x128xbf16>
    %c0_104 = arith.constant 0 : index
    %c0_105 = arith.constant 0 : index
    %c0_106 = arith.constant 0 : index
    %383 = vector.load %arg5[%c0_104, %c0_105, %c0_106] : memref<1x128x512xbf16, #tpu.memory_space<vmem>>, vector<1x128x512xbf16>
    %384 = vector.shape_cast %383 : vector<1x128x512xbf16> to vector<128x512xbf16>
    %cst_107 = arith.constant dense<0.000000e+00> : vector<64x512xf32>
    %385 = tpu.matmul %382, %384, %cst_107 {dimension_numbers = #tpu.dot_dimension_numbers<[1], [0], [0], [1], [0, 0, 1, 1], [], []>} : vector<64x128xbf16>, vector<128x512xbf16>, vector<64x512xf32> -> vector<64x512xf32>
    %c0_108 = arith.constant 0 : index
    %c0_109 = arith.constant 0 : index
    %c0_110 = arith.constant 0 : index
    %386 = vector.load %arg7[%c0_108, %c0_109, %c0_110] : memref<1x1x512xf32, #tpu.memory_space<vmem>>, vector<1x1x512xf32>
    %387 = vector.shape_cast %386 : vector<1x1x512xf32> to vector<1x512xf32>
    %388 = vector.broadcast %387 : vector<1x512xf32> to vector<64x512xf32>
    %389 = arith.addf %385, %388 : vector<64x512xf32>
    %c0_111 = arith.constant 0 : index
    %c0_112 = arith.constant 0 : index
    %390 = vector.load %arg20[%c0_111, %c0_112] : memref<64x512xf32, #tpu.memory_space<vmem>>, vector<64x512xf32>
    tpu.vector_store %arg20[%c0_111, %c0_112], %389 {strides = array<i32>} : memref<64x512xf32, #tpu.memory_space<vmem>>, vector<64x512xf32>,
    %c0_113 = arith.constant 0 : index
    %c0_114 = arith.constant 0 : index
    %c0_115 = arith.constant 0 : index
    %391 = vector.load %arg6[%c0_113, %c0_114, %c0_115] : memref<1x128x512xbf16, #tpu.memory_space<vmem>>, vector<1x128x512xbf16>
    %392 = vector.shape_cast %391 : vector<1x128x512xbf16> to vector<128x512xbf16>
    %cst_116 = arith.constant 0.000000e+00 : f32
    %393 = vector.broadcast %cst_116 : f32 to vector<8x128xf32>
    %c0_i32_117 = arith.constant 0 : i32
    %c8_i32_118 = arith.constant 8 : i32
    %394 = arith.muli %c0_i32_117, %c8_i32_118 : i32
    %395 = tpu.assume_multiple %394, 8 : i32
    %c7_i32_119 = arith.constant 7 : i32
    %396 = arith.subi %c7_i32_119, %c0_i32_117 : i32
    %c8_i32_120 = arith.constant 8 : i32
    %397 = arith.muli %396, %c8_i32_120 : i32
    %398 = tpu.assume_multiple %397, 8 : i32
    %399 = arith.index_cast %395 : i32 to index
    %c0_121 = arith.constant 0 : index
    %400 = vector.load %arg20[%399, %c0_121] : memref<64x512xf32, #tpu.memory_space<vmem>>, vector<8x512xf32>
    %401 = arith.index_cast %398 : i32 to index
    %c0_122 = arith.constant 0 : index
    %402 = vector.load %arg20[%401, %c0_122] : memref<64x512xf32, #tpu.memory_space<vmem>>, vector<8x512xf32>
    %403 = arith.select %18, %400, %402 : vector<8x512xi1>, vector<8x512xf32>
    %404 = arith.truncf %393 : vector<8x128xf32> to vector<8x128xbf16>
    %cst_123 = arith.constant dense<0.000000e+00> : vector<8x512xf32>
    %405 = tpu.matmul %404, %392, %cst_123 {dimension_numbers = #tpu.dot_dimension_numbers<[1], [0], [0], [1], [0, 0, 1, 1], [], []>} : vector<8x128xbf16>, vector<128x512xbf16>, vector<8x512xf32> -> vector<8x512xf32>
    %406 = arith.addf %403, %405 : vector<8x512xf32>
    %407 = vector.extract_strided_slice %406 {offsets = [0, 0], sizes = [8, 128], strides = [1, 1]} : vector<8x512xf32> to vector<8x128xf32>
    %408 = arith.negf %407 : vector<8x128xf32>
    %409 = math.exp %408 : vector<8x128xf32>
    %cst_124 = arith.constant 1.000000e+00 : f32
    %410 = vector.broadcast %cst_124 : f32 to vector<8x128xf32>
    %411 = arith.addf %410, %409 : vector<8x128xf32>
    %412 = arith.divf %410, %411 : vector<8x128xf32>
    %413 = vector.extract_strided_slice %406 {offsets = [0, 128], sizes = [8, 128], strides = [1, 1]} : vector<8x512xf32> to vector<8x128xf32>
    %414 = arith.negf %413 : vector<8x128xf32>
    %415 = math.exp %414 : vector<8x128xf32>
    %cst_125 = arith.constant 1.000000e+00 : f32
    %416 = vector.broadcast %cst_125 : f32 to vector<8x128xf32>
    %417 = arith.addf %416, %415 : vector<8x128xf32>
    %418 = arith.divf %416, %417 : vector<8x128xf32>
    %419 = vector.extract_strided_slice %406 {offsets = [0, 256], sizes = [8, 128], strides = [1, 1]} : vector<8x512xf32> to vector<8x128xf32>
    %420 = math.tanh %419 : vector<8x128xf32>
    %421 = vector.extract_strided_slice %406 {offsets = [0, 384], sizes = [8, 128], strides = [1, 1]} : vector<8x512xf32> to vector<8x128xf32>
    %422 = arith.negf %421 : vector<8x128xf32>
    %423 = math.exp %422 : vector<8x128xf32>
    %cst_126 = arith.constant 1.000000e+00 : f32
    %424 = vector.broadcast %cst_126 : f32 to vector<8x128xf32>
    %425 = arith.addf %424, %423 : vector<8x128xf32>
    %426 = arith.divf %424, %425 : vector<8x128xf32>
    %427 = arith.mulf %418, %393 : vector<8x128xf32>
    %428 = arith.mulf %412, %420 : vector<8x128xf32>
    %429 = arith.addf %427, %428 : vector<8x128xf32>
    %430 = math.tanh %429 : vector<8x128xf32>
    %431 = arith.mulf %426, %430 : vector<8x128xf32>
    %432 = vector.extract_strided_slice %431 {offsets = [0, 0], sizes = [8, 64], strides = [1, 1]} : vector<8x128xf32> to vector<8x64xf32>
    %433 = arith.index_cast %395 : i32 to index
    %c0_127 = arith.constant 0 : index
    %434 = vector.load %arg21[%433, %c0_127] : memref<64x128xf32, #tpu.memory_space<vmem>>, vector<8x64xf32>
    tpu.vector_store %arg21[%433, %c0_127], %432 {strides = array<i32>} : memref<64x128xf32, #tpu.memory_space<vmem>>, vector<8x64xf32>,
    %435 = vector.extract_strided_slice %431 {offsets = [0, 64], sizes = [8, 64], strides = [1, 1]} : vector<8x128xf32> to vector<8x64xf32>
    %436 = arith.index_cast %398 : i32 to index
    %c64_128 = arith.constant 64 : index
    %437 = vector.load %arg21[%436, %c64_128] : memref<64x128xf32, #tpu.memory_space<vmem>>, vector<8x64xf32>
    tpu.vector_store %arg21[%436, %c64_128], %435 {strides = array<i32>} : memref<64x128xf32, #tpu.memory_space<vmem>>, vector<8x64xf32>,
    %c1_i32_129 = arith.constant 1 : i32
    %c8_i32_130 = arith.constant 8 : i32
    %438 = arith.muli %c1_i32_129, %c8_i32_130 : i32
    %439 = tpu.assume_multiple %438, 8 : i32
    %c7_i32_131 = arith.constant 7 : i32
    %440 = arith.subi %c7_i32_131, %c1_i32_129 : i32
    %c8_i32_132 = arith.constant 8 : i32
    %441 = arith.muli %440, %c8_i32_132 : i32
    %442 = tpu.assume_multiple %441, 8 : i32
    %443 = arith.index_cast %439 : i32 to index
    %c0_133 = arith.constant 0 : index
    %444 = vector.load %arg20[%443, %c0_133] : memref<64x512xf32, #tpu.memory_space<vmem>>, vector<8x512xf32>
    %445 = arith.index_cast %442 : i32 to index
    %c0_134 = arith.constant 0 : index
    %446 = vector.load %arg20[%445, %c0_134] : memref<64x512xf32, #tpu.memory_space<vmem>>, vector<8x512xf32>
    %447 = arith.select %18, %444, %446 : vector<8x512xi1>, vector<8x512xf32>
    %448 = arith.truncf %431 : vector<8x128xf32> to vector<8x128xbf16>
    %cst_135 = arith.constant dense<0.000000e+00> : vector<8x512xf32>
    %449 = tpu.matmul %448, %392, %cst_135 {dimension_numbers = #tpu.dot_dimension_numbers<[1], [0], [0], [1], [0, 0, 1, 1], [], []>} : vector<8x128xbf16>, vector<128x512xbf16>, vector<8x512xf32> -> vector<8x512xf32>
    %450 = arith.addf %447, %449 : vector<8x512xf32>
    %451 = vector.extract_strided_slice %450 {offsets = [0, 0], sizes = [8, 128], strides = [1, 1]} : vector<8x512xf32> to vector<8x128xf32>
    %452 = arith.negf %451 : vector<8x128xf32>
    %453 = math.exp %452 : vector<8x128xf32>
    %cst_136 = arith.constant 1.000000e+00 : f32
    %454 = vector.broadcast %cst_136 : f32 to vector<8x128xf32>
    %455 = arith.addf %454, %453 : vector<8x128xf32>
    %456 = arith.divf %454, %455 : vector<8x128xf32>
    %457 = vector.extract_strided_slice %450 {offsets = [0, 128], sizes = [8, 128], strides = [1, 1]} : vector<8x512xf32> to vector<8x128xf32>
    %458 = arith.negf %457 : vector<8x128xf32>
    %459 = math.exp %458 : vector<8x128xf32>
    %cst_137 = arith.constant 1.000000e+00 : f32
    %460 = vector.broadcast %cst_137 : f32 to vector<8x128xf32>
    %461 = arith.addf %460, %459 : vector<8x128xf32>
    %462 = arith.divf %460, %461 : vector<8x128xf32>
    %463 = vector.extract_strided_slice %450 {offsets = [0, 256], sizes = [8, 128], strides = [1, 1]} : vector<8x512xf32> to vector<8x128xf32>
    %464 = math.tanh %463 : vector<8x128xf32>
    %465 = vector.extract_strided_slice %450 {offsets = [0, 384], sizes = [8, 128], strides = [1, 1]} : vector<8x512xf32> to vector<8x128xf32>
    %466 = arith.negf %465 : vector<8x128xf32>
    %467 = math.exp %466 : vector<8x128xf32>
    %cst_138 = arith.constant 1.000000e+00 : f32
    %468 = vector.broadcast %cst_138 : f32 to vector<8x128xf32>
    %469 = arith.addf %468, %467 : vector<8x128xf32>
    %470 = arith.divf %468, %469 : vector<8x128xf32>
    %471 = arith.mulf %462, %429 : vector<8x128xf32>
    %472 = arith.mulf %456, %464 : vector<8x128xf32>
    %473 = arith.addf %471, %472 : vector<8x128xf32>
    %474 = math.tanh %473 : vector<8x128xf32>
    %475 = arith.mulf %470, %474 : vector<8x128xf32>
    %476 = vector.extract_strided_slice %475 {offsets = [0, 0], sizes = [8, 64], strides = [1, 1]} : vector<8x128xf32> to vector<8x64xf32>
    %477 = arith.index_cast %439 : i32 to index
    %c0_139 = arith.constant 0 : index
    %478 = vector.load %arg21[%477, %c0_139] : memref<64x128xf32, #tpu.memory_space<vmem>>, vector<8x64xf32>
    tpu.vector_store %arg21[%477, %c0_139], %476 {strides = array<i32>} : memref<64x128xf32, #tpu.memory_space<vmem>>, vector<8x64xf32>,
    %479 = vector.extract_strided_slice %475 {offsets = [0, 64], sizes = [8, 64], strides = [1, 1]} : vector<8x128xf32> to vector<8x64xf32>
    %480 = arith.index_cast %442 : i32 to index
    %c64_140 = arith.constant 64 : index
    %481 = vector.load %arg21[%480, %c64_140] : memref<64x128xf32, #tpu.memory_space<vmem>>, vector<8x64xf32>
    tpu.vector_store %arg21[%480, %c64_140], %479 {strides = array<i32>} : memref<64x128xf32, #tpu.memory_space<vmem>>, vector<8x64xf32>,
    %c2_i32_141 = arith.constant 2 : i32
    %c8_i32_142 = arith.constant 8 : i32
    %482 = arith.muli %c2_i32_141, %c8_i32_142 : i32
    %483 = tpu.assume_multiple %482, 8 : i32
    %c7_i32_143 = arith.constant 7 : i32
    %484 = arith.subi %c7_i32_143, %c2_i32_141 : i32
    %c8_i32_144 = arith.constant 8 : i32
    %485 = arith.muli %484, %c8_i32_144 : i32
    %486 = tpu.assume_multiple %485, 8 : i32
    %487 = arith.index_cast %483 : i32 to index
    %c0_145 = arith.constant 0 : index
    %488 = vector.load %arg20[%487, %c0_145] : memref<64x512xf32, #tpu.memory_space<vmem>>, vector<8x512xf32>
    %489 = arith.index_cast %486 : i32 to index
    %c0_146 = arith.constant 0 : index
    %490 = vector.load %arg20[%489, %c0_146] : memref<64x512xf32, #tpu.memory_space<vmem>>, vector<8x512xf32>
    %491 = arith.select %18, %488, %490 : vector<8x512xi1>, vector<8x512xf32>
    %492 = arith.truncf %475 : vector<8x128xf32> to vector<8x128xbf16>
    %cst_147 = arith.constant dense<0.000000e+00> : vector<8x512xf32>
    %493 = tpu.matmul %492, %392, %cst_147 {dimension_numbers = #tpu.dot_dimension_numbers<[1], [0], [0], [1], [0, 0, 1, 1], [], []>} : vector<8x128xbf16>, vector<128x512xbf16>, vector<8x512xf32> -> vector<8x512xf32>
    %494 = arith.addf %491, %493 : vector<8x512xf32>
    %495 = vector.extract_strided_slice %494 {offsets = [0, 0], sizes = [8, 128], strides = [1, 1]} : vector<8x512xf32> to vector<8x128xf32>
    %496 = arith.negf %495 : vector<8x128xf32>
    %497 = math.exp %496 : vector<8x128xf32>
    %cst_148 = arith.constant 1.000000e+00 : f32
    %498 = vector.broadcast %cst_148 : f32 to vector<8x128xf32>
    %499 = arith.addf %498, %497 : vector<8x128xf32>
    %500 = arith.divf %498, %499 : vector<8x128xf32>
    %501 = vector.extract_strided_slice %494 {offsets = [0, 128], sizes = [8, 128], strides = [1, 1]} : vector<8x512xf32> to vector<8x128xf32>
    %502 = arith.negf %501 : vector<8x128xf32>
    %503 = math.exp %502 : vector<8x128xf32>
    %cst_149 = arith.constant 1.000000e+00 : f32
    %504 = vector.broadcast %cst_149 : f32 to vector<8x128xf32>
    %505 = arith.addf %504, %503 : vector<8x128xf32>
    %506 = arith.divf %504, %505 : vector<8x128xf32>
    %507 = vector.extract_strided_slice %494 {offsets = [0, 256], sizes = [8, 128], strides = [1, 1]} : vector<8x512xf32> to vector<8x128xf32>
    %508 = math.tanh %507 : vector<8x128xf32>
    %509 = vector.extract_strided_slice %494 {offsets = [0, 384], sizes = [8, 128], strides = [1, 1]} : vector<8x512xf32> to vector<8x128xf32>
    %510 = arith.negf %509 : vector<8x128xf32>
    %511 = math.exp %510 : vector<8x128xf32>
    %cst_150 = arith.constant 1.000000e+00 : f32
    %512 = vector.broadcast %cst_150 : f32 to vector<8x128xf32>
    %513 = arith.addf %512, %511 : vector<8x128xf32>
    %514 = arith.divf %512, %513 : vector<8x128xf32>
    %515 = arith.mulf %506, %473 : vector<8x128xf32>
    %516 = arith.mulf %500, %508 : vector<8x128xf32>
    %517 = arith.addf %515, %516 : vector<8x128xf32>
    %518 = math.tanh %517 : vector<8x128xf32>
    %519 = arith.mulf %514, %518 : vector<8x128xf32>
    %520 = vector.extract_strided_slice %519 {offsets = [0, 0], sizes = [8, 64], strides = [1, 1]} : vector<8x128xf32> to vector<8x64xf32>
    %521 = arith.index_cast %483 : i32 to index
    %c0_151 = arith.constant 0 : index
    %522 = vector.load %arg21[%521, %c0_151] : memref<64x128xf32, #tpu.memory_space<vmem>>, vector<8x64xf32>
    tpu.vector_store %arg21[%521, %c0_151], %520 {strides = array<i32>} : memref<64x128xf32, #tpu.memory_space<vmem>>, vector<8x64xf32>,
    %523 = vector.extract_strided_slice %519 {offsets = [0, 64], sizes = [8, 64], strides = [1, 1]} : vector<8x128xf32> to vector<8x64xf32>
    %524 = arith.index_cast %486 : i32 to index
    %c64_152 = arith.constant 64 : index
    %525 = vector.load %arg21[%524, %c64_152] : memref<64x128xf32, #tpu.memory_space<vmem>>, vector<8x64xf32>
    tpu.vector_store %arg21[%524, %c64_152], %523 {strides = array<i32>} : memref<64x128xf32, #tpu.memory_space<vmem>>, vector<8x64xf32>,
    %c3_i32_153 = arith.constant 3 : i32
    %c8_i32_154 = arith.constant 8 : i32
    %526 = arith.muli %c3_i32_153, %c8_i32_154 : i32
    %527 = tpu.assume_multiple %526, 8 : i32
    %c7_i32_155 = arith.constant 7 : i32
    %528 = arith.subi %c7_i32_155, %c3_i32_153 : i32
    %c8_i32_156 = arith.constant 8 : i32
    %529 = arith.muli %528, %c8_i32_156 : i32
    %530 = tpu.assume_multiple %529, 8 : i32
    %531 = arith.index_cast %527 : i32 to index
    %c0_157 = arith.constant 0 : index
    %532 = vector.load %arg20[%531, %c0_157] : memref<64x512xf32, #tpu.memory_space<vmem>>, vector<8x512xf32>
    %533 = arith.index_cast %530 : i32 to index
    %c0_158 = arith.constant 0 : index
    %534 = vector.load %arg20[%533, %c0_158] : memref<64x512xf32, #tpu.memory_space<vmem>>, vector<8x512xf32>
    %535 = arith.select %18, %532, %534 : vector<8x512xi1>, vector<8x512xf32>
    %536 = arith.truncf %519 : vector<8x128xf32> to vector<8x128xbf16>
    %cst_159 = arith.constant dense<0.000000e+00> : vector<8x512xf32>
    %537 = tpu.matmul %536, %392, %cst_159 {dimension_numbers = #tpu.dot_dimension_numbers<[1], [0], [0], [1], [0, 0, 1, 1], [], []>} : vector<8x128xbf16>, vector<128x512xbf16>, vector<8x512xf32> -> vector<8x512xf32>
    %538 = arith.addf %535, %537 : vector<8x512xf32>
    %539 = vector.extract_strided_slice %538 {offsets = [0, 0], sizes = [8, 128], strides = [1, 1]} : vector<8x512xf32> to vector<8x128xf32>
    %540 = arith.negf %539 : vector<8x128xf32>
    %541 = math.exp %540 : vector<8x128xf32>
    %cst_160 = arith.constant 1.000000e+00 : f32
    %542 = vector.broadcast %cst_160 : f32 to vector<8x128xf32>
    %543 = arith.addf %542, %541 : vector<8x128xf32>
    %544 = arith.divf %542, %543 : vector<8x128xf32>
    %545 = vector.extract_strided_slice %538 {offsets = [0, 128], sizes = [8, 128], strides = [1, 1]} : vector<8x512xf32> to vector<8x128xf32>
    %546 = arith.negf %545 : vector<8x128xf32>
    %547 = math.exp %546 : vector<8x128xf32>
    %cst_161 = arith.constant 1.000000e+00 : f32
    %548 = vector.broadcast %cst_161 : f32 to vector<8x128xf32>
    %549 = arith.addf %548, %547 : vector<8x128xf32>
    %550 = arith.divf %548, %549 : vector<8x128xf32>
    %551 = vector.extract_strided_slice %538 {offsets = [0, 256], sizes = [8, 128], strides = [1, 1]} : vector<8x512xf32> to vector<8x128xf32>
    %552 = math.tanh %551 : vector<8x128xf32>
    %553 = vector.extract_strided_slice %538 {offsets = [0, 384], sizes = [8, 128], strides = [1, 1]} : vector<8x512xf32> to vector<8x128xf32>
    %554 = arith.negf %553 : vector<8x128xf32>
    %555 = math.exp %554 : vector<8x128xf32>
    %cst_162 = arith.constant 1.000000e+00 : f32
    %556 = vector.broadcast %cst_162 : f32 to vector<8x128xf32>
    %557 = arith.addf %556, %555 : vector<8x128xf32>
    %558 = arith.divf %556, %557 : vector<8x128xf32>
    %559 = arith.mulf %550, %517 : vector<8x128xf32>
    %560 = arith.mulf %544, %552 : vector<8x128xf32>
    %561 = arith.addf %559, %560 : vector<8x128xf32>
    %562 = math.tanh %561 : vector<8x128xf32>
    %563 = arith.mulf %558, %562 : vector<8x128xf32>
    %564 = vector.extract_strided_slice %563 {offsets = [0, 0], sizes = [8, 64], strides = [1, 1]} : vector<8x128xf32> to vector<8x64xf32>
    %565 = arith.index_cast %527 : i32 to index
    %c0_163 = arith.constant 0 : index
    %566 = vector.load %arg21[%565, %c0_163] : memref<64x128xf32, #tpu.memory_space<vmem>>, vector<8x64xf32>
    tpu.vector_store %arg21[%565, %c0_163], %564 {strides = array<i32>} : memref<64x128xf32, #tpu.memory_space<vmem>>, vector<8x64xf32>,
    %567 = vector.extract_strided_slice %563 {offsets = [0, 64], sizes = [8, 64], strides = [1, 1]} : vector<8x128xf32> to vector<8x64xf32>
    %568 = arith.index_cast %530 : i32 to index
    %c64_164 = arith.constant 64 : index
    %569 = vector.load %arg21[%568, %c64_164] : memref<64x128xf32, #tpu.memory_space<vmem>>, vector<8x64xf32>
    tpu.vector_store %arg21[%568, %c64_164], %567 {strides = array<i32>} : memref<64x128xf32, #tpu.memory_space<vmem>>, vector<8x64xf32>,
    %c4_i32_165 = arith.constant 4 : i32
    %c8_i32_166 = arith.constant 8 : i32
    %570 = arith.muli %c4_i32_165, %c8_i32_166 : i32
    %571 = tpu.assume_multiple %570, 8 : i32
    %c7_i32_167 = arith.constant 7 : i32
    %572 = arith.subi %c7_i32_167, %c4_i32_165 : i32
    %c8_i32_168 = arith.constant 8 : i32
    %573 = arith.muli %572, %c8_i32_168 : i32
    %574 = tpu.assume_multiple %573, 8 : i32
    %575 = arith.index_cast %571 : i32 to index
    %c0_169 = arith.constant 0 : index
    %576 = vector.load %arg20[%575, %c0_169] : memref<64x512xf32, #tpu.memory_space<vmem>>, vector<8x512xf32>
    %577 = arith.index_cast %574 : i32 to index
    %c0_170 = arith.constant 0 : index
    %578 = vector.load %arg20[%577, %c0_170] : memref<64x512xf32, #tpu.memory_space<vmem>>, vector<8x512xf32>
    %579 = arith.select %18, %576, %578 : vector<8x512xi1>, vector<8x512xf32>
    %580 = arith.truncf %563 : vector<8x128xf32> to vector<8x128xbf16>
    %cst_171 = arith.constant dense<0.000000e+00> : vector<8x512xf32>
    %581 = tpu.matmul %580, %392, %cst_171 {dimension_numbers = #tpu.dot_dimension_numbers<[1], [0], [0], [1], [0, 0, 1, 1], [], []>} : vector<8x128xbf16>, vector<128x512xbf16>, vector<8x512xf32> -> vector<8x512xf32>
    %582 = arith.addf %579, %581 : vector<8x512xf32>
    %583 = vector.extract_strided_slice %582 {offsets = [0, 0], sizes = [8, 128], strides = [1, 1]} : vector<8x512xf32> to vector<8x128xf32>
    %584 = arith.negf %583 : vector<8x128xf32>
    %585 = math.exp %584 : vector<8x128xf32>
    %cst_172 = arith.constant 1.000000e+00 : f32
    %586 = vector.broadcast %cst_172 : f32 to vector<8x128xf32>
    %587 = arith.addf %586, %585 : vector<8x128xf32>
    %588 = arith.divf %586, %587 : vector<8x128xf32>
    %589 = vector.extract_strided_slice %582 {offsets = [0, 128], sizes = [8, 128], strides = [1, 1]} : vector<8x512xf32> to vector<8x128xf32>
    %590 = arith.negf %589 : vector<8x128xf32>
    %591 = math.exp %590 : vector<8x128xf32>
    %cst_173 = arith.constant 1.000000e+00 : f32
    %592 = vector.broadcast %cst_173 : f32 to vector<8x128xf32>
    %593 = arith.addf %592, %591 : vector<8x128xf32>
    %594 = arith.divf %592, %593 : vector<8x128xf32>
    %595 = vector.extract_strided_slice %582 {offsets = [0, 256], sizes = [8, 128], strides = [1, 1]} : vector<8x512xf32> to vector<8x128xf32>
    %596 = math.tanh %595 : vector<8x128xf32>
    %597 = vector.extract_strided_slice %582 {offsets = [0, 384], sizes = [8, 128], strides = [1, 1]} : vector<8x512xf32> to vector<8x128xf32>
    %598 = arith.negf %597 : vector<8x128xf32>
    %599 = math.exp %598 : vector<8x128xf32>
    %cst_174 = arith.constant 1.000000e+00 : f32
    %600 = vector.broadcast %cst_174 : f32 to vector<8x128xf32>
    %601 = arith.addf %600, %599 : vector<8x128xf32>
    %602 = arith.divf %600, %601 : vector<8x128xf32>
    %603 = arith.mulf %594, %561 : vector<8x128xf32>
    %604 = arith.mulf %588, %596 : vector<8x128xf32>
    %605 = arith.addf %603, %604 : vector<8x128xf32>
    %606 = math.tanh %605 : vector<8x128xf32>
    %607 = arith.mulf %602, %606 : vector<8x128xf32>
    %608 = vector.extract_strided_slice %607 {offsets = [0, 0], sizes = [8, 64], strides = [1, 1]} : vector<8x128xf32> to vector<8x64xf32>
    %609 = arith.index_cast %571 : i32 to index
    %c0_175 = arith.constant 0 : index
    %610 = vector.load %arg21[%609, %c0_175] : memref<64x128xf32, #tpu.memory_space<vmem>>, vector<8x64xf32>
    tpu.vector_store %arg21[%609, %c0_175], %608 {strides = array<i32>} : memref<64x128xf32, #tpu.memory_space<vmem>>, vector<8x64xf32>,
    %611 = vector.extract_strided_slice %607 {offsets = [0, 64], sizes = [8, 64], strides = [1, 1]} : vector<8x128xf32> to vector<8x64xf32>
    %612 = arith.index_cast %574 : i32 to index
    %c64_176 = arith.constant 64 : index
    %613 = vector.load %arg21[%612, %c64_176] : memref<64x128xf32, #tpu.memory_space<vmem>>, vector<8x64xf32>
    tpu.vector_store %arg21[%612, %c64_176], %611 {strides = array<i32>} : memref<64x128xf32, #tpu.memory_space<vmem>>, vector<8x64xf32>,
    %c5_i32_177 = arith.constant 5 : i32
    %c8_i32_178 = arith.constant 8 : i32
    %614 = arith.muli %c5_i32_177, %c8_i32_178 : i32
    %615 = tpu.assume_multiple %614, 8 : i32
    %c7_i32_179 = arith.constant 7 : i32
    %616 = arith.subi %c7_i32_179, %c5_i32_177 : i32
    %c8_i32_180 = arith.constant 8 : i32
    %617 = arith.muli %616, %c8_i32_180 : i32
    %618 = tpu.assume_multiple %617, 8 : i32
    %619 = arith.index_cast %615 : i32 to index
    %c0_181 = arith.constant 0 : index
    %620 = vector.load %arg20[%619, %c0_181] : memref<64x512xf32, #tpu.memory_space<vmem>>, vector<8x512xf32>
    %621 = arith.index_cast %618 : i32 to index
    %c0_182 = arith.constant 0 : index
    %622 = vector.load %arg20[%621, %c0_182] : memref<64x512xf32, #tpu.memory_space<vmem>>, vector<8x512xf32>
    %623 = arith.select %18, %620, %622 : vector<8x512xi1>, vector<8x512xf32>
    %624 = arith.truncf %607 : vector<8x128xf32> to vector<8x128xbf16>
    %cst_183 = arith.constant dense<0.000000e+00> : vector<8x512xf32>
    %625 = tpu.matmul %624, %392, %cst_183 {dimension_numbers = #tpu.dot_dimension_numbers<[1], [0], [0], [1], [0, 0, 1, 1], [], []>} : vector<8x128xbf16>, vector<128x512xbf16>, vector<8x512xf32> -> vector<8x512xf32>
    %626 = arith.addf %623, %625 : vector<8x512xf32>
    %627 = vector.extract_strided_slice %626 {offsets = [0, 0], sizes = [8, 128], strides = [1, 1]} : vector<8x512xf32> to vector<8x128xf32>
    %628 = arith.negf %627 : vector<8x128xf32>
    %629 = math.exp %628 : vector<8x128xf32>
    %cst_184 = arith.constant 1.000000e+00 : f32
    %630 = vector.broadcast %cst_184 : f32 to vector<8x128xf32>
    %631 = arith.addf %630, %629 : vector<8x128xf32>
    %632 = arith.divf %630, %631 : vector<8x128xf32>
    %633 = vector.extract_strided_slice %626 {offsets = [0, 128], sizes = [8, 128], strides = [1, 1]} : vector<8x512xf32> to vector<8x128xf32>
    %634 = arith.negf %633 : vector<8x128xf32>
    %635 = math.exp %634 : vector<8x128xf32>
    %cst_185 = arith.constant 1.000000e+00 : f32
    %636 = vector.broadcast %cst_185 : f32 to vector<8x128xf32>
    %637 = arith.addf %636, %635 : vector<8x128xf32>
    %638 = arith.divf %636, %637 : vector<8x128xf32>
    %639 = vector.extract_strided_slice %626 {offsets = [0, 256], sizes = [8, 128], strides = [1, 1]} : vector<8x512xf32> to vector<8x128xf32>
    %640 = math.tanh %639 : vector<8x128xf32>
    %641 = vector.extract_strided_slice %626 {offsets = [0, 384], sizes = [8, 128], strides = [1, 1]} : vector<8x512xf32> to vector<8x128xf32>
    %642 = arith.negf %641 : vector<8x128xf32>
    %643 = math.exp %642 : vector<8x128xf32>
    %cst_186 = arith.constant 1.000000e+00 : f32
    %644 = vector.broadcast %cst_186 : f32 to vector<8x128xf32>
    %645 = arith.addf %644, %643 : vector<8x128xf32>
    %646 = arith.divf %644, %645 : vector<8x128xf32>
    %647 = arith.mulf %638, %605 : vector<8x128xf32>
    %648 = arith.mulf %632, %640 : vector<8x128xf32>
    %649 = arith.addf %647, %648 : vector<8x128xf32>
    %650 = math.tanh %649 : vector<8x128xf32>
    %651 = arith.mulf %646, %650 : vector<8x128xf32>
    %652 = vector.extract_strided_slice %651 {offsets = [0, 0], sizes = [8, 64], strides = [1, 1]} : vector<8x128xf32> to vector<8x64xf32>
    %653 = arith.index_cast %615 : i32 to index
    %c0_187 = arith.constant 0 : index
    %654 = vector.load %arg21[%653, %c0_187] : memref<64x128xf32, #tpu.memory_space<vmem>>, vector<8x64xf32>
    tpu.vector_store %arg21[%653, %c0_187], %652 {strides = array<i32>} : memref<64x128xf32, #tpu.memory_space<vmem>>, vector<8x64xf32>,
    %655 = vector.extract_strided_slice %651 {offsets = [0, 64], sizes = [8, 64], strides = [1, 1]} : vector<8x128xf32> to vector<8x64xf32>
    %656 = arith.index_cast %618 : i32 to index
    %c64_188 = arith.constant 64 : index
    %657 = vector.load %arg21[%656, %c64_188] : memref<64x128xf32, #tpu.memory_space<vmem>>, vector<8x64xf32>
    tpu.vector_store %arg21[%656, %c64_188], %655 {strides = array<i32>} : memref<64x128xf32, #tpu.memory_space<vmem>>, vector<8x64xf32>,
    %c6_i32_189 = arith.constant 6 : i32
    %c8_i32_190 = arith.constant 8 : i32
    %658 = arith.muli %c6_i32_189, %c8_i32_190 : i32
    %659 = tpu.assume_multiple %658, 8 : i32
    %c7_i32_191 = arith.constant 7 : i32
    %660 = arith.subi %c7_i32_191, %c6_i32_189 : i32
    %c8_i32_192 = arith.constant 8 : i32
    %661 = arith.muli %660, %c8_i32_192 : i32
    %662 = tpu.assume_multiple %661, 8 : i32
    %663 = arith.index_cast %659 : i32 to index
    %c0_193 = arith.constant 0 : index
    %664 = vector.load %arg20[%663, %c0_193] : memref<64x512xf32, #tpu.memory_space<vmem>>, vector<8x512xf32>
    %665 = arith.index_cast %662 : i32 to index
    %c0_194 = arith.constant 0 : index
    %666 = vector.load %arg20[%665, %c0_194] : memref<64x512xf32, #tpu.memory_space<vmem>>, vector<8x512xf32>
    %667 = arith.select %18, %664, %666 : vector<8x512xi1>, vector<8x512xf32>
    %668 = arith.truncf %651 : vector<8x128xf32> to vector<8x128xbf16>
    %cst_195 = arith.constant dense<0.000000e+00> : vector<8x512xf32>
    %669 = tpu.matmul %668, %392, %cst_195 {dimension_numbers = #tpu.dot_dimension_numbers<[1], [0], [0], [1], [0, 0, 1, 1], [], []>} : vector<8x128xbf16>, vector<128x512xbf16>, vector<8x512xf32> -> vector<8x512xf32>
    %670 = arith.addf %667, %669 : vector<8x512xf32>
    %671 = vector.extract_strided_slice %670 {offsets = [0, 0], sizes = [8, 128], strides = [1, 1]} : vector<8x512xf32> to vector<8x128xf32>
    %672 = arith.negf %671 : vector<8x128xf32>
    %673 = math.exp %672 : vector<8x128xf32>
    %cst_196 = arith.constant 1.000000e+00 : f32
    %674 = vector.broadcast %cst_196 : f32 to vector<8x128xf32>
    %675 = arith.addf %674, %673 : vector<8x128xf32>
    %676 = arith.divf %674, %675 : vector<8x128xf32>
    %677 = vector.extract_strided_slice %670 {offsets = [0, 128], sizes = [8, 128], strides = [1, 1]} : vector<8x512xf32> to vector<8x128xf32>
    %678 = arith.negf %677 : vector<8x128xf32>
    %679 = math.exp %678 : vector<8x128xf32>
    %cst_197 = arith.constant 1.000000e+00 : f32
    %680 = vector.broadcast %cst_197 : f32 to vector<8x128xf32>
    %681 = arith.addf %680, %679 : vector<8x128xf32>
    %682 = arith.divf %680, %681 : vector<8x128xf32>
    %683 = vector.extract_strided_slice %670 {offsets = [0, 256], sizes = [8, 128], strides = [1, 1]} : vector<8x512xf32> to vector<8x128xf32>
    %684 = math.tanh %683 : vector<8x128xf32>
    %685 = vector.extract_strided_slice %670 {offsets = [0, 384], sizes = [8, 128], strides = [1, 1]} : vector<8x512xf32> to vector<8x128xf32>
    %686 = arith.negf %685 : vector<8x128xf32>
    %687 = math.exp %686 : vector<8x128xf32>
    %cst_198 = arith.constant 1.000000e+00 : f32
    %688 = vector.broadcast %cst_198 : f32 to vector<8x128xf32>
    %689 = arith.addf %688, %687 : vector<8x128xf32>
    %690 = arith.divf %688, %689 : vector<8x128xf32>
    %691 = arith.mulf %682, %649 : vector<8x128xf32>
    %692 = arith.mulf %676, %684 : vector<8x128xf32>
    %693 = arith.addf %691, %692 : vector<8x128xf32>
    %694 = math.tanh %693 : vector<8x128xf32>
    %695 = arith.mulf %690, %694 : vector<8x128xf32>
    %696 = vector.extract_strided_slice %695 {offsets = [0, 0], sizes = [8, 64], strides = [1, 1]} : vector<8x128xf32> to vector<8x64xf32>
    %697 = arith.index_cast %659 : i32 to index
    %c0_199 = arith.constant 0 : index
    %698 = vector.load %arg21[%697, %c0_199] : memref<64x128xf32, #tpu.memory_space<vmem>>, vector<8x64xf32>
    tpu.vector_store %arg21[%697, %c0_199], %696 {strides = array<i32>} : memref<64x128xf32, #tpu.memory_space<vmem>>, vector<8x64xf32>,
    %699 = vector.extract_strided_slice %695 {offsets = [0, 64], sizes = [8, 64], strides = [1, 1]} : vector<8x128xf32> to vector<8x64xf32>
    %700 = arith.index_cast %662 : i32 to index
    %c64_200 = arith.constant 64 : index
    %701 = vector.load %arg21[%700, %c64_200] : memref<64x128xf32, #tpu.memory_space<vmem>>, vector<8x64xf32>
    tpu.vector_store %arg21[%700, %c64_200], %699 {strides = array<i32>} : memref<64x128xf32, #tpu.memory_space<vmem>>, vector<8x64xf32>,
    %c7_i32_201 = arith.constant 7 : i32
    %c8_i32_202 = arith.constant 8 : i32
    %702 = arith.muli %c7_i32_201, %c8_i32_202 : i32
    %703 = tpu.assume_multiple %702, 8 : i32
    %c7_i32_203 = arith.constant 7 : i32
    %704 = arith.subi %c7_i32_203, %c7_i32_201 : i32
    %c8_i32_204 = arith.constant 8 : i32
    %705 = arith.muli %704, %c8_i32_204 : i32
    %706 = tpu.assume_multiple %705, 8 : i32
    %707 = arith.index_cast %703 : i32 to index
    %c0_205 = arith.constant 0 : index
    %708 = vector.load %arg20[%707, %c0_205] : memref<64x512xf32, #tpu.memory_space<vmem>>, vector<8x512xf32>
    %709 = arith.index_cast %706 : i32 to index
    %c0_206 = arith.constant 0 : index
    %710 = vector.load %arg20[%709, %c0_206] : memref<64x512xf32, #tpu.memory_space<vmem>>, vector<8x512xf32>
    %711 = arith.select %18, %708, %710 : vector<8x512xi1>, vector<8x512xf32>
    %712 = arith.truncf %695 : vector<8x128xf32> to vector<8x128xbf16>
    %cst_207 = arith.constant dense<0.000000e+00> : vector<8x512xf32>
    %713 = tpu.matmul %712, %392, %cst_207 {dimension_numbers = #tpu.dot_dimension_numbers<[1], [0], [0], [1], [0, 0, 1, 1], [], []>} : vector<8x128xbf16>, vector<128x512xbf16>, vector<8x512xf32> -> vector<8x512xf32>
    %714 = arith.addf %711, %713 : vector<8x512xf32>
    %715 = vector.extract_strided_slice %714 {offsets = [0, 0], sizes = [8, 128], strides = [1, 1]} : vector<8x512xf32> to vector<8x128xf32>
    %716 = arith.negf %715 : vector<8x128xf32>
    %717 = math.exp %716 : vector<8x128xf32>
    %cst_208 = arith.constant 1.000000e+00 : f32
    %718 = vector.broadcast %cst_208 : f32 to vector<8x128xf32>
    %719 = arith.addf %718, %717 : vector<8x128xf32>
    %720 = arith.divf %718, %719 : vector<8x128xf32>
    %721 = vector.extract_strided_slice %714 {offsets = [0, 128], sizes = [8, 128], strides = [1, 1]} : vector<8x512xf32> to vector<8x128xf32>
    %722 = arith.negf %721 : vector<8x128xf32>
    %723 = math.exp %722 : vector<8x128xf32>
    %cst_209 = arith.constant 1.000000e+00 : f32
    %724 = vector.broadcast %cst_209 : f32 to vector<8x128xf32>
    %725 = arith.addf %724, %723 : vector<8x128xf32>
    %726 = arith.divf %724, %725 : vector<8x128xf32>
    %727 = vector.extract_strided_slice %714 {offsets = [0, 256], sizes = [8, 128], strides = [1, 1]} : vector<8x512xf32> to vector<8x128xf32>
    %728 = math.tanh %727 : vector<8x128xf32>
    %729 = vector.extract_strided_slice %714 {offsets = [0, 384], sizes = [8, 128], strides = [1, 1]} : vector<8x512xf32> to vector<8x128xf32>
    %730 = arith.negf %729 : vector<8x128xf32>
    %731 = math.exp %730 : vector<8x128xf32>
    %cst_210 = arith.constant 1.000000e+00 : f32
    %732 = vector.broadcast %cst_210 : f32 to vector<8x128xf32>
    %733 = arith.addf %732, %731 : vector<8x128xf32>
    %734 = arith.divf %732, %733 : vector<8x128xf32>
    %735 = arith.mulf %726, %693 : vector<8x128xf32>
    %736 = arith.mulf %720, %728 : vector<8x128xf32>
    %737 = arith.addf %735, %736 : vector<8x128xf32>
    %738 = math.tanh %737 : vector<8x128xf32>
    %739 = arith.mulf %734, %738 : vector<8x128xf32>
    %740 = vector.extract_strided_slice %739 {offsets = [0, 0], sizes = [8, 64], strides = [1, 1]} : vector<8x128xf32> to vector<8x64xf32>
    %741 = arith.index_cast %703 : i32 to index
    %c0_211 = arith.constant 0 : index
    %742 = vector.load %arg21[%741, %c0_211] : memref<64x128xf32, #tpu.memory_space<vmem>>, vector<8x64xf32>
    tpu.vector_store %arg21[%741, %c0_211], %740 {strides = array<i32>} : memref<64x128xf32, #tpu.memory_space<vmem>>, vector<8x64xf32>,
    %743 = vector.extract_strided_slice %739 {offsets = [0, 64], sizes = [8, 64], strides = [1, 1]} : vector<8x128xf32> to vector<8x64xf32>
    %744 = arith.index_cast %706 : i32 to index
    %c64_212 = arith.constant 64 : index
    %745 = vector.load %arg21[%744, %c64_212] : memref<64x128xf32, #tpu.memory_space<vmem>>, vector<8x64xf32>
    tpu.vector_store %arg21[%744, %c64_212], %743 {strides = array<i32>} : memref<64x128xf32, #tpu.memory_space<vmem>>, vector<8x64xf32>,
    %c8_i32_213 = arith.constant 8 : i32
    %746 = vector.extract_strided_slice %739 {offsets = [0, 0], sizes = [8, 64], strides = [1, 1]} : vector<8x128xf32> to vector<8x64xf32>
    %747 = vector.extract_strided_slice %737 {offsets = [0, 0], sizes = [8, 64], strides = [1, 1]} : vector<8x128xf32> to vector<8x64xf32>
    %c0_214 = arith.constant 0 : index
    %c0_215 = arith.constant 0 : index
    %c0_216 = arith.constant 0 : index
    %748 = vector.load %arg1[%c0_214, %c0_215, %c0_216] : memref<8x8x1024xf32, #tpu.memory_space<vmem>>, vector<8x8x1024xf32>
    %cst_217 = arith.constant dense<0.000000e+00> : vector<8x8xf32>
    %749 = vector.multi_reduction <add>, %748, %cst_217 [2] : vector<8x8x1024xf32> to vector<8x8xf32>
    %cst_218 = arith.constant 1.024000e+03 : f32
    %750 = vector.broadcast %cst_218 : f32 to vector<8x8xf32>
    %751 = arith.divf %749, %750 : vector<8x8xf32>
    %c0_219 = arith.constant 0 : index
    %c0_220 = arith.constant 0 : index
    %752 = vector.load %arg8[%c0_219, %c0_220] : memref<8x512xf32, #tpu.memory_space<vmem>>, vector<8x512xf32>
    %cst_221 = arith.constant dense<0.000000e+00> : vector<8x512xf32>
    %753 = tpu.matmul %751, %752, %cst_221 {dimension_numbers = #tpu.dot_dimension_numbers<[1], [0], [0], [1], [0, 0, 1, 1], [], []>} : vector<8x8xf32>, vector<8x512xf32>, vector<8x512xf32> -> vector<8x512xf32>
    %cst_222 = arith.constant 0.000000e+00 : f32
    %754 = vector.broadcast %cst_222 : f32 to vector<8x512xf32>
    %755 = arith.maximumf %753, %754 : vector<8x512xf32>
    %c0_223 = arith.constant 0 : index
    %c0_224 = arith.constant 0 : index
    %756 = vector.load %arg9[%c0_223, %c0_224] : memref<512x128xf32, #tpu.memory_space<vmem>>, vector<512x128xf32>
    %cst_225 = arith.constant dense<0.000000e+00> : vector<8x128xf32>
    %757 = tpu.matmul %755, %756, %cst_225 {dimension_numbers = #tpu.dot_dimension_numbers<[1], [0], [0], [1], [0, 0, 1, 1], [], []>} : vector<8x512xf32>, vector<512x128xf32>, vector<8x128xf32> -> vector<8x128xf32>
    %c0_226 = arith.constant 0 : index
    %c0_227 = arith.constant 0 : index
    %758 = vector.load %arg10[%c0_226, %c0_227] : memref<1x128xf32, #tpu.memory_space<vmem>>, vector<1x128xf32>
    %759 = vector.broadcast %758 : vector<1x128xf32> to vector<8x128xf32>
    %760 = arith.addf %757, %759 : vector<8x128xf32>
    %761 = arith.truncf %760 : vector<8x128xf32> to vector<8x128xbf16>
    %c0_228 = arith.constant 0 : index
    %c0_229 = arith.constant 0 : index
    %762 = vector.load %arg11[%c0_228, %c0_229] : memref<128x256xbf16, #tpu.memory_space<vmem>>, vector<128x256xbf16>
    %cst_230 = arith.constant dense<0.000000e+00> : vector<8x256xf32>
    %763 = tpu.matmul %761, %762, %cst_230 {dimension_numbers = #tpu.dot_dimension_numbers<[1], [0], [0], [1], [0, 0, 1, 1], [], []>} : vector<8x128xbf16>, vector<128x256xbf16>, vector<8x256xf32> -> vector<8x256xf32>
    %c0_231 = arith.constant 0 : index
    %c0_232 = arith.constant 0 : index
    %764 = vector.load %arg21[%c0_231, %c0_232] : memref<64x128xf32, #tpu.memory_space<vmem>>, vector<40x128xf32>
    %765 = arith.truncf %764 : vector<40x128xf32> to vector<40x128xbf16>
    %c0_233 = arith.constant 0 : index
    %c0_234 = arith.constant 0 : index
    %766 = vector.load %arg12[%c0_233, %c0_234] : memref<128x256xbf16, #tpu.memory_space<vmem>>, vector<128x256xbf16>
    %cst_235 = arith.constant dense<0.000000e+00> : vector<40x256xf32>
    %767 = tpu.matmul %765, %766, %cst_235 {dimension_numbers = #tpu.dot_dimension_numbers<[1], [0], [0], [1], [0, 0, 1, 1], [], []>} : vector<40x128xbf16>, vector<128x256xbf16>, vector<40x256xf32> -> vector<40x256xf32>
    %c0_236 = arith.constant 0 : index
    %c0_237 = arith.constant 0 : index
    %768 = vector.load %arg14[%c0_236, %c0_237] : memref<1x256xf32, #tpu.memory_space<vmem>>, vector<1x256xf32>
    %769 = vector.broadcast %768 : vector<1x256xf32> to vector<40x256xf32>
    %770 = arith.addf %767, %769 : vector<40x256xf32>
    %771 = tpu.concatenate %763, %763, %763, %763, %763 in 0 : vector<8x256xf32>, vector<8x256xf32>, vector<8x256xf32>, vector<8x256xf32>, vector<8x256xf32> -> vector<40x256xf32>
    %772 = arith.addf %770, %771 : vector<40x256xf32>
    %c0_238 = arith.constant 0 : index
    %c0_239 = arith.constant 0 : index
    %773 = vector.load %arg22[%c0_238, %c0_239] : memref<40x256xf32, #tpu.memory_space<vmem>>, vector<40x256xf32>
    tpu.vector_store %arg22[%c0_238, %c0_239], %772 {strides = array<i32>} : memref<40x256xf32, #tpu.memory_space<vmem>>, vector<40x256xf32>,
    %c0_240 = arith.constant 0 : index
    %c0_241 = arith.constant 0 : index
    %774 = vector.load %arg13[%c0_240, %c0_241] : memref<64x256xbf16, #tpu.memory_space<vmem>>, vector<64x256xbf16>
    %c0_242 = arith.constant 0 : index
    %c0_243 = arith.constant 0 : index
    %c0_244 = arith.constant 0 : index
    %775 = vector.load %arg15[%c0_242, %c0_243, %c0_244] : memref<1x128x256xbf16, #tpu.memory_space<vmem>>, vector<1x128x256xbf16>
    %776 = vector.shape_cast %775 : vector<1x128x256xbf16> to vector<128x256xbf16>
    %c0_245 = arith.constant 0 : index
    %c0_246 = arith.constant 0 : index
    %c0_247 = arith.constant 0 : index
    %777 = vector.load %arg16[%c0_245, %c0_246, %c0_247] : memref<1x1x256xf32, #tpu.memory_space<vmem>>, vector<1x1x256xf32>
    %778 = vector.shape_cast %777 : vector<1x1x256xf32> to vector<1x256xf32>
    %c0_i32_248 = arith.constant 0 : i32
    %c8_i32_249 = arith.constant 8 : i32
    %779 = arith.muli %c0_i32_248, %c8_i32_249 : i32
    %780 = tpu.assume_multiple %779, 8 : i32
    %781 = arith.index_cast %780 : i32 to index
    %c0_250 = arith.constant 0 : index
    %782 = vector.load %arg22[%781, %c0_250] : memref<40x256xf32, #tpu.memory_space<vmem>>, vector<8x256xf32>
    %783 = arith.truncf %746 : vector<8x64xf32> to vector<8x64xbf16>
    %cst_251 = arith.constant dense<0.000000e+00> : vector<8x256xf32>
    %784 = tpu.matmul %783, %774, %cst_251 {dimension_numbers = #tpu.dot_dimension_numbers<[1], [0], [0], [1], [0, 0, 1, 1], [], []>} : vector<8x64xbf16>, vector<64x256xbf16>, vector<8x256xf32> -> vector<8x256xf32>
    %785 = arith.addf %782, %784 : vector<8x256xf32>
    %786 = vector.extract_strided_slice %785 {offsets = [0, 0], sizes = [8, 64], strides = [1, 1]} : vector<8x256xf32> to vector<8x64xf32>
    %787 = arith.negf %786 : vector<8x64xf32>
    %788 = math.exp %787 : vector<8x64xf32>
    %cst_252 = arith.constant 1.000000e+00 : f32
    %789 = vector.broadcast %cst_252 : f32 to vector<8x64xf32>
    %790 = arith.addf %789, %788 : vector<8x64xf32>
    %791 = arith.divf %789, %790 : vector<8x64xf32>
    %792 = vector.extract_strided_slice %785 {offsets = [0, 64], sizes = [8, 64], strides = [1, 1]} : vector<8x256xf32> to vector<8x64xf32>
    %793 = arith.negf %792 : vector<8x64xf32>
    %794 = math.exp %793 : vector<8x64xf32>
    %cst_253 = arith.constant 1.000000e+00 : f32
    %795 = vector.broadcast %cst_253 : f32 to vector<8x64xf32>
    %796 = arith.addf %795, %794 : vector<8x64xf32>
    %797 = arith.divf %795, %796 : vector<8x64xf32>
    %798 = vector.extract_strided_slice %785 {offsets = [0, 128], sizes = [8, 64], strides = [1, 1]} : vector<8x256xf32> to vector<8x64xf32>
    %799 = math.tanh %798 : vector<8x64xf32>
    %800 = vector.extract_strided_slice %785 {offsets = [0, 192], sizes = [8, 64], strides = [1, 1]} : vector<8x256xf32> to vector<8x64xf32>
    %801 = arith.negf %800 : vector<8x64xf32>
    %802 = math.exp %801 : vector<8x64xf32>
    %cst_254 = arith.constant 1.000000e+00 : f32
    %803 = vector.broadcast %cst_254 : f32 to vector<8x64xf32>
    %804 = arith.addf %803, %802 : vector<8x64xf32>
    %805 = arith.divf %803, %804 : vector<8x64xf32>
    %806 = arith.mulf %797, %747 : vector<8x64xf32>
    %807 = arith.mulf %791, %799 : vector<8x64xf32>
    %808 = arith.addf %806, %807 : vector<8x64xf32>
    %809 = math.tanh %808 : vector<8x64xf32>
    %810 = arith.mulf %805, %809 : vector<8x64xf32>
    %811 = tpu.concatenate %810, %746 in 1 : vector<8x64xf32>, vector<8x64xf32> -> vector<8x128xf32>
    %812 = arith.truncf %811 : vector<8x128xf32> to vector<8x128xbf16>
    %cst_255 = arith.constant dense<0.000000e+00> : vector<8x256xf32>
    %813 = tpu.matmul %812, %776, %cst_255 {dimension_numbers = #tpu.dot_dimension_numbers<[1], [0], [0], [1], [0, 0, 1, 1], [], []>} : vector<8x128xbf16>, vector<128x256xbf16>, vector<8x256xf32> -> vector<8x256xf32>
    %814 = vector.broadcast %778 : vector<1x256xf32> to vector<8x256xf32>
    %815 = arith.addf %813, %814 : vector<8x256xf32>
    %816 = vector.extract_strided_slice %815 {offsets = [0, 0], sizes = [8, 64], strides = [1, 1]} : vector<8x256xf32> to vector<8x64xf32>
    %817 = arith.negf %816 : vector<8x64xf32>
    %818 = math.exp %817 : vector<8x64xf32>
    %cst_256 = arith.constant 1.000000e+00 : f32
    %819 = vector.broadcast %cst_256 : f32 to vector<8x64xf32>
    %820 = arith.addf %819, %818 : vector<8x64xf32>
    %821 = arith.divf %819, %820 : vector<8x64xf32>
    %822 = vector.extract_strided_slice %815 {offsets = [0, 64], sizes = [8, 64], strides = [1, 1]} : vector<8x256xf32> to vector<8x64xf32>
    %823 = arith.negf %822 : vector<8x64xf32>
    %824 = math.exp %823 : vector<8x64xf32>
    %cst_257 = arith.constant 1.000000e+00 : f32
    %825 = vector.broadcast %cst_257 : f32 to vector<8x64xf32>
    %826 = arith.addf %825, %824 : vector<8x64xf32>
    %827 = arith.divf %825, %826 : vector<8x64xf32>
    %828 = vector.extract_strided_slice %815 {offsets = [0, 128], sizes = [8, 64], strides = [1, 1]} : vector<8x256xf32> to vector<8x64xf32>
    %829 = math.tanh %828 : vector<8x64xf32>
    %830 = vector.extract_strided_slice %815 {offsets = [0, 192], sizes = [8, 64], strides = [1, 1]} : vector<8x256xf32> to vector<8x64xf32>
    %831 = arith.negf %830 : vector<8x64xf32>
    %832 = math.exp %831 : vector<8x64xf32>
    %cst_258 = arith.constant 1.000000e+00 : f32
    %833 = vector.broadcast %cst_258 : f32 to vector<8x64xf32>
    %834 = arith.addf %833, %832 : vector<8x64xf32>
    %835 = arith.divf %833, %834 : vector<8x64xf32>
    %836 = arith.mulf %827, %747 : vector<8x64xf32>
    %837 = arith.mulf %821, %829 : vector<8x64xf32>
    %838 = arith.addf %836, %837 : vector<8x64xf32>
    %839 = math.tanh %838 : vector<8x64xf32>
    %840 = arith.mulf %835, %839 : vector<8x64xf32>
    %841 = arith.index_cast %780 : i32 to index
    %c0_259 = arith.constant 0 : index
    %842 = vector.load %arg23[%841, %c0_259] : memref<40x64xf32, #tpu.memory_space<vmem>>, vector<8x64xf32>
    tpu.vector_store %arg23[%841, %c0_259], %840 {strides = array<i32>} : memref<40x64xf32, #tpu.memory_space<vmem>>, vector<8x64xf32>,
    %c1_i32_260 = arith.constant 1 : i32
    %c8_i32_261 = arith.constant 8 : i32
    %843 = arith.muli %c1_i32_260, %c8_i32_261 : i32
    %844 = tpu.assume_multiple %843, 8 : i32
    %845 = arith.index_cast %844 : i32 to index
    %c0_262 = arith.constant 0 : index
    %846 = vector.load %arg22[%845, %c0_262] : memref<40x256xf32, #tpu.memory_space<vmem>>, vector<8x256xf32>
    %847 = arith.truncf %810 : vector<8x64xf32> to vector<8x64xbf16>
    %cst_263 = arith.constant dense<0.000000e+00> : vector<8x256xf32>
    %848 = tpu.matmul %847, %774, %cst_263 {dimension_numbers = #tpu.dot_dimension_numbers<[1], [0], [0], [1], [0, 0, 1, 1], [], []>} : vector<8x64xbf16>, vector<64x256xbf16>, vector<8x256xf32> -> vector<8x256xf32>
    %849 = arith.addf %846, %848 : vector<8x256xf32>
    %850 = vector.extract_strided_slice %849 {offsets = [0, 0], sizes = [8, 64], strides = [1, 1]} : vector<8x256xf32> to vector<8x64xf32>
    %851 = arith.negf %850 : vector<8x64xf32>
    %852 = math.exp %851 : vector<8x64xf32>
    %cst_264 = arith.constant 1.000000e+00 : f32
    %853 = vector.broadcast %cst_264 : f32 to vector<8x64xf32>
    %854 = arith.addf %853, %852 : vector<8x64xf32>
    %855 = arith.divf %853, %854 : vector<8x64xf32>
    %856 = vector.extract_strided_slice %849 {offsets = [0, 64], sizes = [8, 64], strides = [1, 1]} : vector<8x256xf32> to vector<8x64xf32>
    %857 = arith.negf %856 : vector<8x64xf32>
    %858 = math.exp %857 : vector<8x64xf32>
    %cst_265 = arith.constant 1.000000e+00 : f32
    %859 = vector.broadcast %cst_265 : f32 to vector<8x64xf32>
    %860 = arith.addf %859, %858 : vector<8x64xf32>
    %861 = arith.divf %859, %860 : vector<8x64xf32>
    %862 = vector.extract_strided_slice %849 {offsets = [0, 128], sizes = [8, 64], strides = [1, 1]} : vector<8x256xf32> to vector<8x64xf32>
    %863 = math.tanh %862 : vector<8x64xf32>
    %864 = vector.extract_strided_slice %849 {offsets = [0, 192], sizes = [8, 64], strides = [1, 1]} : vector<8x256xf32> to vector<8x64xf32>
    %865 = arith.negf %864 : vector<8x64xf32>
    %866 = math.exp %865 : vector<8x64xf32>
    %cst_266 = arith.constant 1.000000e+00 : f32
    %867 = vector.broadcast %cst_266 : f32 to vector<8x64xf32>
    %868 = arith.addf %867, %866 : vector<8x64xf32>
    %869 = arith.divf %867, %868 : vector<8x64xf32>
    %870 = arith.mulf %861, %808 : vector<8x64xf32>
    %871 = arith.mulf %855, %863 : vector<8x64xf32>
    %872 = arith.addf %870, %871 : vector<8x64xf32>
    %873 = math.tanh %872 : vector<8x64xf32>
    %874 = arith.mulf %869, %873 : vector<8x64xf32>
    %875 = tpu.concatenate %874, %840 in 1 : vector<8x64xf32>, vector<8x64xf32> -> vector<8x128xf32>
    %876 = arith.truncf %875 : vector<8x128xf32> to vector<8x128xbf16>
    %cst_267 = arith.constant dense<0.000000e+00> : vector<8x256xf32>
    %877 = tpu.matmul %876, %776, %cst_267 {dimension_numbers = #tpu.dot_dimension_numbers<[1], [0], [0], [1], [0, 0, 1, 1], [], []>} : vector<8x128xbf16>, vector<128x256xbf16>, vector<8x256xf32> -> vector<8x256xf32>
    %878 = vector.broadcast %778 : vector<1x256xf32> to vector<8x256xf32>
    %879 = arith.addf %877, %878 : vector<8x256xf32>
    %880 = vector.extract_strided_slice %879 {offsets = [0, 0], sizes = [8, 64], strides = [1, 1]} : vector<8x256xf32> to vector<8x64xf32>
    %881 = arith.negf %880 : vector<8x64xf32>
    %882 = math.exp %881 : vector<8x64xf32>
    %cst_268 = arith.constant 1.000000e+00 : f32
    %883 = vector.broadcast %cst_268 : f32 to vector<8x64xf32>
    %884 = arith.addf %883, %882 : vector<8x64xf32>
    %885 = arith.divf %883, %884 : vector<8x64xf32>
    %886 = vector.extract_strided_slice %879 {offsets = [0, 64], sizes = [8, 64], strides = [1, 1]} : vector<8x256xf32> to vector<8x64xf32>
    %887 = arith.negf %886 : vector<8x64xf32>
    %888 = math.exp %887 : vector<8x64xf32>
    %cst_269 = arith.constant 1.000000e+00 : f32
    %889 = vector.broadcast %cst_269 : f32 to vector<8x64xf32>
    %890 = arith.addf %889, %888 : vector<8x64xf32>
    %891 = arith.divf %889, %890 : vector<8x64xf32>
    %892 = vector.extract_strided_slice %879 {offsets = [0, 128], sizes = [8, 64], strides = [1, 1]} : vector<8x256xf32> to vector<8x64xf32>
    %893 = math.tanh %892 : vector<8x64xf32>
    %894 = vector.extract_strided_slice %879 {offsets = [0, 192], sizes = [8, 64], strides = [1, 1]} : vector<8x256xf32> to vector<8x64xf32>
    %895 = arith.negf %894 : vector<8x64xf32>
    %896 = math.exp %895 : vector<8x64xf32>
    %cst_270 = arith.constant 1.000000e+00 : f32
    %897 = vector.broadcast %cst_270 : f32 to vector<8x64xf32>
    %898 = arith.addf %897, %896 : vector<8x64xf32>
    %899 = arith.divf %897, %898 : vector<8x64xf32>
    %900 = arith.mulf %891, %838 : vector<8x64xf32>
    %901 = arith.mulf %885, %893 : vector<8x64xf32>
    %902 = arith.addf %900, %901 : vector<8x64xf32>
    %903 = math.tanh %902 : vector<8x64xf32>
    %904 = arith.mulf %899, %903 : vector<8x64xf32>
    %905 = arith.index_cast %844 : i32 to index
    %c0_271 = arith.constant 0 : index
    %906 = vector.load %arg23[%905, %c0_271] : memref<40x64xf32, #tpu.memory_space<vmem>>, vector<8x64xf32>
    tpu.vector_store %arg23[%905, %c0_271], %904 {strides = array<i32>} : memref<40x64xf32, #tpu.memory_space<vmem>>, vector<8x64xf32>,
    %c2_i32_272 = arith.constant 2 : i32
    %c8_i32_273 = arith.constant 8 : i32
    %907 = arith.muli %c2_i32_272, %c8_i32_273 : i32
    %908 = tpu.assume_multiple %907, 8 : i32
    %909 = arith.index_cast %908 : i32 to index
    %c0_274 = arith.constant 0 : index
    %910 = vector.load %arg22[%909, %c0_274] : memref<40x256xf32, #tpu.memory_space<vmem>>, vector<8x256xf32>
    %911 = arith.truncf %874 : vector<8x64xf32> to vector<8x64xbf16>
    %cst_275 = arith.constant dense<0.000000e+00> : vector<8x256xf32>
    %912 = tpu.matmul %911, %774, %cst_275 {dimension_numbers = #tpu.dot_dimension_numbers<[1], [0], [0], [1], [0, 0, 1, 1], [], []>} : vector<8x64xbf16>, vector<64x256xbf16>, vector<8x256xf32> -> vector<8x256xf32>
    %913 = arith.addf %910, %912 : vector<8x256xf32>
    %914 = vector.extract_strided_slice %913 {offsets = [0, 0], sizes = [8, 64], strides = [1, 1]} : vector<8x256xf32> to vector<8x64xf32>
    %915 = arith.negf %914 : vector<8x64xf32>
    %916 = math.exp %915 : vector<8x64xf32>
    %cst_276 = arith.constant 1.000000e+00 : f32
    %917 = vector.broadcast %cst_276 : f32 to vector<8x64xf32>
    %918 = arith.addf %917, %916 : vector<8x64xf32>
    %919 = arith.divf %917, %918 : vector<8x64xf32>
    %920 = vector.extract_strided_slice %913 {offsets = [0, 64], sizes = [8, 64], strides = [1, 1]} : vector<8x256xf32> to vector<8x64xf32>
    %921 = arith.negf %920 : vector<8x64xf32>
    %922 = math.exp %921 : vector<8x64xf32>
    %cst_277 = arith.constant 1.000000e+00 : f32
    %923 = vector.broadcast %cst_277 : f32 to vector<8x64xf32>
    %924 = arith.addf %923, %922 : vector<8x64xf32>
    %925 = arith.divf %923, %924 : vector<8x64xf32>
    %926 = vector.extract_strided_slice %913 {offsets = [0, 128], sizes = [8, 64], strides = [1, 1]} : vector<8x256xf32> to vector<8x64xf32>
    %927 = math.tanh %926 : vector<8x64xf32>
    %928 = vector.extract_strided_slice %913 {offsets = [0, 192], sizes = [8, 64], strides = [1, 1]} : vector<8x256xf32> to vector<8x64xf32>
    %929 = arith.negf %928 : vector<8x64xf32>
    %930 = math.exp %929 : vector<8x64xf32>
    %cst_278 = arith.constant 1.000000e+00 : f32
    %931 = vector.broadcast %cst_278 : f32 to vector<8x64xf32>
    %932 = arith.addf %931, %930 : vector<8x64xf32>
    %933 = arith.divf %931, %932 : vector<8x64xf32>
    %934 = arith.mulf %925, %872 : vector<8x64xf32>
    %935 = arith.mulf %919, %927 : vector<8x64xf32>
    %936 = arith.addf %934, %935 : vector<8x64xf32>
    %937 = math.tanh %936 : vector<8x64xf32>
    %938 = arith.mulf %933, %937 : vector<8x64xf32>
    %939 = tpu.concatenate %938, %904 in 1 : vector<8x64xf32>, vector<8x64xf32> -> vector<8x128xf32>
    %940 = arith.truncf %939 : vector<8x128xf32> to vector<8x128xbf16>
    %cst_279 = arith.constant dense<0.000000e+00> : vector<8x256xf32>
    %941 = tpu.matmul %940, %776, %cst_279 {dimension_numbers = #tpu.dot_dimension_numbers<[1], [0], [0], [1], [0, 0, 1, 1], [], []>} : vector<8x128xbf16>, vector<128x256xbf16>, vector<8x256xf32> -> vector<8x256xf32>
    %942 = vector.broadcast %778 : vector<1x256xf32> to vector<8x256xf32>
    %943 = arith.addf %941, %942 : vector<8x256xf32>
    %944 = vector.extract_strided_slice %943 {offsets = [0, 0], sizes = [8, 64], strides = [1, 1]} : vector<8x256xf32> to vector<8x64xf32>
    %945 = arith.negf %944 : vector<8x64xf32>
    %946 = math.exp %945 : vector<8x64xf32>
    %cst_280 = arith.constant 1.000000e+00 : f32
    %947 = vector.broadcast %cst_280 : f32 to vector<8x64xf32>
    %948 = arith.addf %947, %946 : vector<8x64xf32>
    %949 = arith.divf %947, %948 : vector<8x64xf32>
    %950 = vector.extract_strided_slice %943 {offsets = [0, 64], sizes = [8, 64], strides = [1, 1]} : vector<8x256xf32> to vector<8x64xf32>
    %951 = arith.negf %950 : vector<8x64xf32>
    %952 = math.exp %951 : vector<8x64xf32>
    %cst_281 = arith.constant 1.000000e+00 : f32
    %953 = vector.broadcast %cst_281 : f32 to vector<8x64xf32>
    %954 = arith.addf %953, %952 : vector<8x64xf32>
    %955 = arith.divf %953, %954 : vector<8x64xf32>
    %956 = vector.extract_strided_slice %943 {offsets = [0, 128], sizes = [8, 64], strides = [1, 1]} : vector<8x256xf32> to vector<8x64xf32>
    %957 = math.tanh %956 : vector<8x64xf32>
    %958 = vector.extract_strided_slice %943 {offsets = [0, 192], sizes = [8, 64], strides = [1, 1]} : vector<8x256xf32> to vector<8x64xf32>
    %959 = arith.negf %958 : vector<8x64xf32>
    %960 = math.exp %959 : vector<8x64xf32>
    %cst_282 = arith.constant 1.000000e+00 : f32
    %961 = vector.broadcast %cst_282 : f32 to vector<8x64xf32>
    %962 = arith.addf %961, %960 : vector<8x64xf32>
    %963 = arith.divf %961, %962 : vector<8x64xf32>
    %964 = arith.mulf %955, %902 : vector<8x64xf32>
    %965 = arith.mulf %949, %957 : vector<8x64xf32>
    %966 = arith.addf %964, %965 : vector<8x64xf32>
    %967 = math.tanh %966 : vector<8x64xf32>
    %968 = arith.mulf %963, %967 : vector<8x64xf32>
    %969 = arith.index_cast %908 : i32 to index
    %c0_283 = arith.constant 0 : index
    %970 = vector.load %arg23[%969, %c0_283] : memref<40x64xf32, #tpu.memory_space<vmem>>, vector<8x64xf32>
    tpu.vector_store %arg23[%969, %c0_283], %968 {strides = array<i32>} : memref<40x64xf32, #tpu.memory_space<vmem>>, vector<8x64xf32>,
    %c3_i32_284 = arith.constant 3 : i32
    %c8_i32_285 = arith.constant 8 : i32
    %971 = arith.muli %c3_i32_284, %c8_i32_285 : i32
    %972 = tpu.assume_multiple %971, 8 : i32
    %973 = arith.index_cast %972 : i32 to index
    %c0_286 = arith.constant 0 : index
    %974 = vector.load %arg22[%973, %c0_286] : memref<40x256xf32, #tpu.memory_space<vmem>>, vector<8x256xf32>
    %975 = arith.truncf %938 : vector<8x64xf32> to vector<8x64xbf16>
    %cst_287 = arith.constant dense<0.000000e+00> : vector<8x256xf32>
    %976 = tpu.matmul %975, %774, %cst_287 {dimension_numbers = #tpu.dot_dimension_numbers<[1], [0], [0], [1], [0, 0, 1, 1], [], []>} : vector<8x64xbf16>, vector<64x256xbf16>, vector<8x256xf32> -> vector<8x256xf32>
    %977 = arith.addf %974, %976 : vector<8x256xf32>
    %978 = vector.extract_strided_slice %977 {offsets = [0, 0], sizes = [8, 64], strides = [1, 1]} : vector<8x256xf32> to vector<8x64xf32>
    %979 = arith.negf %978 : vector<8x64xf32>
    %980 = math.exp %979 : vector<8x64xf32>
    %cst_288 = arith.constant 1.000000e+00 : f32
    %981 = vector.broadcast %cst_288 : f32 to vector<8x64xf32>
    %982 = arith.addf %981, %980 : vector<8x64xf32>
    %983 = arith.divf %981, %982 : vector<8x64xf32>
    %984 = vector.extract_strided_slice %977 {offsets = [0, 64], sizes = [8, 64], strides = [1, 1]} : vector<8x256xf32> to vector<8x64xf32>
    %985 = arith.negf %984 : vector<8x64xf32>
    %986 = math.exp %985 : vector<8x64xf32>
    %cst_289 = arith.constant 1.000000e+00 : f32
    %987 = vector.broadcast %cst_289 : f32 to vector<8x64xf32>
    %988 = arith.addf %987, %986 : vector<8x64xf32>
    %989 = arith.divf %987, %988 : vector<8x64xf32>
    %990 = vector.extract_strided_slice %977 {offsets = [0, 128], sizes = [8, 64], strides = [1, 1]} : vector<8x256xf32> to vector<8x64xf32>
    %991 = math.tanh %990 : vector<8x64xf32>
    %992 = vector.extract_strided_slice %977 {offsets = [0, 192], sizes = [8, 64], strides = [1, 1]} : vector<8x256xf32> to vector<8x64xf32>
    %993 = arith.negf %992 : vector<8x64xf32>
    %994 = math.exp %993 : vector<8x64xf32>
    %cst_290 = arith.constant 1.000000e+00 : f32
    %995 = vector.broadcast %cst_290 : f32 to vector<8x64xf32>
    %996 = arith.addf %995, %994 : vector<8x64xf32>
    %997 = arith.divf %995, %996 : vector<8x64xf32>
    %998 = arith.mulf %989, %936 : vector<8x64xf32>
    %999 = arith.mulf %983, %991 : vector<8x64xf32>
    %1000 = arith.addf %998, %999 : vector<8x64xf32>
    %1001 = math.tanh %1000 : vector<8x64xf32>
    %1002 = arith.mulf %997, %1001 : vector<8x64xf32>
    %1003 = tpu.concatenate %1002, %968 in 1 : vector<8x64xf32>, vector<8x64xf32> -> vector<8x128xf32>
    %1004 = arith.truncf %1003 : vector<8x128xf32> to vector<8x128xbf16>
    %cst_291 = arith.constant dense<0.000000e+00> : vector<8x256xf32>
    %1005 = tpu.matmul %1004, %776, %cst_291 {dimension_numbers = #tpu.dot_dimension_numbers<[1], [0], [0], [1], [0, 0, 1, 1], [], []>} : vector<8x128xbf16>, vector<128x256xbf16>, vector<8x256xf32> -> vector<8x256xf32>
    %1006 = vector.broadcast %778 : vector<1x256xf32> to vector<8x256xf32>
    %1007 = arith.addf %1005, %1006 : vector<8x256xf32>
    %1008 = vector.extract_strided_slice %1007 {offsets = [0, 0], sizes = [8, 64], strides = [1, 1]} : vector<8x256xf32> to vector<8x64xf32>
    %1009 = arith.negf %1008 : vector<8x64xf32>
    %1010 = math.exp %1009 : vector<8x64xf32>
    %cst_292 = arith.constant 1.000000e+00 : f32
    %1011 = vector.broadcast %cst_292 : f32 to vector<8x64xf32>
    %1012 = arith.addf %1011, %1010 : vector<8x64xf32>
    %1013 = arith.divf %1011, %1012 : vector<8x64xf32>
    %1014 = vector.extract_strided_slice %1007 {offsets = [0, 64], sizes = [8, 64], strides = [1, 1]} : vector<8x256xf32> to vector<8x64xf32>
    %1015 = arith.negf %1014 : vector<8x64xf32>
    %1016 = math.exp %1015 : vector<8x64xf32>
    %cst_293 = arith.constant 1.000000e+00 : f32
    %1017 = vector.broadcast %cst_293 : f32 to vector<8x64xf32>
    %1018 = arith.addf %1017, %1016 : vector<8x64xf32>
    %1019 = arith.divf %1017, %1018 : vector<8x64xf32>
    %1020 = vector.extract_strided_slice %1007 {offsets = [0, 128], sizes = [8, 64], strides = [1, 1]} : vector<8x256xf32> to vector<8x64xf32>
    %1021 = math.tanh %1020 : vector<8x64xf32>
    %1022 = vector.extract_strided_slice %1007 {offsets = [0, 192], sizes = [8, 64], strides = [1, 1]} : vector<8x256xf32> to vector<8x64xf32>
    %1023 = arith.negf %1022 : vector<8x64xf32>
    %1024 = math.exp %1023 : vector<8x64xf32>
    %cst_294 = arith.constant 1.000000e+00 : f32
    %1025 = vector.broadcast %cst_294 : f32 to vector<8x64xf32>
    %1026 = arith.addf %1025, %1024 : vector<8x64xf32>
    %1027 = arith.divf %1025, %1026 : vector<8x64xf32>
    %1028 = arith.mulf %1019, %966 : vector<8x64xf32>
    %1029 = arith.mulf %1013, %1021 : vector<8x64xf32>
    %1030 = arith.addf %1028, %1029 : vector<8x64xf32>
    %1031 = math.tanh %1030 : vector<8x64xf32>
    %1032 = arith.mulf %1027, %1031 : vector<8x64xf32>
    %1033 = arith.index_cast %972 : i32 to index
    %c0_295 = arith.constant 0 : index
    %1034 = vector.load %arg23[%1033, %c0_295] : memref<40x64xf32, #tpu.memory_space<vmem>>, vector<8x64xf32>
    tpu.vector_store %arg23[%1033, %c0_295], %1032 {strides = array<i32>} : memref<40x64xf32, #tpu.memory_space<vmem>>, vector<8x64xf32>,
    %c4_i32_296 = arith.constant 4 : i32
    %c8_i32_297 = arith.constant 8 : i32
    %1035 = arith.muli %c4_i32_296, %c8_i32_297 : i32
    %1036 = tpu.assume_multiple %1035, 8 : i32
    %1037 = arith.index_cast %1036 : i32 to index
    %c0_298 = arith.constant 0 : index
    %1038 = vector.load %arg22[%1037, %c0_298] : memref<40x256xf32, #tpu.memory_space<vmem>>, vector<8x256xf32>
    %1039 = arith.truncf %1002 : vector<8x64xf32> to vector<8x64xbf16>
    %cst_299 = arith.constant dense<0.000000e+00> : vector<8x256xf32>
    %1040 = tpu.matmul %1039, %774, %cst_299 {dimension_numbers = #tpu.dot_dimension_numbers<[1], [0], [0], [1], [0, 0, 1, 1], [], []>} : vector<8x64xbf16>, vector<64x256xbf16>, vector<8x256xf32> -> vector<8x256xf32>
    %1041 = arith.addf %1038, %1040 : vector<8x256xf32>
    %1042 = vector.extract_strided_slice %1041 {offsets = [0, 0], sizes = [8, 64], strides = [1, 1]} : vector<8x256xf32> to vector<8x64xf32>
    %1043 = arith.negf %1042 : vector<8x64xf32>
    %1044 = math.exp %1043 : vector<8x64xf32>
    %cst_300 = arith.constant 1.000000e+00 : f32
    %1045 = vector.broadcast %cst_300 : f32 to vector<8x64xf32>
    %1046 = arith.addf %1045, %1044 : vector<8x64xf32>
    %1047 = arith.divf %1045, %1046 : vector<8x64xf32>
    %1048 = vector.extract_strided_slice %1041 {offsets = [0, 64], sizes = [8, 64], strides = [1, 1]} : vector<8x256xf32> to vector<8x64xf32>
    %1049 = arith.negf %1048 : vector<8x64xf32>
    %1050 = math.exp %1049 : vector<8x64xf32>
    %cst_301 = arith.constant 1.000000e+00 : f32
    %1051 = vector.broadcast %cst_301 : f32 to vector<8x64xf32>
    %1052 = arith.addf %1051, %1050 : vector<8x64xf32>
    %1053 = arith.divf %1051, %1052 : vector<8x64xf32>
    %1054 = vector.extract_strided_slice %1041 {offsets = [0, 128], sizes = [8, 64], strides = [1, 1]} : vector<8x256xf32> to vector<8x64xf32>
    %1055 = math.tanh %1054 : vector<8x64xf32>
    %1056 = vector.extract_strided_slice %1041 {offsets = [0, 192], sizes = [8, 64], strides = [1, 1]} : vector<8x256xf32> to vector<8x64xf32>
    %1057 = arith.negf %1056 : vector<8x64xf32>
    %1058 = math.exp %1057 : vector<8x64xf32>
    %cst_302 = arith.constant 1.000000e+00 : f32
    %1059 = vector.broadcast %cst_302 : f32 to vector<8x64xf32>
    %1060 = arith.addf %1059, %1058 : vector<8x64xf32>
    %1061 = arith.divf %1059, %1060 : vector<8x64xf32>
    %1062 = arith.mulf %1053, %1000 : vector<8x64xf32>
    %1063 = arith.mulf %1047, %1055 : vector<8x64xf32>
    %1064 = arith.addf %1062, %1063 : vector<8x64xf32>
    %1065 = math.tanh %1064 : vector<8x64xf32>
    %1066 = arith.mulf %1061, %1065 : vector<8x64xf32>
    %1067 = tpu.concatenate %1066, %1032 in 1 : vector<8x64xf32>, vector<8x64xf32> -> vector<8x128xf32>
    %1068 = arith.truncf %1067 : vector<8x128xf32> to vector<8x128xbf16>
    %cst_303 = arith.constant dense<0.000000e+00> : vector<8x256xf32>
    %1069 = tpu.matmul %1068, %776, %cst_303 {dimension_numbers = #tpu.dot_dimension_numbers<[1], [0], [0], [1], [0, 0, 1, 1], [], []>} : vector<8x128xbf16>, vector<128x256xbf16>, vector<8x256xf32> -> vector<8x256xf32>
    %1070 = vector.broadcast %778 : vector<1x256xf32> to vector<8x256xf32>
    %1071 = arith.addf %1069, %1070 : vector<8x256xf32>
    %1072 = vector.extract_strided_slice %1071 {offsets = [0, 0], sizes = [8, 64], strides = [1, 1]} : vector<8x256xf32> to vector<8x64xf32>
    %1073 = arith.negf %1072 : vector<8x64xf32>
    %1074 = math.exp %1073 : vector<8x64xf32>
    %cst_304 = arith.constant 1.000000e+00 : f32
    %1075 = vector.broadcast %cst_304 : f32 to vector<8x64xf32>
    %1076 = arith.addf %1075, %1074 : vector<8x64xf32>
    %1077 = arith.divf %1075, %1076 : vector<8x64xf32>
    %1078 = vector.extract_strided_slice %1071 {offsets = [0, 64], sizes = [8, 64], strides = [1, 1]} : vector<8x256xf32> to vector<8x64xf32>
    %1079 = arith.negf %1078 : vector<8x64xf32>
    %1080 = math.exp %1079 : vector<8x64xf32>
    %cst_305 = arith.constant 1.000000e+00 : f32
    %1081 = vector.broadcast %cst_305 : f32 to vector<8x64xf32>
    %1082 = arith.addf %1081, %1080 : vector<8x64xf32>
    %1083 = arith.divf %1081, %1082 : vector<8x64xf32>
    %1084 = vector.extract_strided_slice %1071 {offsets = [0, 128], sizes = [8, 64], strides = [1, 1]} : vector<8x256xf32> to vector<8x64xf32>
    %1085 = math.tanh %1084 : vector<8x64xf32>
    %1086 = vector.extract_strided_slice %1071 {offsets = [0, 192], sizes = [8, 64], strides = [1, 1]} : vector<8x256xf32> to vector<8x64xf32>
    %1087 = arith.negf %1086 : vector<8x64xf32>
    %1088 = math.exp %1087 : vector<8x64xf32>
    %cst_306 = arith.constant 1.000000e+00 : f32
    %1089 = vector.broadcast %cst_306 : f32 to vector<8x64xf32>
    %1090 = arith.addf %1089, %1088 : vector<8x64xf32>
    %1091 = arith.divf %1089, %1090 : vector<8x64xf32>
    %1092 = arith.mulf %1083, %1030 : vector<8x64xf32>
    %1093 = arith.mulf %1077, %1085 : vector<8x64xf32>
    %1094 = arith.addf %1092, %1093 : vector<8x64xf32>
    %1095 = math.tanh %1094 : vector<8x64xf32>
    %1096 = arith.mulf %1091, %1095 : vector<8x64xf32>
    %1097 = arith.index_cast %1036 : i32 to index
    %c0_307 = arith.constant 0 : index
    %1098 = vector.load %arg23[%1097, %c0_307] : memref<40x64xf32, #tpu.memory_space<vmem>>, vector<8x64xf32>
    tpu.vector_store %arg23[%1097, %c0_307], %1096 {strides = array<i32>} : memref<40x64xf32, #tpu.memory_space<vmem>>, vector<8x64xf32>,
    %c5_i32_308 = arith.constant 5 : i32
    %c0_309 = arith.constant 0 : index
    %c0_310 = arith.constant 0 : index
    %1099 = vector.load %arg23[%c0_309, %c0_310] : memref<40x64xf32, #tpu.memory_space<vmem>>, vector<40x64xf32>
    %c0_311 = arith.constant 0 : index
    %c0_312 = arith.constant 0 : index
    %1100 = vector.load %arg17[%c0_311, %c0_312] : memref<64x128xf32, #tpu.memory_space<vmem>>, vector<64x128xf32>
    %cst_313 = arith.constant dense<0.000000e+00> : vector<40x128xf32>
    %1101 = tpu.matmul %1099, %1100, %cst_313 {dimension_numbers = #tpu.dot_dimension_numbers<[1], [0], [0], [1], [0, 0, 1, 1], [], []>} : vector<40x64xf32>, vector<64x128xf32>, vector<40x128xf32> -> vector<40x128xf32>
    %c0_314 = arith.constant 0 : index
    %c0_315 = arith.constant 0 : index
    %1102 = vector.load %arg18[%c0_314, %c0_315] : memref<1x128xf32, #tpu.memory_space<vmem>>, vector<1x128xf32>
    %1103 = vector.broadcast %1102 : vector<1x128xf32> to vector<40x128xf32>
    %1104 = arith.addf %1101, %1103 : vector<40x128xf32>
    %c0_316 = arith.constant 0 : index
    %c0_317 = arith.constant 0 : index
    %1105 = vector.load %arg19[%c0_316, %c0_317] : memref<40x128xf32, #tpu.memory_space<vmem>>, vector<40x128xf32>
    tpu.vector_store %arg19[%c0_316, %c0_317], %1104 {strides = array<i32>} : memref<40x128xf32, #tpu.memory_space<vmem>>, vector<40x128xf32>,
    return
  }
}

</mosaic_0001>

<bundles_post_ra>
// kernel: vtp_forward.1
= control target key start
LH: loop header
LB: loop body
LE: loop exit
PB: predicated region body
PF: predicated region fallthrough
CT: control target
= control target key end

     0   :  { %s9557_s0 = inlined_call_operand.vmem [shape: f32[64,8], index: 0, kind: input, shape index: {}]   ;;  %s9558_s1 = inlined_call_operand.vmem [shape: f32[8,8,1024], index: 1, kind: input, shape index: {}]   ;;  %s9559_s2 = inlined_call_operand.vmem [shape: bf16[8,512], index: 2, kind: input, shape index: {}]   ;;  %s9560_s3 = inlined_call_operand.vmem [shape: bf16[128,512], index: 3, kind: input, shape index: {}]   ;;  %s9561_s4 = inlined_call_operand.vmem [shape: f32[1,512], index: 4, kind: input, shape index: {}]   ;;  %s9562_s5 = inlined_call_operand.hbm [shape: bf16[1,128,512], index: 5, kind: input, shape index: {}]   ;;  %s9563_s6 = inlined_call_operand.hbm [shape: bf16[1,128,512], index: 6, kind: input, shape index: {}]   ;;  %s9564_s7 = inlined_call_operand.hbm [shape: f32[1,1,512], index: 7, kind: input, shape index: {}]   ;;  %s9565_s8 = inlined_call_operand.vmem [shape: f32[8,512], index: 8, kind: input, shape index: {}]   ;;  %s9566_s9 = inlined_call_operand.vmem [shape: f32[512,128], index: 9, kind: input, shape index: {}]   ;;  %s9567_s10 = inlined_call_operand.vmem [shape: f32[1,128], index: 10, kind: input, shape index: {}]   ;;  %s9568_s11 = inlined_call_operand.vmem [shape: bf16[128,256], index: 11, kind: input, shape index: {}]   ;;  %s9569_s12 = inlined_call_operand.hbm [shape: bf16[128,256], index: 12, kind: input, shape index: {}]   ;;  %s9570_s13 = inlined_call_operand.vmem [shape: bf16[64,256], index: 13, kind: input, shape index: {}]   ;;  %s9571_s14 = inlined_call_operand.vmem [shape: f32[1,256], index: 14, kind: input, shape index: {}]   ;;  %s9572_s15 = inlined_call_operand.hbm [shape: bf16[1,128,256], index: 15, kind: input, shape index: {}]   ;;  %s9573_s16 = inlined_call_operand.hbm [shape: f32[1,1,256], index: 16, kind: input, shape index: {}]   ;;  %s9574_s17 = inlined_call_operand.hbm [shape: f32[64,128], index: 17, kind: input, shape index: {}]   ;;  %s9575_s18 = inlined_call_operand.hbm [shape: f32[1,128], index: 18, kind: input, shape index: {}]   ;;  %s9576_s19 = inlined_call_operand.vmem [shape: f32[40,128], index: 19, kind: output, shape index: {}]  }
   0x1   :  { %9681 = sst [smem:[#allocation61_spill]] %s9557_s0 }
   0x2   :  { %9682 = sst [smem:[#allocation62_spill]] %s9558_s1 }
   0x3   :  { %9683 = sst [smem:[#allocation63_spill]] %s9559_s2 }
   0x4   :  { %9684 = sst [smem:[#allocation64_spill]] %s9560_s3 }
   0x5   :  { %24 = vsyncpa [#allocation7], 0 }
   0x6   :  { %25 = vsyncpa [#allocation9], 0 }
   0x7   :  { %26 = vsyncpa [#allocation12], 0 }
   0x8   :  { %27 = vsyncpa [#allocation15], 0 }
   0x9   :  { %28 = vsyncpa [#allocation18], 0  ;;  %s6585_s0 = smov [#allocation8]   ;;  %s6586_s20 = smov [#allocation11]  }
   0xa   :  { %s56_s30 = sshll.u32 %s6585_s0, 4  ;;  %s86_s21 = sshll.u32 %s6586_s20, 4  ;;  %s57_s30 = int_to_ptr.vmem [resolvable:$true] %s56_s30  ;;  %s6702_s21 = int_to_ptr.vmem [resolvable:$true] %s86_s21 }
   0xb   :  { %s6399_s2 = scalar_lea.hbm %s9563_s6, 4096 }
   0xc   :  { %p6400_p0 = scmp.ne.s32.totalorder %s9563_s6, %s6399_s2  ;;  %p6403_p1 = scmp.lt.u32.totalorder %s6399_s2, %s9563_s6 }
   0xe   :  { %p6405_p2 = pnand %p6403_p1, %p6400_p0 }
  0x10   :  { %6408 = shalt.err (!%p6405_p2)
}
  0x11   :  { %s6409_s26 = scalar_lea.vmem %s57_s30, 4096  ;;  %p6414_p4 = scmp.lt.s32.totalorder %s57_s30, %s57_s30 }
  0x12   :  { %p6410_p3 = scmp.ne.s32.totalorder %s57_s30, %s6409_s26  ;;  %p6415_p5 = scmp.lt.s32.totalorder %s6409_s26, %s6409_s26 }
  0x14   :  { %p6416_p6 = por %p6415_p5, %p6414_p4 }
  0x16   :  { %p6417_p7 = pnand %p6416_p6, %p6410_p3 }
  0x18   :  { %6420 = shalt.err (!%p6417_p7)
}
  0x19   :  { %s9581_s27 = smov 256   ;;  %s9582_s28 = smov 16  }
  0x1a   :  { %62 = dma.hbm_to_vmem [thread:$0]  %s9563_s6, 4096, %s57_s30, [#allocation9], %s9581_s27, %s9581_s27, %s9582_s28  }
  0x1b   :  { %s6421_s22 = scalar_lea.hbm %s9569_s12, 2048 }
  0x1c   :  { %p6422_p8 = scmp.ne.s32.totalorder %s9569_s12, %s6421_s22  ;;  %p6425_p9 = scmp.lt.u32.totalorder %s6421_s22, %s9569_s12 }
  0x1e   :  { %p6427_p10 = pnand %p6425_p9, %p6422_p8 }
  0x20   :  { %6430 = shalt.err (!%p6427_p10)
}
  0x21   :  { %s6431_s3 = scalar_lea.vmem %s6702_s21, 2048  ;;  %p6436_p12 = scmp.lt.s32.totalorder %s6702_s21, %s6702_s21 }
  0x22   :  { %p6432_p11 = scmp.ne.s32.totalorder %s6702_s21, %s6431_s3  ;;  %p6437_p13 = scmp.lt.s32.totalorder %s6431_s3, %s6431_s3 }
  0x24   :  { %p6438_p0 = por %p6437_p13, %p6436_p12 }
  0x26   :  { %p6439_p1 = pnand %p6438_p0, %p6432_p11 }
  0x28   :  { %6442 = shalt.err (!%p6439_p1)
}
  0x29   :  { %s6589_s6 = smov 128   ;;  %s6590_s30 = smov 8  }
  0x2a   :  { %92 = dma.hbm_to_vmem [thread:$0]  %s9569_s12, 2048, %s6702_s21, [#allocation12], %s6589_s6, %s6589_s6, %s6590_s30  }
  0x2b   :  { %s6591_s0 = smov [#allocation14]   ;;  %s6592_s1 = smov [#allocation6]  }
  0x2c   :  { %s115_s20 = sshll.u32 %s6591_s0, 4  ;;  %s44_s22 = sshll.u32 %s6592_s1, 4  ;;  %s116_s20 = int_to_ptr.vmem [resolvable:$true] %s115_s20  ;;  %s6739_s22 = int_to_ptr.vmem [resolvable:$true] %s44_s22 }
  0x2d   :  { %s6443_s24 = scalar_lea.hbm %s9573_s16, 32 }
  0x2e   :  { %p6444_p2 = scmp.ne.s32.totalorder %s9573_s16, %s6443_s24  ;;  %p6447_p3 = scmp.lt.u32.totalorder %s6443_s24, %s9573_s16 }
  0x30   :  { %p6449_p4 = pnand %p6447_p3, %p6444_p2 }
  0x32   :  { %6452 = shalt.err (!%p6449_p4)
}
  0x33   :  { %s6453_s12 = scalar_lea.vmem %s116_s20, 32  ;;  %p6458_p6 = scmp.lt.s32.totalorder %s116_s20, %s116_s20 }
  0x34   :  { %p6454_p5 = scmp.ne.s32.totalorder %s116_s20, %s6453_s12  ;;  %p6459_p7 = scmp.lt.s32.totalorder %s6453_s12, %s6453_s12 }
  0x36   :  { %p6460_p8 = por %p6459_p7, %p6458_p6 }
  0x38   :  { %p6461_p9 = pnand %p6460_p8, %p6454_p5 }
  0x3a   :  { %6464 = shalt.err (!%p6461_p9)
}
  0x3b   :  { %118 = dma.hbm_to_vmem [thread:$0]  %s9573_s16, 32, %s116_s20, [#allocation15]  }
  0x3c   :  { %s6465_s1 = scalar_lea.hbm %s9562_s5, 4096 }
  0x3d   :  { %p6466_p10 = scmp.ne.s32.totalorder %s9562_s5, %s6465_s1  ;;  %p6469_p11 = scmp.lt.u32.totalorder %s6465_s1, %s9562_s5 }
  0x3f   :  { %p6471_p12 = pnand %p6469_p11, %p6466_p10 }
  0x41   :  { %6474 = shalt.err (!%p6471_p12)
}
  0x42   :  { %s6475_s24 = scalar_lea.vmem %s6739_s22, 4096  ;;  %p6480_p0 = scmp.lt.s32.totalorder %s6739_s22, %s6739_s22 }
  0x43   :  { %p6476_p13 = scmp.ne.s32.totalorder %s6739_s22, %s6475_s24  ;;  %p6481_p1 = scmp.lt.s32.totalorder %s6475_s24, %s6475_s24 }
  0x45   :  { %p6482_p2 = por %p6481_p1, %p6480_p0 }
  0x47   :  { %p6483_p3 = pnand %p6482_p2, %p6476_p13 }
  0x49   :  { %6486 = shalt.err (!%p6483_p3)
}
  0x4a   :  { %s9685_s16 = smov 16   ;;  %s9686_s20 = smov 256  }
  0x4b   :  { %50 = dma.hbm_to_vmem [thread:$0]  %s9562_s5, 4096, %s6739_s22, [#allocation7], %s9686_s20, %s9686_s20, %s9685_s16  }
  0x4c   :  { %s6593_s12 = smov [#allocation10]   ;;  %s6594_s26 = smov [#allocation13]  }
  0x4d   :  { %s69_s21 = sshll.u32 %s6593_s12, 4  ;;  %s102_s29 = sshll.u32 %s6594_s26, 4  ;;  %s70_s21 = int_to_ptr.vmem [resolvable:$true] %s69_s21  ;;  %s6773_s29 = int_to_ptr.vmem [resolvable:$true] %s102_s29 }
  0x4e   :  { %s6487_s2 = scalar_lea.hbm %s9564_s7, 64 }
  0x4f   :  { %p6488_p4 = scmp.ne.s32.totalorder %s9564_s7, %s6487_s2  ;;  %p6491_p5 = scmp.lt.u32.totalorder %s6487_s2, %s9564_s7 }
  0x51   :  { %p6493_p6 = pnand %p6491_p5, %p6488_p4 }
  0x53   :  { %6496 = shalt.err (!%p6493_p6)
}
  0x54   :  { %s6497_s5 = scalar_lea.vmem %s70_s21, 64  ;;  %p6502_p8 = scmp.lt.s32.totalorder %s70_s21, %s70_s21 }
  0x55   :  { %p6498_p7 = scmp.ne.s32.totalorder %s70_s21, %s6497_s5  ;;  %p6503_p9 = scmp.lt.s32.totalorder %s6497_s5, %s6497_s5 }
  0x57   :  { %p6504_p10 = por %p6503_p9, %p6502_p8 }
  0x59   :  { %p6505_p11 = pnand %p6504_p10, %p6498_p7 }
  0x5b   :  { %6508 = shalt.err (!%p6505_p11)
}
  0x5c   :  { %72 = dma.hbm_to_vmem [thread:$0]  %s9564_s7, 64, %s70_s21, [#allocation9]  }
  0x5d   :  { %s6509_s3 = scalar_lea.hbm %s9572_s15, 2048 }
  0x5e   :  { %p6510_p12 = scmp.ne.s32.totalorder %s9572_s15, %s6509_s3  ;;  %p6513_p13 = scmp.lt.u32.totalorder %s6509_s3, %s9572_s15 }
  0x60   :  { %p6515_p0 = pnand %p6513_p13, %p6510_p12 }
  0x62   :  { %6518 = shalt.err (!%p6515_p0)
}
  0x63   :  { %s6519_s2 = scalar_lea.vmem %s6773_s29, 2048  ;;  %p6524_p2 = scmp.lt.s32.totalorder %s6773_s29, %s6773_s29 }
  0x64   :  { %p6520_p1 = scmp.ne.s32.totalorder %s6773_s29, %s6519_s2  ;;  %p6525_p3 = scmp.lt.s32.totalorder %s6519_s2, %s6519_s2 }
  0x66   :  { %p6526_p4 = por %p6525_p3, %p6524_p2 }
  0x68   :  { %p6527_p5 = pnand %p6526_p4, %p6520_p1 }
  0x6a   :  { %6530 = shalt.err (!%p6527_p5)
}
  0x6b   :  { %108 = dma.hbm_to_vmem [thread:$0]  %s9572_s15, 2048, %s6773_s29, [#allocation12], %s6589_s6, %s6589_s6, %s6590_s30  }
  0x6c   :  { %s6595_s27 = smov [#allocation16]   ;;  %s6596_s23 = smov [#allocation17]  }
  0x6d   :  { %s124_s28 = sshll.u32 %s6595_s27, 4  ;;  %s137_s24 = sshll.u32 %s6596_s23, 4  ;;  %s125_s28 = int_to_ptr.vmem [resolvable:$true] %s124_s28  ;;  %s138_s24 = int_to_ptr.vmem [resolvable:$true] %s137_s24 }
  0x6e   :  { %s6531_s16 = scalar_lea.hbm %s9574_s17, 1024 }
  0x6f   :  { %p6532_p6 = scmp.ne.s32.totalorder %s9574_s17, %s6531_s16  ;;  %p6535_p7 = scmp.lt.u32.totalorder %s6531_s16, %s9574_s17 }
  0x71   :  { %p6537_p8 = pnand %p6535_p7, %p6532_p6 }
  0x73   :  { %6540 = shalt.err (!%p6537_p8)
}
  0x74   :  { %s6541_s15 = scalar_lea.vmem %s125_s28, 1024  ;;  %p6546_p10 = scmp.lt.s32.totalorder %s125_s28, %s125_s28 }
  0x75   :  { %p6542_p9 = scmp.ne.s32.totalorder %s125_s28, %s6541_s15  ;;  %p6547_p11 = scmp.lt.s32.totalorder %s6541_s15, %s6541_s15 }
  0x77   :  { %p6548_p12 = por %p6547_p11, %p6546_p10 }
  0x79   :  { %p6549_p13 = pnand %p6548_p12, %p6542_p9 }
  0x7b   :  { %6552 = shalt.err (!%p6549_p13)
}
  0x7c   :  { %130 = dma.hbm_to_vmem [thread:$0]  %s9574_s17, 1024, %s125_s28, [#allocation15], %s6589_s6, %s6589_s6, %s6590_s30  }
  0x7d   :  { %s6553_s2 = scalar_lea.hbm %s9575_s18, 16 }
  0x7e   :  { %p6554_p0 = scmp.ne.s32.totalorder %s9575_s18, %s6553_s2  ;;  %p6557_p1 = scmp.lt.u32.totalorder %s6553_s2, %s9575_s18 }
  0x80   :  { %p6559_p2 = pnand %p6557_p1, %p6554_p0 }
  0x82   :  { %6562 = shalt.err (!%p6559_p2)
}
  0x83   :  { %s6563_s5 = scalar_lea.vmem %s138_s24, 16  ;;  %s6567_s22 = scalar_lea.vmem %s138_s24, 32 }
  0x84   :  { %p6564_p3 = scmp.ne.s32.totalorder %s138_s24, %s6563_s5  ;;  %p6568_p4 = scmp.lt.s32.totalorder %s138_s24, %s138_s24 }
  0x85   :  { %p6569_p5 = scmp.lt.s32.totalorder %s6567_s22, %s6563_s5 }
  0x87   :  { %p6570_p6 = por %p6569_p5, %p6568_p4 }
  0x89   :  { %p6571_p7 = pnand %p6570_p6, %p6564_p3 }
  0x8b   :  { %6574 = shalt.err (!%p6571_p7)
}
  0x8c   :  { %140 = dma.hbm_to_vmem [thread:$0]  %s9575_s18, 16, %s138_s24, [#allocation18]  }
  0x8d   :  { %6575 = dma.done.wait [#allocation7], 4096  }
  0x8e   :  { %6576 = vsyncadd [#allocation7], 4294963200 }
  0x8f   :  { %6577 = dma.done.wait [#allocation9], 4160  }
  0x90   :  { %6578 = vsyncadd [#allocation9], 4294963136 }
  0x91   :  { %6579 = dma.done.wait [#allocation12], 4096  }
  0x92   :  { %6580 = vsyncadd [#allocation12], 4294963200 }
  0x93   :  { %6581 = dma.done.wait [#allocation15], 1056  }
  0x94   :  { %6582 = vsyncadd [#allocation15], 4294966240 }
  0x95   :  { %6583 = dma.done.wait [#allocation18], 16  }
  0x96   :  { %6584 = vsyncadd [#allocation18], 4294967280  ;;  %v9585_v0 = vmov 0   ;;  %s9687_s16 = sld [smem:[#allocation63_spill]]  ;;  %vm282_vm0 = vcmask 1043456   ;;  %s9688_s3 = sld [smem:[#allocation61_spill]]  ;;  %v166_v53 = vlaneseq }
  0x97   :  { %327 = vmatprep.mubr.bf16.mxu0 %v9585_v0  ;;  %400 = vmatprep.mubr.bf16.mxu1 %v9585_v0  ;;  %s9689_s0 = sld [smem:[#allocation64_spill]]  ;;  %vm269_vm1 = vcmask 64512   ;;  %v237_v58 = vld [vmem:[%s9561_s4] sm:$0xf]  ;;  %vm793_vm6 = vcmask 523264   ;;  %vm796_vm7 = vcmask 1048064  }
  0x98   :  { %v7112_v54 = vshrl.u32 %v166_v53, 7  ;;  %s9857_s17 = sld [smem:[#allocation62_spill]]  ;;  %vm3481_vm8 = vcmask 1041409   ;;  %vm3483_vm9 = vcmask 1042434   ;;  %vm3485_vm10 = vcmask 1043459   ;;  %s6599_s1 = smov 64  }
  0x99   :  { %vm3487_vm11 = vcmask 1044484   ;;  %vm3489_vm12 = vcmask 1045509   ;;  %vm3491_vm13 = vcmask 1046534   ;;  %vm3493_vm14 = vcmask 1047559  }
  0x9a   :  { %9696 = vst [vmem:[#allocation30_spill] sm:$0xff] %v7112_v54  ;;  %v9584_v55 = vsub.s32 2, %v7112_v54  ;;  %v9583_v56 = vsub.s32 3, %v7112_v54  ;;  %v7117_v57 = vsub.s32 0, %v7112_v54  ;;  %v7123_v59 = vsub.s32 1, %v7112_v54 }
  0x9b   :  { %vm6601_vm15 = vmmov 0  }
  0x9c   :  { %v235_v1 = vld [vmem:[%s9687_s16] sm:$0xff]  ;;  %v236_v2 = vld [vmem:[%s9687_s16 + $0x8] sm:$0xff]  ;;  %v225_v20 = vld [vmem:[%s9688_s3 + $0x10] sm:$0xff]  ;;  %9697 = vst [vmem:[#allocation31_spill] sm:$0xff] %v7117_v57  ;;  %v7127_v60 = vrot.slane %v237_v58, %v9584_v55  ;;  %v7135_v63 = vrot.slane %v237_v58, %v9583_v56 }
  0x9d   :  { %v223_v3 = vld [vmem:[%s9688_s3] sm:$0xff]  ;;  %v5260_v4 = vcombine.high %v235_v1, %v235_v1  ;;  %v5262_v5 = vcombine.high %v236_v2, %v236_v2  ;;  %v5259_v6 = vcombine.low %v235_v1, %v235_v1  ;;  %v5261_v7 = vcombine.low %v236_v2, %v236_v2  ;;  %v224_v8 = vld [vmem:[%s9688_s3 + $0x8] sm:$0xff]  ;;  %v226_v21 = vld [vmem:[%s9688_s3 + $0x18] sm:$0xff]  ;;  %9698 = vst [vmem:[#allocation32_spill] sm:$0xff] %v7123_v59 }
  0x9e   :  { %v6851_v9 = vld [vmem:[%s9689_s0 + $0x4] ss:$16 sps:$4 sm:$0xff]   ;;  %v231_v12 = vpack.c.bf16 %v224_v8, %v223_v3  ;;  %v6856_v13 = vld [vmem:[%s9689_s0 + $0xc] ss:$16 sps:$4 sm:$0xff]   ;;  %v6861_v14 = vld [vmem:[%s9689_s0] ss:$16 sps:$4 sm:$0xff]   ;;  %v232_v24 = vpack.c.bf16 %v226_v21, %v225_v20  ;;  %v7138_v1 = vrot.slane %v237_v58, %v7117_v57 }
  0x9f   :  { %9690 = vst [vmem:[#allocation24_spill] sm:$0xff] %v6851_v9  ;;  %5263 = vmatprep.subr.msk.bf16.mxu0 %vm282_vm0, %v5260_v4  ;;  %5268 = vmatprep.subr.msk.bf16.mxu1 %vm282_vm0, %v5262_v5  ;;  %v284_v10 = vsel %vm282_vm0, %v5259_v6, 0  ;;  %v290_v11 = vsel %vm282_vm0, %v5261_v7, 0  ;;  %9691 = vst [vmem:[#allocation25_spill] sm:$0xff] %v6856_v13  ;;  %v6866_v15 = vld [vmem:[%s9689_s0 + $0x8] ss:$16 sps:$4 sm:$0xff]   ;;  %v7145_v4 = vrot.slane %v237_v58, %v7123_v59 }
  0xa0   :  { %296 = vmatpush1.bf16.msra.mxu0 %v284_v10  ;;  %369 = vmatpush1.bf16.msra.mxu1 %v290_v11  ;;  %v6873_v16 = vld [vmem:[%s9689_s0 + $0x24] ss:$16 sps:$4 sm:$0xff]   ;;  %v6878_v17 = vld [vmem:[%s9689_s0 + $0x2c] ss:$16 sps:$4 sm:$0xff]   ;;  %v6883_v18 = vld [vmem:[%s9689_s0 + $0x20] ss:$16 sps:$4 sm:$0xff]  }
  0xa1   :  { %683 = vmatprep.subr.bf16.mxu0 %v6851_v9  ;;  %724 = vmatprep.subr.bf16.mxu1 %v6856_v13  ;;  %v6890_v19 = vld [vmem:[%s9689_s0 + $0x28] ss:$16 sps:$4 sm:$0xff]   ;;  %v6905_v22 = vld [vmem:[%s9689_s0 + $0x44] ss:$16 sps:$4 sm:$0xff]   ;;  %v6910_v23 = vld [vmem:[%s9689_s0 + $0x4c] ss:$16 sps:$4 sm:$0xff]  }
  0xa2   :  { %v6919_v25 = vld [vmem:[%s9689_s0 + $0x40] ss:$16 sps:$4 sm:$0xff]   ;;  %v6924_v26 = vld [vmem:[%s9689_s0 + $0x48] ss:$16 sps:$4 sm:$0xff]   ;;  %v6931_v27 = vld [vmem:[%s9689_s0 + $0x64] ss:$16 sps:$4 sm:$0xff]  }
  0xa3   :  { %5264 = vmatmul.mubr.msk.bf16.vlgmr.msra.gmra.mrb[0].mxu0 %vm269_vm1, %v231_v12  ;;  %5269 = vmatmul.mubr.msk.bf16.vlgmr.msra.gmra.mrb[0].mxu1 %vm269_vm1, %v231_v12  ;;  %v6936_v28 = vld [vmem:[%s9689_s0 + $0x6c] ss:$16 sps:$4 sm:$0xff]   ;;  %v6941_v29 = vld [vmem:[%s9689_s0 + $0x60] ss:$16 sps:$4 sm:$0xff]   ;;  %v6946_v30 = vld [vmem:[%s9689_s0 + $0x68] ss:$16 sps:$4 sm:$0xff]  }
  0xa4   :  { %684 = vmatpush1.bf16.msra.mxu0 %v6861_v14  ;;  %725 = vmatpush1.bf16.msra.mxu1 %v6866_v15  ;;  %v227_v31 = vld [vmem:[%s9688_s3 + $0x20] sm:$0xff]  ;;  %v228_v32 = vld [vmem:[%s9688_s3 + $0x28] sm:$0xff]  ;;  %v229_v42 = vld [vmem:[%s9688_s3 + $0x30] sm:$0xff]  ;;  %v7159_v21 = vand.u32 127, %v166_v53 }
  0xa5   :  { %685 = vmatprep.subr.bf16.mxu0 %v6873_v16  ;;  %726 = vmatprep.subr.bf16.mxu1 %v6878_v17  ;;  %v6961_v33 = vld [vmem:[%s9689_s0 + $0x84] ss:$16 sps:$4 sm:$0xff]   ;;  %v6968_v34 = vld [vmem:[%s9689_s0 + $0x8c] ss:$16 sps:$4 sm:$0xff]   ;;  %v233_v35 = vpack.c.bf16 %v228_v32, %v227_v31  ;;  %v6975_v36 = vld [vmem:[%s9689_s0 + $0x80] ss:$16 sps:$4 sm:$0xff]  }
  0xa6   :  { %337 = vmatprep.mubr.bf16.mxu0 %v9585_v0  ;;  %410 = vmatprep.mubr.bf16.mxu1 %v9585_v0  ;;  %v6982_v37 = vld [vmem:[%s9689_s0 + $0x88] ss:$16 sps:$4 sm:$0xff]   ;;  %v6989_v38 = vld [vmem:[%s9689_s0 + $0xa4] ss:$16 sps:$4 sm:$0xff]   ;;  %v6994_v39 = vld [vmem:[%s9689_s0 + $0xac] ss:$16 sps:$4 sm:$0xff]  }
  0xa7   :  { %v6999_v40 = vld [vmem:[%s9689_s0 + $0xa0] ss:$16 sps:$4 sm:$0xff]   ;;  %v7006_v41 = vld [vmem:[%s9689_s0 + $0xa8] ss:$16 sps:$4 sm:$0xff]   ;;  %v7019_v44 = vld [vmem:[%s9689_s0 + $0xc4] ss:$16 sps:$4 sm:$0xff]  }
  0xa8   :  { %686 = vmatpush1.bf16.msra.mxu0 %v6883_v18  ;;  %727 = vmatpush1.bf16.msra.mxu1 %v6890_v19  ;;  %v230_v43 = vld [vmem:[%s9688_s3 + $0x38] sm:$0xff]  ;;  %v7033_v46 = vld [vmem:[%s9689_s0 + $0xc0] ss:$16 sps:$4 sm:$0xff]   ;;  %v7043_v49 = vld [vmem:[%s9689_s0 + $0xe4] ss:$16 sps:$4 sm:$0xff]   ;;  %9702 = vst [vmem:[#allocation36_spill] sm:$0xff] %v7159_v21 }
  0xa9   :  { %687 = vmatprep.subr.bf16.mxu0 %v6905_v22  ;;  %728 = vmatprep.subr.bf16.mxu1 %v6910_v23  ;;  %v7026_v45 = vld [vmem:[%s9689_s0 + $0xcc] ss:$16 sps:$4 sm:$0xff]   ;;  %v7038_v47 = vld [vmem:[%s9689_s0 + $0xc8] ss:$16 sps:$4 sm:$0xff]   ;;  %v234_v48 = vpack.c.bf16 %v230_v43, %v229_v42  ;;  %9692 = vst [vmem:[#allocation26_spill] sm:$0xff] %v7043_v49  ;;  %v169_v31 = vadd.s32 256, %v7159_v21 }
  0xaa   :  { %v7048_v50 = vld [vmem:[%s9689_s0 + $0xec] ss:$16 sps:$4 sm:$0xff]   ;;  %v7057_v51 = vld [vmem:[%s9689_s0 + $0xe0] ss:$16 sps:$4 sm:$0xff]   ;;  %v7062_v52 = vld [vmem:[%s9689_s0 + $0xe8] ss:$16 sps:$4 sm:$0xff]  }
  0xab   :  { %5265 = vmatmul.mubr.msk.bf16.gmra.mrb[4].mxu0 %vm269_vm1, %v232_v24  ;;  %5270 = vmatmul.mubr.msk.bf16.gmra.mrb[4].mxu1 %vm269_vm1, %v232_v24  ;;  %9693 = vst [vmem:[#allocation27_spill] sm:$0xff] %v7048_v50  ;;  %9694 = vst [vmem:[#allocation28_spill] sm:$0xff] %v7057_v51  ;;  %v168_v43 = vadd.s32 128, %v7159_v21  ;;  %vm219_vm2 = vcmp.lt.s32.totalorder %v7159_v21, 64 }
  0xac   :  { %688 = vmatpush1.bf16.msra.mxu0 %v6919_v25  ;;  %729 = vmatpush1.bf16.msra.mxu1 %v6924_v26  ;;  %9695 = vst [vmem:[#allocation29_spill] sm:$0xff] %v7062_v52 }
  0xad   :  { %689 = vmatprep.subr.bf16.mxu0 %v6931_v27  ;;  %730 = vmatprep.subr.bf16.mxu1 %v6936_v28 }
  0xae   :  { %347 = vmatprep.mubr.bf16.mxu0 %v9585_v0  ;;  %420 = vmatprep.mubr.bf16.mxu1 %v9585_v0 }
  0xb0   :  { %690 = vmatpush1.bf16.msra.mxu0 %v6941_v29  ;;  %731 = vmatpush1.bf16.msra.mxu1 %v6946_v30 }
  0xb1   :  { %691 = vmatprep.subr.bf16.mxu0 %v6961_v33  ;;  %732 = vmatprep.subr.bf16.mxu1 %v6968_v34 }
  0xb3   :  { %5266 = vmatmul.mubr.msk.bf16.gmra.mrb[8].mxu0 %vm269_vm1, %v233_v35  ;;  %5271 = vmatmul.mubr.msk.bf16.gmra.mrb[8].mxu1 %vm269_vm1, %v233_v35 }
  0xb4   :  { %692 = vmatpush1.bf16.msra.mxu0 %v6975_v36  ;;  %733 = vmatpush1.bf16.msra.mxu1 %v6982_v37 }
  0xb5   :  { %693 = vmatprep.subr.bf16.mxu0 %v6989_v38  ;;  %734 = vmatprep.subr.bf16.mxu1 %v6994_v39 }
  0xb6   :  { %357 = vmatprep.mubr.bf16.mxu0 %v9585_v0  ;;  %430 = vmatprep.mubr.bf16.mxu1 %v9585_v0 }
  0xb8   :  { %694 = vmatpush1.bf16.msra.mxu0 %v6999_v40  ;;  %735 = vmatpush1.bf16.msra.mxu1 %v7006_v41 }
  0xb9   :  { %695 = vmatprep.subr.bf16.mxu0 %v7019_v44  ;;  %736 = vmatprep.subr.bf16.mxu1 %v7026_v45 }
  0xbb   :  { %5267 = vmatmul.mubr.msk.bf16.gmra.mrb[12].mxu0 %vm269_vm1, %v234_v48  ;;  %5272 = vmatmul.mubr.msk.bf16.gmra.mrb[12].mxu1 %vm269_vm1, %v234_v48  ;;  %v170_v48 = vadd.s32 384, %v7159_v21 }
  0xbc   :  { %696 = vmatpush1.bf16.msra.mxu0 %v7033_v46  ;;  %737 = vmatpush1.bf16.msra.mxu1 %v7038_v47 }
  0xbd   :  { %697 = vmatprep.subr.bf16.mxu0 %v7043_v49  ;;  %738 = vmatprep.subr.bf16.mxu1 %v7048_v50  ;;  %v196_v57 = vand.u32 127, %v170_v48 }
  0xbe   :  { %715 = vmatprep.mubr.bf16.mxu0 %v9585_v0  ;;  %756 = vmatprep.mubr.bf16.mxu1 %v9585_v0 }
  0xbf   :  { %vm7193_vm5 = vcmp.lt.s32.totalorder %v196_v57, 64 }
  0xc0   :  { %698 = vmatpush1.bf16.msra.mxu0 %v7057_v51  ;;  %739 = vmatpush1.bf16.msra.mxu1 %v7062_v52 }
  0xc1   :  { %817 = vmatprep.subr.bf16.mxu0 %v6851_v9  ;;  %858 = vmatprep.subr.bf16.mxu1 %v6856_v13 }
  0xc3   :  { %716 = vmatmul.mubr.bf16.vlgmr.msra.gmra.mrb[16].mxu0 %v9585_v0  ;;  %757 = vmatmul.mubr.bf16.vlgmr.msra.gmra.mrb[16].mxu1 %v9585_v0 }
  0xc4   :  { %818 = vmatpush1.bf16.msra.mxu0 %v6861_v14  ;;  %859 = vmatpush1.bf16.msra.mxu1 %v6866_v15 }
  0xc5   :  { %819 = vmatprep.subr.bf16.mxu0 %v6873_v16  ;;  %860 = vmatprep.subr.bf16.mxu1 %v6878_v17 }
  0xc6   :  { %849 = vmatprep.mubr.bf16.mxu0 %v9585_v0  ;;  %890 = vmatprep.mubr.bf16.mxu1 %v9585_v0 }
  0xc8   :  { %820 = vmatpush1.bf16.msra.mxu0 %v6883_v18  ;;  %861 = vmatpush1.bf16.msra.mxu1 %v6890_v19 }
  0xc9   :  { %821 = vmatprep.subr.bf16.mxu0 %v6905_v22  ;;  %862 = vmatprep.subr.bf16.mxu1 %v6910_v23 }
  0xcc   :  { %822 = vmatpush1.bf16.msra.mxu0 %v6919_v25  ;;  %863 = vmatpush1.bf16.msra.mxu1 %v6924_v26 }
  0xcd   :  { %823 = vmatprep.subr.bf16.mxu0 %v6931_v27  ;;  %864 = vmatprep.subr.bf16.mxu1 %v6936_v28 }
  0xd0   :  { %824 = vmatpush1.bf16.msra.mxu0 %v6941_v29  ;;  %865 = vmatpush1.bf16.msra.mxu1 %v6946_v30 }
  0xd1   :  { %825 = vmatprep.subr.bf16.mxu0 %v6961_v33  ;;  %866 = vmatprep.subr.bf16.mxu1 %v6968_v34 }
  0xd4   :  { %826 = vmatpush1.bf16.msra.mxu0 %v6975_v36  ;;  %867 = vmatpush1.bf16.msra.mxu1 %v6982_v37 }
  0xd5   :  { %827 = vmatprep.subr.bf16.mxu0 %v6989_v38  ;;  %868 = vmatprep.subr.bf16.mxu1 %v6994_v39 }
  0xd8   :  { %828 = vmatpush1.bf16.msra.mxu0 %v6999_v40  ;;  %869 = vmatpush1.bf16.msra.mxu1 %v7006_v41 }
  0xd9   :  { %829 = vmatprep.subr.bf16.mxu0 %v7019_v44  ;;  %870 = vmatprep.subr.bf16.mxu1 %v7026_v45 }
  0xdc   :  { %830 = vmatpush1.bf16.msra.mxu0 %v7033_v46  ;;  %871 = vmatpush1.bf16.msra.mxu1 %v7038_v47 }
  0xdd   :  { %831 = vmatprep.subr.bf16.mxu0 %v7043_v49  ;;  %872 = vmatprep.subr.bf16.mxu1 %v7048_v50 }
  0xe0   :  { %832 = vmatpush1.bf16.msra.mxu0 %v7057_v51  ;;  %873 = vmatpush1.bf16.msra.mxu1 %v7062_v52 }
  0xe1   :  { %950 = vmatprep.subr.bf16.mxu0 %v6851_v9  ;;  %991 = vmatprep.subr.bf16.mxu1 %v6856_v13 }
 0x176   :  { %v7129_v61 = vpop.f32.mrb[0].mxu0  ;;  %v7131_v62 = vpop.f32.mrb[0].mxu1 }
 0x177   :  { %v7140_v2 = vpop.f32.mrb[1].mxu0  ;;  %v7142_v3 = vpop.f32.mrb[1].mxu1 }
 0x178   :  { %v333_v5 = vpop.f32.mrb[2].mxu0  ;;  %v406_v6 = vpop.f32.mrb[2].mxu1 }
 0x179   :  { %v7148_v7 = vadd.f32 %v333_v5, %v7138_v1  ;;  %v335_v8 = vpop.f32.mrb[3].mxu0  ;;  %v7151_v10 = vadd.f32 %v406_v6, %v7127_v60  ;;  %v408_v11 = vpop.f32.mrb[3].mxu1 }
 0x17a   :  { %v7154_v12 = vadd.f32 %v335_v8, %v7145_v4  ;;  %v7157_v20 = vadd.f32 %v408_v11, %v7135_v63 }
 0x17b   :  { %9699 = vst [vmem:[#allocation33_spill] sm:$0xff] %v7151_v10 }
 0x17c   :  { %9700 = vst [vmem:[#allocation34_spill] sm:$0xff] %v7154_v12  ;;  %9701 = vst [vmem:[#allocation35_spill] sm:$0xff] %v7157_v20 }
 0x17e   :  { %v339_v24 = vpop.f32.mrb[4].mxu0  ;;  %v412_v32 = vpop.f32.mrb[4].mxu1 }
 0x17f   :  { %v340_v35 = vadd.f32 %v339_v24, %v7138_v1  ;;  %v341_v42 = vpop.f32.mrb[5].mxu0  ;;  %v7166_v58 = vadd.f32 %v412_v32, %v7127_v60  ;;  %v414_v5 = vpop.f32.mrb[5].mxu1  ;;  %v189_v32 = vand.u32 127, %v169_v31 }
 0x180   :  { %v7169_v6 = vadd.f32 %v341_v42, %v7145_v4  ;;  %v343_v53 = vpop.f32.mrb[6].mxu0  ;;  %v7172_v8 = vadd.f32 %v414_v5, %v7135_v63  ;;  %v416_v11 = vpop.f32.mrb[6].mxu1  ;;  %v182_v42 = vand.u32 127, %v168_v43 }
 0x181   :  { %v344_v56 = vadd.f32 %v343_v53, %v7138_v1  ;;  %v345_v24 = vpop.f32.mrb[7].mxu0  ;;  %v7176_v55 = vadd.f32 %v416_v11, %v7127_v60  ;;  %v418_v0 = vpop.f32.mrb[7].mxu1  ;;  %vm7185_vm3 = vcmp.lt.s32.totalorder %v189_v32, 64 }
 0x182   :  { %9703 = vst [vmem:[#allocation37_spill] sm:$0xff] %v7172_v8  ;;  %v7179_v59 = vadd.f32 %v345_v24, %v7145_v4  ;;  %v7182_v54 = vadd.f32 %v418_v0, %v7135_v63  ;;  %vm7189_vm4 = vcmp.lt.s32.totalorder %v182_v42, 64 }
 0x183   :  { %9704 = vst [vmem:[#allocation38_spill] sm:$0xff] %v7176_v55 }
 0x184   :  { %9705 = vst [vmem:[#allocation39_spill] sm:$0xff] %v7179_v59  ;;  %9706 = vst [vmem:[#allocation40_spill] sm:$0xff] %v7182_v54 }
 0x186   :  { %v349_v53 = vpop.f32.mrb[8].mxu0  ;;  %v422_v13 = vpop.f32.mrb[8].mxu1 }
 0x187   :  { %v350_v0 = vadd.f32 %v349_v53, %v7138_v1  ;;  %v351_v31 = vpop.f32.mrb[9].mxu0  ;;  %v7199_v43 = vadd.f32 %v422_v13, %v7127_v60  ;;  %v424_v48 = vpop.f32.mrb[9].mxu1 }
 0x188   :  { %v7202_v32 = vadd.f32 %v351_v31, %v7145_v4  ;;  %v353_v9 = vpop.f32.mrb[10].mxu0  ;;  %v7205_v42 = vadd.f32 %v424_v48, %v7135_v63  ;;  %v426_v52 = vpop.f32.mrb[10].mxu1 }
 0x189   :  { %9713 = vst [vmem:[#allocation41_spill] sm:$0xff] %v7199_v43  ;;  %v354_v57 = vadd.f32 %v353_v9, %v7138_v1  ;;  %v355_v51 = vpop.f32.mrb[11].mxu0  ;;  %v7209_v50 = vadd.f32 %v426_v52, %v7127_v60  ;;  %v428_v53 = vpop.f32.mrb[11].mxu1  ;;  %v7213_v13 = vsel %vm219_vm2, %v344_v56, %v350_v0 }
 0x18a   :  { %9714 = vst [vmem:[#allocation42_spill] sm:$0xff] %v7202_v32  ;;  %9715 = vst [vmem:[#allocation43_spill] sm:$0xff] %v7205_v42  ;;  %v7220_v48 = vadd.f32 %v355_v51, %v7145_v4  ;;  %v7223_v49 = vadd.f32 %v428_v53, %v7135_v63  ;;  %v7243_v53 = vsel %vm219_vm2, %v350_v0, %v344_v56 }
 0x18b   :  { %9716 = vst [vmem:[#allocation44_spill] sm:$0xff] %v7213_v13  ;;  %v7235_v13 = vsel %vm219_vm2, %v340_v35, %v354_v57  ;;  %9719 = vst [vmem:[#allocation47_spill] sm:$0xff] %v7243_v53  ;;  %v7267_v9 = vsel %vm219_vm2, %v354_v57, %v340_v35  ;;  %v330_v35 = vadd.f32 %v7129_v61, %v7138_v1 }
 0x18c   :  { %9717 = vst [vmem:[#allocation45_spill] sm:$0xff] %v7220_v48  ;;  %9718 = vst [vmem:[#allocation46_spill] sm:$0xff] %v7223_v49  ;;  %v7285_v57 = vadd.f32 %v7131_v62, %v7127_v60  ;;  %v7293_v42 = vadd.f32 %v7140_v2, %v7145_v4  ;;  %v7297_v56 = vadd.f32 %v7142_v3, %v7135_v63 }
 0x18d   :  { %9720 = vst [vmem:[#allocation48_spill] sm:$0xff] %v7267_v9 }
 0x18e   :  { %v359_v0 = vpop.f32.mrb[12].mxu0  ;;  %v432_v51 = vpop.f32.mrb[12].mxu1  ;;  %9721 = vst [vmem:[#allocation49_spill] sm:$0xff] %v7285_v57  ;;  %9723 = vst [vmem:[#allocation51_spill] sm:$0xff] %v7293_v42 }
 0x18f   :  { %v360_v52 = vadd.f32 %v359_v0, %v7138_v1  ;;  %v7289_v9 = vadd.f32 %v432_v51, %v7127_v60  ;;  %v361_v31 = vpop.f32.mrb[13].mxu0  ;;  %v434_v53 = vpop.f32.mrb[13].mxu1  ;;  %9724 = vst [vmem:[#allocation52_spill] sm:$0xff] %v7297_v56 }
 0x190   :  { %v7300_v61 = vadd.f32 %v361_v31, %v7145_v4  ;;  %v7303_v62 = vadd.f32 %v434_v53, %v7135_v63  ;;  %v363_v0 = vpop.f32.mrb[14].mxu0  ;;  %v436_v54 = vpop.f32.mrb[14].mxu1 }
 0x191   :  { %9722 = vst [vmem:[#allocation50_spill] sm:$0xff] %v7289_v9  ;;  %v364_v51 = vadd.f32 %v363_v0, %v7138_v1  ;;  %v7307_v32 = vadd.f32 %v436_v54, %v7127_v60  ;;  %v365_v59 = vpop.f32.mrb[15].mxu0  ;;  %v438_v2 = vpop.f32.mrb[15].mxu1  ;;  %v7312_v3 = vsel %vm219_vm2, %v7148_v7, %v360_v52 }
 0x192   :  { %9725 = vst [vmem:[#allocation53_spill] sm:$0xff] %v7300_v61  ;;  %9726 = vst [vmem:[#allocation54_spill] sm:$0xff] %v7303_v62  ;;  %v7319_v53 = vadd.f32 %v365_v59, %v7145_v4  ;;  %v7322_v1 = vadd.f32 %v438_v2, %v7135_v63  ;;  %v7341_v63 = vsel %vm219_vm2, %v360_v52, %v7148_v7 }
 0x193   :  { %9727 = vst [vmem:[#allocation55_spill] sm:$0xff] %v7307_v32  ;;  %v519_v0 = vsel %vm219_vm2, %v330_v35, %v364_v51  ;;  %v521_v59 = vsel %vm7185_vm3, %v7285_v57, %v7307_v32  ;;  %9730 = vst [vmem:[#allocation58_spill] sm:$0xff] %v7341_v63  ;;  %v7365_v4 = vsel %vm219_vm2, %v364_v51, %v330_v35 }
 0x194   :  { %9728 = vst [vmem:[#allocation56_spill] sm:$0xff] %v7319_v53  ;;  %9729 = vst [vmem:[#allocation57_spill] sm:$0xff] %v7322_v1  ;;  %v520_v2 = vsel %vm7189_vm4, %v7293_v42, %v7319_v53  ;;  %v522_v60 = vsel %vm7193_vm5, %v7297_v56, %v7322_v1  ;;  %v9756_v56 = vld [vmem:[#allocation43_spill] sm:$0xff] }
 0x195   :  { %9731 = vst [vmem:[#allocation59_spill] sm:$0xff] %v7365_v4 }
 0x196   :  { %v717_v52 = vpop.f32.mrb[16].mxu0  ;;  %v758_v63 = vpop.f32.mrb[16].mxu1 }
 0x197   :  { %v765_v21 = vadd.f32 %v717_v52, %v519_v0  ;;  %v767_v35 = vadd.f32 %v758_v63, %v521_v59  ;;  %v719_v51 = vpop.f32.mrb[17].mxu0  ;;  %v760_v4 = vpop.f32.mrb[17].mxu1 }
 0x198   :  { %v766_v43 = vadd.f32 %v719_v51, %v520_v2  ;;  %v768_v55 = vadd.f32 %v760_v4, %v522_v60  ;;  %v721_v49 = vpop.f32.mrb[18].mxu0  ;;  %v762_v54 = vpop.f32.mrb[18].mxu1  ;;  %v9737_v4 = vld [vmem:[#allocation24_spill] sm:$0xff]  ;;  %v9738_v2 = vld [vmem:[#allocation25_spill] sm:$0xff]  ;;  %v9739_v51 = vsel %vm7185_vm3, %v7151_v10, %v7289_v9 }
 0x199   :  { %v5305_v57 = vmul.f32 -1.442695, %v765_v21  ;;  %v722_v32 = vpop.f32.mrb[19].mxu0  ;;  %v763_v8 = vpop.f32.mrb[19].mxu1 }
 0x19a   :  { %v5306_v48 = vmul.f32 -1.442695, %v766_v43  ;;  %v5307_v31 = vmul.f32 -1.442695, %v768_v55 }
 0x19b   :  { %5959 = vpow2.f32 %v5305_v57  ;;  %v9732_v57 = vmov 0  }
 0x19c   :  { %5961 = vpow2.f32 %v5306_v48 }
 0x19d   :  { %5963 = vpow2.f32 %v5307_v31  ;;  %v9735_v31 = vld [vmem:[#allocation28_spill] sm:$0xff] }
 0x19e   :  { %5965 = vtanh.f32 %v767_v35 }
 0x1a5   :  { %v5960_v42 = vpop.eup %5959 }
 0x1a6   :  { %v5962_v53 = vpop.eup %5961  ;;  %v772_v7 = vadd.f32 1.0, %v5960_v42 }
 0x1a7   :  { %v778_v0 = vadd.f32 1.0, %v5962_v53  ;;  %v5964_v59 = vpop.eup %5963  ;;  %v9736_v53 = vld [vmem:[#allocation29_spill] sm:$0xff] }
 0x1a8   :  { %5967 = vrcp.f32 %v772_v7  ;;  %v5966_v63 = vpop.eup %5965  ;;  %v785_v21 = vadd.f32 1.0, %v5964_v59 }
 0x1a9   :  { %5969 = vrcp.f32 %v778_v0 }
 0x1aa   :  { %5971 = vrcp.f32 %v785_v21 }
 0x1b2   :  { %v5968_v60 = vpop.eup %5967 }
 0x1b3   :  { %v5970_v49 = vpop.eup %5969  ;;  %v789_v54 = vmul.f32 %v5968_v60, %v5966_v63  ;;  %v9740_v60 = vsel %vm7189_vm4, %v7154_v12, %v7300_v61 }
 0x1b4   :  { %v788_v32 = vmul.f32 0.0, %v5970_v49  ;;  %v5972_v55 = vpop.eup %5971 }
 0x1b6   :  { %v7379_v8 = vadd.f32 %v789_v54, %v788_v32  ;;  %v9741_v54 = vsel %vm7193_vm5, %v7157_v20, %v7303_v62 }
 0x1b8   :  { %5973 = vtanh.f32 %v7379_v8 }
 0x1c2   :  { %v5974_v43 = vpop.eup %5973 }
 0x1c3   :  { %v792_v42 = vmul.f32 %v5974_v43, %v5972_v55 }
 0x1c5   :  { %794 = vst.msk [vmem:[#allocation3] sm:$0xff] %vm793_vm6, %v792_v42  ;;  %v816_v48 = vpack.c.bf16 %v792_v42, %v792_v42 }
 0x1c6   :  { %797 = vst.msk [vmem:[#allocation3 + $0x38] sm:$0xff] %vm796_vm7, %v792_v42 }
 0x1c7   :  { %850 = vmatmul.mubr.bf16.vlgmr.msra.gmra.mrb[20].mxu0 %v816_v48  ;;  %891 = vmatmul.mubr.bf16.vlgmr.msra.gmra.mrb[20].mxu1 %v816_v48 }
 0x1c8   :  { %951 = vmatpush1.bf16.msra.mxu0 %v6861_v14  ;;  %992 = vmatpush1.bf16.msra.mxu1 %v6866_v15  ;;  %v9733_v14 = vld [vmem:[#allocation26_spill] sm:$0xff]  ;;  %v9734_v15 = vld [vmem:[#allocation27_spill] sm:$0xff] }
 0x1c9   :  { %952 = vmatprep.subr.bf16.mxu0 %v6873_v16  ;;  %993 = vmatprep.subr.bf16.mxu1 %v6878_v17 }
 0x1ca   :  { %982 = vmatprep.mubr.bf16.mxu0 %v9732_v57  ;;  %1023 = vmatprep.mubr.bf16.mxu1 %v9732_v57 }
 0x1cc   :  { %953 = vmatpush1.bf16.msra.mxu0 %v6883_v18  ;;  %994 = vmatpush1.bf16.msra.mxu1 %v6890_v19 }
 0x1cd   :  { %954 = vmatprep.subr.bf16.mxu0 %v6905_v22  ;;  %995 = vmatprep.subr.bf16.mxu1 %v6910_v23 }
 0x1d0   :  { %955 = vmatpush1.bf16.msra.mxu0 %v6919_v25  ;;  %996 = vmatpush1.bf16.msra.mxu1 %v6924_v26 }
 0x1d1   :  { %956 = vmatprep.subr.bf16.mxu0 %v6931_v27  ;;  %997 = vmatprep.subr.bf16.mxu1 %v6936_v28 }
 0x1d4   :  { %957 = vmatpush1.bf16.msra.mxu0 %v6941_v29  ;;  %998 = vmatpush1.bf16.msra.mxu1 %v6946_v30 }
 0x1d5   :  { %958 = vmatprep.subr.bf16.mxu0 %v6961_v33  ;;  %999 = vmatprep.subr.bf16.mxu1 %v6968_v34 }
 0x1d8   :  { %959 = vmatpush1.bf16.msra.mxu0 %v6975_v36  ;;  %1000 = vmatpush1.bf16.msra.mxu1 %v6982_v37 }
 0x1d9   :  { %960 = vmatprep.subr.bf16.mxu0 %v6989_v38  ;;  %1001 = vmatprep.subr.bf16.mxu1 %v6994_v39 }
 0x1dc   :  { %961 = vmatpush1.bf16.msra.mxu0 %v6999_v40  ;;  %1002 = vmatpush1.bf16.msra.mxu1 %v7006_v41 }
 0x1dd   :  { %962 = vmatprep.subr.bf16.mxu0 %v7019_v44  ;;  %1003 = vmatprep.subr.bf16.mxu1 %v7026_v45 }
 0x1e0   :  { %963 = vmatpush1.bf16.msra.mxu0 %v7033_v46  ;;  %1004 = vmatpush1.bf16.msra.mxu1 %v7038_v47 }
 0x1e1   :  { %964 = vmatprep.subr.bf16.mxu0 %v9733_v14  ;;  %1005 = vmatprep.subr.bf16.mxu1 %v9734_v15 }
 0x1e4   :  { %965 = vmatpush1.bf16.msra.mxu0 %v9735_v31  ;;  %1006 = vmatpush1.bf16.msra.mxu1 %v9736_v53 }
 0x1e5   :  { %1083 = vmatprep.subr.bf16.mxu0 %v9737_v4  ;;  %1124 = vmatprep.subr.bf16.mxu1 %v9738_v2 }
 0x29a   :  { %v851_v7 = vpop.f32.mrb[20].mxu0  ;;  %v892_v52 = vpop.f32.mrb[20].mxu1 }
 0x29b   :  { %v899_v35 = vadd.f32 %v851_v7, %v7312_v3  ;;  %v901_v0 = vadd.f32 %v892_v52, %v9739_v51  ;;  %v853_v59 = vpop.f32.mrb[21].mxu0  ;;  %v894_v63 = vpop.f32.mrb[21].mxu1 }
 0x29c   :  { %v900_v49 = vadd.f32 %v853_v59, %v9740_v60  ;;  %v902_v3 = vadd.f32 %v894_v63, %v9741_v54  ;;  %v855_v21 = vpop.f32.mrb[22].mxu0  ;;  %v896_v32 = vpop.f32.mrb[22].mxu1 }
 0x29d   :  { %v5308_v55 = vmul.f32 -1.442695, %v899_v35  ;;  %v856_v43 = vpop.f32.mrb[23].mxu0  ;;  %v897_v42 = vpop.f32.mrb[23].mxu1 }
 0x29e   :  { %v5309_v48 = vmul.f32 -1.442695, %v900_v49  ;;  %v5310_v4 = vmul.f32 -1.442695, %v902_v3  ;;  %v7443_v42 = vld [vmem:[%s9689_s0] ss:$16 sps:$4 sm:$0xff]  }
 0x29f   :  { %5975 = vpow2.f32 %v5308_v55 }
 0x2a0   :  { %5977 = vpow2.f32 %v5309_v48 }
 0x2a1   :  { %5979 = vpow2.f32 %v5310_v4 }
 0x2a2   :  { %5981 = vtanh.f32 %v901_v0 }
 0x2a9   :  { %v5976_v2 = vpop.eup %5975 }
 0x2aa   :  { %v5978_v7 = vpop.eup %5977  ;;  %v906_v52 = vadd.f32 1.0, %v5976_v2 }
 0x2ab   :  { %v912_v51 = vadd.f32 1.0, %v5978_v7  ;;  %v5980_v59 = vpop.eup %5979 }
 0x2ac   :  { %5983 = vrcp.f32 %v906_v52  ;;  %v5982_v60 = vpop.eup %5981  ;;  %v919_v35 = vadd.f32 1.0, %v5980_v59 }
 0x2ad   :  { %5985 = vrcp.f32 %v912_v51 }
 0x2ae   :  { %5987 = vrcp.f32 %v919_v35 }
 0x2b6   :  { %v5984_v63 = vpop.eup %5983 }
 0x2b7   :  { %v5986_v54 = vpop.eup %5985  ;;  %v923_v21 = vmul.f32 %v5984_v63, %v5982_v60 }
 0x2b8   :  { %v922_v32 = vmul.f32 %v5986_v54, %v7379_v8  ;;  %v5988_v3 = vpop.eup %5987  ;;  %v7449_v8 = vld [vmem:[%s9689_s0 + $0x8] ss:$16 sps:$4 sm:$0xff]  }
 0x2ba   :  { %v7435_v49 = vadd.f32 %v923_v21, %v922_v32  ;;  %v7521_v32 = vld [vmem:[%s9689_s0 + $0x24] ss:$16 sps:$4 sm:$0xff]  }
 0x2bc   :  { %5989 = vtanh.f32 %v7435_v49 }
 0x2c6   :  { %v5990_v55 = vpop.eup %5989 }
 0x2c7   :  { %v926_v43 = vmul.f32 %v5990_v55, %v5988_v3  ;;  %v7535_v3 = vld [vmem:[%s9689_s0 + $0x20] ss:$16 sps:$4 sm:$0xff]   ;;  %v7541_v55 = vld [vmem:[%s9689_s0 + $0x28] ss:$16 sps:$4 sm:$0xff]  }
 0x2c9   :  { %928 = vst.msk [vmem:[#allocation3 + $0x8] sm:$0xff] %vm793_vm6, %v926_v43  ;;  %v949_v0 = vpack.c.bf16 %v926_v43, %v926_v43 }
 0x2ca   :  { %930 = vst.msk [vmem:[#allocation3 + $0x30] sm:$0xff] %vm796_vm7, %v926_v43  ;;  %v7547_v43 = vld [vmem:[%s9689_s0 + $0x44] ss:$16 sps:$4 sm:$0xff]  }
 0x2cb   :  { %983 = vmatmul.mubr.bf16.vlgmr.msra.gmra.mrb[24].mxu0 %v949_v0  ;;  %1024 = vmatmul.mubr.bf16.vlgmr.msra.gmra.mrb[24].mxu1 %v949_v0  ;;  %v7553_v0 = vld [vmem:[%s9689_s0 + $0x4c] ss:$16 sps:$4 sm:$0xff]  }
 0x2cc   :  { %1084 = vmatpush1.bf16.msra.mxu0 %v7443_v42  ;;  %1125 = vmatpush1.bf16.msra.mxu1 %v7449_v8 }
 0x2cd   :  { %1085 = vmatprep.subr.bf16.mxu0 %v6873_v16  ;;  %1126 = vmatprep.subr.bf16.mxu1 %v6878_v17  ;;  %v7485_v16 = vld [vmem:[%s9689_s0 + $0x4] ss:$16 sps:$4 sm:$0xff]   ;;  %v7491_v17 = vld [vmem:[%s9689_s0 + $0xc] ss:$16 sps:$4 sm:$0xff]  }
 0x2ce   :  { %1115 = vmatprep.mubr.bf16.mxu0 %v9732_v57  ;;  %1156 = vmatprep.mubr.bf16.mxu1 %v9732_v57 }
 0x2d0   :  { %1086 = vmatpush1.bf16.msra.mxu0 %v6883_v18  ;;  %1127 = vmatpush1.bf16.msra.mxu1 %v6890_v19 }
 0x2d1   :  { %1087 = vmatprep.subr.bf16.mxu0 %v6905_v22  ;;  %1128 = vmatprep.subr.bf16.mxu1 %v6910_v23  ;;  %v9742_v23 = vsel %vm7185_vm3, %v7166_v58, %v7209_v50 }
 0x2d4   :  { %1088 = vmatpush1.bf16.msra.mxu0 %v6919_v25  ;;  %1129 = vmatpush1.bf16.msra.mxu1 %v6924_v26 }
 0x2d5   :  { %1089 = vmatprep.subr.bf16.mxu0 %v6931_v27  ;;  %1130 = vmatprep.subr.bf16.mxu1 %v6936_v28  ;;  %v9743_v28 = vld [vmem:[#allocation45_spill] sm:$0xff] }
 0x2d8   :  { %1090 = vmatpush1.bf16.msra.mxu0 %v6941_v29  ;;  %1131 = vmatpush1.bf16.msra.mxu1 %v6946_v30  ;;  %v9744_v29 = vsel %vm7189_vm4, %v7169_v6, %v9743_v28 }
 0x2d9   :  { %1091 = vmatprep.subr.bf16.mxu0 %v6961_v33  ;;  %1132 = vmatprep.subr.bf16.mxu1 %v6968_v34  ;;  %v9745_v33 = vld [vmem:[#allocation37_spill] sm:$0xff]  ;;  %v9746_v34 = vld [vmem:[#allocation46_spill] sm:$0xff] }
 0x2dc   :  { %1092 = vmatpush1.bf16.msra.mxu0 %v6975_v36  ;;  %1133 = vmatpush1.bf16.msra.mxu1 %v6982_v37  ;;  %v9747_v36 = vsel %vm7193_vm5, %v9745_v33, %v9746_v34 }
 0x2dd   :  { %1093 = vmatprep.subr.bf16.mxu0 %v6989_v38  ;;  %1134 = vmatprep.subr.bf16.mxu1 %v6994_v39 }
 0x2e0   :  { %1094 = vmatpush1.bf16.msra.mxu0 %v6999_v40  ;;  %1135 = vmatpush1.bf16.msra.mxu1 %v7006_v41 }
 0x2e1   :  { %1095 = vmatprep.subr.bf16.mxu0 %v7019_v44  ;;  %1136 = vmatprep.subr.bf16.mxu1 %v7026_v45 }
 0x2e4   :  { %1096 = vmatpush1.bf16.msra.mxu0 %v7033_v46  ;;  %1137 = vmatpush1.bf16.msra.mxu1 %v7038_v47 }
 0x2e5   :  { %1097 = vmatprep.subr.bf16.mxu0 %v9733_v14  ;;  %1138 = vmatprep.subr.bf16.mxu1 %v9734_v15 }
 0x2e8   :  { %1098 = vmatpush1.bf16.msra.mxu0 %v9735_v31  ;;  %1139 = vmatpush1.bf16.msra.mxu1 %v9736_v53 }
 0x2e9   :  { %1210 = vmatprep.subr.bf16.mxu0 %v7485_v16  ;;  %1251 = vmatprep.subr.bf16.mxu1 %v7491_v17 }
 0x39e   :  { %v984_v18 = vpop.f32.mrb[24].mxu0  ;;  %v1025_v19 = vpop.f32.mrb[24].mxu1 }
 0x39f   :  { %v1032_v22 = vadd.f32 %v984_v18, %v7235_v13  ;;  %v1034_v25 = vadd.f32 %v1025_v19, %v9742_v23  ;;  %v986_v26 = vpop.f32.mrb[25].mxu0  ;;  %v1027_v27 = vpop.f32.mrb[25].mxu1  ;;  %v7559_v18 = vld [vmem:[%s9689_s0 + $0x40] ss:$16 sps:$4 sm:$0xff]   ;;  %v7565_v19 = vld [vmem:[%s9689_s0 + $0x48] ss:$16 sps:$4 sm:$0xff]  }
 0x3a0   :  { %v1033_v30 = vadd.f32 %v986_v26, %v9744_v29  ;;  %v1035_v37 = vadd.f32 %v1027_v27, %v9747_v36  ;;  %v988_v38 = vpop.f32.mrb[26].mxu0  ;;  %v1029_v39 = vpop.f32.mrb[26].mxu1  ;;  %v7577_v23 = vld [vmem:[%s9689_s0 + $0x6c] ss:$16 sps:$4 sm:$0xff]   ;;  %v7589_v26 = vld [vmem:[%s9689_s0 + $0x68] ss:$16 sps:$4 sm:$0xff]  }
 0x3a1   :  { %v5311_v40 = vmul.f32 -1.442695, %v1032_v22  ;;  %v989_v41 = vpop.f32.mrb[27].mxu0  ;;  %v1030_v44 = vpop.f32.mrb[27].mxu1  ;;  %v7571_v22 = vld [vmem:[%s9689_s0 + $0x64] ss:$16 sps:$4 sm:$0xff]  }
 0x3a2   :  { %v5312_v45 = vmul.f32 -1.442695, %v1033_v30  ;;  %v5313_v46 = vmul.f32 -1.442695, %v1035_v37  ;;  %v7595_v27 = vld [vmem:[%s9689_s0 + $0x84] ss:$16 sps:$4 sm:$0xff]  }
 0x3a3   :  { %5991 = vpow2.f32 %v5311_v40  ;;  %v7601_v29 = vld [vmem:[%s9689_s0 + $0x8c] ss:$16 sps:$4 sm:$0xff]   ;;  %v7607_v30 = vld [vmem:[%s9689_s0 + $0x80] ss:$16 sps:$4 sm:$0xff]   ;;  %v7613_v36 = vld [vmem:[%s9689_s0 + $0x88] ss:$16 sps:$4 sm:$0xff]  }
 0x3a4   :  { %5993 = vpow2.f32 %v5312_v45  ;;  %v7619_v37 = vld [vmem:[%s9689_s0 + $0xa4] ss:$16 sps:$4 sm:$0xff]   ;;  %v7625_v38 = vld [vmem:[%s9689_s0 + $0xac] ss:$16 sps:$4 sm:$0xff]   ;;  %v7631_v39 = vld [vmem:[%s9689_s0 + $0xa0] ss:$16 sps:$4 sm:$0xff]  }
 0x3a5   :  { %5995 = vpow2.f32 %v5313_v46  ;;  %v7637_v40 = vld [vmem:[%s9689_s0 + $0xa8] ss:$16 sps:$4 sm:$0xff]   ;;  %v7643_v41 = vld [vmem:[%s9689_s0 + $0xc4] ss:$16 sps:$4 sm:$0xff]   ;;  %v7649_v44 = vld [vmem:[%s9689_s0 + $0xcc] ss:$16 sps:$4 sm:$0xff]  }
 0x3a6   :  { %5997 = vtanh.f32 %v1034_v25  ;;  %v7583_v25 = vld [vmem:[%s9689_s0 + $0x60] ss:$16 sps:$4 sm:$0xff]   ;;  %v7661_v46 = vld [vmem:[%s9689_s0 + $0xc8] ss:$16 sps:$4 sm:$0xff]  }
 0x3a7   :  { %v7655_v45 = vld [vmem:[%s9689_s0 + $0xc0] ss:$16 sps:$4 sm:$0xff]  }
 0x3ad   :  { %v5992_v47 = vpop.eup %5991 }
 0x3ae   :  { %v5994_v13 = vpop.eup %5993  ;;  %v1039_v14 = vadd.f32 1.0, %v5992_v47  ;;  %v7667_v47 = vld [vmem:[%s9689_s0 + $0xe4] ss:$16 sps:$4 sm:$0xff]  }
 0x3af   :  { %v1045_v15 = vadd.f32 1.0, %v5994_v13  ;;  %v5996_v48 = vpop.eup %5995  ;;  %v7673_v13 = vld [vmem:[%s9689_s0 + $0xec] ss:$16 sps:$4 sm:$0xff]  }
 0x3b0   :  { %5999 = vrcp.f32 %v1039_v14  ;;  %v5998_v4 = vpop.eup %5997  ;;  %v1052_v51 = vadd.f32 1.0, %v5996_v48  ;;  %v9748_v48 = vld [vmem:[#allocation44_spill] sm:$0xff] }
 0x3b1   :  { %6001 = vrcp.f32 %v1045_v15 }
 0x3b2   :  { %6003 = vrcp.f32 %v1052_v51 }
 0x3ba   :  { %v6000_v2 = vpop.eup %5999 }
 0x3bb   :  { %v6002_v7 = vpop.eup %6001  ;;  %v1056_v52 = vmul.f32 %v6000_v2, %v5998_v4  ;;  %v9749_v2 = vld [vmem:[#allocation38_spill] sm:$0xff] }
 0x3bc   :  { %v1055_v59 = vmul.f32 %v6002_v7, %v7435_v49  ;;  %v6004_v63 = vpop.eup %6003  ;;  %v7527_v49 = vld [vmem:[%s9689_s0 + $0x2c] ss:$16 sps:$4 sm:$0xff]  }
 0x3bd   :  { %v9750_v7 = vld [vmem:[#allocation41_spill] sm:$0xff] }
 0x3be   :  { %v7511_v60 = vadd.f32 %v1056_v52, %v1055_v59  ;;  %v9751_v52 = vsel %vm7185_vm3, %v9749_v2, %v9750_v7 }
 0x3c0   :  { %6005 = vtanh.f32 %v7511_v60 }
 0x3ca   :  { %v6006_v54 = vpop.eup %6005 }
 0x3cb   :  { %v1059_v21 = vmul.f32 %v6006_v54, %v6004_v63 }
 0x3cd   :  { %1061 = vst.msk [vmem:[#allocation3 + $0x10] sm:$0xff] %vm793_vm6, %v1059_v21  ;;  %v1082_v35 = vpack.c.bf16 %v1059_v21, %v1059_v21 }
 0x3ce   :  { %1063 = vst.msk [vmem:[#allocation3 + $0x28] sm:$0xff] %vm796_vm7, %v1059_v21 }
 0x3cf   :  { %1116 = vmatmul.mubr.bf16.vlgmr.msra.gmra.mrb[28].mxu0 %v1082_v35  ;;  %1157 = vmatmul.mubr.bf16.vlgmr.msra.gmra.mrb[28].mxu1 %v1082_v35  ;;  %v9755_v35 = vld [vmem:[#allocation40_spill] sm:$0xff] }
 0x3d0   :  { %1211 = vmatpush1.bf16.msra.mxu0 %v7443_v42  ;;  %1252 = vmatpush1.bf16.msra.mxu1 %v7449_v8  ;;  %v9757_v1 = vsel %vm7193_vm5, %v9755_v35, %v9756_v56 }
 0x3d1   :  { %1212 = vmatprep.subr.bf16.mxu0 %v7521_v32  ;;  %1253 = vmatprep.subr.bf16.mxu1 %v7527_v49 }
 0x3d2   :  { %1242 = vmatprep.mubr.bf16.mxu0 %v9732_v57  ;;  %1283 = vmatprep.mubr.bf16.mxu1 %v9732_v57 }
 0x3d4   :  { %1213 = vmatpush1.bf16.msra.mxu0 %v7535_v3  ;;  %1254 = vmatpush1.bf16.msra.mxu1 %v7541_v55 }
 0x3d5   :  { %1214 = vmatprep.subr.bf16.mxu0 %v7547_v43  ;;  %1255 = vmatprep.subr.bf16.mxu1 %v7553_v0 }
 0x3d8   :  { %1215 = vmatpush1.bf16.msra.mxu0 %v7559_v18  ;;  %1256 = vmatpush1.bf16.msra.mxu1 %v7565_v19 }
 0x3d9   :  { %1216 = vmatprep.subr.bf16.mxu0 %v7571_v22  ;;  %1257 = vmatprep.subr.bf16.mxu1 %v7577_v23 }
 0x3dc   :  { %1217 = vmatpush1.bf16.msra.mxu0 %v7583_v25  ;;  %1258 = vmatpush1.bf16.msra.mxu1 %v7589_v26 }
 0x3dd   :  { %1218 = vmatprep.subr.bf16.mxu0 %v7595_v27  ;;  %1259 = vmatprep.subr.bf16.mxu1 %v7601_v29 }
 0x3e0   :  { %1219 = vmatpush1.bf16.msra.mxu0 %v7607_v30  ;;  %1260 = vmatpush1.bf16.msra.mxu1 %v7613_v36 }
 0x3e1   :  { %1220 = vmatprep.subr.bf16.mxu0 %v7619_v37  ;;  %1261 = vmatprep.subr.bf16.mxu1 %v7625_v38 }
 0x3e4   :  { %1221 = vmatpush1.bf16.msra.mxu0 %v7631_v39  ;;  %1262 = vmatpush1.bf16.msra.mxu1 %v7637_v40 }
 0x3e5   :  { %1222 = vmatprep.subr.bf16.mxu0 %v7643_v41  ;;  %1263 = vmatprep.subr.bf16.mxu1 %v7649_v44 }
 0x3e8   :  { %1223 = vmatpush1.bf16.msra.mxu0 %v7655_v45  ;;  %1264 = vmatpush1.bf16.msra.mxu1 %v7661_v46 }
 0x3e9   :  { %1224 = vmatprep.subr.bf16.mxu0 %v7667_v47  ;;  %1265 = vmatprep.subr.bf16.mxu1 %v7673_v13 }
 0x3ec   :  { %1225 = vmatpush1.bf16.msra.mxu0 %v9735_v31  ;;  %1266 = vmatpush1.bf16.msra.mxu1 %v9736_v53  ;;  %v9752_v31 = vld [vmem:[#allocation39_spill] sm:$0xff]  ;;  %v9753_v53 = vld [vmem:[#allocation42_spill] sm:$0xff] }
 0x3ed   :  { %1335 = vmatprep.subr.bf16.mxu0 %v7485_v16  ;;  %1376 = vmatprep.subr.bf16.mxu1 %v7491_v17  ;;  %v9754_v54 = vsel %vm7189_vm4, %v9752_v31, %v9753_v53 }
 0x4a2   :  { %v1117_v14 = vpop.f32.mrb[28].mxu0  ;;  %v1158_v15 = vpop.f32.mrb[28].mxu1 }
 0x4a3   :  { %v1165_v4 = vadd.f32 %v1117_v14, %v9748_v48  ;;  %v1167_v51 = vadd.f32 %v1158_v15, %v9751_v52  ;;  %v1119_v59 = vpop.f32.mrb[29].mxu0  ;;  %v1160_v63 = vpop.f32.mrb[29].mxu1 }
 0x4a4   :  { %v1166_v21 = vadd.f32 %v1119_v59, %v9754_v54  ;;  %v1168_v14 = vadd.f32 %v1160_v63, %v9757_v1  ;;  %v1121_v48 = vpop.f32.mrb[30].mxu0  ;;  %v1162_v20 = vpop.f32.mrb[30].mxu1 }
 0x4a5   :  { %v5314_v62 = vmul.f32 -1.442695, %v1165_v4  ;;  %v1122_v12 = vpop.f32.mrb[31].mxu0  ;;  %v1163_v61 = vpop.f32.mrb[31].mxu1 }
 0x4a6   :  { %v5315_v15 = vmul.f32 -1.442695, %v1166_v21  ;;  %v5316_v52 = vmul.f32 -1.442695, %v1168_v14  ;;  %v9758_v14 = vld [vmem:[#allocation47_spill] sm:$0xff] }
 0x4a7   :  { %6007 = vpow2.f32 %v5314_v62 }
 0x4a8   :  { %6009 = vpow2.f32 %v5315_v15  ;;  %v9759_v15 = vsel %vm7185_vm3, %v9750_v7, %v9749_v2 }
 0x4a9   :  { %6011 = vpow2.f32 %v5316_v52 }
 0x4aa   :  { %6013 = vtanh.f32 %v1167_v51 }
 0x4b1   :  { %v6008_v10 = vpop.eup %6007 }
 0x4b2   :  { %v6010_v9 = vpop.eup %6009  ;;  %v1172_v33 = vadd.f32 1.0, %v6008_v10 }
 0x4b3   :  { %v1178_v59 = vadd.f32 1.0, %v6010_v9  ;;  %v6012_v54 = vpop.eup %6011 }
 0x4b4   :  { %6015 = vrcp.f32 %v1172_v33  ;;  %v6014_v34 = vpop.eup %6013  ;;  %v1185_v4 = vadd.f32 1.0, %v6012_v54  ;;  %v7735_v33 = vld [vmem:[%s9689_s0 + $0xe0] ss:$16 sps:$4 sm:$0xff]  }
 0x4b5   :  { %6017 = vrcp.f32 %v1178_v59 }
 0x4b6   :  { %6019 = vrcp.f32 %v1185_v4 }
 0x4be   :  { %v6016_v1 = vpop.eup %6015 }
 0x4bf   :  { %v6018_v63 = vpop.eup %6017  ;;  %v1189_v20 = vmul.f32 %v6016_v1, %v6014_v34  ;;  %v7741_v34 = vld [vmem:[%s9689_s0 + $0xe8] ss:$16 sps:$4 sm:$0xff]   ;;  %v9760_v1 = vsel %vm7189_vm4, %v9753_v53, %v9752_v31 }
 0x4c0   :  { %v1188_v12 = vmul.f32 %v6018_v63, %v7511_v60  ;;  %v6020_v62 = vpop.eup %6019 }
 0x4c2   :  { %v7697_v61 = vadd.f32 %v1189_v20, %v1188_v12  ;;  %v9761_v20 = vsel %vm7193_vm5, %v9756_v56, %v9755_v35 }
 0x4c4   :  { %6021 = vtanh.f32 %v7697_v61 }
 0x4ce   :  { %v6022_v10 = vpop.eup %6021 }
 0x4cf   :  { %v1192_v21 = vmul.f32 %v6022_v10, %v6020_v62 }
 0x4d1   :  { %1194 = vst.msk [vmem:[#allocation3 + $0x18] sm:$0xff] %vm793_vm6, %v1192_v21  ;;  %v1209_v9 = vpack.c.bf16 %v1192_v21, %v1192_v21 }
 0x4d2   :  { %1196 = vst.msk [vmem:[#allocation3 + $0x20] sm:$0xff] %vm796_vm7, %v1192_v21 }
 0x4d3   :  { %1243 = vmatmul.mubr.bf16.vlgmr.msra.gmra.mrb[32].mxu0 %v1209_v9  ;;  %1284 = vmatmul.mubr.bf16.vlgmr.msra.gmra.mrb[32].mxu1 %v1209_v9 }
 0x4d4   :  { %1336 = vmatpush1.bf16.msra.mxu0 %v7443_v42  ;;  %1377 = vmatpush1.bf16.msra.mxu1 %v7449_v8 }
 0x4d5   :  { %1337 = vmatprep.subr.bf16.mxu0 %v7521_v32  ;;  %1378 = vmatprep.subr.bf16.mxu1 %v7527_v49 }
 0x4d6   :  { %1367 = vmatprep.mubr.bf16.mxu0 %v9732_v57  ;;  %1408 = vmatprep.mubr.bf16.mxu1 %v9732_v57 }
 0x4d8   :  { %1338 = vmatpush1.bf16.msra.mxu0 %v7535_v3  ;;  %1379 = vmatpush1.bf16.msra.mxu1 %v7541_v55 }
 0x4d9   :  { %1339 = vmatprep.subr.bf16.mxu0 %v7547_v43  ;;  %1380 = vmatprep.subr.bf16.mxu1 %v7553_v0 }
 0x4dc   :  { %1340 = vmatpush1.bf16.msra.mxu0 %v7559_v18  ;;  %1381 = vmatpush1.bf16.msra.mxu1 %v7565_v19 }
 0x4dd   :  { %1341 = vmatprep.subr.bf16.mxu0 %v7571_v22  ;;  %1382 = vmatprep.subr.bf16.mxu1 %v7577_v23 }
 0x4e0   :  { %1342 = vmatpush1.bf16.msra.mxu0 %v7583_v25  ;;  %1383 = vmatpush1.bf16.msra.mxu1 %v7589_v26 }
 0x4e1   :  { %1343 = vmatprep.subr.bf16.mxu0 %v7595_v27  ;;  %1384 = vmatprep.subr.bf16.mxu1 %v7601_v29 }
 0x4e4   :  { %1344 = vmatpush1.bf16.msra.mxu0 %v7607_v30  ;;  %1385 = vmatpush1.bf16.msra.mxu1 %v7613_v36 }
 0x4e5   :  { %1345 = vmatprep.subr.bf16.mxu0 %v7619_v37  ;;  %1386 = vmatprep.subr.bf16.mxu1 %v7625_v38 }
 0x4e8   :  { %1346 = vmatpush1.bf16.msra.mxu0 %v7631_v39  ;;  %1387 = vmatpush1.bf16.msra.mxu1 %v7637_v40 }
 0x4e9   :  { %1347 = vmatprep.subr.bf16.mxu0 %v7643_v41  ;;  %1388 = vmatprep.subr.bf16.mxu1 %v7649_v44 }
 0x4ec   :  { %1348 = vmatpush1.bf16.msra.mxu0 %v7655_v45  ;;  %1389 = vmatpush1.bf16.msra.mxu1 %v7661_v46 }
 0x4ed   :  { %1349 = vmatprep.subr.bf16.mxu0 %v7667_v47  ;;  %1390 = vmatprep.subr.bf16.mxu1 %v7673_v13 }
 0x4f0   :  { %1350 = vmatpush1.bf16.msra.mxu0 %v7735_v33  ;;  %1391 = vmatpush1.bf16.msra.mxu1 %v7741_v34 }
 0x4f1   :  { %1460 = vmatprep.subr.bf16.mxu0 %v7485_v16  ;;  %1501 = vmatprep.subr.bf16.mxu1 %v7491_v17 }
 0x5a6   :  { %v1244_v60 = vpop.f32.mrb[32].mxu0  ;;  %v1285_v51 = vpop.f32.mrb[32].mxu1 }
 0x5a7   :  { %v1292_v48 = vadd.f32 %v1244_v60, %v9758_v14  ;;  %v1294_v52 = vadd.f32 %v1285_v51, %v9759_v15  ;;  %v1246_v59 = vpop.f32.mrb[33].mxu0  ;;  %v1287_v54 = vpop.f32.mrb[33].mxu1 }
 0x5a8   :  { %v1293_v63 = vadd.f32 %v1246_v59, %v9760_v1  ;;  %v1295_v4 = vadd.f32 %v1287_v54, %v9761_v20  ;;  %v1248_v12 = vpop.f32.mrb[34].mxu0  ;;  %v1289_v62 = vpop.f32.mrb[34].mxu1 }
 0x5a9   :  { %v5317_v10 = vmul.f32 -1.442695, %v1292_v48  ;;  %v1249_v21 = vpop.f32.mrb[35].mxu0  ;;  %v1290_v2 = vpop.f32.mrb[35].mxu1  ;;  %v9762_v62 = vld [vmem:[#allocation48_spill] sm:$0xff] }
 0x5aa   :  { %v5318_v7 = vmul.f32 -1.442695, %v1293_v63  ;;  %v5319_v9 = vmul.f32 -1.442695, %v1295_v4  ;;  %v9763_v21 = vsel %vm7185_vm3, %v7209_v50, %v7166_v58 }
 0x5ab   :  { %6023 = vpow2.f32 %v5317_v10 }
 0x5ac   :  { %6025 = vpow2.f32 %v5318_v7 }
 0x5ad   :  { %6027 = vpow2.f32 %v5319_v9 }
 0x5ae   :  { %6029 = vtanh.f32 %v1294_v52 }
 0x5b5   :  { %v6024_v60 = vpop.eup %6023 }
 0x5b6   :  { %v6026_v51 = vpop.eup %6025  ;;  %v1299_v14 = vadd.f32 1.0, %v6024_v60  ;;  %v9764_v60 = vsel %vm7189_vm4, %v9743_v28, %v7169_v6 }
 0x5b7   :  { %v1305_v31 = vadd.f32 1.0, %v6026_v51  ;;  %v6028_v53 = vpop.eup %6027  ;;  %v9766_v51 = vld [vmem:[#allocation37_spill] sm:$0xff] }
 0x5b8   :  { %6031 = vrcp.f32 %v1299_v14  ;;  %v6030_v56 = vpop.eup %6029  ;;  %v1312_v48 = vadd.f32 1.0, %v6028_v53 }
 0x5b9   :  { %6033 = vrcp.f32 %v1305_v31 }
 0x5ba   :  { %6035 = vrcp.f32 %v1312_v48 }
 0x5c2   :  { %v6032_v35 = vpop.eup %6031 }
 0x5c3   :  { %v6034_v15 = vpop.eup %6033  ;;  %v1316_v59 = vmul.f32 %v6032_v35, %v6030_v56 }
 0x5c4   :  { %v1315_v54 = vmul.f32 %v6034_v15, %v7697_v61  ;;  %v6036_v63 = vpop.eup %6035 }
 0x5c6   :  { %v7763_v1 = vadd.f32 %v1316_v59, %v1315_v54 }
 0x5c8   :  { %6037 = vtanh.f32 %v7763_v1 }
 0x5d2   :  { %v6038_v20 = vpop.eup %6037 }
 0x5d3   :  { %v1319_v4 = vmul.f32 %v6038_v20, %v6036_v63 }
 0x5d5   :  { %1320 = vst.msk [vmem:[#allocation3 + $0x20] sm:$0xff] %vm793_vm6, %v1319_v4  ;;  %v1334_v52 = vpack.c.bf16 %v1319_v4, %v1319_v4 }
 0x5d6   :  { %1321 = vst.msk [vmem:[#allocation3 + $0x18] sm:$0xff] %vm796_vm7, %v1319_v4 }
 0x5d7   :  { %1368 = vmatmul.mubr.bf16.vlgmr.msra.gmra.mrb[36].mxu0 %v1334_v52  ;;  %1409 = vmatmul.mubr.bf16.vlgmr.msra.gmra.mrb[36].mxu1 %v1334_v52 }
 0x5d8   :  { %1461 = vmatpush1.bf16.msra.mxu0 %v7443_v42  ;;  %1502 = vmatpush1.bf16.msra.mxu1 %v7449_v8 }
 0x5d9   :  { %1462 = vmatprep.subr.bf16.mxu0 %v7521_v32  ;;  %1503 = vmatprep.subr.bf16.mxu1 %v7527_v49 }
 0x5da   :  { %1492 = vmatprep.mubr.bf16.mxu0 %v9732_v57  ;;  %1533 = vmatprep.mubr.bf16.mxu1 %v9732_v57 }
 0x5dc   :  { %1463 = vmatpush1.bf16.msra.mxu0 %v7535_v3  ;;  %1504 = vmatpush1.bf16.msra.mxu1 %v7541_v55 }
 0x5dd   :  { %1464 = vmatprep.subr.bf16.mxu0 %v7547_v43  ;;  %1505 = vmatprep.subr.bf16.mxu1 %v7553_v0 }
 0x5e0   :  { %1465 = vmatpush1.bf16.msra.mxu0 %v7559_v18  ;;  %1506 = vmatpush1.bf16.msra.mxu1 %v7565_v19 }
 0x5e1   :  { %1466 = vmatprep.subr.bf16.mxu0 %v7571_v22  ;;  %1507 = vmatprep.subr.bf16.mxu1 %v7577_v23 }
 0x5e4   :  { %1467 = vmatpush1.bf16.msra.mxu0 %v7583_v25  ;;  %1508 = vmatpush1.bf16.msra.mxu1 %v7589_v26 }
 0x5e5   :  { %1468 = vmatprep.subr.bf16.mxu0 %v7595_v27  ;;  %1509 = vmatprep.subr.bf16.mxu1 %v7601_v29 }
 0x5e8   :  { %1469 = vmatpush1.bf16.msra.mxu0 %v7607_v30  ;;  %1510 = vmatpush1.bf16.msra.mxu1 %v7613_v36 }
 0x5e9   :  { %1470 = vmatprep.subr.bf16.mxu0 %v7619_v37  ;;  %1511 = vmatprep.subr.bf16.mxu1 %v7625_v38 }
 0x5ec   :  { %1471 = vmatpush1.bf16.msra.mxu0 %v7631_v39  ;;  %1512 = vmatpush1.bf16.msra.mxu1 %v7637_v40 }
 0x5ed   :  { %1472 = vmatprep.subr.bf16.mxu0 %v7643_v41  ;;  %1513 = vmatprep.subr.bf16.mxu1 %v7649_v44 }
 0x5f0   :  { %1473 = vmatpush1.bf16.msra.mxu0 %v7655_v45  ;;  %1514 = vmatpush1.bf16.msra.mxu1 %v7661_v46 }
 0x5f1   :  { %1474 = vmatprep.subr.bf16.mxu0 %v7667_v47  ;;  %1515 = vmatprep.subr.bf16.mxu1 %v7673_v13 }
 0x5f4   :  { %1475 = vmatpush1.bf16.msra.mxu0 %v7735_v33  ;;  %1516 = vmatpush1.bf16.msra.mxu1 %v7741_v34 }
 0x5f5   :  { %1585 = vmatprep.subr.bf16.mxu0 %v7485_v16  ;;  %1626 = vmatprep.subr.bf16.mxu1 %v7491_v17  ;;  %v9765_v17 = vld [vmem:[#allocation46_spill] sm:$0xff] }
 0x5f6   :  { %v9767_v14 = vsel %vm7193_vm5, %v9765_v17, %v9766_v51 }
 0x6aa   :  { %v1369_v61 = vpop.f32.mrb[36].mxu0  ;;  %v1410_v12 = vpop.f32.mrb[36].mxu1 }
 0x6ab   :  { %v1417_v10 = vadd.f32 %v1369_v61, %v9762_v62  ;;  %v1419_v2 = vadd.f32 %v1410_v12, %v9763_v21  ;;  %v1371_v7 = vpop.f32.mrb[37].mxu0  ;;  %v1412_v9 = vpop.f32.mrb[37].mxu1 }
 0x6ac   :  { %v1418_v16 = vadd.f32 %v1371_v7, %v9764_v60  ;;  %v1420_v31 = vadd.f32 %v1412_v9, %v9767_v14  ;;  %v1373_v53 = vpop.f32.mrb[38].mxu0  ;;  %v1414_v56 = vpop.f32.mrb[38].mxu1 }
 0x6ad   :  { %v5320_v35 = vmul.f32 -1.442695, %v1417_v10  ;;  %v1374_v15 = vpop.f32.mrb[39].mxu0  ;;  %v1415_v50 = vpop.f32.mrb[39].mxu1 }
 0x6ae   :  { %v5321_v58 = vmul.f32 -1.442695, %v1418_v16  ;;  %v5322_v59 = vmul.f32 -1.442695, %v1420_v31  ;;  %v5781_v50 = vld [vmem:[#allocation6 + $0x4] ss:$16 sps:$4 sm:$0xff]  }
 0x6af   :  { %6039 = vpow2.f32 %v5320_v35 }
 0x6b0   :  { %6041 = vpow2.f32 %v5321_v58  ;;  %v5784_v58 = vld [vmem:[#allocation6 + $0xc] ss:$16 sps:$4 sm:$0xff]  }
 0x6b1   :  { %6043 = vpow2.f32 %v5322_v59  ;;  %v5779_v59 = vld [vmem:[#allocation6] ss:$16 sps:$4 sm:$0xff]  }
 0x6b2   :  { %6045 = vtanh.f32 %v1419_v2 }
 0x6b9   :  { %v6040_v48 = vpop.eup %6039 }
 0x6ba   :  { %v6042_v54 = vpop.eup %6041  ;;  %v1424_v63 = vadd.f32 1.0, %v6040_v48  ;;  %v5782_v48 = vld [vmem:[#allocation6 + $0x8] ss:$16 sps:$4 sm:$0xff]  }
 0x6bb   :  { %v1430_v6 = vadd.f32 1.0, %v6042_v54  ;;  %v6044_v28 = vpop.eup %6043  ;;  %v5787_v54 = vld [vmem:[#allocation6 + $0x24] ss:$16 sps:$4 sm:$0xff]  }
 0x6bc   :  { %6047 = vrcp.f32 %v1424_v63  ;;  %v6046_v20 = vpop.eup %6045  ;;  %v1437_v12 = vadd.f32 1.0, %v6044_v28  ;;  %v5790_v63 = vld [vmem:[#allocation6 + $0x2c] ss:$16 sps:$4 sm:$0xff]   ;;  %v5788_v28 = vld [vmem:[#allocation6 + $0x28] ss:$16 sps:$4 sm:$0xff]  }
 0x6bd   :  { %6049 = vrcp.f32 %v1430_v6  ;;  %v5785_v6 = vld [vmem:[#allocation6 + $0x20] ss:$16 sps:$4 sm:$0xff]  }
 0x6be   :  { %6051 = vrcp.f32 %v1437_v12  ;;  %v5799_v12 = vld [vmem:[#allocation6 + $0x64] ss:$16 sps:$4 sm:$0xff]  }
 0x6c6   :  { %v6048_v4 = vpop.eup %6047 }
 0x6c7   :  { %v6050_v52 = vpop.eup %6049  ;;  %v1441_v61 = vmul.f32 %v6048_v4, %v6046_v20  ;;  %v5793_v20 = vld [vmem:[#allocation6 + $0x44] ss:$16 sps:$4 sm:$0xff]   ;;  %v5796_v4 = vld [vmem:[#allocation6 + $0x4c] ss:$16 sps:$4 sm:$0xff]  }
 0x6c8   :  { %v1440_v62 = vmul.f32 %v6050_v52, %v7763_v1  ;;  %v6052_v21 = vpop.eup %6051  ;;  %v5791_v52 = vld [vmem:[#allocation6 + $0x40] ss:$16 sps:$4 sm:$0xff]  }
 0x6ca   :  { %v7819_v10 = vadd.f32 %v1441_v61, %v1440_v62  ;;  %v5794_v61 = vld [vmem:[#allocation6 + $0x48] ss:$16 sps:$4 sm:$0xff]   ;;  %v5802_v62 = vld [vmem:[#allocation6 + $0x6c] ss:$16 sps:$4 sm:$0xff]  }
 0x6cc   :  { %6053 = vtanh.f32 %v7819_v10 }
 0x6d6   :  { %v6054_v7 = vpop.eup %6053 }
 0x6d7   :  { %v1444_v9 = vmul.f32 %v6054_v7, %v6052_v21  ;;  %v5800_v21 = vld [vmem:[#allocation6 + $0x68] ss:$16 sps:$4 sm:$0xff]   ;;  %v5805_v7 = vld [vmem:[#allocation6 + $0x84] ss:$16 sps:$4 sm:$0xff]  }
 0x6d9   :  { %1445 = vst.msk [vmem:[#allocation3 + $0x28] sm:$0xff] %vm793_vm6, %v1444_v9  ;;  %v1459_v2 = vpack.c.bf16 %v1444_v9, %v1444_v9 }
 0x6da   :  { %1446 = vst.msk [vmem:[#allocation3 + $0x10] sm:$0xff] %vm796_vm7, %v1444_v9  ;;  %v5808_v9 = vld [vmem:[#allocation6 + $0x8c] ss:$16 sps:$4 sm:$0xff]  }
 0x6db   :  { %1493 = vmatmul.mubr.bf16.vlgmr.msra.gmra.mrb[40].mxu0 %v1459_v2  ;;  %1534 = vmatmul.mubr.bf16.vlgmr.msra.gmra.mrb[40].mxu1 %v1459_v2  ;;  %v5803_v2 = vld [vmem:[#allocation6 + $0x80] ss:$16 sps:$4 sm:$0xff]  }
 0x6dc   :  { %1586 = vmatpush1.bf16.msra.mxu0 %v7443_v42  ;;  %1627 = vmatpush1.bf16.msra.mxu1 %v7449_v8 }
 0x6dd   :  { %1587 = vmatprep.subr.bf16.mxu0 %v7521_v32  ;;  %1628 = vmatprep.subr.bf16.mxu1 %v7527_v49  ;;  %v9768_v32 = vld [vmem:[#allocation58_spill] sm:$0xff] }
 0x6de   :  { %1617 = vmatprep.mubr.bf16.mxu0 %v9732_v57  ;;  %1658 = vmatprep.mubr.bf16.mxu1 %v9732_v57 }
 0x6e0   :  { %1588 = vmatpush1.bf16.msra.mxu0 %v7535_v3  ;;  %1629 = vmatpush1.bf16.msra.mxu1 %v7541_v55  ;;  %v9769_v3 = vld [vmem:[#allocation50_spill] sm:$0xff]  ;;  %v9770_v55 = vld [vmem:[#allocation33_spill] sm:$0xff] }
 0x6e1   :  { %1589 = vmatprep.subr.bf16.mxu0 %v7547_v43  ;;  %1630 = vmatprep.subr.bf16.mxu1 %v7553_v0  ;;  %v9771_v43 = vsel %vm7185_vm3, %v9769_v3, %v9770_v55  ;;  %v5812_v3 = vld [vmem:[#allocation6 + $0xa8] ss:$16 sps:$4 sm:$0xff]   ;;  %v5817_v55 = vld [vmem:[#allocation6 + $0xc4] ss:$16 sps:$4 sm:$0xff]  }
 0x6e4   :  { %1590 = vmatpush1.bf16.msra.mxu0 %v7559_v18  ;;  %1631 = vmatpush1.bf16.msra.mxu1 %v7565_v19 }
 0x6e5   :  { %1591 = vmatprep.subr.bf16.mxu0 %v7571_v22  ;;  %1632 = vmatprep.subr.bf16.mxu1 %v7577_v23  ;;  %v9772_v22 = vld [vmem:[#allocation53_spill] sm:$0xff]  ;;  %v9773_v23 = vld [vmem:[#allocation34_spill] sm:$0xff] }
 0x6e8   :  { %1592 = vmatpush1.bf16.msra.mxu0 %v7583_v25  ;;  %1633 = vmatpush1.bf16.msra.mxu1 %v7589_v26  ;;  %v9774_v25 = vsel %vm7189_vm4, %v9772_v22, %v9773_v23  ;;  %v5826_v22 = vld [vmem:[#allocation6 + $0xec] ss:$16 sps:$4 sm:$0xff]   ;;  %v5821_v23 = vld [vmem:[#allocation6 + $0xe0] ss:$16 sps:$4 sm:$0xff]  }
 0x6e9   :  { %1593 = vmatprep.subr.bf16.mxu0 %v7595_v27  ;;  %1634 = vmatprep.subr.bf16.mxu1 %v7601_v29  ;;  %v9775_v27 = vld [vmem:[#allocation54_spill] sm:$0xff]  ;;  %v9776_v29 = vld [vmem:[#allocation35_spill] sm:$0xff] }
 0x6ec   :  { %1594 = vmatpush1.bf16.msra.mxu0 %v7607_v30  ;;  %1635 = vmatpush1.bf16.msra.mxu1 %v7613_v36  ;;  %v9777_v30 = vsel %vm7193_vm5, %v9775_v27, %v9776_v29  ;;  %v7882_v27 = vld [vmem:[#allocation8 + $0xc] ss:$16 sps:$4 sm:$0xff]  }
 0x6ed   :  { %1595 = vmatprep.subr.bf16.mxu0 %v7619_v37  ;;  %1636 = vmatprep.subr.bf16.mxu1 %v7625_v38  ;;  %9779 = vst [vmem:[#allocation27_spill] sm:$0xff] %v7882_v27 }
 0x6f0   :  { %1596 = vmatpush1.bf16.msra.mxu0 %v7631_v39  ;;  %1637 = vmatpush1.bf16.msra.mxu1 %v7637_v40 }
 0x6f1   :  { %1597 = vmatprep.subr.bf16.mxu0 %v7643_v41  ;;  %1638 = vmatprep.subr.bf16.mxu1 %v7649_v44 }
 0x6f4   :  { %1598 = vmatpush1.bf16.msra.mxu0 %v7655_v45  ;;  %1639 = vmatpush1.bf16.msra.mxu1 %v7661_v46 }
 0x6f5   :  { %1599 = vmatprep.subr.bf16.mxu0 %v7667_v47  ;;  %1640 = vmatprep.subr.bf16.mxu1 %v7673_v13 }
 0x6f8   :  { %1600 = vmatpush1.bf16.msra.mxu0 %v7735_v33  ;;  %1641 = vmatpush1.bf16.msra.mxu1 %v7741_v34 }
 0x6f9   :  { %1923 = vmatprep.subr.bf16.mxu0 %v5781_v50  ;;  %1996 = vmatprep.subr.bf16.mxu1 %v5784_v58 }
 0x7ae   :  { %v1494_v42 = vpop.f32.mrb[40].mxu0  ;;  %v1535_v8 = vpop.f32.mrb[40].mxu1 }
 0x7af   :  { %v1542_v49 = vadd.f32 %v1494_v42, %v9768_v32  ;;  %v1544_v0 = vadd.f32 %v1535_v8, %v9771_v43  ;;  %v1496_v18 = vpop.f32.mrb[41].mxu0  ;;  %v1537_v19 = vpop.f32.mrb[41].mxu1  ;;  %v5806_v42 = vld [vmem:[#allocation6 + $0x88] ss:$16 sps:$4 sm:$0xff]   ;;  %v5811_v8 = vld [vmem:[#allocation6 + $0xa4] ss:$16 sps:$4 sm:$0xff]  }
 0x7b0   :  { %v1543_v26 = vadd.f32 %v1496_v18, %v9774_v25  ;;  %v1545_v36 = vadd.f32 %v1537_v19, %v9777_v30  ;;  %v1498_v37 = vpop.f32.mrb[42].mxu0  ;;  %v1539_v38 = vpop.f32.mrb[42].mxu1  ;;  %v5814_v32 = vld [vmem:[#allocation6 + $0xac] ss:$16 sps:$4 sm:$0xff]   ;;  %v5815_v43 = vld [vmem:[#allocation6 + $0xc0] ss:$16 sps:$4 sm:$0xff]  }
 0x7b1   :  { %v5323_v39 = vmul.f32 -1.442695, %v1542_v49  ;;  %v1499_v40 = vpop.f32.mrb[43].mxu0  ;;  %v1540_v41 = vpop.f32.mrb[43].mxu1  ;;  %v5809_v49 = vld [vmem:[#allocation6 + $0xa0] ss:$16 sps:$4 sm:$0xff]  }
 0x7b2   :  { %v5324_v44 = vmul.f32 -1.442695, %v1543_v26  ;;  %v5325_v45 = vmul.f32 -1.442695, %v1545_v36  ;;  %v5820_v18 = vld [vmem:[#allocation6 + $0xcc] ss:$16 sps:$4 sm:$0xff]  }
 0x7b3   :  { %6055 = vpow2.f32 %v5323_v39  ;;  %v5823_v19 = vld [vmem:[#allocation6 + $0xe4] ss:$16 sps:$4 sm:$0xff]   ;;  %v5824_v25 = vld [vmem:[#allocation6 + $0xe8] ss:$16 sps:$4 sm:$0xff]  }
 0x7b4   :  { %6057 = vpow2.f32 %v5324_v44  ;;  %v7880_v26 = vld [vmem:[#allocation8 + $0x4] ss:$16 sps:$4 sm:$0xff]  }
 0x7b5   :  { %6059 = vpow2.f32 %v5325_v45  ;;  %9778 = vst [vmem:[#allocation26_spill] sm:$0xff] %v7880_v26  ;;  %v9780_v36 = vld [vmem:[#allocation59_spill] sm:$0xff]  ;;  %v9782_v39 = vld [vmem:[#allocation49_spill] sm:$0xff] }
 0x7b6   :  { %6061 = vtanh.f32 %v1544_v0  ;;  %v5818_v0 = vld [vmem:[#allocation6 + $0xc8] ss:$16 sps:$4 sm:$0xff]   ;;  %v9781_v38 = vld [vmem:[#allocation55_spill] sm:$0xff] }
 0x7b7   :  { %v9783_v40 = vsel %vm7185_vm3, %v9781_v38, %v9782_v39  ;;  %v1702_v38 = vld [vmem:[#allocation3 + $0x28] sm:$0xff]  ;;  %v1701_v39 = vld [vmem:[#allocation3 + $0x20] sm:$0xff] }
 0x7bd   :  { %v6056_v46 = vpop.eup %6055 }
 0x7be   :  { %v6058_v47 = vpop.eup %6057  ;;  %v1549_v13 = vadd.f32 1.0, %v6056_v46  ;;  %v9784_v46 = vld [vmem:[#allocation56_spill] sm:$0xff] }
 0x7bf   :  { %v1555_v33 = vadd.f32 1.0, %v6058_v47  ;;  %v6060_v34 = vpop.eup %6059  ;;  %v9785_v47 = vld [vmem:[#allocation51_spill] sm:$0xff] }
 0x7c0   :  { %6063 = vrcp.f32 %v1549_v13  ;;  %v6062_v1 = vpop.eup %6061  ;;  %v1562_v51 = vadd.f32 1.0, %v6060_v34  ;;  %v9786_v13 = vsel %vm7189_vm4, %v9784_v46, %v9785_v47  ;;  %v9787_v34 = vld [vmem:[#allocation57_spill] sm:$0xff]  ;;  %v7963_v46 = vld [vmem:[#allocation8 + $0xac] ss:$16 sps:$4 sm:$0xff]  }
 0x7c1   :  { %6065 = vrcp.f32 %v1555_v33  ;;  %v7967_v47 = vld [vmem:[#allocation8 + $0xa0] ss:$16 sps:$4 sm:$0xff]  }
 0x7c2   :  { %6067 = vrcp.f32 %v1562_v51 }
 0x7ca   :  { %v6064_v60 = vpop.eup %6063 }
 0x7cb   :  { %v6066_v16 = vpop.eup %6065  ;;  %v1566_v17 = vmul.f32 %v6064_v60, %v6062_v1  ;;  %v9788_v1 = vld [vmem:[#allocation52_spill] sm:$0xff] }
 0x7cc   :  { %v1565_v14 = vmul.f32 %v6066_v16, %v7819_v10  ;;  %v6068_v53 = vpop.eup %6067  ;;  %v5797_v10 = vld [vmem:[#allocation6 + $0x60] ss:$16 sps:$4 sm:$0xff]   ;;  %v9789_v60 = vsel %vm7193_vm5, %v9787_v34, %v9788_v1  ;;  %v7975_v34 = vld [vmem:[#allocation8 + $0xcc] ss:$16 sps:$4 sm:$0xff]  }
 0x7ce   :  { %v7873_v31 = vadd.f32 %v1566_v17, %v1565_v14 }
 0x7d0   :  { %6069 = vtanh.f32 %v7873_v31 }
 0x7da   :  { %v6070_v56 = vpop.eup %6069 }
 0x7db   :  { %v1569_v35 = vmul.f32 %v6070_v56, %v6068_v53 }
 0x7dd   :  { %1570 = vst.msk [vmem:[#allocation3 + $0x30] sm:$0xff] %vm793_vm6, %v1569_v35  ;;  %v1584_v15 = vpack.c.bf16 %v1569_v35, %v1569_v35 }
 0x7de   :  { %1571 = vst.msk [vmem:[#allocation3 + $0x8] sm:$0xff] %vm796_vm7, %v1569_v35 }
 0x7df   :  { %1618 = vmatmul.mubr.bf16.vlgmr.msra.gmra.mrb[44].mxu0 %v1584_v15  ;;  %1659 = vmatmul.mubr.bf16.vlgmr.msra.gmra.mrb[44].mxu1 %v1584_v15 }
 0x7e0   :  { %1955 = vmatprep.mubr.bf16.mxu0 %v9732_v57  ;;  %2028 = vmatprep.mubr.bf16.mxu1 %v9732_v57 }
 0x7e1   :  { %1924 = vmatpush1.bf16.msra.mxu0 %v5779_v59  ;;  %1997 = vmatpush1.bf16.msra.mxu1 %v5782_v48 }
 0x7e2   :  { %1925 = vmatprep.subr.bf16.mxu0 %v5787_v54  ;;  %1998 = vmatprep.subr.bf16.mxu1 %v5790_v63 }
 0x7e5   :  { %1926 = vmatpush1.bf16.msra.mxu0 %v5785_v6  ;;  %1999 = vmatpush1.bf16.msra.mxu1 %v5788_v28 }
 0x7e6   :  { %1927 = vmatprep.subr.bf16.mxu0 %v5793_v20  ;;  %2000 = vmatprep.subr.bf16.mxu1 %v5796_v4 }
 0x7e9   :  { %1928 = vmatpush1.bf16.msra.mxu0 %v5791_v52  ;;  %2001 = vmatpush1.bf16.msra.mxu1 %v5794_v61 }
 0x7ea   :  { %1929 = vmatprep.subr.bf16.mxu0 %v5799_v12  ;;  %2002 = vmatprep.subr.bf16.mxu1 %v5802_v62 }
 0x7ed   :  { %1930 = vmatpush1.bf16.msra.mxu0 %v5797_v10  ;;  %2003 = vmatpush1.bf16.msra.mxu1 %v5800_v21  ;;  %v1698_v21 = vld [vmem:[#allocation3 + $0x8] sm:$0xff] }
 0x7ee   :  { %1931 = vmatprep.subr.bf16.mxu0 %v5805_v7  ;;  %2004 = vmatprep.subr.bf16.mxu1 %v5808_v9  ;;  %v7905_v9 = vld [vmem:[#allocation8] ss:$16 sps:$4 sm:$0xff]  }
 0x7f1   :  { %1932 = vmatpush1.bf16.msra.mxu0 %v5803_v2  ;;  %2005 = vmatpush1.bf16.msra.mxu1 %v5806_v42  ;;  %v7907_v2 = vld [vmem:[#allocation8 + $0x8] ss:$16 sps:$4 sm:$0xff]  }
 0x7f2   :  { %1933 = vmatprep.subr.bf16.mxu0 %v5811_v8  ;;  %2006 = vmatprep.subr.bf16.mxu1 %v5814_v32  ;;  %v7909_v8 = vld [vmem:[#allocation8 + $0x24] ss:$16 sps:$4 sm:$0xff]   ;;  %v7915_v32 = vld [vmem:[#allocation8 + $0x20] ss:$16 sps:$4 sm:$0xff]  }
 0x7f5   :  { %1934 = vmatpush1.bf16.msra.mxu0 %v5809_v49  ;;  %2007 = vmatpush1.bf16.msra.mxu1 %v5812_v3  ;;  %v7917_v49 = vld [vmem:[#allocation8 + $0x28] ss:$16 sps:$4 sm:$0xff]   ;;  %v7921_v3 = vld [vmem:[#allocation8 + $0x44] ss:$16 sps:$4 sm:$0xff]  }
 0x7f6   :  { %1935 = vmatprep.subr.bf16.mxu0 %v5817_v55  ;;  %2008 = vmatprep.subr.bf16.mxu1 %v5820_v18  ;;  %v7923_v55 = vld [vmem:[#allocation8 + $0x4c] ss:$16 sps:$4 sm:$0xff]   ;;  %v7929_v18 = vld [vmem:[#allocation8 + $0x40] ss:$16 sps:$4 sm:$0xff]  }
 0x7f9   :  { %1936 = vmatpush1.bf16.msra.mxu0 %v5815_v43  ;;  %2009 = vmatpush1.bf16.msra.mxu1 %v5818_v0  ;;  %v1699_v43 = vld [vmem:[#allocation3 + $0x10] sm:$0xff]  ;;  %v1700_v0 = vld [vmem:[#allocation3 + $0x18] sm:$0xff] }
 0x7fa   :  { %1937 = vmatprep.subr.bf16.mxu0 %v5823_v19  ;;  %2010 = vmatprep.subr.bf16.mxu1 %v5826_v22  ;;  %v7931_v19 = vld [vmem:[#allocation8 + $0x48] ss:$16 sps:$4 sm:$0xff]   ;;  %v1706_v22 = vpack.c.bf16 %v1700_v0, %v1699_v43 }
 0x7fd   :  { %1938 = vmatpush1.bf16.msra.mxu0 %v5821_v23  ;;  %2011 = vmatpush1.bf16.msra.mxu1 %v5824_v25  ;;  %v7935_v23 = vld [vmem:[#allocation8 + $0x64] ss:$16 sps:$4 sm:$0xff]   ;;  %v7937_v25 = vld [vmem:[#allocation8 + $0x6c] ss:$16 sps:$4 sm:$0xff]  }
 0x7fe   :  { %2305 = vmatprep.subr.bf16.mxu0 %v7880_v26  ;;  %2346 = vmatprep.subr.bf16.mxu1 %v7882_v27 }
 0x8b2   :  { %v1619_v29 = vpop.f32.mrb[44].mxu0  ;;  %v1660_v30 = vpop.f32.mrb[44].mxu1 }
 0x8b3   :  { %v1667_v37 = vadd.f32 %v1619_v29, %v9780_v36  ;;  %v1669_v41 = vadd.f32 %v1660_v30, %v9783_v40  ;;  %v1621_v44 = vpop.f32.mrb[45].mxu0  ;;  %v1662_v45 = vpop.f32.mrb[45].mxu1  ;;  %v7941_v29 = vld [vmem:[#allocation8 + $0x60] ss:$16 sps:$4 sm:$0xff]   ;;  %v7943_v30 = vld [vmem:[#allocation8 + $0x68] ss:$16 sps:$4 sm:$0xff]  }
 0x8b4   :  { %v1668_v33 = vadd.f32 %v1621_v44, %v9786_v13  ;;  %v1670_v16 = vadd.f32 %v1662_v45, %v9789_v60  ;;  %v1623_v17 = vpop.f32.mrb[46].mxu0  ;;  %v1664_v51 = vpop.f32.mrb[46].mxu1  ;;  %v7947_v36 = vld [vmem:[#allocation8 + $0x84] ss:$16 sps:$4 sm:$0xff]   ;;  %v7955_v40 = vld [vmem:[#allocation8 + $0x80] ss:$16 sps:$4 sm:$0xff]   ;;  %v1707_v44 = vpack.c.bf16 %v1702_v38, %v1701_v39 }
 0x8b5   :  { %v5326_v14 = vmul.f32 -1.442695, %v1667_v37  ;;  %v1624_v53 = vpop.f32.mrb[47].mxu0  ;;  %v1665_v56 = vpop.f32.mrb[47].mxu1  ;;  %v7949_v37 = vld [vmem:[#allocation8 + $0x8c] ss:$16 sps:$4 sm:$0xff]  }
 0x8b6   :  { %v5327_v35 = vmul.f32 -1.442695, %v1668_v33  ;;  %v5328_v15 = vmul.f32 -1.442695, %v1670_v16  ;;  %v7961_v45 = vld [vmem:[#allocation8 + $0xa4] ss:$16 sps:$4 sm:$0xff]  }
 0x8b7   :  { %6071 = vpow2.f32 %v5326_v14  ;;  %v7969_v13 = vld [vmem:[#allocation8 + $0xa8] ss:$16 sps:$4 sm:$0xff]   ;;  %v7973_v33 = vld [vmem:[#allocation8 + $0xc4] ss:$16 sps:$4 sm:$0xff]   ;;  %v7981_v16 = vld [vmem:[#allocation8 + $0xc0] ss:$16 sps:$4 sm:$0xff]  }
 0x8b8   :  { %6073 = vpow2.f32 %v5327_v35  ;;  %v1703_v60 = vld [vmem:[#allocation3 + $0x30] sm:$0xff]  ;;  %v7987_v14 = vld [vmem:[#allocation8 + $0xe4] ss:$16 sps:$4 sm:$0xff]   ;;  %v7993_v56 = vld [vmem:[#allocation8 + $0xe0] ss:$16 sps:$4 sm:$0xff]  }
 0x8b9   :  { %6075 = vpow2.f32 %v5328_v15  ;;  %v7983_v17 = vld [vmem:[#allocation8 + $0xc8] ss:$16 sps:$4 sm:$0xff]   ;;  %9791 = vst [vmem:[#allocation29_spill] sm:$0xff] %v7987_v14  ;;  %v7989_v53 = vld [vmem:[#allocation8 + $0xec] ss:$16 sps:$4 sm:$0xff]   ;;  %9793 = vst [vmem:[#allocation25_spill] sm:$0xff] %v7993_v56 }
 0x8ba   :  { %6077 = vtanh.f32 %v1669_v41  ;;  %v7957_v41 = vld [vmem:[#allocation8 + $0x88] ss:$16 sps:$4 sm:$0xff]   ;;  %9790 = vst [vmem:[#allocation28_spill] sm:$0xff] %v7983_v17  ;;  %9792 = vst [vmem:[#allocation24_spill] sm:$0xff] %v7989_v53  ;;  %v1741_v15 = vld [vmem:[#allocation10] sm:$0xf] }
 0x8bb   :  { %v7995_v35 = vld [vmem:[#allocation8 + $0xe8] ss:$16 sps:$4 sm:$0xff]  }
 0x8bc   :  { %9794 = vst [vmem:[#allocation45_spill] sm:$0xff] %v7995_v35 }
 0x8c1   :  { %v6072_v50 = vpop.eup %6071 }
 0x8c2   :  { %v6074_v58 = vpop.eup %6073  ;;  %v1674_v59 = vadd.f32 1.0, %v6072_v50 }
 0x8c3   :  { %v1680_v48 = vadd.f32 1.0, %v6074_v58  ;;  %v6076_v54 = vpop.eup %6075 }
 0x8c4   :  { %6079 = vrcp.f32 %v1674_v59  ;;  %v6078_v63 = vpop.eup %6077  ;;  %v1687_v4 = vadd.f32 1.0, %v6076_v54  ;;  %v9795_v59 = vld [vmem:[#allocation31_spill] sm:$0xff]  ;;  %v9796_v54 = vld [vmem:[#allocation30_spill] sm:$0xff] }
 0x8c5   :  { %6081 = vrcp.f32 %v1680_v48  ;;  %v8046_v48 = vrot.slane %v1741_v15, %v9795_v59 }
 0x8c6   :  { %6083 = vrcp.f32 %v1687_v4  ;;  %v9798_v4 = vld [vmem:[#allocation32_spill] sm:$0xff] }
 0x8ce   :  { %v6080_v6 = vpop.eup %6079 }
 0x8cf   :  { %v6082_v28 = vpop.eup %6081  ;;  %v1691_v20 = vmul.f32 %v6080_v6, %v6078_v63  ;;  %v9797_v63 = vsub.s32 2, %v9796_v54 }
 0x8d0   :  { %v1690_v52 = vmul.f32 %v6082_v28, %v7873_v31  ;;  %v6084_v12 = vpop.eup %6083  ;;  %v7911_v31 = vld [vmem:[#allocation8 + $0x2c] ss:$16 sps:$4 sm:$0xff]  }
 0x8d1   :  { %v8050_v6 = vrot.slane %v1741_v15, %v9797_v63 }
 0x8d2   :  { %v1692_v61 = vadd.f32 %v1691_v20, %v1690_v52  ;;  %v8057_v52 = vrot.slane %v1741_v15, %v9798_v4 }
 0x8d4   :  { %6085 = vtanh.f32 %v1692_v61  ;;  %v9799_v61 = vsub.s32 3, %v9796_v54 }
 0x8de   :  { %v6086_v62 = vpop.eup %6085 }
 0x8df   :  { %v1694_v10 = vmul.f32 %v6086_v62, %v6084_v12  ;;  %v8061_v12 = vrot.slane %v1741_v15, %v9799_v61 }
 0x8e1   :  { %1695 = vst.msk [vmem:[#allocation3 + $0x38] sm:$0xff] %vm793_vm6, %v1694_v10 }
 0x8e2   :  { %1696 = vst.msk [vmem:[#allocation3] sm:$0xff] %vm796_vm7, %v1694_v10 }
 0x8e8   :  { %v1704_v1 = vld [vmem:[#allocation3 + $0x38] sm:$0xff] }
 0x8e9   :  { %v1697_v7 = vld [vmem:[#allocation3] sm:$0xff]  ;;  %v1708_v51 = vpack.c.bf16 %v1704_v1, %v1703_v60 }
 0x8ea   :  { %v1705_v42 = vpack.c.bf16 %v1698_v21, %v1697_v7 }
 0x8ec   :  { %1956 = vmatmul.mubr.bf16.vlgmr.msra.gmra.mrb[48].mxu0 %v1705_v42  ;;  %2029 = vmatmul.mubr.bf16.vlgmr.msra.gmra.mrb[48].mxu1 %v1705_v42 }
 0x8ed   :  { %2306 = vmatpush1.bf16.msra.mxu0 %v7905_v9  ;;  %2347 = vmatpush1.bf16.msra.mxu1 %v7907_v2 }
 0x8ee   :  { %2307 = vmatprep.subr.bf16.mxu0 %v7909_v8  ;;  %2348 = vmatprep.subr.bf16.mxu1 %v7911_v31 }
 0x8ef   :  { %1965 = vmatprep.mubr.bf16.mxu0 %v9732_v57  ;;  %2038 = vmatprep.mubr.bf16.mxu1 %v9732_v57 }
 0x8f1   :  { %2308 = vmatpush1.bf16.msra.mxu0 %v7915_v32  ;;  %2349 = vmatpush1.bf16.msra.mxu1 %v7917_v49 }
 0x8f2   :  { %2309 = vmatprep.subr.bf16.mxu0 %v7921_v3  ;;  %2350 = vmatprep.subr.bf16.mxu1 %v7923_v55 }
 0x8f4   :  { %1966 = vmatmul.mubr.bf16.gmra.mrb[52].mxu0 %v1706_v22  ;;  %2039 = vmatmul.mubr.bf16.gmra.mrb[52].mxu1 %v1706_v22 }
 0x8f5   :  { %2310 = vmatpush1.bf16.msra.mxu0 %v7929_v18  ;;  %2351 = vmatpush1.bf16.msra.mxu1 %v7931_v19 }
 0x8f6   :  { %2311 = vmatprep.subr.bf16.mxu0 %v7935_v23  ;;  %2352 = vmatprep.subr.bf16.mxu1 %v7937_v25 }
 0x8f7   :  { %1975 = vmatprep.mubr.bf16.mxu0 %v9732_v57  ;;  %2048 = vmatprep.mubr.bf16.mxu1 %v9732_v57 }
 0x8f9   :  { %2312 = vmatpush1.bf16.msra.mxu0 %v7941_v29  ;;  %2353 = vmatpush1.bf16.msra.mxu1 %v7943_v30 }
 0x8fa   :  { %2313 = vmatprep.subr.bf16.mxu0 %v7947_v36  ;;  %2354 = vmatprep.subr.bf16.mxu1 %v7949_v37 }
 0x8fc   :  { %1976 = vmatmul.mubr.bf16.gmra.mrb[56].mxu0 %v1707_v44  ;;  %2049 = vmatmul.mubr.bf16.gmra.mrb[56].mxu1 %v1707_v44 }
 0x8fd   :  { %2314 = vmatpush1.bf16.msra.mxu0 %v7955_v40  ;;  %2355 = vmatpush1.bf16.msra.mxu1 %v7957_v41 }
 0x8fe   :  { %2315 = vmatprep.subr.bf16.mxu0 %v7961_v45  ;;  %2356 = vmatprep.subr.bf16.mxu1 %v7963_v46 }
 0x8ff   :  { %1985 = vmatprep.mubr.bf16.mxu0 %v9732_v57  ;;  %2058 = vmatprep.mubr.bf16.mxu1 %v9732_v57 }
 0x901   :  { %2316 = vmatpush1.bf16.msra.mxu0 %v7967_v47  ;;  %2357 = vmatpush1.bf16.msra.mxu1 %v7969_v13 }
 0x902   :  { %2317 = vmatprep.subr.bf16.mxu0 %v7973_v33  ;;  %2358 = vmatprep.subr.bf16.mxu1 %v7975_v34 }
 0x904   :  { %1986 = vmatmul.mubr.bf16.gmra.mrb[60].mxu0 %v1708_v51  ;;  %2059 = vmatmul.mubr.bf16.gmra.mrb[60].mxu1 %v1708_v51 }
 0x905   :  { %2318 = vmatpush1.bf16.msra.mxu0 %v7981_v16  ;;  %2359 = vmatpush1.bf16.msra.mxu1 %v7983_v17 }
 0x906   :  { %2319 = vmatprep.subr.bf16.mxu0 %v7987_v14  ;;  %2360 = vmatprep.subr.bf16.mxu1 %v7989_v53 }
 0x907   :  { %2337 = vmatprep.mubr.bf16.mxu0 %v9732_v57  ;;  %2378 = vmatprep.mubr.bf16.mxu1 %v9732_v57 }
 0x909   :  { %2320 = vmatpush1.bf16.msra.mxu0 %v7993_v56  ;;  %2361 = vmatpush1.bf16.msra.mxu1 %v7995_v35 }
 0x90a   :  { %2430 = vmatprep.subr.bf16.mxu0 %v7880_v26  ;;  %2471 = vmatprep.subr.bf16.mxu1 %v7882_v27 }
 0x90c   :  { %2338 = vmatmul.mubr.bf16.vlgmr.msra.gmra.mrb[64].mxu0 %v9732_v57  ;;  %2379 = vmatmul.mubr.bf16.vlgmr.msra.gmra.mrb[64].mxu1 %v9732_v57 }
 0x90d   :  { %2431 = vmatpush1.bf16.msra.mxu0 %v7905_v9  ;;  %2472 = vmatpush1.bf16.msra.mxu1 %v7907_v2 }
 0x90e   :  { %2432 = vmatprep.subr.bf16.mxu0 %v7909_v8  ;;  %2473 = vmatprep.subr.bf16.mxu1 %v7911_v31 }
 0x90f   :  { %2462 = vmatprep.mubr.bf16.mxu0 %v9732_v57  ;;  %2503 = vmatprep.mubr.bf16.mxu1 %v9732_v57 }
 0x911   :  { %2433 = vmatpush1.bf16.msra.mxu0 %v7915_v32  ;;  %2474 = vmatpush1.bf16.msra.mxu1 %v7917_v49 }
 0x912   :  { %2434 = vmatprep.subr.bf16.mxu0 %v7921_v3  ;;  %2475 = vmatprep.subr.bf16.mxu1 %v7923_v55 }
 0x915   :  { %2435 = vmatpush1.bf16.msra.mxu0 %v7929_v18  ;;  %2476 = vmatpush1.bf16.msra.mxu1 %v7931_v19 }
 0x916   :  { %2436 = vmatprep.subr.bf16.mxu0 %v7935_v23  ;;  %2477 = vmatprep.subr.bf16.mxu1 %v7937_v25 }
 0x919   :  { %2437 = vmatpush1.bf16.msra.mxu0 %v7941_v29  ;;  %2478 = vmatpush1.bf16.msra.mxu1 %v7943_v30 }
 0x91a   :  { %2438 = vmatprep.subr.bf16.mxu0 %v7947_v36  ;;  %2479 = vmatprep.subr.bf16.mxu1 %v7949_v37 }
 0x91d   :  { %2439 = vmatpush1.bf16.msra.mxu0 %v7955_v40  ;;  %2480 = vmatpush1.bf16.msra.mxu1 %v7957_v41 }
 0x91e   :  { %2440 = vmatprep.subr.bf16.mxu0 %v7961_v45  ;;  %2481 = vmatprep.subr.bf16.mxu1 %v7963_v46 }
 0x921   :  { %2441 = vmatpush1.bf16.msra.mxu0 %v7967_v47  ;;  %2482 = vmatpush1.bf16.msra.mxu1 %v7969_v13 }
 0x922   :  { %2442 = vmatprep.subr.bf16.mxu0 %v7973_v33  ;;  %2483 = vmatprep.subr.bf16.mxu1 %v7975_v34 }
 0x925   :  { %2443 = vmatpush1.bf16.msra.mxu0 %v7981_v16  ;;  %2484 = vmatpush1.bf16.msra.mxu1 %v7983_v17 }
 0x926   :  { %2444 = vmatprep.subr.bf16.mxu0 %v7987_v14  ;;  %2485 = vmatprep.subr.bf16.mxu1 %v7989_v53 }
 0x929   :  { %2445 = vmatpush1.bf16.msra.mxu0 %v7993_v56  ;;  %2486 = vmatpush1.bf16.msra.mxu1 %v7995_v35 }
 0x92a   :  { %2555 = vmatprep.subr.bf16.mxu0 %v7880_v26  ;;  %2596 = vmatprep.subr.bf16.mxu1 %v7882_v27 }
 0x9bf   :  { %v8041_v50 = vpop.f32.mrb[48].mxu0  ;;  %v8043_v58 = vpop.f32.mrb[48].mxu1 }
 0x9c0   :  { %v8052_v28 = vpop.f32.mrb[49].mxu0  ;;  %v8054_v20 = vpop.f32.mrb[49].mxu1 }
 0x9c1   :  { %v1961_v62 = vpop.f32.mrb[50].mxu0  ;;  %v2034_v10 = vpop.f32.mrb[50].mxu1 }
 0x9c2   :  { %v8064_v21 = vadd.f32 %v1961_v62, %v8046_v48  ;;  %v8067_v7 = vadd.f32 %v2034_v10, %v8050_v6  ;;  %v1963_v42 = vpop.f32.mrb[51].mxu0  ;;  %v2036_v43 = vpop.f32.mrb[51].mxu1 }
 0x9c3   :  { %v8070_v0 = vadd.f32 %v1963_v42, %v8057_v52  ;;  %v8073_v22 = vadd.f32 %v2036_v43, %v8061_v12 }
 0x9c4   :  { %9800 = vst [vmem:[#allocation44_spill] sm:$0xff] %v8067_v7 }
 0x9c5   :  { %9801 = vst [vmem:[#allocation38_spill] sm:$0xff] %v8070_v0  ;;  %9802 = vst [vmem:[#allocation41_spill] sm:$0xff] %v8073_v22 }
 0x9c7   :  { %v1967_v38 = vpop.f32.mrb[52].mxu0  ;;  %v2040_v39 = vpop.f32.mrb[52].mxu1 }
 0x9c8   :  { %v1968_v44 = vadd.f32 %v1967_v38, %v8046_v48  ;;  %v8077_v1 = vadd.f32 %v2040_v39, %v8050_v6  ;;  %v1969_v60 = vpop.f32.mrb[53].mxu0  ;;  %v2042_v51 = vpop.f32.mrb[53].mxu1 }
 0x9c9   :  { %v8080_v15 = vadd.f32 %v1969_v60, %v8057_v52  ;;  %v8083_v63 = vadd.f32 %v2042_v51, %v8061_v12  ;;  %v1971_v61 = vpop.f32.mrb[54].mxu0  ;;  %v2044_v62 = vpop.f32.mrb[54].mxu1 }
 0x9ca   :  { %v1972_v10 = vadd.f32 %v1971_v61, %v8046_v48  ;;  %v8087_v42 = vadd.f32 %v2044_v62, %v8050_v6  ;;  %v1973_v43 = vpop.f32.mrb[55].mxu0  ;;  %v2046_v38 = vpop.f32.mrb[55].mxu1 }
 0x9cb   :  { %9803 = vst [vmem:[#allocation39_spill] sm:$0xff] %v8083_v63  ;;  %v8090_v39 = vadd.f32 %v1973_v43, %v8057_v52  ;;  %v8093_v4 = vadd.f32 %v2046_v38, %v8061_v12 }
 0x9cc   :  { %9804 = vst [vmem:[#allocation42_spill] sm:$0xff] %v8087_v42 }
 0x9cd   :  { %9805 = vst [vmem:[#allocation40_spill] sm:$0xff] %v8090_v39  ;;  %9806 = vst [vmem:[#allocation43_spill] sm:$0xff] %v8093_v4 }
 0x9cf   :  { %v1977_v60 = vpop.f32.mrb[56].mxu0  ;;  %v2050_v59 = vpop.f32.mrb[56].mxu1 }
 0x9d0   :  { %v1978_v51 = vadd.f32 %v1977_v60, %v8046_v48  ;;  %v8097_v54 = vadd.f32 %v2050_v59, %v8050_v6  ;;  %v1979_v27 = vpop.f32.mrb[57].mxu0  ;;  %v2052_v61 = vpop.f32.mrb[57].mxu1 }
 0x9d1   :  { %v8100_v62 = vadd.f32 %v1979_v27, %v8057_v52  ;;  %v8103_v26 = vadd.f32 %v2052_v61, %v8061_v12  ;;  %v1981_v43 = vpop.f32.mrb[58].mxu0  ;;  %v2054_v35 = vpop.f32.mrb[58].mxu1 }
 0x9d2   :  { %9807 = vst [vmem:[#allocation47_spill] sm:$0xff] %v8097_v54  ;;  %v1982_v38 = vadd.f32 %v1981_v43, %v8046_v48  ;;  %v8107_v56 = vadd.f32 %v2054_v35, %v8050_v6  ;;  %v1983_v53 = vpop.f32.mrb[59].mxu0  ;;  %v2056_v60 = vpop.f32.mrb[59].mxu1  ;;  %v8111_v59 = vsel %vm219_vm2, %v1972_v10, %v1978_v51 }
 0x9d3   :  { %9808 = vst [vmem:[#allocation48_spill] sm:$0xff] %v8100_v62  ;;  %9809 = vst [vmem:[#allocation46_spill] sm:$0xff] %v8103_v26  ;;  %v8118_v61 = vadd.f32 %v1983_v53, %v8057_v52  ;;  %v8121_v17 = vadd.f32 %v2056_v60, %v8061_v12  ;;  %v8141_v60 = vsel %vm219_vm2, %v1978_v51, %v1972_v10 }
 0x9d4   :  { %9811 = vst [vmem:[#allocation37_spill] sm:$0xff] %v8111_v59  ;;  %v8133_v59 = vsel %vm219_vm2, %v1968_v44, %v1982_v38  ;;  %9814 = vst [vmem:[#allocation33_spill] sm:$0xff] %v8141_v60  ;;  %v8165_v35 = vsel %vm219_vm2, %v1982_v38, %v1968_v44  ;;  %v1958_v44 = vadd.f32 %v8041_v50, %v8046_v48 }
 0x9d5   :  { %9812 = vst [vmem:[#allocation58_spill] sm:$0xff] %v8118_v61  ;;  %9813 = vst [vmem:[#allocation50_spill] sm:$0xff] %v8121_v17  ;;  %v8183_v38 = vadd.f32 %v8043_v58, %v8050_v6  ;;  %v8191_v26 = vadd.f32 %v8052_v28, %v8057_v52  ;;  %v8195_v10 = vadd.f32 %v8054_v20, %v8061_v12 }
 0x9d6   :  { %9815 = vst [vmem:[#allocation53_spill] sm:$0xff] %v8165_v35 }
 0x9d7   :  { %v1987_v51 = vpop.f32.mrb[60].mxu0  ;;  %v2060_v53 = vpop.f32.mrb[60].mxu1  ;;  %9816 = vst [vmem:[#allocation34_spill] sm:$0xff] %v8183_v38  ;;  %9818 = vst [vmem:[#allocation35_spill] sm:$0xff] %v8191_v26 }
 0x9d8   :  { %v1988_v43 = vadd.f32 %v1987_v51, %v8046_v48  ;;  %v8187_v35 = vadd.f32 %v2060_v53, %v8050_v6  ;;  %v1989_v27 = vpop.f32.mrb[61].mxu0  ;;  %v2062_v60 = vpop.f32.mrb[61].mxu1  ;;  %9819 = vst [vmem:[#allocation59_spill] sm:$0xff] %v8195_v10 }
 0x9d9   :  { %v8198_v50 = vadd.f32 %v1989_v27, %v8057_v52  ;;  %v8201_v58 = vadd.f32 %v2062_v60, %v8061_v12  ;;  %v1991_v51 = vpop.f32.mrb[62].mxu0  ;;  %v2064_v4 = vpop.f32.mrb[62].mxu1 }
 0x9da   :  { %9817 = vst [vmem:[#allocation54_spill] sm:$0xff] %v8187_v35  ;;  %v1992_v53 = vadd.f32 %v1991_v51, %v8046_v48  ;;  %v8205_v62 = vadd.f32 %v2064_v4, %v8050_v6  ;;  %v1993_v39 = vpop.f32.mrb[63].mxu0  ;;  %v2066_v28 = vpop.f32.mrb[63].mxu1  ;;  %v8210_v20 = vsel %vm219_vm2, %v8064_v21, %v1988_v43 }
 0x9db   :  { %9820 = vst [vmem:[#allocation55_spill] sm:$0xff] %v8198_v50  ;;  %9821 = vst [vmem:[#allocation49_spill] sm:$0xff] %v8201_v58  ;;  %v8217_v60 = vadd.f32 %v1993_v39, %v8057_v52  ;;  %v8220_v48 = vadd.f32 %v2066_v28, %v8061_v12  ;;  %v8239_v12 = vsel %vm219_vm2, %v1988_v43, %v8064_v21 }
 0x9dc   :  { %9822 = vst [vmem:[#allocation56_spill] sm:$0xff] %v8205_v62  ;;  %v2141_v51 = vsel %vm219_vm2, %v1958_v44, %v1992_v53  ;;  %v2143_v52 = vsel %vm7185_vm3, %v8183_v38, %v8205_v62  ;;  %9825 = vst [vmem:[#allocation52_spill] sm:$0xff] %v8239_v12  ;;  %v8263_v39 = vsel %vm219_vm2, %v1992_v53, %v1958_v44 }
 0x9dd   :  { %9823 = vst [vmem:[#allocation51_spill] sm:$0xff] %v8217_v60  ;;  %9824 = vst [vmem:[#allocation57_spill] sm:$0xff] %v8220_v48  ;;  %v2142_v28 = vsel %vm7189_vm4, %v8191_v26, %v8217_v60  ;;  %v2144_v4 = vsel %vm7193_vm5, %v8195_v10, %v8220_v48 }
 0x9de   :  { %9826 = vst [vmem:[#allocation60_spill] sm:$0xff] %v8263_v39 }
 0x9df   :  { %v2339_v43 = vpop.f32.mrb[64].mxu0  ;;  %v2380_v12 = vpop.f32.mrb[64].mxu1 }
 0x9e0   :  { %v2387_v14 = vadd.f32 %v2339_v43, %v2141_v51  ;;  %v2389_v44 = vadd.f32 %v2380_v12, %v2143_v52  ;;  %v2341_v53 = vpop.f32.mrb[65].mxu0  ;;  %v2382_v39 = vpop.f32.mrb[65].mxu1  ;;  %v9833_v43 = vld [vmem:[#allocation27_spill] sm:$0xff] }
 0x9e1   :  { %v2388_v54 = vadd.f32 %v2341_v53, %v2142_v28  ;;  %v2390_v42 = vadd.f32 %v2382_v39, %v2144_v4  ;;  %v2343_v17 = vpop.f32.mrb[66].mxu0  ;;  %v2384_v6 = vpop.f32.mrb[66].mxu1  ;;  %v9830_v39 = vld [vmem:[#allocation25_spill] sm:$0xff] }
 0x9e2   :  { %v5393_v38 = vmul.f32 -1.442695, %v2387_v14  ;;  %v2344_v62 = vpop.f32.mrb[67].mxu0  ;;  %v2385_v63 = vpop.f32.mrb[67].mxu1  ;;  %v9831_v28 = vld [vmem:[#allocation45_spill] sm:$0xff] }
 0x9e3   :  { %v5394_v61 = vmul.f32 -1.442695, %v2388_v54  ;;  %v5395_v27 = vmul.f32 -1.442695, %v2390_v42 }
 0x9e4   :  { %6087 = vpow2.f32 %v5393_v38  ;;  %v9827_v38 = vld [vmem:[#allocation28_spill] sm:$0xff] }
 0x9e5   :  { %6089 = vpow2.f32 %v5394_v61 }
 0x9e6   :  { %6091 = vpow2.f32 %v5395_v27  ;;  %v9828_v27 = vld [vmem:[#allocation29_spill] sm:$0xff] }
 0x9e7   :  { %6093 = vtanh.f32 %v2389_v44 }
 0x9ee   :  { %v6088_v26 = vpop.eup %6087 }
 0x9ef   :  { %v6090_v60 = vpop.eup %6089  ;;  %v2394_v21 = vadd.f32 1.0, %v6088_v26 }
 0x9f0   :  { %v2400_v51 = vadd.f32 1.0, %v6090_v60  ;;  %v6092_v52 = vpop.eup %6091  ;;  %v9829_v60 = vld [vmem:[#allocation24_spill] sm:$0xff] }
 0x9f1   :  { %6095 = vrcp.f32 %v2394_v21  ;;  %v6094_v12 = vpop.eup %6093  ;;  %v2407_v14 = vadd.f32 1.0, %v6092_v52  ;;  %v9832_v21 = vld [vmem:[#allocation26_spill] sm:$0xff]  ;;  %v9834_v52 = vsel %vm7185_vm3, %v8067_v7, %v8187_v35 }
 0x9f2   :  { %6097 = vrcp.f32 %v2400_v51 }
 0x9f3   :  { %6099 = vrcp.f32 %v2407_v14 }
 0x9fb   :  { %v6096_v4 = vpop.eup %6095 }
 0x9fc   :  { %v6098_v17 = vpop.eup %6097  ;;  %v2411_v6 = vmul.f32 %v6096_v4, %v6094_v12 }
 0x9fd   :  { %v2410_v62 = vmul.f32 0.0, %v6098_v17  ;;  %v6100_v54 = vpop.eup %6099 }
 0x9ff   :  { %v8277_v63 = vadd.f32 %v2411_v6, %v2410_v62  ;;  %v9835_v6 = vsel %vm7189_vm4, %v8070_v0, %v8198_v50  ;;  %v9836_v62 = vsel %vm7193_vm5, %v8073_v22, %v8201_v58 }
 0xa01   :  { %6101 = vtanh.f32 %v8277_v63 }
 0xa0b   :  { %v6102_v42 = vpop.eup %6101 }
 0xa0c   :  { %v2414_v26 = vmul.f32 %v6102_v42, %v6100_v54 }
 0xa0e   :  { %2415 = vst.msk [vmem:[#allocation3] sm:$0xff] %vm793_vm6, %v2414_v26  ;;  %v2429_v61 = vpack.c.bf16 %v2414_v26, %v2414_v26 }
 0xa0f   :  { %2416 = vst.msk [vmem:[#allocation3 + $0x38] sm:$0xff] %vm796_vm7, %v2414_v26 }
 0xa10   :  { %2463 = vmatmul.mubr.bf16.vlgmr.msra.gmra.mrb[68].mxu0 %v2429_v61  ;;  %2504 = vmatmul.mubr.bf16.vlgmr.msra.gmra.mrb[68].mxu1 %v2429_v61 }
 0xa11   :  { %2556 = vmatpush1.bf16.msra.mxu0 %v7905_v9  ;;  %2597 = vmatpush1.bf16.msra.mxu1 %v7907_v2 }
 0xa12   :  { %2557 = vmatprep.subr.bf16.mxu0 %v7909_v8  ;;  %2598 = vmatprep.subr.bf16.mxu1 %v7911_v31 }
 0xa13   :  { %2587 = vmatprep.mubr.bf16.mxu0 %v9732_v57  ;;  %2628 = vmatprep.mubr.bf16.mxu1 %v9732_v57 }
 0xa15   :  { %2558 = vmatpush1.bf16.msra.mxu0 %v7915_v32  ;;  %2599 = vmatpush1.bf16.msra.mxu1 %v7917_v49 }
 0xa16   :  { %2559 = vmatprep.subr.bf16.mxu0 %v7921_v3  ;;  %2600 = vmatprep.subr.bf16.mxu1 %v7923_v55 }
 0xa19   :  { %2560 = vmatpush1.bf16.msra.mxu0 %v7929_v18  ;;  %2601 = vmatpush1.bf16.msra.mxu1 %v7931_v19 }
 0xa1a   :  { %2561 = vmatprep.subr.bf16.mxu0 %v7935_v23  ;;  %2602 = vmatprep.subr.bf16.mxu1 %v7937_v25 }
 0xa1d   :  { %2562 = vmatpush1.bf16.msra.mxu0 %v7941_v29  ;;  %2603 = vmatpush1.bf16.msra.mxu1 %v7943_v30 }
 0xa1e   :  { %2563 = vmatprep.subr.bf16.mxu0 %v7947_v36  ;;  %2604 = vmatprep.subr.bf16.mxu1 %v7949_v37 }
 0xa21   :  { %2564 = vmatpush1.bf16.msra.mxu0 %v7955_v40  ;;  %2605 = vmatpush1.bf16.msra.mxu1 %v7957_v41 }
 0xa22   :  { %2565 = vmatprep.subr.bf16.mxu0 %v7961_v45  ;;  %2606 = vmatprep.subr.bf16.mxu1 %v7963_v46 }
 0xa25   :  { %2566 = vmatpush1.bf16.msra.mxu0 %v7967_v47  ;;  %2607 = vmatpush1.bf16.msra.mxu1 %v7969_v13 }
 0xa26   :  { %2567 = vmatprep.subr.bf16.mxu0 %v7973_v33  ;;  %2608 = vmatprep.subr.bf16.mxu1 %v7975_v34 }
 0xa29   :  { %2568 = vmatpush1.bf16.msra.mxu0 %v7981_v16  ;;  %2609 = vmatpush1.bf16.msra.mxu1 %v9827_v38 }
 0xa2a   :  { %2569 = vmatprep.subr.bf16.mxu0 %v9828_v27  ;;  %2610 = vmatprep.subr.bf16.mxu1 %v9829_v60 }
 0xa2d   :  { %2570 = vmatpush1.bf16.msra.mxu0 %v9830_v39  ;;  %2611 = vmatpush1.bf16.msra.mxu1 %v9831_v28 }
 0xa2e   :  { %2680 = vmatprep.subr.bf16.mxu0 %v9832_v21  ;;  %2721 = vmatprep.subr.bf16.mxu1 %v9833_v43 }
 0xae3   :  { %v2464_v44 = vpop.f32.mrb[68].mxu0  ;;  %v2505_v53 = vpop.f32.mrb[68].mxu1 }
 0xae4   :  { %v2512_v51 = vadd.f32 %v2464_v44, %v8210_v20  ;;  %v2514_v12 = vadd.f32 %v2505_v53, %v9834_v52  ;;  %v2466_v4 = vpop.f32.mrb[69].mxu0  ;;  %v2507_v17 = vpop.f32.mrb[69].mxu1 }
 0xae5   :  { %v2513_v14 = vadd.f32 %v2466_v4, %v9835_v6  ;;  %v2515_v20 = vadd.f32 %v2507_v17, %v9836_v62  ;;  %v2468_v54 = vpop.f32.mrb[70].mxu0  ;;  %v2509_v42 = vpop.f32.mrb[70].mxu1 }
 0xae6   :  { %v5396_v26 = vmul.f32 -1.442695, %v2512_v51  ;;  %v2469_v61 = vpop.f32.mrb[71].mxu0  ;;  %v2510_v44 = vpop.f32.mrb[71].mxu1 }
 0xae7   :  { %v5397_v53 = vmul.f32 -1.442695, %v2513_v14  ;;  %v5398_v52 = vmul.f32 -1.442695, %v2515_v20 }
 0xae8   :  { %6103 = vpow2.f32 %v5396_v26 }
 0xae9   :  { %6105 = vpow2.f32 %v5397_v53 }
 0xaea   :  { %6107 = vpow2.f32 %v5398_v52  ;;  %v9838_v52 = vld [vmem:[#allocation58_spill] sm:$0xff] }
 0xaeb   :  { %6109 = vtanh.f32 %v2514_v12 }
 0xaf2   :  { %v6104_v10 = vpop.eup %6103 }
 0xaf3   :  { %v6106_v48 = vpop.eup %6105  ;;  %v2519_v7 = vadd.f32 1.0, %v6104_v10 }
 0xaf4   :  { %v2525_v4 = vadd.f32 1.0, %v6106_v48  ;;  %v6108_v6 = vpop.eup %6107 }
 0xaf5   :  { %6111 = vrcp.f32 %v2519_v7  ;;  %v6110_v22 = vpop.eup %6109  ;;  %v2532_v51 = vadd.f32 1.0, %v6108_v6 }
 0xaf6   :  { %6113 = vrcp.f32 %v2525_v4  ;;  %v9839_v4 = vsel %vm7189_vm4, %v8080_v15, %v9838_v52 }
 0xaf7   :  { %6115 = vrcp.f32 %v2532_v51 }
 0xaff   :  { %v6112_v17 = vpop.eup %6111 }
 0xb00   :  { %v6114_v62 = vpop.eup %6113  ;;  %v2536_v54 = vmul.f32 %v6112_v17, %v6110_v22  ;;  %v9840_v17 = vld [vmem:[#allocation39_spill] sm:$0xff] }
 0xb01   :  { %v2535_v42 = vmul.f32 %v6114_v62, %v8277_v63  ;;  %v6116_v20 = vpop.eup %6115  ;;  %v9837_v63 = vsel %vm7185_vm3, %v8077_v1, %v8107_v56  ;;  %v9841_v62 = vld [vmem:[#allocation50_spill] sm:$0xff] }
 0xb03   :  { %v8333_v14 = vadd.f32 %v2536_v54, %v2535_v42  ;;  %v9842_v54 = vsel %vm7193_vm5, %v9840_v17, %v9841_v62 }
 0xb05   :  { %6117 = vtanh.f32 %v8333_v14 }
 0xb0f   :  { %v6118_v10 = vpop.eup %6117 }
 0xb10   :  { %v2539_v26 = vmul.f32 %v6118_v10, %v6116_v20 }
 0xb12   :  { %v2554_v12 = vpack.c.bf16 %v2539_v26, %v2539_v26  ;;  %2540 = vst.msk [vmem:[#allocation3 + $0x8] sm:$0xff] %vm793_vm6, %v2539_v26 }
 0xb13   :  { %2541 = vst.msk [vmem:[#allocation3 + $0x30] sm:$0xff] %vm796_vm7, %v2539_v26 }
 0xb14   :  { %2588 = vmatmul.mubr.bf16.vlgmr.msra.gmra.mrb[72].mxu0 %v2554_v12  ;;  %2629 = vmatmul.mubr.bf16.vlgmr.msra.gmra.mrb[72].mxu1 %v2554_v12 }
 0xb15   :  { %2681 = vmatpush1.bf16.msra.mxu0 %v7905_v9  ;;  %2722 = vmatpush1.bf16.msra.mxu1 %v7907_v2 }
 0xb16   :  { %2682 = vmatprep.subr.bf16.mxu0 %v7909_v8  ;;  %2723 = vmatprep.subr.bf16.mxu1 %v7911_v31 }
 0xb17   :  { %2712 = vmatprep.mubr.bf16.mxu0 %v9732_v57  ;;  %2753 = vmatprep.mubr.bf16.mxu1 %v9732_v57 }
 0xb19   :  { %2683 = vmatpush1.bf16.msra.mxu0 %v7915_v32  ;;  %2724 = vmatpush1.bf16.msra.mxu1 %v7917_v49 }
 0xb1a   :  { %2684 = vmatprep.subr.bf16.mxu0 %v7921_v3  ;;  %2725 = vmatprep.subr.bf16.mxu1 %v7923_v55 }
 0xb1d   :  { %2685 = vmatpush1.bf16.msra.mxu0 %v7929_v18  ;;  %2726 = vmatpush1.bf16.msra.mxu1 %v7931_v19 }
 0xb1e   :  { %2686 = vmatprep.subr.bf16.mxu0 %v7935_v23  ;;  %2727 = vmatprep.subr.bf16.mxu1 %v7937_v25 }
 0xb21   :  { %2687 = vmatpush1.bf16.msra.mxu0 %v7941_v29  ;;  %2728 = vmatpush1.bf16.msra.mxu1 %v7943_v30 }
 0xb22   :  { %2688 = vmatprep.subr.bf16.mxu0 %v7947_v36  ;;  %2729 = vmatprep.subr.bf16.mxu1 %v7949_v37 }
 0xb25   :  { %2689 = vmatpush1.bf16.msra.mxu0 %v7955_v40  ;;  %2730 = vmatpush1.bf16.msra.mxu1 %v7957_v41 }
 0xb26   :  { %2690 = vmatprep.subr.bf16.mxu0 %v7961_v45  ;;  %2731 = vmatprep.subr.bf16.mxu1 %v7963_v46 }
 0xb29   :  { %2691 = vmatpush1.bf16.msra.mxu0 %v7967_v47  ;;  %2732 = vmatpush1.bf16.msra.mxu1 %v7969_v13 }
 0xb2a   :  { %2692 = vmatprep.subr.bf16.mxu0 %v7973_v33  ;;  %2733 = vmatprep.subr.bf16.mxu1 %v7975_v34 }
 0xb2d   :  { %2693 = vmatpush1.bf16.msra.mxu0 %v7981_v16  ;;  %2734 = vmatpush1.bf16.msra.mxu1 %v9827_v38 }
 0xb2e   :  { %2694 = vmatprep.subr.bf16.mxu0 %v9828_v27  ;;  %2735 = vmatprep.subr.bf16.mxu1 %v9829_v60 }
 0xb31   :  { %2695 = vmatpush1.bf16.msra.mxu0 %v9830_v39  ;;  %2736 = vmatpush1.bf16.msra.mxu1 %v9831_v28 }
 0xb32   :  { %2805 = vmatprep.subr.bf16.mxu0 %v9832_v21  ;;  %2846 = vmatprep.subr.bf16.mxu1 %v9833_v43 }
 0xbe7   :  { %v2589_v7 = vpop.f32.mrb[72].mxu0  ;;  %v2630_v22 = vpop.f32.mrb[72].mxu1 }
 0xbe8   :  { %v2637_v48 = vadd.f32 %v2589_v7, %v8133_v59  ;;  %v2639_v61 = vadd.f32 %v2630_v22, %v9837_v63  ;;  %v2591_v44 = vpop.f32.mrb[73].mxu0  ;;  %v2632_v53 = vpop.f32.mrb[73].mxu1 }
 0xbe9   :  { %v2638_v6 = vadd.f32 %v2591_v44, %v9839_v4  ;;  %v2640_v59 = vadd.f32 %v2632_v53, %v9842_v54  ;;  %v2593_v51 = vpop.f32.mrb[74].mxu0  ;;  %v2634_v42 = vpop.f32.mrb[74].mxu1 }
 0xbea   :  { %v5399_v20 = vmul.f32 -1.442695, %v2637_v48  ;;  %v2594_v10 = vpop.f32.mrb[75].mxu0  ;;  %v2635_v26 = vpop.f32.mrb[75].mxu1 }
 0xbeb   :  { %v5400_v12 = vmul.f32 -1.442695, %v2638_v6  ;;  %v5401_v7 = vmul.f32 -1.442695, %v2640_v59 }
 0xbec   :  { %6119 = vpow2.f32 %v5399_v20 }
 0xbed   :  { %6121 = vpow2.f32 %v5400_v12  ;;  %v9844_v12 = vld [vmem:[#allocation42_spill] sm:$0xff] }
 0xbee   :  { %6123 = vpow2.f32 %v5401_v7  ;;  %v9845_v7 = vld [vmem:[#allocation47_spill] sm:$0xff] }
 0xbef   :  { %6125 = vtanh.f32 %v2639_v61 }
 0xbf6   :  { %v6120_v22 = vpop.eup %6119 }
 0xbf7   :  { %v6122_v63 = vpop.eup %6121  ;;  %v2644_v58 = vadd.f32 1.0, %v6120_v22  ;;  %v9846_v22 = vsel %vm7185_vm3, %v9844_v12, %v9845_v7 }
 0xbf8   :  { %v2650_v44 = vadd.f32 1.0, %v6122_v63  ;;  %v6124_v4 = vpop.eup %6123 }
 0xbf9   :  { %6127 = vrcp.f32 %v2644_v58  ;;  %v6126_v0 = vpop.eup %6125  ;;  %v2657_v48 = vadd.f32 1.0, %v6124_v4 }
 0xbfa   :  { %6129 = vrcp.f32 %v2650_v44 }
 0xbfb   :  { %6131 = vrcp.f32 %v2657_v48  ;;  %v9851_v48 = vld [vmem:[#allocation46_spill] sm:$0xff] }
 0xc03   :  { %v6128_v53 = vpop.eup %6127 }
 0xc04   :  { %v6130_v54 = vpop.eup %6129  ;;  %v2661_v51 = vmul.f32 %v6128_v53, %v6126_v0  ;;  %v9847_v53 = vld [vmem:[#allocation40_spill] sm:$0xff] }
 0xc05   :  { %v2660_v42 = vmul.f32 %v6130_v54, %v8333_v14  ;;  %v6132_v59 = vpop.eup %6131  ;;  %v9843_v14 = vld [vmem:[#allocation37_spill] sm:$0xff]  ;;  %v9848_v54 = vld [vmem:[#allocation48_spill] sm:$0xff] }
 0xc07   :  { %v8389_v6 = vadd.f32 %v2661_v51, %v2660_v42  ;;  %v9849_v51 = vsel %vm7189_vm4, %v9847_v53, %v9848_v54 }
 0xc09   :  { %6133 = vtanh.f32 %v8389_v6 }
 0xc13   :  { %v6134_v20 = vpop.eup %6133 }
 0xc14   :  { %v2664_v10 = vmul.f32 %v6134_v20, %v6132_v59 }
 0xc16   :  { %v2679_v61 = vpack.c.bf16 %v2664_v10, %v2664_v10  ;;  %2665 = vst.msk [vmem:[#allocation3 + $0x10] sm:$0xff] %vm793_vm6, %v2664_v10 }
 0xc17   :  { %2666 = vst.msk [vmem:[#allocation3 + $0x28] sm:$0xff] %vm796_vm7, %v2664_v10 }
 0xc18   :  { %2713 = vmatmul.mubr.bf16.vlgmr.msra.gmra.mrb[76].mxu0 %v2679_v61  ;;  %2754 = vmatmul.mubr.bf16.vlgmr.msra.gmra.mrb[76].mxu1 %v2679_v61 }
 0xc19   :  { %2806 = vmatpush1.bf16.msra.mxu0 %v7905_v9  ;;  %2847 = vmatpush1.bf16.msra.mxu1 %v7907_v2 }
 0xc1a   :  { %2807 = vmatprep.subr.bf16.mxu0 %v7909_v8  ;;  %2848 = vmatprep.subr.bf16.mxu1 %v7911_v31 }
 0xc1b   :  { %2837 = vmatprep.mubr.bf16.mxu0 %v9732_v57  ;;  %2878 = vmatprep.mubr.bf16.mxu1 %v9732_v57 }
 0xc1d   :  { %2808 = vmatpush1.bf16.msra.mxu0 %v7915_v32  ;;  %2849 = vmatpush1.bf16.msra.mxu1 %v7917_v49 }
 0xc1e   :  { %2809 = vmatprep.subr.bf16.mxu0 %v7921_v3  ;;  %2850 = vmatprep.subr.bf16.mxu1 %v7923_v55 }
 0xc21   :  { %2810 = vmatpush1.bf16.msra.mxu0 %v7929_v18  ;;  %2851 = vmatpush1.bf16.msra.mxu1 %v7931_v19 }
 0xc22   :  { %2811 = vmatprep.subr.bf16.mxu0 %v7935_v23  ;;  %2852 = vmatprep.subr.bf16.mxu1 %v7937_v25 }
 0xc25   :  { %2812 = vmatpush1.bf16.msra.mxu0 %v7941_v29  ;;  %2853 = vmatpush1.bf16.msra.mxu1 %v7943_v30 }
 0xc26   :  { %2813 = vmatprep.subr.bf16.mxu0 %v7947_v36  ;;  %2854 = vmatprep.subr.bf16.mxu1 %v7949_v37 }
 0xc29   :  { %2814 = vmatpush1.bf16.msra.mxu0 %v7955_v40  ;;  %2855 = vmatpush1.bf16.msra.mxu1 %v7957_v41 }
 0xc2a   :  { %2815 = vmatprep.subr.bf16.mxu0 %v7961_v45  ;;  %2856 = vmatprep.subr.bf16.mxu1 %v7963_v46 }
 0xc2d   :  { %2816 = vmatpush1.bf16.msra.mxu0 %v7967_v47  ;;  %2857 = vmatpush1.bf16.msra.mxu1 %v7969_v13 }
 0xc2e   :  { %2817 = vmatprep.subr.bf16.mxu0 %v7973_v33  ;;  %2858 = vmatprep.subr.bf16.mxu1 %v7975_v34 }
 0xc31   :  { %2818 = vmatpush1.bf16.msra.mxu0 %v7981_v16  ;;  %2859 = vmatpush1.bf16.msra.mxu1 %v9827_v38 }
 0xc32   :  { %2819 = vmatprep.subr.bf16.mxu0 %v9828_v27  ;;  %2860 = vmatprep.subr.bf16.mxu1 %v9829_v60 }
 0xc35   :  { %2820 = vmatpush1.bf16.msra.mxu0 %v9830_v39  ;;  %2861 = vmatpush1.bf16.msra.mxu1 %v9831_v28 }
 0xc36   :  { %2930 = vmatprep.subr.bf16.mxu0 %v9832_v21  ;;  %2971 = vmatprep.subr.bf16.mxu1 %v9833_v43  ;;  %v9850_v43 = vld [vmem:[#allocation43_spill] sm:$0xff] }
 0xc37   :  { %v9852_v42 = vsel %vm7193_vm5, %v9850_v43, %v9851_v48 }
 0xceb   :  { %v2714_v0 = vpop.f32.mrb[76].mxu0  ;;  %v2755_v58 = vpop.f32.mrb[76].mxu1 }
 0xcec   :  { %v2762_v26 = vadd.f32 %v2714_v0, %v9843_v14  ;;  %v2764_v63 = vadd.f32 %v2755_v58, %v9846_v22  ;;  %v2716_v44 = vpop.f32.mrb[77].mxu0  ;;  %v2757_v4 = vpop.f32.mrb[77].mxu1 }
 0xced   :  { %v2763_v21 = vadd.f32 %v2716_v44, %v9849_v51  ;;  %v2765_v59 = vadd.f32 %v2757_v4, %v9852_v42  ;;  %v2718_v20 = vpop.f32.mrb[78].mxu0  ;;  %v2759_v10 = vpop.f32.mrb[78].mxu1 }
 0xcee   :  { %v5402_v61 = vmul.f32 -1.442695, %v2762_v26  ;;  %v2719_v0 = vpop.f32.mrb[79].mxu0  ;;  %v2760_v14 = vpop.f32.mrb[79].mxu1 }
 0xcef   :  { %v5403_v58 = vmul.f32 -1.442695, %v2763_v21  ;;  %v5404_v22 = vmul.f32 -1.442695, %v2765_v59  ;;  %v8519_v0 = vld [vmem:[#allocation8 + $0x2c] ss:$16 sps:$4 sm:$0xff]  }
 0xcf0   :  { %6135 = vpow2.f32 %v5402_v61  ;;  %v8524_v14 = vld [vmem:[#allocation8 + $0x20] ss:$16 sps:$4 sm:$0xff]  }
 0xcf1   :  { %6137 = vpow2.f32 %v5403_v58  ;;  %v8527_v58 = vld [vmem:[#allocation8 + $0x28] ss:$16 sps:$4 sm:$0xff]  }
 0xcf2   :  { %6139 = vpow2.f32 %v5404_v22  ;;  %v8530_v22 = vld [vmem:[#allocation8 + $0x44] ss:$16 sps:$4 sm:$0xff]  }
 0xcf3   :  { %6141 = vtanh.f32 %v2764_v63 }
 0xcfa   :  { %v6136_v50 = vpop.eup %6135 }
 0xcfb   :  { %v6138_v35 = vpop.eup %6137  ;;  %v2769_v17 = vadd.f32 1.0, %v6136_v50 }
 0xcfc   :  { %v2775_v44 = vadd.f32 1.0, %v6138_v35  ;;  %v6140_v51 = vpop.eup %6139 }
 0xcfd   :  { %6143 = vrcp.f32 %v2769_v17  ;;  %v6142_v62 = vpop.eup %6141  ;;  %v2782_v26 = vadd.f32 1.0, %v6140_v51  ;;  %v8536_v51 = vld [vmem:[#allocation8 + $0x40] ss:$16 sps:$4 sm:$0xff]  }
 0xcfe   :  { %6145 = vrcp.f32 %v2775_v44  ;;  %v8533_v44 = vld [vmem:[#allocation8 + $0x4c] ss:$16 sps:$4 sm:$0xff]  }
 0xcff   :  { %6147 = vrcp.f32 %v2782_v26  ;;  %v8548_v26 = vld [vmem:[#allocation8 + $0x60] ss:$16 sps:$4 sm:$0xff]  }
 0xd07   :  { %v6144_v4 = vpop.eup %6143 }
 0xd08   :  { %v6146_v42 = vpop.eup %6145  ;;  %v2786_v20 = vmul.f32 %v6144_v4, %v6142_v62  ;;  %v8539_v4 = vld [vmem:[#allocation8 + $0x48] ss:$16 sps:$4 sm:$0xff]  }
 0xd09   :  { %v2785_v10 = vmul.f32 %v6146_v42, %v8389_v6  ;;  %v6148_v59 = vpop.eup %6147  ;;  %v8542_v42 = vld [vmem:[#allocation8 + $0x64] ss:$16 sps:$4 sm:$0xff]  }
 0xd0b   :  { %v8445_v21 = vadd.f32 %v2786_v20, %v2785_v10  ;;  %v8545_v20 = vld [vmem:[#allocation8 + $0x6c] ss:$16 sps:$4 sm:$0xff]   ;;  %v8551_v10 = vld [vmem:[#allocation8 + $0x68] ss:$16 sps:$4 sm:$0xff]  }
 0xd0d   :  { %6149 = vtanh.f32 %v8445_v21 }
 0xd17   :  { %v6150_v50 = vpop.eup %6149 }
 0xd18   :  { %v2789_v61 = vmul.f32 %v6150_v50, %v6148_v59  ;;  %v8557_v59 = vld [vmem:[#allocation8 + $0x8c] ss:$16 sps:$4 sm:$0xff]   ;;  %v8560_v50 = vld [vmem:[#allocation8 + $0x80] ss:$16 sps:$4 sm:$0xff]  }
 0xd1a   :  { %v2804_v63 = vpack.c.bf16 %v2789_v61, %v2789_v61  ;;  %2790 = vst.msk [vmem:[#allocation3 + $0x18] sm:$0xff] %vm793_vm6, %v2789_v61 }
 0xd1b   :  { %2791 = vst.msk [vmem:[#allocation3 + $0x20] sm:$0xff] %vm796_vm7, %v2789_v61  ;;  %v8563_v61 = vld [vmem:[#allocation8 + $0x88] ss:$16 sps:$4 sm:$0xff]  }
 0xd1c   :  { %2838 = vmatmul.mubr.bf16.vlgmr.msra.gmra.mrb[80].mxu0 %v2804_v63  ;;  %2879 = vmatmul.mubr.bf16.vlgmr.msra.gmra.mrb[80].mxu1 %v2804_v63  ;;  %v8566_v63 = vld [vmem:[#allocation8 + $0xa4] ss:$16 sps:$4 sm:$0xff]  }
 0xd1d   :  { %2931 = vmatpush1.bf16.msra.mxu0 %v7905_v9  ;;  %2972 = vmatpush1.bf16.msra.mxu1 %v7907_v2  ;;  %v8482_v9 = vld [vmem:[#allocation8 + $0x4] ss:$16 sps:$4 sm:$0xff]   ;;  %v8485_v2 = vld [vmem:[#allocation8 + $0xc] ss:$16 sps:$4 sm:$0xff]  }
 0xd1e   :  { %2932 = vmatprep.subr.bf16.mxu0 %v7909_v8  ;;  %2973 = vmatprep.subr.bf16.mxu1 %v7911_v31 }
 0xd1f   :  { %2962 = vmatprep.mubr.bf16.mxu0 %v9732_v57  ;;  %3003 = vmatprep.mubr.bf16.mxu1 %v9732_v57 }
 0xd21   :  { %2933 = vmatpush1.bf16.msra.mxu0 %v7915_v32  ;;  %2974 = vmatpush1.bf16.msra.mxu1 %v7917_v49  ;;  %v9853_v32 = vld [vmem:[#allocation33_spill] sm:$0xff] }
 0xd22   :  { %2934 = vmatprep.subr.bf16.mxu0 %v7921_v3  ;;  %2975 = vmatprep.subr.bf16.mxu1 %v7923_v55  ;;  %v9854_v3 = vsel %vm7185_vm3, %v9845_v7, %v9844_v12 }
 0xd25   :  { %2935 = vmatpush1.bf16.msra.mxu0 %v7929_v18  ;;  %2976 = vmatpush1.bf16.msra.mxu1 %v7931_v19 }
 0xd26   :  { %2936 = vmatprep.subr.bf16.mxu0 %v7935_v23  ;;  %2977 = vmatprep.subr.bf16.mxu1 %v7937_v25  ;;  %v9855_v23 = vsel %vm7189_vm4, %v9848_v54, %v9847_v53  ;;  %v8510_v54 = vld [vmem:[#allocation8] ss:$16 sps:$4 sm:$0xff]  }
 0xd29   :  { %2937 = vmatpush1.bf16.msra.mxu0 %v7941_v29  ;;  %2978 = vmatpush1.bf16.msra.mxu1 %v7943_v30  ;;  %v9856_v29 = vsel %vm7193_vm5, %v9851_v48, %v9850_v43  ;;  %v8513_v43 = vld [vmem:[#allocation8 + $0x8] ss:$16 sps:$4 sm:$0xff]   ;;  %v8516_v48 = vld [vmem:[#allocation8 + $0x24] ss:$16 sps:$4 sm:$0xff]  }
 0xd2a   :  { %2938 = vmatprep.subr.bf16.mxu0 %v7947_v36  ;;  %2979 = vmatprep.subr.bf16.mxu1 %v7949_v37 }
 0xd2d   :  { %2939 = vmatpush1.bf16.msra.mxu0 %v7955_v40  ;;  %2980 = vmatpush1.bf16.msra.mxu1 %v7957_v41 }
 0xd2e   :  { %2940 = vmatprep.subr.bf16.mxu0 %v7961_v45  ;;  %2981 = vmatprep.subr.bf16.mxu1 %v7963_v46 }
 0xd31   :  { %2941 = vmatpush1.bf16.msra.mxu0 %v7967_v47  ;;  %2982 = vmatpush1.bf16.msra.mxu1 %v7969_v13 }
 0xd32   :  { %2942 = vmatprep.subr.bf16.mxu0 %v7973_v33  ;;  %2983 = vmatprep.subr.bf16.mxu1 %v7975_v34 }
 0xd35   :  { %2943 = vmatpush1.bf16.msra.mxu0 %v7981_v16  ;;  %2984 = vmatpush1.bf16.msra.mxu1 %v9827_v38 }
 0xd36   :  { %2944 = vmatprep.subr.bf16.mxu0 %v9828_v27  ;;  %2985 = vmatprep.subr.bf16.mxu1 %v9829_v60 }
 0xd39   :  { %2945 = vmatpush1.bf16.msra.mxu0 %v9830_v39  ;;  %2986 = vmatpush1.bf16.msra.mxu1 %v9831_v28 }
 0xd3a   :  { %3055 = vmatprep.subr.bf16.mxu0 %v8482_v9  ;;  %3096 = vmatprep.subr.bf16.mxu1 %v8485_v2 }
 0xdef   :  { %v2839_v8 = vpop.f32.mrb[80].mxu0  ;;  %v2880_v31 = vpop.f32.mrb[80].mxu1 }
 0xdf0   :  { %v2887_v49 = vadd.f32 %v2839_v8, %v9853_v32  ;;  %v2889_v55 = vadd.f32 %v2880_v31, %v9854_v3  ;;  %v2841_v18 = vpop.f32.mrb[81].mxu0  ;;  %v2882_v19 = vpop.f32.mrb[81].mxu1  ;;  %v8569_v8 = vld [vmem:[#allocation8 + $0xac] ss:$16 sps:$4 sm:$0xff]   ;;  %v8572_v31 = vld [vmem:[#allocation8 + $0xa0] ss:$16 sps:$4 sm:$0xff]  }
 0xdf1   :  { %v2888_v25 = vadd.f32 %v2841_v18, %v9855_v23  ;;  %v2890_v30 = vadd.f32 %v2882_v19, %v9856_v29  ;;  %v2843_v36 = vpop.f32.mrb[82].mxu0  ;;  %v2884_v37 = vpop.f32.mrb[82].mxu1  ;;  %v8575_v32 = vld [vmem:[#allocation8 + $0xa8] ss:$16 sps:$4 sm:$0xff]   ;;  %v8581_v3 = vld [vmem:[#allocation8 + $0xcc] ss:$16 sps:$4 sm:$0xff]  }
 0xdf2   :  { %v5405_v40 = vmul.f32 -1.442695, %v2887_v49  ;;  %v2844_v41 = vpop.f32.mrb[83].mxu0  ;;  %v2885_v45 = vpop.f32.mrb[83].mxu1  ;;  %v8578_v49 = vld [vmem:[#allocation8 + $0xc4] ss:$16 sps:$4 sm:$0xff]  }
 0xdf3   :  { %v5406_v46 = vmul.f32 -1.442695, %v2888_v25  ;;  %v5407_v47 = vmul.f32 -1.442695, %v2890_v30  ;;  %v8587_v18 = vld [vmem:[#allocation8 + $0xc8] ss:$16 sps:$4 sm:$0xff]  }
 0xdf4   :  { %6151 = vpow2.f32 %v5405_v40  ;;  %v8590_v19 = vld [vmem:[#allocation8 + $0xe4] ss:$16 sps:$4 sm:$0xff]   ;;  %v8593_v23 = vld [vmem:[#allocation8 + $0xec] ss:$16 sps:$4 sm:$0xff]   ;;  %v8596_v25 = vld [vmem:[#allocation8 + $0xe0] ss:$16 sps:$4 sm:$0xff]  }
 0xdf5   :  { %6153 = vpow2.f32 %v5406_v46  ;;  %v8599_v29 = vld [vmem:[#allocation8 + $0xe8] ss:$16 sps:$4 sm:$0xff]   ;;  %v3293_v36 = vld [vmem:[%s9857_s17 + $0x8] sm:$0xff]  ;;  %v3295_v41 = vld [vmem:[%s9857_s17 + $0x18] sm:$0xff] }
 0xdf6   :  { %6155 = vpow2.f32 %v5407_v47  ;;  %v3292_v30 = vld [vmem:[%s9857_s17] sm:$0xff]  ;;  %v3294_v37 = vld [vmem:[%s9857_s17 + $0x10] sm:$0xff]  ;;  %v3309_v45 = vld [vmem:[%s9857_s17 + $0x88] sm:$0xff] }
 0xdf7   :  { %6157 = vtanh.f32 %v2889_v55  ;;  %v8584_v55 = vld [vmem:[#allocation8 + $0xc0] ss:$16 sps:$4 sm:$0xff]   ;;  %v3356_v40 = vadd.f32 %v3293_v36, %v3292_v30  ;;  %v3310_v46 = vld [vmem:[%s9857_s17 + $0x90] sm:$0xff]  ;;  %v3296_v47 = vld [vmem:[%s9857_s17 + $0x20] sm:$0xff] }
 0xdf8   :  { %v3316_v30 = vld [vmem:[%s9857_s17 + $0xc0] sm:$0xff]  ;;  %v3317_v36 = vld [vmem:[%s9857_s17 + $0xc8] sm:$0xff] }
 0xdfe   :  { %v6152_v13 = vpop.eup %6151 }
 0xdff   :  { %v6154_v33 = vpop.eup %6153  ;;  %v2894_v34 = vadd.f32 1.0, %v6152_v13 }
 0xe00   :  { %v2900_v16 = vadd.f32 1.0, %v6154_v33  ;;  %v6156_v35 = vpop.eup %6155 }
 0xe01   :  { %6159 = vrcp.f32 %v2894_v34  ;;  %v6158_v38 = vpop.eup %6157  ;;  %v2907_v28 = vadd.f32 1.0, %v6156_v35  ;;  %v3311_v34 = vld [vmem:[%s9857_s17 + $0x98] sm:$0xff]  ;;  %v3301_v35 = vld [vmem:[%s9857_s17 + $0x48] sm:$0xff] }
 0xe02   :  { %6161 = vrcp.f32 %v2900_v16  ;;  %v3300_v16 = vld [vmem:[%s9857_s17 + $0x40] sm:$0xff] }
 0xe03   :  { %6163 = vrcp.f32 %v2907_v28  ;;  %v3298_v28 = vld [vmem:[%s9857_s17 + $0x30] sm:$0xff] }
 0xe0b   :  { %v6160_v27 = vpop.eup %6159 }
 0xe0c   :  { %v6162_v60 = vpop.eup %6161  ;;  %v2911_v39 = vmul.f32 %v6160_v27, %v6158_v38  ;;  %v3297_v38 = vld [vmem:[%s9857_s17 + $0x28] sm:$0xff] }
 0xe0d   :  { %v2910_v17 = vmul.f32 %v6162_v60, %v8445_v21  ;;  %v6164_v6 = vpop.eup %6163  ;;  %v8554_v21 = vld [vmem:[#allocation8 + $0x84] ss:$16 sps:$4 sm:$0xff]   ;;  %v3302_v60 = vld [vmem:[%s9857_s17 + $0x50] sm:$0xff] }
 0xe0f   :  { %v8505_v62 = vadd.f32 %v2911_v39, %v2910_v17  ;;  %v3365_v39 = vadd.f32 %v3301_v35, %v3300_v16  ;;  %v3305_v35 = vld [vmem:[%s9857_s17 + $0x68] sm:$0xff] }
 0xe11   :  { %6165 = vtanh.f32 %v8505_v62 }
 0xe1b   :  { %v6166_v12 = vpop.eup %6165 }
 0xe1c   :  { %v2914_v7 = vmul.f32 %v6166_v12, %v6164_v6  ;;  %v3312_v6 = vld [vmem:[%s9857_s17 + $0xa0] sm:$0xff]  ;;  %v3303_v12 = vld [vmem:[%s9857_s17 + $0x58] sm:$0xff] }
 0xe1e   :  { %2915 = vst.msk [vmem:[#allocation3 + $0x20] sm:$0xff] %vm793_vm6, %v2914_v7  ;;  %v2929_v53 = vpack.c.bf16 %v2914_v7, %v2914_v7 }
 0xe1f   :  { %2916 = vst.msk [vmem:[#allocation3 + $0x18] sm:$0xff] %vm796_vm7, %v2914_v7 }
 0xe20   :  { %2963 = vmatmul.mubr.bf16.vlgmr.msra.gmra.mrb[84].mxu0 %v2929_v53  ;;  %3004 = vmatmul.mubr.bf16.vlgmr.msra.gmra.mrb[84].mxu1 %v2929_v53  ;;  %v3366_v53 = vadd.f32 %v3365_v39, %v3302_v60  ;;  %v3326_v60 = vld [vmem:[%s9857_s17 + $0x110] sm:$0xff]  ;;  %v3315_v39 = vld [vmem:[%s9857_s17 + $0xb8] sm:$0xff] }
 0xe21   :  { %3056 = vmatpush1.bf16.msra.mxu0 %v8510_v54  ;;  %3097 = vmatpush1.bf16.msra.mxu1 %v8513_v43 }
 0xe22   :  { %3057 = vmatprep.subr.bf16.mxu0 %v8516_v48  ;;  %3098 = vmatprep.subr.bf16.mxu1 %v8519_v0 }
 0xe23   :  { %3087 = vmatprep.mubr.bf16.mxu0 %v9732_v57  ;;  %3128 = vmatprep.mubr.bf16.mxu1 %v9732_v57 }
 0xe25   :  { %3058 = vmatpush1.bf16.msra.mxu0 %v8524_v14  ;;  %3099 = vmatpush1.bf16.msra.mxu1 %v8527_v58 }
 0xe26   :  { %3059 = vmatprep.subr.bf16.mxu0 %v8530_v22  ;;  %3100 = vmatprep.subr.bf16.mxu1 %v8533_v44 }
 0xe29   :  { %3060 = vmatpush1.bf16.msra.mxu0 %v8536_v51  ;;  %3101 = vmatpush1.bf16.msra.mxu1 %v8539_v4 }
 0xe2a   :  { %3061 = vmatprep.subr.bf16.mxu0 %v8542_v42  ;;  %3102 = vmatprep.subr.bf16.mxu1 %v8545_v20 }
 0xe2d   :  { %3062 = vmatpush1.bf16.msra.mxu0 %v8548_v26  ;;  %3103 = vmatpush1.bf16.msra.mxu1 %v8551_v10 }
 0xe2e   :  { %3063 = vmatprep.subr.bf16.mxu0 %v8554_v21  ;;  %3104 = vmatprep.subr.bf16.mxu1 %v8557_v59 }
 0xe31   :  { %3064 = vmatpush1.bf16.msra.mxu0 %v8560_v50  ;;  %3105 = vmatpush1.bf16.msra.mxu1 %v8563_v61 }
 0xe32   :  { %3065 = vmatprep.subr.bf16.mxu0 %v8566_v63  ;;  %3106 = vmatprep.subr.bf16.mxu1 %v8569_v8 }
 0xe35   :  { %3066 = vmatpush1.bf16.msra.mxu0 %v8572_v31  ;;  %3107 = vmatpush1.bf16.msra.mxu1 %v8575_v32 }
 0xe36   :  { %3067 = vmatprep.subr.bf16.mxu0 %v8578_v49  ;;  %3108 = vmatprep.subr.bf16.mxu1 %v8581_v3 }
 0xe39   :  { %3068 = vmatpush1.bf16.msra.mxu0 %v8584_v55  ;;  %3109 = vmatpush1.bf16.msra.mxu1 %v8587_v18 }
 0xe3a   :  { %3069 = vmatprep.subr.bf16.mxu0 %v8590_v19  ;;  %3110 = vmatprep.subr.bf16.mxu1 %v8593_v23 }
 0xe3d   :  { %3070 = vmatpush1.bf16.msra.mxu0 %v8596_v25  ;;  %3111 = vmatpush1.bf16.msra.mxu1 %v8599_v29 }
 0xe3e   :  { %3180 = vmatprep.subr.bf16.mxu0 %v8482_v9  ;;  %3221 = vmatprep.subr.bf16.mxu1 %v8485_v2  ;;  %v3308_v9 = vld [vmem:[%s9857_s17 + $0x80] sm:$0xff]  ;;  %v3357_v2 = vadd.f32 %v3356_v40, %v3294_v37  ;;  %v3318_v37 = vld [vmem:[%s9857_s17 + $0xd0] sm:$0xff]  ;;  %v3299_v40 = vld [vmem:[%s9857_s17 + $0x38] sm:$0xff] }
 0xe3f   :  { %v3374_v13 = vadd.f32 %v3309_v45, %v3308_v9  ;;  %v3313_v9 = vld [vmem:[%s9857_s17 + $0xa8] sm:$0xff]  ;;  %v3383_v45 = vadd.f32 %v3317_v36, %v3316_v30  ;;  %v3327_v36 = vld [vmem:[%s9857_s17 + $0x118] sm:$0xff] }
 0xe40   :  { %v3358_v33 = vadd.f32 %v3357_v2, %v3295_v41  ;;  %v3304_v2 = vld [vmem:[%s9857_s17 + $0x60] sm:$0xff] }
 0xe41   :  { %v3375_v27 = vadd.f32 %v3374_v13, %v3310_v46  ;;  %v3314_v46 = vld [vmem:[%s9857_s17 + $0xb0] sm:$0xff]  ;;  %v3367_v13 = vadd.f32 %v3366_v53, %v3303_v12  ;;  %v3320_v12 = vld [vmem:[%s9857_s17 + $0xe0] sm:$0xff] }
 0xe42   :  { %v3359_v17 = vadd.f32 %v3358_v33, %v3296_v47  ;;  %v3319_v33 = vld [vmem:[%s9857_s17 + $0xd8] sm:$0xff] }
 0xe43   :  { %v3376_v7 = vadd.f32 %v3375_v27, %v3311_v34  ;;  %v3324_v34 = vld [vmem:[%s9857_s17 + $0x100] sm:$0xff]  ;;  %v3325_v27 = vld [vmem:[%s9857_s17 + $0x108] sm:$0xff] }
 0xe44   :  { %v3360_v41 = vadd.f32 %v3359_v17, %v3297_v38  ;;  %v3384_v38 = vadd.f32 %v3383_v45, %v3318_v37  ;;  %v3332_v37 = vld [vmem:[%s9857_s17 + $0x140] sm:$0xff] }
 0xe45   :  { %v3377_v47 = vadd.f32 %v3376_v7, %v3312_v6  ;;  %v3368_v6 = vadd.f32 %v3367_v13, %v3304_v2  ;;  %v3392_v7 = vadd.f32 %v3325_v27, %v3324_v34  ;;  %v3307_v2 = vld [vmem:[%s9857_s17 + $0x78] sm:$0xff]  ;;  %v3334_v13 = vld [vmem:[%s9857_s17 + $0x150] sm:$0xff] }
 0xe46   :  { %v3361_v16 = vadd.f32 %v3360_v41, %v3298_v28  ;;  %v3306_v28 = vld [vmem:[%s9857_s17 + $0x70] sm:$0xff]  ;;  %v3385_v30 = vadd.f32 %v3384_v38, %v3319_v33  ;;  %v3333_v41 = vld [vmem:[%s9857_s17 + $0x148] sm:$0xff] }
 0xe47   :  { %v3378_v17 = vadd.f32 %v3377_v47, %v3313_v9  ;;  %v3369_v45 = vadd.f32 %v3368_v6, %v3305_v35  ;;  %v3393_v47 = vadd.f32 %v3392_v7, %v3326_v60  ;;  %v3401_v33 = vadd.f32 %v3333_v41, %v3332_v37  ;;  %v3335_v35 = vld [vmem:[%s9857_s17 + $0x158] sm:$0xff]  ;;  %v3340_v6 = vld [vmem:[%s9857_s17 + $0x180] sm:$0xff]  ;;  %v3342_v7 = vld [vmem:[%s9857_s17 + $0x190] sm:$0xff] }
 0xe48   :  { %v3362_v53 = vadd.f32 %v3361_v16, %v3299_v40  ;;  %v3321_v40 = vld [vmem:[%s9857_s17 + $0xe8] sm:$0xff]  ;;  %v3386_v34 = vadd.f32 %v3385_v30, %v3320_v12  ;;  %v3328_v16 = vld [vmem:[%s9857_s17 + $0x120] sm:$0xff]  ;;  %v3330_v41 = vld [vmem:[%s9857_s17 + $0x130] sm:$0xff] }
 0xe49   :  { %v3379_v9 = vadd.f32 %v3378_v17, %v3314_v46  ;;  %v3322_v46 = vld [vmem:[%s9857_s17 + $0xf0] sm:$0xff]  ;;  %v3370_v27 = vadd.f32 %v3369_v45, %v3306_v28  ;;  %v3394_v60 = vadd.f32 %v3393_v47, %v3327_v36  ;;  %v3402_v17 = vadd.f32 %v3401_v33, %v3334_v13  ;;  %v3341_v12 = vld [vmem:[%s9857_s17 + $0x188] sm:$0xff]  ;;  %v3336_v30 = vld [vmem:[%s9857_s17 + $0x160] sm:$0xff] }
 0xe4a   :  { %3363 = vadd.xlane.f32.xlu0 %v3362_v53  ;;  %v3323_v53 = vld [vmem:[%s9857_s17 + $0xf8] sm:$0xff]  ;;  %v3329_v28 = vld [vmem:[%s9857_s17 + $0x128] sm:$0xff]  ;;  %v3410_v36 = vadd.f32 %v3341_v12, %v3340_v6  ;;  %v3348_v47 = vld [vmem:[%s9857_s17 + $0x1c0] sm:$0xff] }
 0xe4b   :  { %v3380_v38 = vadd.f32 %v3379_v9, %v3315_v39  ;;  %v3387_v39 = vadd.f32 %v3386_v34, %v3321_v40  ;;  %v3371_v37 = vadd.f32 %v3370_v27, %v3307_v2  ;;  %v3395_v9 = vadd.f32 %v3394_v60, %v3328_v16  ;;  %v3343_v40 = vld [vmem:[%s9857_s17 + $0x198] sm:$0xff]  ;;  %v3337_v33 = vld [vmem:[%s9857_s17 + $0x168] sm:$0xff]  ;;  %v3350_v16 = vld [vmem:[%s9857_s17 + $0x1d0] sm:$0xff] }
 0xe4c   :  { %v3403_v45 = vadd.f32 %v3402_v17, %v3335_v35  ;;  %v3411_v2 = vadd.f32 %v3410_v36, %v3342_v7  ;;  %v3349_v34 = vld [vmem:[%s9857_s17 + $0x1c8] sm:$0xff]  ;;  %v3331_v17 = vld [vmem:[%s9857_s17 + $0x138] sm:$0xff]  ;;  %v3338_v6 = vld [vmem:[%s9857_s17 + $0x170] sm:$0xff] }
 0xe4d   :  { %3381 = vadd.xlane.f32.xlu1 %v3380_v38  ;;  %v3388_v13 = vadd.f32 %v3387_v39, %v3322_v46  ;;  %v3396_v35 = vadd.f32 %v3395_v9, %v3329_v28  ;;  %v3344_v46 = vld [vmem:[%s9857_s17 + $0x1a0] sm:$0xff]  ;;  %v3419_v27 = vadd.f32 %v3349_v34, %v3348_v47  ;;  %v3351_v7 = vld [vmem:[%s9857_s17 + $0x1d8] sm:$0xff] }
 0xe4e   :  { %3372 = vadd.xlane.f32.xlu0 %v3371_v37  ;;  %v3404_v38 = vadd.f32 %v3403_v45, %v3336_v30  ;;  %v3412_v12 = vadd.f32 %v3411_v2, %v3343_v40  ;;  %v3345_v30 = vld [vmem:[%s9857_s17 + $0x1a8] sm:$0xff]  ;;  %v3339_v36 = vld [vmem:[%s9857_s17 + $0x178] sm:$0xff]  ;;  %v3352_v9 = vld [vmem:[%s9857_s17 + $0x1e0] sm:$0xff] }
 0xe4f   :  { %v3389_v60 = vadd.f32 %v3388_v13, %v3323_v53  ;;  %v3397_v39 = vadd.f32 %v3396_v35, %v3330_v41  ;;  %v3420_v53 = vadd.f32 %v3419_v27, %v3350_v16  ;;  %v3346_v41 = vld [vmem:[%s9857_s17 + $0x1b0] sm:$0xff]  ;;  %v3347_v34 = vld [vmem:[%s9857_s17 + $0x1b8] sm:$0xff] }
 0xe50   :  { %v3405_v28 = vadd.f32 %v3404_v38, %v3337_v33  ;;  %v3413_v37 = vadd.f32 %v3412_v12, %v3344_v46  ;;  %v3353_v33 = vld [vmem:[%s9857_s17 + $0x1e8] sm:$0xff]  ;;  %v3354_v38 = vld [vmem:[%s9857_s17 + $0x1f0] sm:$0xff] }
 0xe51   :  { %3390 = vadd.xlane.f32.xlu1 %v3389_v60  ;;  %v3398_v45 = vadd.f32 %v3397_v39, %v3331_v17  ;;  %v3421_v47 = vadd.f32 %v3420_v53, %v3351_v7  ;;  %v3355_v60 = vld [vmem:[%s9857_s17 + $0x1f8] sm:$0xff] }
 0xe52   :  { %v3406_v40 = vadd.f32 %v3405_v28, %v3338_v6  ;;  %v3414_v13 = vadd.f32 %v3413_v37, %v3345_v30  ;;  %v9858_v39 = vld [vmem:[#allocation53_spill] sm:$0xff]  ;;  %v9859_v30 = vsel %vm7185_vm3, %v8107_v56, %v8077_v1 }
 0xe53   :  { %3399 = vadd.xlane.f32.xlu0 %v3398_v45  ;;  %v3422_v16 = vadd.f32 %v3421_v47, %v3352_v9  ;;  %v9860_v9 = vsel %vm7189_vm4, %v9838_v52, %v8080_v15 }
 0xe54   :  { %v3407_v2 = vadd.f32 %v3406_v40, %v3339_v36  ;;  %v3415_v35 = vadd.f32 %v3414_v13, %v3346_v41  ;;  %v9861_v40 = vld [vmem:[#allocation50_spill] sm:$0xff]  ;;  %v9862_v41 = vld [vmem:[#allocation39_spill] sm:$0xff] }
 0xe55   :  { %v3423_v46 = vadd.f32 %v3422_v16, %v3353_v33  ;;  %v9863_v47 = vsel %vm7193_vm5, %v9861_v40, %v9862_v41 }
 0xe56   :  { %3408 = vadd.xlane.f32.xlu1 %v3407_v2  ;;  %v3416_v27 = vadd.f32 %v3415_v35, %v3347_v34 }
 0xe57   :  { %v3424_v17 = vadd.f32 %v3423_v46, %v3354_v38 }
 0xe58   :  { %3417 = vadd.xlane.f32.xlu0 %v3416_v27 }
 0xe59   :  { %v3425_v6 = vadd.f32 %v3424_v17, %v3355_v60 }
 0xe5b   :  { %3426 = vadd.xlane.f32.xlu1 %v3425_v6 }
 0xed7   :  { %v3364_v40 = vpop.xlane.xlu0 %3363 }
 0xef3   :  { %v2964_v12 = vpop.f32.mrb[84].mxu0  ;;  %v3005_v7 = vpop.f32.mrb[84].mxu1 }
 0xef4   :  { %v3012_v28 = vadd.f32 %v2964_v12, %v9858_v39  ;;  %v3014_v53 = vadd.f32 %v3005_v7, %v9859_v30  ;;  %v2966_v36 = vpop.f32.mrb[85].mxu0  ;;  %v3007_v37 = vpop.f32.mrb[85].mxu1 }
 0xef5   :  { %v3013_v45 = vadd.f32 %v2966_v36, %v9860_v9  ;;  %v3015_v13 = vadd.f32 %v3007_v37, %v9863_v47  ;;  %v2968_v33 = vpop.f32.mrb[86].mxu0  ;;  %v3009_v2 = vpop.f32.mrb[86].mxu1 }
 0xef6   :  { %v5408_v34 = vmul.f32 -1.442695, %v3012_v28  ;;  %v2969_v16 = vpop.f32.mrb[87].mxu0  ;;  %v3010_v56 = vpop.f32.mrb[87].mxu1 }
 0xef7   :  { %v5409_v1 = vmul.f32 -1.442695, %v3013_v45  ;;  %v5410_v35 = vmul.f32 -1.442695, %v3015_v13  ;;  %v3382_v13 = vpop.xlane.xlu1 %3381  ;;  %v3373_v56 = vpop.xlane.xlu0 %3372 }
 0xef8   :  { %6167 = vpow2.f32 %v5408_v34 }
 0xef9   :  { %6169 = vpow2.f32 %v5409_v1 }
 0xefa   :  { %6171 = vpow2.f32 %v5410_v35  ;;  %v9874_v35 = vld [vmem:[#allocation30_spill] sm:$0xff] }
 0xefb   :  { %6173 = vtanh.f32 %v3014_v53 }
 0xf02   :  { %v6168_v38 = vpop.eup %6167 }
 0xf03   :  { %v6170_v46 = vpop.eup %6169  ;;  %v3019_v27 = vadd.f32 1.0, %v6168_v38  ;;  %v9875_v38 = vld [vmem:[#allocation36_spill] sm:$0xff] }
 0xf04   :  { %v3025_v15 = vadd.f32 1.0, %v6170_v46  ;;  %v6172_v52 = vpop.eup %6171  ;;  %v8878_v46 = vsub.s32 %v9875_v38, %v9874_v35  ;;  %v3693_v35 = vld [vmem:[%s9566_s9 + $0x190] sm:$0xff] }
 0xf05   :  { %6175 = vrcp.f32 %v3019_v27  ;;  %v6174_v60 = vpop.eup %6173  ;;  %v3032_v7 = vadd.f32 1.0, %v6172_v52  ;;  %v3429_v27 = vmul.f32 0.0009765625, %v3364_v40 }
 0xf06   :  { %6177 = vrcp.f32 %v3025_v15  ;;  %v3430_v15 = vmul.f32 0.0009765625, %v3373_v56  ;;  %v3675_v56 = vld [vmem:[%s9566_s9 + $0x100] sm:$0xff] }
 0xf07   :  { %6179 = vrcp.f32 %v3032_v7 }
 0xf0f   :  { %v6176_v17 = vpop.eup %6175 }
 0xf10   :  { %v6178_v6 = vpop.eup %6177  ;;  %v3036_v12 = vmul.f32 %v6176_v17, %v6174_v60  ;;  %v3431_v60 = vmul.f32 0.0009765625, %v3382_v13  ;;  %v3391_v17 = vpop.xlane.xlu1 %3390 }
 0xf11   :  { %v3035_v39 = vmul.f32 %v6178_v6, %v8505_v62  ;;  %v6180_v30 = vpop.eup %6179  ;;  %v3438_v62 = vld [vmem:[%s9565_s8 + $0x8] sm:$0xff]  ;;  %v3452_v6 = vrot.slane %v3429_v27, %v8878_v46  ;;  %v3432_v7 = vmul.f32 0.0009765625, %v3391_v17  ;;  %v3694_v27 = vld [vmem:[%s9566_s9 + $0x198] sm:$0xff] }
 0xf12   :  { %v3650_v17 = vld [vmem:[%s9566_s9 + $0x38] sm:$0xff] }
 0xf13   :  { %v8813_v28 = vadd.f32 %v3036_v12, %v3035_v39  ;;  %v3456_v12 = vrot.slane %v3430_v15, %v8878_v46  ;;  %v3400_v39 = vpop.xlane.xlu0 %3399 }
 0xf15   :  { %6181 = vtanh.f32 %v8813_v28 }
 0xf1f   :  { %v6182_v36 = vpop.eup %6181 }
 0xf20   :  { %v3039_v37 = vmul.f32 %v6182_v36, %v6180_v30  ;;  %v3482_v30 = vsel %vm3481_vm8, %v3456_v12, %v3452_v6  ;;  %v3433_v36 = vmul.f32 0.0009765625, %v3400_v39  ;;  %v3667_v6 = vld [vmem:[%s9566_s9 + $0xc0] sm:$0xff]  ;;  %v3668_v12 = vld [vmem:[%s9566_s9 + $0xc8] sm:$0xff]  ;;  %v5657_v39 = vpack.c.bf16 %v3694_v27, %v3693_v35  ;;  %v3658_v27 = vld [vmem:[%s9566_s9 + $0x78] sm:$0xff] }
 0xf22   :  { %3040 = vst.msk [vmem:[#allocation3 + $0x28] sm:$0xff] %vm793_vm6, %v3039_v37  ;;  %v3054_v53 = vpack.c.bf16 %v3039_v37, %v3039_v37 }
 0xf23   :  { %3041 = vst.msk [vmem:[#allocation3 + $0x10] sm:$0xff] %vm796_vm7, %v3039_v37  ;;  %v3409_v37 = vpop.xlane.xlu1 %3408 }
 0xf24   :  { %3088 = vmatmul.mubr.bf16.vlgmr.msra.gmra.mrb[88].mxu0 %v3054_v53  ;;  %3129 = vmatmul.mubr.bf16.vlgmr.msra.gmra.mrb[88].mxu1 %v3054_v53  ;;  %v3464_v53 = vrot.slane %v3432_v7, %v8878_v46 }
 0xf25   :  { %3181 = vmatpush1.bf16.msra.mxu0 %v8510_v54  ;;  %3222 = vmatpush1.bf16.msra.mxu1 %v8513_v43  ;;  %v3659_v54 = vld [vmem:[%s9566_s9 + $0x80] sm:$0xff]  ;;  %v3660_v43 = vld [vmem:[%s9566_s9 + $0x88] sm:$0xff] }
 0xf26   :  { %3182 = vmatprep.subr.bf16.mxu0 %v8516_v48  ;;  %3223 = vmatprep.subr.bf16.mxu1 %v8519_v0  ;;  %v5621_v48 = vpack.c.bf16 %v3660_v43, %v3659_v54  ;;  %v3434_v54 = vmul.f32 0.0009765625, %v3409_v37  ;;  %v3418_v43 = vpop.xlane.xlu0 %3417 }
 0xf27   :  { %3212 = vmatprep.mubr.bf16.mxu0 %v9732_v57  ;;  %3253 = vmatprep.mubr.bf16.mxu1 %v9732_v57 }
 0xf29   :  { %3183 = vmatpush1.bf16.msra.mxu0 %v8524_v14  ;;  %3224 = vmatpush1.bf16.msra.mxu1 %v8527_v58  ;;  %v9864_v58 = vld [vmem:[#allocation52_spill] sm:$0xff] }
 0xf2a   :  { %3184 = vmatprep.subr.bf16.mxu0 %v8530_v22  ;;  %3225 = vmatprep.subr.bf16.mxu1 %v8533_v44  ;;  %v9865_v44 = vld [vmem:[#allocation54_spill] sm:$0xff] }
 0xf2d   :  { %3185 = vmatpush1.bf16.msra.mxu0 %v8536_v51  ;;  %3226 = vmatpush1.bf16.msra.mxu1 %v8539_v4  ;;  %v9866_v51 = vld [vmem:[#allocation44_spill] sm:$0xff] }
 0xf2e   :  { %3186 = vmatprep.subr.bf16.mxu0 %v8542_v42  ;;  %3227 = vmatprep.subr.bf16.mxu1 %v8545_v20  ;;  %v9867_v4 = vsel %vm7185_vm3, %v9865_v44, %v9866_v51  ;;  %v3644_v44 = vld [vmem:[%s9566_s9 + $0x8] sm:$0xff]  ;;  %v3435_v51 = vmul.f32 0.0009765625, %v3418_v43 }
 0xf2f   :  { %v3652_v43 = vld [vmem:[%s9566_s9 + $0x48] sm:$0xff] }
 0xf31   :  { %3187 = vmatpush1.bf16.msra.mxu0 %v8548_v26  ;;  %3228 = vmatpush1.bf16.msra.mxu1 %v8551_v10  ;;  %v9868_v10 = vld [vmem:[#allocation55_spill] sm:$0xff] }
 0xf32   :  { %3188 = vmatprep.subr.bf16.mxu0 %v8554_v21  ;;  %3229 = vmatprep.subr.bf16.mxu1 %v8557_v59  ;;  %v9869_v21 = vld [vmem:[#allocation38_spill] sm:$0xff] }
 0xf33   :  { %v9870_v59 = vsel %vm7189_vm4, %v9868_v10, %v9869_v21  ;;  %v3472_v10 = vrot.slane %v3434_v54, %v8878_v46  ;;  %v3651_v54 = vld [vmem:[%s9566_s9 + $0x40] sm:$0xff] }
 0xf35   :  { %3189 = vmatpush1.bf16.msra.mxu0 %v8560_v50  ;;  %3230 = vmatpush1.bf16.msra.mxu1 %v8563_v61  ;;  %v9871_v61 = vld [vmem:[#allocation49_spill] sm:$0xff] }
 0xf36   :  { %3190 = vmatprep.subr.bf16.mxu0 %v8566_v63  ;;  %3231 = vmatprep.subr.bf16.mxu1 %v8569_v8  ;;  %v9872_v63 = vld [vmem:[#allocation41_spill] sm:$0xff] }
 0xf37   :  { %v9873_v8 = vsel %vm7193_vm5, %v9871_v61, %v9872_v63 }
 0xf39   :  { %3191 = vmatpush1.bf16.msra.mxu0 %v8572_v31  ;;  %3232 = vmatpush1.bf16.msra.mxu1 %v8575_v32 }
 0xf3a   :  { %3192 = vmatprep.subr.bf16.mxu0 %v8578_v49  ;;  %3233 = vmatprep.subr.bf16.mxu1 %v8581_v3 }
 0xf3d   :  { %3193 = vmatpush1.bf16.msra.mxu0 %v8584_v55  ;;  %3234 = vmatpush1.bf16.msra.mxu1 %v8587_v18 }
 0xf3e   :  { %3194 = vmatprep.subr.bf16.mxu0 %v8590_v19  ;;  %3235 = vmatprep.subr.bf16.mxu1 %v8593_v23 }
 0xf41   :  { %3195 = vmatpush1.bf16.msra.mxu0 %v8596_v25  ;;  %3236 = vmatpush1.bf16.msra.mxu1 %v8599_v29 }
 0xf42   :  { %3497 = vmatprep.subr.mxu1 %v3438_v62  ;;  %5622 = vmatprep.subr.bf16.mxu0 %v5621_v48 }
 0xff7   :  { %v3089_v0 = vpop.f32.mrb[88].mxu0  ;;  %v3130_v14 = vpop.f32.mrb[88].mxu1 }
 0xff8   :  { %v3137_v22 = vadd.f32 %v3089_v0, %v9864_v58  ;;  %v3139_v42 = vadd.f32 %v3130_v14, %v9867_v4  ;;  %v3091_v20 = vpop.f32.mrb[89].mxu0  ;;  %v3132_v26 = vpop.f32.mrb[89].mxu1  ;;  %v3468_v0 = vrot.slane %v3433_v36, %v8878_v46  ;;  %v3695_v36 = vld [vmem:[%s9566_s9 + $0x1a0] sm:$0xff] }
 0xff9   :  { %v3138_v50 = vadd.f32 %v3091_v20, %v9870_v59  ;;  %v3140_v31 = vadd.f32 %v3132_v26, %v9873_v8  ;;  %v3093_v32 = vpop.f32.mrb[90].mxu0  ;;  %v3134_v49 = vpop.f32.mrb[90].mxu1  ;;  %v3661_v20 = vld [vmem:[%s9566_s9 + $0x90] sm:$0xff]  ;;  %v3662_v26 = vld [vmem:[%s9566_s9 + $0x98] sm:$0xff] }
 0xffa   :  { %v5411_v3 = vmul.f32 -1.442695, %v3137_v22  ;;  %v3094_v55 = vpop.f32.mrb[91].mxu0  ;;  %v3135_v18 = vpop.f32.mrb[91].mxu1  ;;  %v3643_v22 = vld [vmem:[%s9566_s9] sm:$0xff]  ;;  %v3440_v8 = vld [vmem:[%s9565_s8 + $0x18] sm:$0xff] }
 0xffb   :  { %v5412_v19 = vmul.f32 -1.442695, %v3138_v50  ;;  %v5413_v23 = vmul.f32 -1.442695, %v3140_v31  ;;  %v3427_v4 = vpop.xlane.xlu1 %3426  ;;  %v3437_v50 = vld [vmem:[%s9565_s8] sm:$0xff]  ;;  %v5623_v61 = vpack.c.bf16 %v3644_v44, %v3643_v22  ;;  %v5625_v31 = vpack.c.bf16 %v3662_v26, %v3661_v20  ;;  %v3645_v32 = vld [vmem:[%s9566_s9 + $0x10] sm:$0xff] }
 0xffc   :  { %6183 = vpow2.f32 %v5411_v3  ;;  %v3436_v63 = vmul.f32 0.0009765625, %v3427_v4  ;;  %v3646_v49 = vld [vmem:[%s9566_s9 + $0x18] sm:$0xff]  ;;  %v3476_v3 = vrot.slane %v3435_v51, %v8878_v46  ;;  %v3663_v55 = vld [vmem:[%s9566_s9 + $0xa0] sm:$0xff]  ;;  %v3664_v18 = vld [vmem:[%s9566_s9 + $0xa8] sm:$0xff]  ;;  %v5639_v22 = vpack.c.bf16 %v3652_v43, %v3651_v54 }
 0xffd   :  { %6185 = vpow2.f32 %v5412_v19  ;;  %v5629_v40 = vpack.c.bf16 %v3664_v18, %v3663_v55  ;;  %v3697_v44 = vld [vmem:[%s9566_s9 + $0x1b0] sm:$0xff]  ;;  %v3698_v51 = vld [vmem:[%s9566_s9 + $0x1b8] sm:$0xff]  ;;  %v3684_v55 = vld [vmem:[%s9566_s9 + $0x148] sm:$0xff] }
 0xffe   :  { %6187 = vpow2.f32 %v5413_v23  ;;  %v6598_v23 = vmov 0.0   ;;  %v3681_v20 = vld [vmem:[%s9566_s9 + $0x130] sm:$0xff]  ;;  %v3682_v26 = vld [vmem:[%s9566_s9 + $0x138] sm:$0xff] }
 0xfff   :  { %6189 = vtanh.f32 %v3139_v42  ;;  %v9876_v43 = vld [vmem:[#allocation60_spill] sm:$0xff] }
0x1006   :  { %v6184_v25 = vpop.eup %6183 }
0x1007   :  { %v6186_v29 = vpop.eup %6185  ;;  %v3144_v9 = vadd.f32 1.0, %v6184_v25  ;;  %v3691_v25 = vld [vmem:[%s9566_s9 + $0x180] sm:$0xff] }
0x1008   :  { %v3150_v45 = vadd.f32 1.0, %v6186_v29  ;;  %v6188_v41 = vpop.eup %6187  ;;  %v5627_v29 = vpack.c.bf16 %v3646_v49, %v3645_v32 }
0x1009   :  { %6191 = vrcp.f32 %v3144_v9  ;;  %v6190_v47 = vpop.eup %6189  ;;  %v3157_v16 = vadd.f32 1.0, %v6188_v41  ;;  %v3480_v9 = vrot.slane %v3436_v63, %v8878_v46  ;;  %v3647_v41 = vld [vmem:[%s9566_s9 + $0x20] sm:$0xff]  ;;  %v3700_v63 = vld [vmem:[%s9566_s9 + $0x1c8] sm:$0xff] }
0x100a   :  { %6193 = vrcp.f32 %v3150_v45  ;;  %v3692_v45 = vld [vmem:[%s9566_s9 + $0x188] sm:$0xff] }
0x100b   :  { %6195 = vrcp.f32 %v3157_v16  ;;  %v5653_v16 = vpack.c.bf16 %v3692_v45, %v3691_v25  ;;  %v3672_v25 = vld [vmem:[%s9566_s9 + $0xe8] sm:$0xff]  ;;  %v3702_v45 = vld [vmem:[%s9566_s9 + $0x1d8] sm:$0xff] }
0x1013   :  { %v6192_v33 = vpop.eup %6191 }
0x1014   :  { %v6194_v2 = vpop.eup %6193  ;;  %v3161_v34 = vmul.f32 %v6192_v33, %v6190_v47  ;;  %v3648_v47 = vld [vmem:[%s9566_s9 + $0x28] sm:$0xff]  ;;  %v3665_v33 = vld [vmem:[%s9566_s9 + $0xb0] sm:$0xff] }
0x1015   :  { %v3160_v1 = vmul.f32 %v6194_v2, %v8813_v28  ;;  %v3460_v28 = vrot.slane %v3431_v60, %v8878_v46  ;;  %v6196_v48 = vpop.eup %6195  ;;  %v3666_v2 = vld [vmem:[%s9566_s9 + $0xb8] sm:$0xff]  ;;  %v5631_v38 = vpack.c.bf16 %v3648_v47, %v3647_v41  ;;  %v3649_v60 = vld [vmem:[%s9566_s9 + $0x30] sm:$0xff]  ;;  %v3656_v41 = vld [vmem:[%s9566_s9 + $0x68] sm:$0xff] }
0x1016   :  { %v5633_v15 = vpack.c.bf16 %v3666_v2, %v3665_v33  ;;  %v5635_v37 = vpack.c.bf16 %v3650_v17, %v3649_v60  ;;  %v3685_v33 = vld [vmem:[%s9566_s9 + $0x150] sm:$0xff]  ;;  %v3686_v2 = vld [vmem:[%s9566_s9 + $0x158] sm:$0xff]  ;;  %v3687_v17 = vld [vmem:[%s9566_s9 + $0x160] sm:$0xff] }
0x1017   :  { %v8880_v52 = vadd.f32 %v3161_v34, %v3160_v1  ;;  %v3484_v62 = vsel %vm3483_vm9, %v3460_v28, %v3482_v30  ;;  %v3439_v34 = vld [vmem:[%s9565_s8 + $0x10] sm:$0xff]  ;;  %v3676_v1 = vld [vmem:[%s9566_s9 + $0x108] sm:$0xff]  ;;  %v3678_v30 = vld [vmem:[%s9566_s9 + $0x118] sm:$0xff] }
0x1018   :  { %v3486_v58 = vsel %vm3485_vm10, %v3464_v53, %v3484_v62  ;;  %v5655_v7 = vpack.c.bf16 %v3676_v1, %v3675_v56  ;;  %v3677_v28 = vld [vmem:[%s9566_s9 + $0x110] sm:$0xff]  ;;  %v3696_v53 = vld [vmem:[%s9566_s9 + $0x1a8] sm:$0xff]  ;;  %v5637_v62 = vpack.c.bf16 %v3668_v12, %v3667_v6  ;;  %v3674_v56 = vld [vmem:[%s9566_s9 + $0xf8] sm:$0xff] }
0x1019   :  { %6197 = vtanh.f32 %v8880_v52  ;;  %v3488_v21 = vsel %vm3487_vm11, %v3468_v0, %v3486_v58  ;;  %v5661_v0 = vpack.c.bf16 %v3696_v53, %v3695_v36  ;;  %v3680_v58 = vld [vmem:[%s9566_s9 + $0x128] sm:$0xff]  ;;  %v3703_v1 = vld [vmem:[%s9566_s9 + $0x1e0] sm:$0xff]  ;;  %v3690_v36 = vld [vmem:[%s9566_s9 + $0x178] sm:$0xff] }
0x101a   :  { %v3490_v19 = vsel %vm3489_vm12, %v3472_v10, %v3488_v21  ;;  %v5667_v10 = vpack.c.bf16 %v3682_v26, %v3681_v20  ;;  %v3669_v21 = vld [vmem:[%s9566_s9 + $0xd0] sm:$0xff]  ;;  %v3688_v6 = vld [vmem:[%s9566_s9 + $0x168] sm:$0xff] }
0x101b   :  { %v3492_v13 = vsel %vm3491_vm13, %v3476_v3, %v3490_v19  ;;  %v3683_v3 = vld [vmem:[%s9566_s9 + $0x140] sm:$0xff]  ;;  %v5679_v12 = vpack.c.bf16 %v3688_v6, %v3687_v17  ;;  %v5877_v53 = vld [vmem:[#allocation11 + $0x4] ss:$8 sps:$4 sm:$0xff]  }
0x101c   :  { %v3494_v46 = vsel %vm3493_vm14, %v3480_v9, %v3492_v13  ;;  %v5671_v18 = vpack.c.bf16 %v3684_v55, %v3683_v3  ;;  %v3671_v19 = vld [vmem:[%s9566_s9 + $0xe0] sm:$0xff]  ;;  %v5889_v17 = vld [vmem:[#allocation11 + $0x44] ss:$8 sps:$4 sm:$0xff]  }
0x101d   :  { %v5645_v9 = vpack.c.bf16 %v3672_v25, %v3671_v19  ;;  %v5905_v6 = vld [vmem:[%s9568_s11 + $0x20] ss:$8 sps:$4 sm:$0xff]  }
0x1023   :  { %v6198_v14 = vpop.eup %6197 }
0x1024   :  { %v3164_v42 = vmul.f32 %v6198_v14, %v6196_v48  ;;  %v5659_v48 = vpack.c.bf16 %v3678_v30, %v3677_v28  ;;  %v3679_v14 = vld [vmem:[%s9566_s9 + $0x120] sm:$0xff]  ;;  %v3689_v30 = vld [vmem:[%s9566_s9 + $0x170] sm:$0xff] }
0x1025   :  { %v5663_v4 = vpack.c.bf16 %v3680_v58, %v3679_v14  ;;  %v9878_v14 = vld [vmem:[#allocation34_spill] sm:$0xff] }
0x1026   :  { %3165 = vst.msk [vmem:[#allocation3 + $0x30] sm:$0xff] %vm793_vm6, %v3164_v42  ;;  %v3179_v59 = vpack.c.bf16 %v3164_v42, %v3164_v42 }
0x1027   :  { %3166 = vst.msk [vmem:[#allocation3 + $0x8] sm:$0xff] %vm796_vm7, %v3164_v42  ;;  %v5665_v42 = vpack.c.bf16 %v3698_v51, %v3697_v44 }
0x1028   :  { %3213 = vmatmul.mubr.bf16.vlgmr.msra.gmra.mrb[92].mxu0 %v3179_v59  ;;  %3254 = vmatmul.mubr.bf16.vlgmr.msra.gmra.mrb[92].mxu1 %v3179_v59  ;;  %v3670_v59 = vld [vmem:[%s9566_s9 + $0xd8] sm:$0xff] }
0x1029   :  { %3498 = vmatpush1.msra.mxu1 %v3437_v50  ;;  %3561 = vmatprep.mubr.f32.mxu1 %v6598_v23  ;;  %v3699_v50 = vld [vmem:[%s9566_s9 + $0x1c0] sm:$0xff] }
0x102a   :  { %3568 = vmatprep.subr.mxu1 %v3440_v8  ;;  %5624 = vmatpush3.bf16.msra.mxu0 %v5623_v61  ;;  %v5641_v61 = vpack.c.bf16 %v3670_v59, %v3669_v21  ;;  %v3653_v8 = vld [vmem:[%s9566_s9 + $0x50] sm:$0xff]  ;;  %v5669_v32 = vpack.c.bf16 %v3700_v63, %v3699_v50  ;;  %v9884_v21 = vld [vmem:[#allocation59_spill] sm:$0xff] }
0x102b   :  { %5626 = vmatprep.subr.bf16.mxu0 %v5625_v31  ;;  %v3654_v31 = vld [vmem:[%s9566_s9 + $0x58] sm:$0xff] }
0x102c   :  { %v5643_v49 = vpack.c.bf16 %v3654_v31, %v3653_v8 }
0x102e   :  { %5628 = vmatpush3.bf16.msra.mxu0 %v5627_v29  ;;  %v3701_v29 = vld [vmem:[%s9566_s9 + $0x1d0] sm:$0xff] }
0x102f   :  { %5630 = vmatprep.subr.bf16.mxu0 %v5629_v40  ;;  %v3655_v40 = vld [vmem:[%s9566_s9 + $0x60] sm:$0xff]  ;;  %v5673_v47 = vpack.c.bf16 %v3702_v45, %v3701_v29  ;;  %v5875_v29 = vld [vmem:[#allocation11] ss:$8 sps:$4 sm:$0xff]  }
0x1030   :  { %5417 = vmatmul.mubr.msk.f32.vlgmr.msra.gmra.mrb[96].mxu1 %vm269_vm1, %v3494_v46  ;;  %v5647_v13 = vpack.c.bf16 %v3656_v41, %v3655_v40  ;;  %v5880_v40 = vld [vmem:[#allocation11 + $0x14] ss:$8 sps:$4 sm:$0xff]  }
0x1031   :  { %3569 = vmatpush1.msra.mxu1 %v3439_v34  ;;  %3632 = vmatprep.mubr.f32.mxu1 %v6598_v23  ;;  %v5675_v34 = vpack.c.bf16 %v3686_v2, %v3685_v33  ;;  %v5878_v33 = vld [vmem:[#allocation11 + $0x10] ss:$8 sps:$4 sm:$0xff]   ;;  %v5883_v2 = vld [vmem:[#allocation11 + $0x24] ss:$8 sps:$4 sm:$0xff]  }
0x1032   :  { %5654 = vmatprep.subr.bf16.mxu1 %v5653_v16  ;;  %5632 = vmatpush3.bf16.msra.mxu0 %v5631_v38  ;;  %v3673_v16 = vld [vmem:[%s9566_s9 + $0xf0] sm:$0xff]  ;;  %v3704_v38 = vld [vmem:[%s9566_s9 + $0x1e8] sm:$0xff] }
0x1033   :  { %5634 = vmatprep.subr.bf16.mxu0 %v5633_v15  ;;  %v5649_v35 = vpack.c.bf16 %v3674_v56, %v3673_v16  ;;  %v5677_v15 = vpack.c.bf16 %v3704_v38, %v3703_v1  ;;  %v5901_v16 = vld [vmem:[%s9568_s11 + $0x4] ss:$8 sps:$4 sm:$0xff]   ;;  %v5904_v56 = vld [vmem:[%s9568_s11 + $0x14] ss:$8 sps:$4 sm:$0xff]   ;;  %v5902_v38 = vld [vmem:[%s9568_s11 + $0x10] ss:$8 sps:$4 sm:$0xff]  }
0x1034   :  { %5418 = vmatmul.mubr.msk.f32.vlgmr.msra.gmra.mrb[98].mxu1 %vm269_vm1, %v3494_v46  ;;  %v3657_v46 = vld [vmem:[%s9566_s9 + $0x70] sm:$0xff] }
0x1035   :  { %5656 = vmatpush3.bf16.msra.mxu1 %v5655_v7  ;;  %v5651_v60 = vpack.c.bf16 %v3658_v27, %v3657_v46  ;;  %v3705_v7 = vld [vmem:[%s9566_s9 + $0x1f0] sm:$0xff]  ;;  %v5907_v46 = vld [vmem:[%s9568_s11 + $0x24] ss:$8 sps:$4 sm:$0xff]  }
0x1036   :  { %5658 = vmatprep.subr.bf16.mxu1 %v5657_v39  ;;  %5636 = vmatpush3.bf16.msra.mxu0 %v5635_v37  ;;  %v3706_v39 = vld [vmem:[%s9566_s9 + $0x1f8] sm:$0xff]  ;;  %v5683_v37 = vpack.c.bf16 %v3690_v36, %v3689_v30  ;;  %v5881_v1 = vld [vmem:[#allocation11 + $0x20] ss:$8 sps:$4 sm:$0xff]  }
0x1037   :  { %5638 = vmatprep.subr.bf16.mxu0 %v5637_v62  ;;  %v5681_v28 = vpack.c.bf16 %v3706_v39, %v3705_v7  ;;  %v5910_v7 = vld [vmem:[%s9568_s11 + $0x34] ss:$8 sps:$4 sm:$0xff]  }
0x1039   :  { %5660 = vmatpush3.bf16.msra.mxu1 %v5659_v48 }
0x103a   :  { %5662 = vmatprep.subr.bf16.mxu1 %v5661_v0  ;;  %5640 = vmatpush3.bf16.msra.mxu0 %v5639_v22  ;;  %v9877_v0 = vld [vmem:[#allocation56_spill] sm:$0xff] }
0x103b   :  { %5642 = vmatprep.subr.bf16.mxu0 %v5641_v61  ;;  %v9879_v58 = vsel %vm7185_vm3, %v9877_v0, %v9878_v14  ;;  %v5911_v0 = vld [vmem:[%s9568_s11 + $0x40] ss:$8 sps:$4 sm:$0xff]   ;;  %v5916_v14 = vld [vmem:[%s9568_s11 + $0x54] ss:$8 sps:$4 sm:$0xff]  }
0x103d   :  { %5664 = vmatpush3.bf16.msra.mxu1 %v5663_v4  ;;  %v9880_v4 = vld [vmem:[#allocation51_spill] sm:$0xff] }
0x103e   :  { %5666 = vmatprep.subr.bf16.mxu1 %v5665_v42  ;;  %5644 = vmatpush3.bf16.msra.mxu0 %v5643_v49  ;;  %v9881_v42 = vld [vmem:[#allocation35_spill] sm:$0xff] }
0x103f   :  { %5646 = vmatprep.subr.bf16.mxu0 %v5645_v9  ;;  %v9882_v20 = vsel %vm7189_vm4, %v9880_v4, %v9881_v42 }
0x1041   :  { %5668 = vmatpush3.bf16.msra.mxu1 %v5667_v10  ;;  %v9883_v10 = vld [vmem:[#allocation57_spill] sm:$0xff] }
0x1042   :  { %5670 = vmatprep.subr.bf16.mxu1 %v5669_v32  ;;  %5648 = vmatpush3.bf16.msra.mxu0 %v5647_v13  ;;  %v9885_v59 = vsel %vm7193_vm5, %v9883_v10, %v9884_v21  ;;  %v3993_v10 = vld [vmem:[#allocation3 + $0x8] sm:$0xff] }
0x1043   :  { %5650 = vmatprep.subr.bf16.mxu0 %v5649_v35  ;;  %v5886_v35 = vld [vmem:[#allocation11 + $0x34] ss:$8 sps:$4 sm:$0xff]  }
0x1045   :  { %5672 = vmatpush3.bf16.msra.mxu1 %v5671_v18 }
0x1046   :  { %5674 = vmatprep.subr.bf16.mxu1 %v5673_v47  ;;  %5652 = vmatpush3.bf16.msra.mxu0 %v5651_v60 }
0x1047   :  { %3951 = vmatprep.subr.bf16.mxu0 %v5901_v16  ;;  %v9218_v16 = vld [vmem:[%s9570_s13 + $0x30] ss:$8 sps:$4 sm:$0xff]  }
0x1049   :  { %5676 = vmatpush3.bf16.msra.mxu1 %v5675_v34  ;;  %v5899_v34 = vld [vmem:[%s9568_s11] ss:$8 sps:$4 sm:$0xff]  }
0x104a   :  { %5678 = vmatprep.subr.bf16.mxu1 %v5677_v15  ;;  %v5884_v15 = vld [vmem:[#allocation11 + $0x30] ss:$8 sps:$4 sm:$0xff]  }
0x104d   :  { %5680 = vmatpush3.bf16.msra.mxu1 %v5679_v12 }
0x104e   :  { %5682 = vmatprep.subr.bf16.mxu1 %v5681_v28 }
0x1051   :  { %5684 = vmatpush3.bf16.msra.mxu1 %v5683_v37  ;;  %v5887_v37 = vld [vmem:[#allocation11 + $0x40] ss:$8 sps:$4 sm:$0xff]  }
0x1052   :  { %4108 = vmatprep.subr.bf16.mxu1 %v5877_v53  ;;  %v5892_v53 = vld [vmem:[#allocation11 + $0x54] ss:$8 sps:$4 sm:$0xff]  }
0x10fb   :  { %v3214_v62 = vpop.f32.mrb[92].mxu0  ;;  %v3255_v54 = vpop.f32.mrb[92].mxu1 }
0x10fc   :  { %v3262_v48 = vadd.f32 %v3214_v62, %v9876_v43  ;;  %v3264_v22 = vadd.f32 %v3255_v54, %v9879_v58  ;;  %v3216_v44 = vpop.f32.mrb[93].mxu0  ;;  %v3257_v51 = vpop.f32.mrb[93].mxu1  ;;  %v5908_v62 = vld [vmem:[%s9568_s11 + $0x30] ss:$8 sps:$4 sm:$0xff]   ;;  %v5913_v43 = vld [vmem:[%s9568_s11 + $0x44] ss:$8 sps:$4 sm:$0xff]  }
0x10fd   :  { %v3263_v26 = vadd.f32 %v3216_v44, %v9882_v20  ;;  %v3265_v50 = vadd.f32 %v3257_v51, %v9885_v59  ;;  %v3218_v61 = vpop.f32.mrb[94].mxu0  ;;  %v3259_v5 = vpop.f32.mrb[94].mxu1  ;;  %v5893_v58 = vld [vmem:[#allocation11 + $0x60] ss:$8 sps:$4 sm:$0xff]   ;;  %v5914_v44 = vld [vmem:[%s9568_s11 + $0x50] ss:$8 sps:$4 sm:$0xff]  }
0x10fe   :  { %v5414_v63 = vmul.f32 -1.442695, %v3262_v48  ;;  %v3219_v8 = vpop.f32.mrb[95].mxu0  ;;  %v3260_v31 = vpop.f32.mrb[95].mxu1  ;;  %v5895_v48 = vld [vmem:[#allocation11 + $0x64] ss:$8 sps:$4 sm:$0xff]  }
0x10ff   :  { %v5415_v32 = vmul.f32 -1.442695, %v3263_v26  ;;  %v5416_v18 = vmul.f32 -1.442695, %v3265_v50  ;;  %v5896_v51 = vld [vmem:[#allocation11 + $0x70] ss:$8 sps:$4 sm:$0xff]  }
0x1100   :  { %6199 = vpow2.f32 %v5414_v63  ;;  %v3994_v59 = vld [vmem:[#allocation3 + $0x10] sm:$0xff]  ;;  %v3995_v50 = vld [vmem:[#allocation3 + $0x18] sm:$0xff]  ;;  %v3996_v5 = vld [vmem:[#allocation3 + $0x20] sm:$0xff] }
0x1101   :  { %6201 = vpow2.f32 %v5415_v32  ;;  %v3998_v61 = vpack.c.bf16 %v3995_v50, %v3994_v59  ;;  %v3999_v63 = vpack.c.bf16 %v3996_v5, %v3996_v5  ;;  %v5919_v8 = vld [vmem:[%s9568_s11 + $0x64] ss:$8 sps:$4 sm:$0xff]   ;;  %v5917_v31 = vld [vmem:[%s9568_s11 + $0x60] ss:$8 sps:$4 sm:$0xff]   ;;  %v5922_v32 = vld [vmem:[%s9568_s11 + $0x74] ss:$8 sps:$4 sm:$0xff]  }
0x1102   :  { %6203 = vpow2.f32 %v5416_v18 }
0x1103   :  { %v3563_v49 = vpop.f32.mrb[96].mxu1  ;;  %6205 = vtanh.f32 %v3264_v22  ;;  %v5898_v22 = vld [vmem:[#allocation11 + $0x74] ss:$8 sps:$4 sm:$0xff]  }
0x1104   :  { %v3565_v11 = vpop.f32.mrb[97].mxu1  ;;  %v3639_v55 = vmax.f32 %v3563_v49, 0.0  ;;  %v5920_v49 = vld [vmem:[%s9568_s11 + $0x70] ss:$8 sps:$4 sm:$0xff]  }
0x1105   :  { %v3640_v3 = vmax.f32 %v3565_v11, 0.0  ;;  %v9173_v11 = vld [vmem:[%s9570_s13 + $0x4] ss:$8 sps:$4 sm:$0xff]  }
0x1107   :  { %v3634_v19 = vpop.f32.mrb[98].mxu1  ;;  %3778 = vmatprep.mubr.f32.mxu0 %v3640_v3 }
0x1108   :  { %v3636_v24 = vpop.f32.mrb[99].mxu1  ;;  %3779 = vmatmul.mubr.f32.vlgmr.msra.gmra.mrb[96].mxu0 %v3639_v55  ;;  %v3641_v45 = vmax.f32 %v3634_v19, 0.0  ;;  %v5419_v19 = vld [vmem:[%s9567_s10] ss:$0 sm:$0xff] }
0x1109   :  { %v3642_v25 = vmax.f32 %v3636_v24, 0.0  ;;  %3983 = vmatprep.mubr.bf16.mxu0 %v9732_v57  ;;  %3952 = vmatpush1.bf16.msra.mxu0 %v5899_v34  ;;  %v9212_v34 = vld [vmem:[%s9570_s13 + $0x34] ss:$8 sps:$4 sm:$0xff]  }
0x110a   :  { %v6200_v9 = vpop.eup %6199  ;;  %3953 = vmatprep.subr.bf16.mxu0 %v5904_v56 }
0x110b   :  { %v6202_v41 = vpop.eup %6201  ;;  %v3269_v47 = vadd.f32 1.0, %v6200_v9  ;;  %3848 = vmatprep.mubr.f32.mxu1 %v3642_v25 }
0x110c   :  { %v3275_v13 = vadd.f32 1.0, %v6202_v41  ;;  %3849 = vmatmul.mubr.f32.vlgmr.msra.gmra.mrb[100].mxu1 %v3641_v45  ;;  %v6204_v27 = vpop.eup %6203 }
0x110d   :  { %6207 = vrcp.f32 %v3269_v47  ;;  %4109 = vmatpush1.bf16.msra.mxu1 %v5875_v29  ;;  %4140 = vmatprep.mubr.bf16.mxu1 %v9732_v57  ;;  %v6206_v60 = vpop.eup %6205  ;;  %v3282_v28 = vadd.f32 1.0, %v6204_v27  ;;  %v9187_v47 = vld [vmem:[%s9570_s13 + $0x14] ss:$8 sps:$4 sm:$0xff]  }
0x110e   :  { %6209 = vrcp.f32 %v3275_v13  ;;  %4110 = vmatprep.subr.bf16.mxu1 %v5880_v40  ;;  %3954 = vmatpush1.bf16.msra.mxu0 %v5902_v38  ;;  %v9182_v40 = vld [vmem:[%s9570_s13] ss:$8 sps:$4 sm:$0xff]   ;;  %v9193_v13 = vld [vmem:[%s9570_s13 + $0x10] ss:$8 sps:$4 sm:$0xff]  }
0x110f   :  { %3955 = vmatprep.subr.bf16.mxu0 %v5907_v46  ;;  %6211 = vrcp.f32 %v3282_v28 }
0x1111   :  { %4111 = vmatpush1.bf16.msra.mxu1 %v5878_v33  ;;  %v9200_v33 = vld [vmem:[%s9570_s13 + $0x24] ss:$8 sps:$4 sm:$0xff]  }
0x1112   :  { %4112 = vmatprep.subr.bf16.mxu1 %v5883_v2  ;;  %3956 = vmatpush1.bf16.msra.mxu0 %v5905_v6  ;;  %v9206_v2 = vld [vmem:[%s9570_s13 + $0x20] ss:$8 sps:$4 sm:$0xff]  }
0x1113   :  { %3957 = vmatprep.subr.bf16.mxu0 %v5910_v7  ;;  %v4016_v6 = vld [vmem:[%s9571_s14] sm:$0x3] }
0x1115   :  { %4113 = vmatpush1.bf16.msra.mxu1 %v5881_v1 }
0x1116   :  { %4114 = vmatprep.subr.bf16.mxu1 %v5886_v35  ;;  %3958 = vmatpush1.bf16.msra.mxu0 %v5908_v62 }
0x1117   :  { %v6208_v12 = vpop.eup %6207  ;;  %3959 = vmatprep.subr.bf16.mxu0 %v5913_v43 }
0x1118   :  { %v6210_v39 = vpop.eup %6209  ;;  %v3286_v30 = vmul.f32 %v6208_v12, %v6206_v60  ;;  %v9886_v12 = vld [vmem:[#allocation31_spill] sm:$0xff] }
0x1119   :  { %v3285_v36 = vmul.f32 %v6210_v39, %v8880_v52  ;;  %4115 = vmatpush1.bf16.msra.mxu1 %v5884_v15  ;;  %v5890_v52 = vld [vmem:[#allocation11 + $0x50] ss:$8 sps:$4 sm:$0xff]   ;;  %v6212_v4 = vpop.eup %6211  ;;  %v9238_v7 = vrot.slane %v4016_v6, %v9886_v12  ;;  %v9887_v39 = vld [vmem:[#allocation32_spill] sm:$0xff] }
0x111a   :  { %4116 = vmatprep.subr.bf16.mxu1 %v5889_v17  ;;  %3960 = vmatpush1.bf16.msra.mxu0 %v5911_v0  ;;  %v9241_v28 = vrot.slane %v4016_v6, %v9887_v39 }
0x111b   :  { %v3287_v54 = vadd.f32 %v3286_v30, %v3285_v36  ;;  %3961 = vmatprep.subr.bf16.mxu0 %v5916_v14 }
0x111d   :  { %4320 = vrot.lane.b32.xlu0 %v3287_v54, %s6599_s1  ;;  %6213 = vtanh.f32 %v3287_v54  ;;  %4117 = vmatpush1.bf16.msra.mxu1 %v5887_v37 }
0x111e   :  { %4118 = vmatprep.subr.bf16.mxu1 %v5892_v53  ;;  %3962 = vmatpush1.bf16.msra.mxu0 %v5914_v44 }
0x111f   :  { %3963 = vmatprep.subr.bf16.mxu0 %v5919_v8 }
0x1121   :  { %4119 = vmatpush1.bf16.msra.mxu1 %v5890_v52 }
0x1122   :  { %4120 = vmatprep.subr.bf16.mxu1 %v5895_v48  ;;  %3964 = vmatpush1.bf16.msra.mxu0 %v5917_v31 }
0x1123   :  { %3965 = vmatprep.subr.bf16.mxu0 %v5922_v32 }
0x1125   :  { %4121 = vmatpush1.bf16.msra.mxu1 %v5893_v58 }
0x1126   :  { %4122 = vmatprep.subr.bf16.mxu1 %v5898_v22  ;;  %3966 = vmatpush1.bf16.msra.mxu0 %v5920_v49 }
0x1127   :  { %v6214_v42 = vpop.eup %6213  ;;  %4263 = vmatprep.subr.bf16.mxu0 %v9173_v11 }
0x1128   :  { %v9149_v20 = vmul.f32 %v6214_v42, %v6212_v4 }
0x1129   :  { %4123 = vmatpush1.bf16.msra.mxu1 %v5896_v51 }
0x112a   :  { %3290 = vst.msk [vmem:[#allocation3 + $0x38] sm:$0xff] %vm793_vm6, %v9149_v20  ;;  %v4219_v56 = vpack.c.bf16 %v9149_v20, %v9149_v20 }
0x112b   :  { %3291 = vst.msk [vmem:[#allocation3] sm:$0xff] %vm796_vm7, %v9149_v20 }
0x1132   :  { %v3992_v26 = vld [vmem:[#allocation3] sm:$0xff] }
0x1133   :  { %v3997_v21 = vpack.c.bf16 %v3993_v10, %v3992_v26 }
0x1135   :  { %4141 = vmatmul.mubr.bf16.vlgmr.msra.gmra.mrb[104].mxu1 %v3997_v21 }
0x1136   :  { %4150 = vmatprep.mubr.bf16.mxu1 %v9732_v57 }
0x113d   :  { %4151 = vmatmul.mubr.bf16.gmra.mrb[108].mxu1 %v3998_v61 }
0x113e   :  { %4160 = vmatprep.mubr.bf16.mxu1 %v9732_v57 }
0x1145   :  { %4161 = vmatmul.mubr.bf16.gmra.mrb[112].mxu1 %v3999_v63 }
0x1146   :  { %4465 = vmatprep.mubr.bf16.mxu1 %v9732_v57 }
0x11db   :  { %v5539_v3 = vpop.f32.mrb[96].mxu0 }
0x11dc   :  { %v5540_v55 = vpop.f32.mrb[97].mxu0 }
0x11dd   :  { %v5541_v18 = vadd.f32 %v5540_v55, %v5539_v3 }
0x11df   :  { %v5574_v24 = vpop.f32.mrb[100].mxu1  ;;  %v3781_v29 = vadd.f32 %v5541_v18, %v5419_v19  ;;  %v9276_v19 = vld [vmem:[#allocation13 + $0x4] ss:$8 sps:$4 sm:$0xff]  }
0x11e0   :  { %v5575_v25 = vpop.f32.mrb[101].mxu1  ;;  %4433 = vmatprep.subr.bf16.mxu1 %v9276_v19 }
0x11e1   :  { %v5576_v9 = vadd.f32 %v5575_v25, %v5574_v24  ;;  %v9278_v24 = vld [vmem:[#allocation13] ss:$8 sps:$4 sm:$0xff]   ;;  %v9280_v25 = vld [vmem:[#allocation13 + $0x14] ss:$8 sps:$4 sm:$0xff]  }
0x11e2   :  { %4434 = vmatpush1.bf16.msra.mxu1 %v9278_v24 }
0x11e3   :  { %v3851_v45 = vadd.f32 %v5576_v9, %v3781_v29  ;;  %v9285_v29 = vld [vmem:[#allocation13 + $0x10] ss:$8 sps:$4 sm:$0xff]   ;;  %4435 = vmatprep.subr.bf16.mxu1 %v9280_v25  ;;  %v9288_v9 = vld [vmem:[#allocation13 + $0x24] ss:$8 sps:$4 sm:$0xff]  }
0x11e5   :  { %v3854_v41 = vpack.c.bf16 %v3851_v45, %v3851_v45  ;;  %v9291_v45 = vld [vmem:[#allocation13 + $0x20] ss:$8 sps:$4 sm:$0xff]  }
0x11e6   :  { %4436 = vmatpush1.bf16.msra.mxu1 %v9285_v29 }
0x11e7   :  { %3984 = vmatmul.mubr.bf16.vlgmr.msra.gmra.mrb[100].mxu0 %v3854_v41  ;;  %4437 = vmatprep.subr.bf16.mxu1 %v9288_v9  ;;  %v9294_v41 = vld [vmem:[#allocation13 + $0x34] ss:$8 sps:$4 sm:$0xff]  }
0x11e8   :  { %4264 = vmatpush1.bf16.msra.mxu0 %v9182_v40  ;;  %4295 = vmatprep.mubr.bf16.mxu0 %v9732_v57 }
0x11e9   :  { %4265 = vmatprep.subr.bf16.mxu0 %v9187_v47 }
0x11ea   :  { %4438 = vmatpush1.bf16.msra.mxu1 %v9291_v45 }
0x11eb   :  { %4439 = vmatprep.subr.bf16.mxu1 %v9294_v41 }
0x11ec   :  { %4266 = vmatpush1.bf16.msra.mxu0 %v9193_v13 }
0x11ed   :  { %4267 = vmatprep.subr.bf16.mxu0 %v9200_v33 }
0x11f0   :  { %4268 = vmatpush1.bf16.msra.mxu0 %v9206_v2 }
0x11f1   :  { %4269 = vmatprep.subr.bf16.mxu0 %v9212_v34 }
0x11f4   :  { %4270 = vmatpush1.bf16.msra.mxu0 %v9218_v16 }
0x11f5   :  { %4513 = vmatprep.subr.bf16.mxu0 %v9173_v11 }
0x11f7   :  { %5460 = vmatmul.mubr.msk.bf16.vlgmr.msra.gmra.mrb[104].mxu0 %vm793_vm6, %v4219_v56  ;;  %v9297_v56 = vld [vmem:[#allocation13 + $0x30] ss:$8 sps:$4 sm:$0xff]  }
0x11f8   :  { %4514 = vmatpush1.bf16.msra.mxu0 %v9182_v40  ;;  %4545 = vmatprep.mubr.bf16.mxu0 %v9732_v57 }
0x11f9   :  { %4515 = vmatprep.subr.bf16.mxu0 %v9187_v47  ;;  %4440 = vmatpush1.bf16.msra.mxu1 %v9297_v56 }
0x11fc   :  { %4516 = vmatpush1.bf16.msra.mxu0 %v9193_v13 }
0x11fd   :  { %4517 = vmatprep.subr.bf16.mxu0 %v9200_v33 }
0x1200   :  { %4518 = vmatpush1.bf16.msra.mxu0 %v9206_v2 }
0x1201   :  { %4519 = vmatprep.subr.bf16.mxu0 %v9212_v34 }
0x1204   :  { %4520 = vmatpush1.bf16.msra.mxu0 %v9218_v16 }
0x1205   :  { %4584 = vmatprep.subr.bf16.mxu0 %v9276_v19 }
0x1208   :  { %v4142_v1 = vpop.f32.mrb[104].mxu1 }
0x1209   :  { %v4144_v35 = vpop.f32.mrb[105].mxu1  ;;  %v4143_v30 = vadd.f32 %v4142_v1, %v9238_v7  ;;  %v9300_v1 = vld [vmem:[#allocation13 + $0x44] ss:$8 sps:$4 sm:$0xff]  }
0x120a   :  { %v4146_v38 = vpop.f32.mrb[106].mxu1  ;;  %v4145_v62 = vadd.f32 %v4144_v35, %v9241_v28  ;;  %v9303_v35 = vld [vmem:[#allocation13 + $0x40] ss:$8 sps:$4 sm:$0xff]   ;;  %4441 = vmatprep.subr.bf16.mxu1 %v9300_v1 }
0x120b   :  { %v4148_v46 = vpop.f32.mrb[107].mxu1  ;;  %v4147_v36 = vadd.f32 %v4146_v38, %v9238_v7  ;;  %v9306_v38 = vld [vmem:[#allocation13 + $0x54] ss:$8 sps:$4 sm:$0xff]   ;;  %4442 = vmatpush1.bf16.msra.mxu1 %v9303_v35 }
0x120c   :  { %v4149_v54 = vadd.f32 %v4148_v46, %v9241_v28  ;;  %v9309_v46 = vld [vmem:[#allocation13 + $0x50] ss:$8 sps:$4 sm:$0xff]   ;;  %4443 = vmatprep.subr.bf16.mxu1 %v9306_v38 }
0x120f   :  { %4444 = vmatpush1.bf16.msra.mxu1 %v9309_v46 }
0x1210   :  { %v4152_v27 = vpop.f32.mrb[108].mxu1 }
0x1211   :  { %v4154_v15 = vpop.f32.mrb[109].mxu1  ;;  %v4153_v37 = vadd.f32 %v4152_v27, %v9238_v7 }
0x1212   :  { %v4156_v60 = vpop.f32.mrb[110].mxu1  ;;  %v4155_v43 = vadd.f32 %v4154_v15, %v9241_v28 }
0x1213   :  { %v4158_v17 = vpop.f32.mrb[111].mxu1  ;;  %v4157_v53 = vadd.f32 %v4156_v60, %v9238_v7  ;;  %v9313_v60 = vpop.permute.xlu0 %4320 }
0x1214   :  { %v4159_v52 = vadd.f32 %v4158_v17, %v9241_v28 }
0x12ba   :  { %v9251_v48 = vpop.f32.mrb[100].mxu0 }
0x12bb   :  { %v9253_v0 = vpop.f32.mrb[101].mxu0  ;;  %v4169_v14 = vadd.f32 %v4143_v30, %v9251_v48  ;;  %v9257_v58 = vadd.f32 %v4147_v36, %v9251_v48  ;;  %v9260_v22 = vadd.f32 %v4153_v37, %v9251_v48  ;;  %v9263_v44 = vadd.f32 %v4157_v53, %v9251_v48  ;;  %v9319_v37 = vld [vmem:[#allocation13 + $0x64] ss:$8 sps:$4 sm:$0xff]   ;;  %v9321_v53 = vld [vmem:[#allocation13 + $0x60] ss:$8 sps:$4 sm:$0xff]  }
0x12bc   :  { %v3989_v51 = vpop.f32.mrb[102].mxu0  ;;  %v4170_v4 = vadd.f32 %v4145_v62, %v9253_v0  ;;  %v9267_v42 = vadd.f32 %v4149_v54, %v9253_v0  ;;  %v9270_v26 = vadd.f32 %v4155_v43, %v9253_v0  ;;  %v9273_v10 = vadd.f32 %v4159_v52, %v9253_v0  ;;  %4445 = vmatprep.subr.bf16.mxu1 %v9319_v37  ;;  %v9325_v62 = vld [vmem:[#allocation13 + $0x74] ss:$8 sps:$4 sm:$0xff]   ;;  %v9327_v54 = vld [vmem:[#allocation13 + $0x70] ss:$8 sps:$4 sm:$0xff]  }
0x12bd   :  { %v3990_v21 = vpop.f32.mrb[103].mxu0  ;;  %4446 = vmatpush1.bf16.msra.mxu1 %v9321_v53 }
0x12be   :  { %4447 = vmatprep.subr.bf16.mxu1 %v9325_v62 }
0x12c1   :  { %4448 = vmatpush1.bf16.msra.mxu1 %v9327_v54 }
0x12c2   :  { %4665 = vmatprep.subr.bf16.mxu1 %v9173_v11 }
0x12ca   :  { %v4297_v59 = vpop.f32.mrb[104].mxu0 }
0x12cb   :  { %v4304_v50 = vadd.f32 %v4297_v59, %v4169_v14  ;;  %v4299_v61 = vpop.f32.mrb[105].mxu0 }
0x12cc   :  { %v4305_v5 = vadd.f32 %v4299_v61, %v4170_v4  ;;  %v4301_v63 = vpop.f32.mrb[106].mxu0 }
0x12cd   :  { %v5461_v8 = vmul.f32 -1.442695, %v4304_v50  ;;  %v4302_v31 = vpop.f32.mrb[107].mxu0 }
0x12ce   :  { %v5462_v27 = vmul.f32 -1.442695, %v4305_v5 }
0x12cf   :  { %6215 = vpow2.f32 %v5461_v8 }
0x12d0   :  { %6217 = vtanh.f32 %v4305_v5 }
0x12d9   :  { %v6216_v32 = vpop.eup %6215 }
0x12da   :  { %v4309_v49 = vadd.f32 1.0, %v6216_v32  ;;  %v6218_v3 = vpop.eup %6217 }
0x12dc   :  { %6219 = vrcp.f32 %v4309_v49 }
0x12dd   :  { %6221 = vpow2.f32 %v5462_v27 }
0x12e6   :  { %v6220_v55 = vpop.eup %6219 }
0x12e7   :  { %v4324_v18 = vmul.f32 %v6220_v55, %v6218_v3  ;;  %v6222_v15 = vpop.eup %6221  ;;  %v4323_v6 = vmul.f32 %v6220_v55, %v9313_v60 }
0x12e8   :  { %v4316_v17 = vadd.f32 1.0, %v6222_v15 }
0x12e9   :  { %4326 = vrot.lane.b32.xlu1 %v4324_v18, %s6599_s1  ;;  %v4213_v18 = vld [vmem:[#allocation14] sm:$0x3] }
0x12ea   :  { %6223 = vrcp.f32 %v4316_v17  ;;  %v9366_v27 = vrot.slane %v4213_v18, %v9886_v12 }
0x12f4   :  { %v6224_v43 = vpop.eup %6223 }
0x135b   :  { %v4327_v30 = vpop.permute.xlu1 %4326 }
0x135c   :  { %v9316_v36 = vadd.f32 %v4327_v30, %v4323_v6 }
0x135e   :  { %6225 = vtanh.f32 %v9316_v36 }
0x1368   :  { %v6226_v52 = vpop.eup %6225 }
0x1369   :  { %v4331_v14 = vmul.f32 %v6226_v52, %v6224_v43 }
0x136b   :  { %v4506_v51 = vpack.c.bf16 %v4331_v14, %v4331_v14  ;;  %v5722_v4 = vpack.i.bf16 %v9149_v20, %v4331_v14 }
0x136d   :  { %4508 = vrot.lane.b32.xlu1 %v4506_v51, %s6599_s1 }
0x1371   :  { %5723 = vrot.lane.b32.xlu1 %v5722_v4, %s6599_s1 }
0x13df   :  { %v4509_v21 = vpop.permute.xlu1 %4508 }
0x13e0   :  { %5481 = vmatmul.mubr.msk.bf16.vlgmr.msra.gmra.mrb[108].mxu0 %vm793_vm6, %v4509_v21 }
0x13e1   :  { %4585 = vmatpush1.bf16.msra.mxu0 %v9278_v24  ;;  %4616 = vmatprep.mubr.bf16.mxu0 %v9732_v57 }
0x13e2   :  { %4586 = vmatprep.subr.bf16.mxu0 %v9280_v25 }
0x13e3   :  { %v5724_v59 = vpop.permute.xlu1 %5723 }
0x13e4   :  { %v5726_v50 = vunpack.i.h.bf16 %v5724_v59  ;;  %v5725_v61 = vunpack.i.l.bf16 %v5724_v59 }
0x13e5   :  { %4587 = vmatpush1.bf16.msra.mxu0 %v9285_v29 }
0x13e6   :  { %v4340_v5 = vsel %vm793_vm6, %v5725_v61, %v5726_v50  ;;  %4588 = vmatprep.subr.bf16.mxu0 %v9288_v9 }
0x13e7   :  { %v4341_v20 = vpack.c.bf16 %v4340_v5, %v4340_v5 }
0x13e9   :  { %4466 = vmatmul.mubr.bf16.vlgmr.msra.gmra.mrb[116].mxu1 %v4341_v20  ;;  %4589 = vmatpush1.bf16.msra.mxu0 %v9291_v45 }
0x13ea   :  { %4666 = vmatpush1.bf16.msra.mxu1 %v9182_v40  ;;  %4590 = vmatprep.subr.bf16.mxu0 %v9294_v41 }
0x13eb   :  { %4667 = vmatprep.subr.bf16.mxu1 %v9187_v47  ;;  %4697 = vmatprep.mubr.bf16.mxu1 %v9732_v57 }
0x13ed   :  { %4591 = vmatpush1.bf16.msra.mxu0 %v9297_v56 }
0x13ee   :  { %4668 = vmatpush1.bf16.msra.mxu1 %v9193_v13  ;;  %4592 = vmatprep.subr.bf16.mxu0 %v9300_v1 }
0x13ef   :  { %4669 = vmatprep.subr.bf16.mxu1 %v9200_v33 }
0x13f1   :  { %4593 = vmatpush1.bf16.msra.mxu0 %v9303_v35 }
0x13f2   :  { %4670 = vmatpush1.bf16.msra.mxu1 %v9206_v2  ;;  %4594 = vmatprep.subr.bf16.mxu0 %v9306_v38 }
0x13f3   :  { %4671 = vmatprep.subr.bf16.mxu1 %v9212_v34 }
0x13f5   :  { %4595 = vmatpush1.bf16.msra.mxu0 %v9309_v46 }
0x13f6   :  { %4672 = vmatpush1.bf16.msra.mxu1 %v9218_v16  ;;  %4596 = vmatprep.subr.bf16.mxu0 %v9319_v37 }
0x13f7   :  { %4736 = vmatprep.subr.bf16.mxu1 %v9276_v19 }
0x13f9   :  { %4597 = vmatpush1.bf16.msra.mxu0 %v9321_v53 }
0x13fa   :  { %4598 = vmatprep.subr.bf16.mxu0 %v9325_v62 }
0x13fd   :  { %4599 = vmatpush1.bf16.msra.mxu0 %v9327_v54 }
0x13fe   :  { %4817 = vmatprep.subr.bf16.mxu0 %v9173_v11 }
0x14b3   :  { %v4547_v63 = vpop.f32.mrb[108].mxu0 }
0x14b4   :  { %v4554_v8 = vadd.f32 %v4547_v63, %v9257_v58  ;;  %v4549_v31 = vpop.f32.mrb[109].mxu0 }
0x14b5   :  { %v4555_v32 = vadd.f32 %v4549_v31, %v9267_v42  ;;  %v4551_v49 = vpop.f32.mrb[110].mxu0  ;;  %v9370_v42 = vrot.slane %v4213_v18, %v9887_v39 }
0x14b6   :  { %v5482_v3 = vmul.f32 -1.442695, %v4554_v8  ;;  %v4552_v55 = vpop.f32.mrb[111].mxu0 }
0x14b7   :  { %v5483_v63 = vmul.f32 -1.442695, %v4555_v32 }
0x14b8   :  { %6227 = vpow2.f32 %v5482_v3 }
0x14bc   :  { %v4467_v15 = vpop.f32.mrb[116].mxu1 }
0x14bd   :  { %v4468_v17 = vadd.f32 %v4467_v15, %v9366_v27  ;;  %v4469_v6 = vpop.f32.mrb[117].mxu1 }
0x14be   :  { %v4471_v30 = vpop.f32.mrb[118].mxu1  ;;  %v4470_v51 = vadd.f32 %v4469_v6, %v9370_v42 }
0x14bf   :  { %v5479_v43 = vmul.f32 -1.442695, %v4468_v17  ;;  %v4472_v52 = vpop.f32.mrb[119].mxu1 }
0x14c1   :  { %6229 = vpow2.f32 %v5479_v43 }
0x14c2   :  { %v6228_v58 = vpop.eup %6227  ;;  %6231 = vtanh.f32 %v4555_v32  ;;  %v5480_v32 = vmul.f32 -1.442695, %v4470_v51 }
0x14c3   :  { %v4559_v14 = vadd.f32 1.0, %v6228_v58 }
0x14c5   :  { %6233 = vrcp.f32 %v4559_v14 }
0x14c6   :  { %6235 = vtanh.f32 %v4470_v51 }
0x14cb   :  { %v6230_v4 = vpop.eup %6229 }
0x14cc   :  { %v4477_v12 = vadd.f32 1.0, %v6230_v4  ;;  %v6232_v21 = vpop.eup %6231 }
0x14ce   :  { %6237 = vrcp.f32 %v4477_v12 }
0x14cf   :  { %v6234_v59 = vpop.eup %6233  ;;  %6239 = vpow2.f32 %v5483_v63 }
0x14d0   :  { %v4570_v50 = vmul.f32 %v6234_v59, %v6232_v21  ;;  %v6236_v61 = vpop.eup %6235  ;;  %v4569_v31 = vmul.f32 %v6234_v59, %v9316_v36 }
0x14d2   :  { %4572 = vrot.lane.b32.xlu0 %v4570_v50, %s6599_s1 }
0x14d8   :  { %v6238_v5 = vpop.eup %6237 }
0x14d9   :  { %v4488_v20 = vmul.f32 %v6238_v5, %v6236_v61  ;;  %v6240_v39 = vpop.eup %6239  ;;  %v4487_v30 = vmul.f32 %v6238_v5, %v9313_v60 }
0x14da   :  { %v4566_v8 = vadd.f32 1.0, %v6240_v39 }
0x14db   :  { %4490 = vrot.lane.b32.xlu0 %v4488_v20, %s6599_s1 }
0x14dc   :  { %6241 = vrcp.f32 %v4566_v8 }
0x14e6   :  { %v6242_v55 = vpop.eup %6241 }
0x1544   :  { %v4573_v49 = vpop.permute.xlu0 %4572 }
0x1545   :  { %v9376_v3 = vadd.f32 %v4573_v49, %v4569_v31 }
0x1547   :  { %6243 = vtanh.f32 %v9376_v3 }
0x1548   :  { %6245 = vpow2.f32 %v5480_v32 }
0x154d   :  { %v4491_v6 = vpop.permute.xlu0 %4490 }
0x154e   :  { %v9382_v43 = vadd.f32 %v4491_v6, %v4487_v30 }
0x1550   :  { %6247 = vtanh.f32 %v9382_v43 }
0x1551   :  { %v6244_v18 = vpop.eup %6243 }
0x1552   :  { %v4577_v15 = vmul.f32 %v6244_v18, %v6242_v55  ;;  %v6246_v36 = vpop.eup %6245 }
0x1553   :  { %v4484_v52 = vadd.f32 1.0, %v6246_v36 }
0x1554   :  { %v4658_v17 = vpack.c.bf16 %v4577_v15, %v4577_v15 }
0x1555   :  { %6249 = vrcp.f32 %v4484_v52 }
0x1556   :  { %4660 = vrot.lane.b32.xlu1 %v4658_v17, %s6599_s1 }
0x155a   :  { %4579 = vrot.lane.b32.xlu1 %v4577_v15, %s6599_s1  ;;  %v6248_v58 = vpop.eup %6247 }
0x155f   :  { %v6250_v4 = vpop.eup %6249 }
0x1560   :  { %v9388_v51 = vmul.f32 %v6250_v4, %v6248_v58 }
0x15c8   :  { %v4661_v14 = vpop.permute.xlu1 %4660 }
0x15c9   :  { %5486 = vmatmul.mubr.msk.bf16.vlgmr.msra.gmra.mrb[120].mxu1 %vm793_vm6, %v4661_v14 }
0x15ca   :  { %4737 = vmatpush1.bf16.msra.mxu1 %v9278_v24  ;;  %4768 = vmatprep.mubr.bf16.mxu1 %v9732_v57 }
0x15cb   :  { %4738 = vmatprep.subr.bf16.mxu1 %v9280_v25 }
0x15cc   :  { %v4580_v60 = vpop.permute.xlu1 %4579 }
0x15cd   :  { %v4582_v12 = vsel %vm793_vm6, %v4580_v60, %v9388_v51 }
0x15ce   :  { %v4583_v21 = vpack.c.bf16 %v4582_v12, %v4582_v12  ;;  %4739 = vmatpush1.bf16.msra.mxu1 %v9285_v29 }
0x15cf   :  { %4740 = vmatprep.subr.bf16.mxu1 %v9288_v9 }
0x15d0   :  { %4617 = vmatmul.mubr.bf16.vlgmr.msra.gmra.mrb[112].mxu0 %v4583_v21 }
0x15d1   :  { %4818 = vmatpush1.bf16.msra.mxu0 %v9182_v40  ;;  %4849 = vmatprep.mubr.bf16.mxu0 %v9732_v57 }
0x15d2   :  { %4741 = vmatpush1.bf16.msra.mxu1 %v9291_v45  ;;  %4819 = vmatprep.subr.bf16.mxu0 %v9187_v47 }
0x15d3   :  { %4742 = vmatprep.subr.bf16.mxu1 %v9294_v41 }
0x15d5   :  { %4820 = vmatpush1.bf16.msra.mxu0 %v9193_v13 }
0x15d6   :  { %4743 = vmatpush1.bf16.msra.mxu1 %v9297_v56  ;;  %4821 = vmatprep.subr.bf16.mxu0 %v9200_v33 }
0x15d7   :  { %4744 = vmatprep.subr.bf16.mxu1 %v9300_v1 }
0x15d9   :  { %4822 = vmatpush1.bf16.msra.mxu0 %v9206_v2 }
0x15da   :  { %4745 = vmatpush1.bf16.msra.mxu1 %v9303_v35  ;;  %4823 = vmatprep.subr.bf16.mxu0 %v9212_v34 }
0x15db   :  { %4746 = vmatprep.subr.bf16.mxu1 %v9306_v38 }
0x15dd   :  { %4824 = vmatpush1.bf16.msra.mxu0 %v9218_v16 }
0x15de   :  { %4747 = vmatpush1.bf16.msra.mxu1 %v9309_v46  ;;  %4888 = vmatprep.subr.bf16.mxu0 %v9276_v19 }
0x15df   :  { %4748 = vmatprep.subr.bf16.mxu1 %v9319_v37 }
0x15e2   :  { %4749 = vmatpush1.bf16.msra.mxu1 %v9321_v53 }
0x15e3   :  { %4750 = vmatprep.subr.bf16.mxu1 %v9325_v62 }
0x15e6   :  { %4751 = vmatpush1.bf16.msra.mxu1 %v9327_v54 }
0x15e7   :  { %4969 = vmatprep.subr.bf16.mxu1 %v9173_v11 }
0x169c   :  { %v4699_v59 = vpop.f32.mrb[120].mxu1 }
0x169d   :  { %v4706_v50 = vadd.f32 %v4699_v59, %v9260_v22  ;;  %v4701_v61 = vpop.f32.mrb[121].mxu1 }
0x169e   :  { %v4707_v5 = vadd.f32 %v4701_v61, %v9270_v26  ;;  %v4703_v20 = vpop.f32.mrb[122].mxu1 }
0x169f   :  { %v5487_v63 = vmul.f32 -1.442695, %v4706_v50  ;;  %v4704_v39 = vpop.f32.mrb[123].mxu1 }
0x16a0   :  { %v5488_v4 = vmul.f32 -1.442695, %v4707_v5 }
0x16a1   :  { %6251 = vpow2.f32 %v5487_v63 }
0x16a3   :  { %v4618_v8 = vpop.f32.mrb[112].mxu0 }
0x16a4   :  { %v4619_v31 = vadd.f32 %v4618_v8, %v9366_v27  ;;  %v4620_v49 = vpop.f32.mrb[113].mxu0 }
0x16a5   :  { %v4622_v55 = vpop.f32.mrb[114].mxu0  ;;  %v4621_v22 = vadd.f32 %v4620_v49, %v9370_v42 }
0x16a6   :  { %v5484_v18 = vmul.f32 -1.442695, %v4619_v31  ;;  %v4623_v15 = vpop.f32.mrb[115].mxu0 }
0x16a8   :  { %6253 = vpow2.f32 %v5484_v18 }
0x16a9   :  { %6255 = vtanh.f32 %v4707_v5  ;;  %v5485_v5 = vmul.f32 -1.442695, %v4621_v22 }
0x16ab   :  { %v6252_v17 = vpop.eup %6251 }
0x16ac   :  { %v4711_v11 = vadd.f32 1.0, %v6252_v17 }
0x16ae   :  { %6257 = vrcp.f32 %v4711_v11 }
0x16af   :  { %6259 = vtanh.f32 %v4621_v22 }
0x16b2   :  { %v6254_v32 = vpop.eup %6253 }
0x16b3   :  { %v4628_v26 = vadd.f32 1.0, %v6254_v32  ;;  %v6256_v6 = vpop.eup %6255 }
0x16b5   :  { %6261 = vrcp.f32 %v4628_v26 }
0x16b6   :  { %6263 = vpow2.f32 %v5488_v4 }
0x16b8   :  { %v6258_v30 = vpop.eup %6257 }
0x16b9   :  { %v4722_v36 = vmul.f32 %v6258_v30, %v6256_v6  ;;  %v6260_v52 = vpop.eup %6259  ;;  %v4721_v21 = vmul.f32 %v6258_v30, %v9376_v3 }
0x16bb   :  { %4724 = vrot.lane.b32.xlu0 %v4722_v36, %s6599_s1 }
0x16bf   :  { %v6262_v58 = vpop.eup %6261 }
0x16c0   :  { %v4639_v14 = vmul.f32 %v6262_v58, %v6260_v52  ;;  %v6264_v60 = vpop.eup %6263  ;;  %v4638_v31 = vmul.f32 %v6262_v58, %v9382_v43 }
0x16c1   :  { %v4718_v12 = vadd.f32 1.0, %v6264_v60 }
0x16c2   :  { %4641 = vrot.lane.b32.xlu0 %v4639_v14, %s6599_s1 }
0x16c3   :  { %6265 = vrcp.f32 %v4718_v12 }
0x16cd   :  { %v6266_v61 = vpop.eup %6265 }
0x172d   :  { %v4725_v59 = vpop.permute.xlu0 %4724 }
0x172e   :  { %v9423_v50 = vadd.f32 %v4725_v59, %v4721_v21 }
0x1730   :  { %6267 = vtanh.f32 %v9423_v50 }
0x1731   :  { %6269 = vpow2.f32 %v5485_v5 }
0x1734   :  { %v4642_v8 = vpop.permute.xlu0 %4641 }
0x1735   :  { %v9429_v49 = vadd.f32 %v4642_v8, %v4638_v31 }
0x1737   :  { %6271 = vtanh.f32 %v9429_v49 }
0x173a   :  { %v6268_v20 = vpop.eup %6267 }
0x173b   :  { %v4729_v63 = vmul.f32 %v6268_v20, %v6266_v61  ;;  %v6270_v3 = vpop.eup %6269 }
0x173c   :  { %v4635_v55 = vadd.f32 1.0, %v6270_v3 }
0x173d   :  { %v4810_v39 = vpack.c.bf16 %v4729_v63, %v4729_v63 }
0x173e   :  { %6273 = vrcp.f32 %v4635_v55 }
0x173f   :  { %4812 = vrot.lane.b32.xlu1 %v4810_v39, %s6599_s1 }
0x1741   :  { %v6272_v18 = vpop.eup %6271 }
0x1743   :  { %4731 = vrot.lane.b32.xlu1 %v4729_v63, %s6599_s1 }
0x1748   :  { %v6274_v17 = vpop.eup %6273 }
0x1749   :  { %v9435_v11 = vmul.f32 %v6274_v17, %v6272_v18 }
0x17b1   :  { %v4813_v15 = vpop.permute.xlu1 %4812 }
0x17b2   :  { %5491 = vmatmul.mubr.msk.bf16.vlgmr.msra.gmra.mrb[116].mxu0 %vm793_vm6, %v4813_v15 }
0x17b3   :  { %4889 = vmatpush1.bf16.msra.mxu0 %v9278_v24  ;;  %4920 = vmatprep.mubr.bf16.mxu0 %v9732_v57 }
0x17b4   :  { %4890 = vmatprep.subr.bf16.mxu0 %v9280_v25 }
0x17b5   :  { %v4732_v43 = vpop.permute.xlu1 %4731 }
0x17b6   :  { %v4734_v22 = vsel %vm793_vm6, %v4732_v43, %v9435_v11 }
0x17b7   :  { %v4735_v32 = vpack.c.bf16 %v4734_v22, %v4734_v22  ;;  %4891 = vmatpush1.bf16.msra.mxu0 %v9285_v29 }
0x17b8   :  { %4892 = vmatprep.subr.bf16.mxu0 %v9288_v9 }
0x17b9   :  { %4769 = vmatmul.mubr.bf16.vlgmr.msra.gmra.mrb[124].mxu1 %v4735_v32 }
0x17ba   :  { %4970 = vmatpush1.bf16.msra.mxu1 %v9182_v40  ;;  %5001 = vmatprep.mubr.bf16.mxu1 %v9732_v57 }
0x17bb   :  { %4893 = vmatpush1.bf16.msra.mxu0 %v9291_v45  ;;  %4971 = vmatprep.subr.bf16.mxu1 %v9187_v47 }
0x17bc   :  { %4894 = vmatprep.subr.bf16.mxu0 %v9294_v41 }
0x17be   :  { %4972 = vmatpush1.bf16.msra.mxu1 %v9193_v13 }
0x17bf   :  { %4895 = vmatpush1.bf16.msra.mxu0 %v9297_v56  ;;  %4973 = vmatprep.subr.bf16.mxu1 %v9200_v33 }
0x17c0   :  { %4896 = vmatprep.subr.bf16.mxu0 %v9300_v1 }
0x17c2   :  { %4974 = vmatpush1.bf16.msra.mxu1 %v9206_v2 }
0x17c3   :  { %4897 = vmatpush1.bf16.msra.mxu0 %v9303_v35  ;;  %4975 = vmatprep.subr.bf16.mxu1 %v9212_v34 }
0x17c4   :  { %4898 = vmatprep.subr.bf16.mxu0 %v9306_v38 }
0x17c6   :  { %4976 = vmatpush1.bf16.msra.mxu1 %v9218_v16 }
0x17c7   :  { %4899 = vmatpush1.bf16.msra.mxu0 %v9309_v46  ;;  %5040 = vmatprep.subr.bf16.mxu1 %v9276_v19 }
0x17c8   :  { %4900 = vmatprep.subr.bf16.mxu0 %v9319_v37 }
0x17cb   :  { %4901 = vmatpush1.bf16.msra.mxu0 %v9321_v53 }
0x17cc   :  { %4902 = vmatprep.subr.bf16.mxu0 %v9325_v62 }
0x17cf   :  { %4903 = vmatpush1.bf16.msra.mxu0 %v9327_v54 }
0x1885   :  { %v4851_v40 = vpop.f32.mrb[116].mxu0 }
0x1886   :  { %v4858_v47 = vadd.f32 %v4851_v40, %v9263_v44  ;;  %v4853_v13 = vpop.f32.mrb[117].mxu0 }
0x1887   :  { %v4859_v33 = vadd.f32 %v4853_v13, %v9273_v10  ;;  %v4855_v2 = vpop.f32.mrb[118].mxu0 }
0x1888   :  { %v5492_v34 = vmul.f32 -1.442695, %v4858_v47  ;;  %v4856_v16 = vpop.f32.mrb[119].mxu0 }
0x1889   :  { %v5493_v63 = vmul.f32 -1.442695, %v4859_v33 }
0x188a   :  { %6275 = vpow2.f32 %v5492_v34 }
0x188c   :  { %v4770_v26 = vpop.f32.mrb[124].mxu1 }
0x188d   :  { %v4771_v19 = vadd.f32 %v4770_v26, %v9366_v27  ;;  %v4772_v6 = vpop.f32.mrb[125].mxu1 }
0x188e   :  { %v4774_v30 = vpop.f32.mrb[126].mxu1  ;;  %v4773_v44 = vadd.f32 %v4772_v6, %v9370_v42 }
0x188f   :  { %v5489_v36 = vmul.f32 -1.442695, %v4771_v19  ;;  %v4775_v52 = vpop.f32.mrb[127].mxu1 }
0x1890   :  { %v5490_v43 = vmul.f32 -1.442695, %v4773_v44 }
0x1891   :  { %6277 = vpow2.f32 %v5489_v36 }
0x1892   :  { %6279 = vtanh.f32 %v4859_v33 }
0x1894   :  { %v6276_v58 = vpop.eup %6275 }
0x1895   :  { %v4863_v14 = vadd.f32 1.0, %v6276_v58 }
0x1897   :  { %6281 = vrcp.f32 %v4863_v14  ;;  %v5114_v14 = vld [vmem:[#allocation16] sm:$0xff] }
0x1898   :  { %6283 = vtanh.f32 %v4773_v44  ;;  %v5115_v44 = vld [vmem:[#allocation16 + $0x8] sm:$0xff] }
0x189b   :  { %v6278_v4 = vpop.eup %6277 }
0x189c   :  { %v4780_v10 = vadd.f32 1.0, %v6278_v4  ;;  %v6280_v60 = vpop.eup %6279  ;;  %v6600_v4 = vmov 0.0|0.0  }
0x189d   :  { %5685 = vmatprep.subr.bf16.mxu0 %v6600_v4 }
0x189e   :  { %6285 = vrcp.f32 %v4780_v10  ;;  %v5686_v10 = vpack.c.bf16 %v5115_v44, %v5114_v14 }
0x189f   :  { %6287 = vpow2.f32 %v5493_v63  ;;  %v5116_v63 = vld [vmem:[#allocation16 + $0x10] sm:$0xff] }
0x18a1   :  { %v6282_v12 = vpop.eup %6281 }
0x18a2   :  { %v4874_v21 = vmul.f32 %v6282_v12, %v6280_v60  ;;  %v6284_v59 = vpop.eup %6283  ;;  %v4873_v8 = vmul.f32 %v6282_v12, %v9423_v50 }
0x18a4   :  { %4876 = vrot.lane.b32.xlu0 %v4874_v21, %s6599_s1 }
0x18a8   :  { %v6286_v61 = vpop.eup %6285 }
0x18a9   :  { %v4791_v20 = vmul.f32 %v6286_v61, %v6284_v59  ;;  %v6288_v39 = vpop.eup %6287  ;;  %v4790_v32 = vmul.f32 %v6286_v61, %v9429_v49 }
0x18aa   :  { %v4870_v5 = vadd.f32 1.0, %v6288_v39  ;;  %v5117_v39 = vld [vmem:[#allocation16 + $0x18] sm:$0xff] }
0x18ab   :  { %4793 = vrot.lane.b32.xlu0 %v4791_v20, %s6599_s1 }
0x18ac   :  { %6289 = vrcp.f32 %v4870_v5  ;;  %v5689_v5 = vpack.c.bf16 %v5117_v39, %v5116_v63 }
0x18b6   :  { %v6290_v55 = vpop.eup %6289 }
0x1916   :  { %v4877_v31 = vpop.permute.xlu0 %4876 }
0x1917   :  { %v9469_v3 = vadd.f32 %v4877_v31, %v4873_v8  ;;  %v5118_v8 = vld [vmem:[#allocation16 + $0x20] sm:$0xff]  ;;  %v5119_v31 = vld [vmem:[#allocation16 + $0x28] sm:$0xff] }
0x1919   :  { %6291 = vtanh.f32 %v9469_v3 }
0x191a   :  { %6293 = vpow2.f32 %v5490_v43 }
0x191d   :  { %v4794_v22 = vpop.permute.xlu0 %4793 }
0x191e   :  { %v9475_v40 = vadd.f32 %v4794_v22, %v4790_v32 }
0x1920   :  { %6295 = vtanh.f32 %v9475_v40 }
0x1923   :  { %v6292_v18 = vpop.eup %6291 }
0x1924   :  { %v4881_v15 = vmul.f32 %v6292_v18, %v6290_v55  ;;  %v6294_v50 = vpop.eup %6293  ;;  %v5692_v55 = vpack.c.bf16 %v5119_v31, %v5118_v8  ;;  %v5120_v18 = vld [vmem:[#allocation16 + $0x30] sm:$0xff] }
0x1925   :  { %v4787_v47 = vadd.f32 1.0, %v6294_v50 }
0x1926   :  { %v4962_v17 = vpack.c.bf16 %v4881_v15, %v4881_v15 }
0x1927   :  { %6297 = vrcp.f32 %v4787_v47 }
0x1928   :  { %4964 = vrot.lane.b32.xlu1 %v4962_v17, %s6599_s1 }
0x192a   :  { %v6296_v13 = vpop.eup %6295 }
0x192c   :  { %4883 = vrot.lane.b32.xlu1 %v4881_v15, %s6599_s1  ;;  %v5121_v15 = vld [vmem:[#allocation16 + $0x38] sm:$0xff] }
0x192d   :  { %v5695_v17 = vpack.c.bf16 %v5121_v15, %v5120_v18 }
0x1931   :  { %v6298_v2 = vpop.eup %6297 }
0x1932   :  { %v9481_v34 = vmul.f32 %v6298_v2, %v6296_v13 }
0x199a   :  { %v4965_v33 = vpop.permute.xlu1 %4964 }
0x199b   :  { %5496 = vmatmul.mubr.msk.bf16.vlgmr.msra.gmra.mrb[112].mxu1 %vm793_vm6, %v4965_v33 }
0x199c   :  { %5041 = vmatpush1.bf16.msra.mxu1 %v9278_v24  ;;  %5072 = vmatprep.mubr.bf16.mxu1 %v9732_v57  ;;  %v5697_v57 = vadd.f32 %v9238_v7, %v9251_v48 }
0x199d   :  { %5042 = vmatprep.subr.bf16.mxu1 %v9280_v25  ;;  %v5699_v25 = vadd.f32 %v9241_v28, %v9253_v0 }
0x199e   :  { %v4884_v49 = vpop.permute.xlu1 %4883 }
0x199f   :  { %v4886_v16 = vsel %vm793_vm6, %v4884_v49, %v9481_v34 }
0x19a0   :  { %v4887_v26 = vpack.c.bf16 %v4886_v16, %v4886_v16  ;;  %5043 = vmatpush1.bf16.msra.mxu1 %v9285_v29 }
0x19a1   :  { %5044 = vmatprep.subr.bf16.mxu1 %v9288_v9 }
0x19a2   :  { %4921 = vmatmul.mubr.bf16.vlgmr.msra.gmra.mrb[120].mxu0 %v4887_v26 }
0x19a3   :  { %5687 = vmatpush3.bf16.msra.mxu0 %v5686_v10  ;;  %5606 = vmatprep.mubr.msk.f32.mxu0 %vm6601_vm15, %v6598_v23 }
0x19a4   :  { %5045 = vmatpush1.bf16.msra.mxu1 %v9291_v45  ;;  %5688 = vmatprep.subr.bf16.mxu0 %v6600_v4 }
0x19a5   :  { %5046 = vmatprep.subr.bf16.mxu1 %v9294_v41 }
0x19a7   :  { %5690 = vmatpush3.bf16.msra.mxu0 %v5689_v5 }
0x19a8   :  { %5047 = vmatpush1.bf16.msra.mxu1 %v9297_v56  ;;  %5691 = vmatprep.subr.bf16.mxu0 %v6600_v4 }
0x19a9   :  { %5048 = vmatprep.subr.bf16.mxu1 %v9300_v1 }
0x19ab   :  { %5693 = vmatpush3.bf16.msra.mxu0 %v5692_v55 }
0x19ac   :  { %5049 = vmatpush1.bf16.msra.mxu1 %v9303_v35  ;;  %5694 = vmatprep.subr.bf16.mxu0 %v6600_v4 }
0x19ad   :  { %5050 = vmatprep.subr.bf16.mxu1 %v9306_v38 }
0x19af   :  { %5696 = vmatpush3.bf16.msra.mxu0 %v5695_v17 }
0x19b0   :  { %5051 = vmatpush1.bf16.msra.mxu1 %v9309_v46 }
0x19b1   :  { %5052 = vmatprep.subr.bf16.mxu1 %v9319_v37 }
0x19b4   :  { %5053 = vmatpush1.bf16.msra.mxu1 %v9321_v53 }
0x19b5   :  { %5054 = vmatprep.subr.bf16.mxu1 %v9325_v62 }
0x19b8   :  { %5055 = vmatpush1.bf16.msra.mxu1 %v9327_v54 }
0x1a6e   :  { %v5003_v24 = vpop.f32.mrb[112].mxu1 }
0x1a6f   :  { %v5698_v29 = vadd.f32 %v5697_v57, %v5003_v24  ;;  %v5005_v9 = vpop.f32.mrb[113].mxu1 }
0x1a70   :  { %v5700_v45 = vadd.f32 %v5699_v25, %v5005_v9  ;;  %v5007_v41 = vpop.f32.mrb[114].mxu1 }
0x1a71   :  { %v5497_v56 = vmul.f32 -1.442695, %v5698_v29  ;;  %v5008_v1 = vpop.f32.mrb[115].mxu1 }
0x1a72   :  { %v5498_v60 = vmul.f32 -1.442695, %v5700_v45 }
0x1a73   :  { %6299 = vpow2.f32 %v5497_v56 }
0x1a75   :  { %v4922_v35 = vpop.f32.mrb[120].mxu0 }
0x1a76   :  { %v4923_v38 = vadd.f32 %v4922_v35, %v9366_v27  ;;  %v4924_v46 = vpop.f32.mrb[121].mxu0  ;;  %v5501_v35 = vld [vmem:[#allocation17] ss:$0 sm:$0xff] }
0x1a77   :  { %v4926_v37 = vpop.f32.mrb[122].mxu0  ;;  %v4925_v28 = vadd.f32 %v4924_v46, %v9370_v42 }
0x1a78   :  { %v5494_v53 = vmul.f32 -1.442695, %v4923_v38  ;;  %v4927_v62 = vpop.f32.mrb[123].mxu0 }
0x1a79   :  { %v5495_v32 = vmul.f32 -1.442695, %v4925_v28 }
0x1a7a   :  { %6301 = vpow2.f32 %v5494_v53 }
0x1a7b   :  { %6303 = vtanh.f32 %v5700_v45 }
0x1a7d   :  { %v6300_v7 = vpop.eup %6299 }
0x1a7e   :  { %v5015_v48 = vadd.f32 1.0, %v6300_v7 }
0x1a80   :  { %6305 = vrcp.f32 %v5015_v48 }
0x1a81   :  { %6307 = vtanh.f32 %v4925_v28 }
0x1a84   :  { %v6302_v0 = vpop.eup %6301 }
0x1a85   :  { %v4932_v54 = vadd.f32 1.0, %v6302_v0  ;;  %v6304_v19 = vpop.eup %6303 }
0x1a87   :  { %6309 = vrcp.f32 %v4932_v54 }
0x1a88   :  { %6311 = vpow2.f32 %v5498_v60 }
0x1a8a   :  { %v6306_v6 = vpop.eup %6305 }
0x1a8b   :  { %v5026_v30 = vmul.f32 %v6306_v6, %v6304_v19  ;;  %v6308_v36 = vpop.eup %6307  ;;  %v5025_v59 = vmul.f32 %v6306_v6, %v9469_v3 }
0x1a8d   :  { %5028 = vrot.lane.b32.xlu0 %v5026_v30, %s6599_s1 }
0x1a91   :  { %v6310_v52 = vpop.eup %6309 }
0x1a92   :  { %v4943_v58 = vmul.f32 %v6310_v52, %v6308_v36  ;;  %v6312_v12 = vpop.eup %6311  ;;  %v4942_v47 = vmul.f32 %v6310_v52, %v9475_v40 }
0x1a93   :  { %v5022_v21 = vadd.f32 1.0, %v6312_v12 }
0x1a94   :  { %4945 = vrot.lane.b32.xlu1 %v4943_v58, %s6599_s1 }
0x1a95   :  { %6313 = vrcp.f32 %v5022_v21 }
0x1a9f   :  { %v6314_v43 = vpop.eup %6313 }
0x1aff   :  { %v5029_v61 = vpop.permute.xlu0 %5028 }
0x1b00   :  { %v5031_v20 = vadd.f32 %v5029_v61, %v5025_v59 }
0x1b02   :  { %6315 = vtanh.f32 %v5031_v20 }
0x1b03   :  { %6317 = vpow2.f32 %v5495_v32 }
0x1b06   :  { %v4946_v50 = vpop.permute.xlu1 %4945 }
0x1b07   :  { %v4948_v33 = vadd.f32 %v4946_v50, %v4942_v47 }
0x1b09   :  { %6319 = vtanh.f32 %v4948_v33 }
0x1b0c   :  { %v6316_v3 = vpop.eup %6315 }
0x1b0d   :  { %v5033_v22 = vmul.f32 %v6316_v3, %v6314_v43  ;;  %v6318_v13 = vpop.eup %6317 }
0x1b0e   :  { %v4939_v2 = vadd.f32 1.0, %v6318_v13 }
0x1b0f   :  { %5035 = vrot.lane.b32.xlu0 %v5033_v22, %s6599_s1 }
0x1b10   :  { %6321 = vrcp.f32 %v4939_v2 }
0x1b13   :  { %4497 = vrot.lane.b32.xlu0 %v9388_v51, %s6599_s1  ;;  %v6320_v49 = vpop.eup %6319 }
0x1b17   :  { %4800 = vrot.lane.b32.xlu0 %v9481_v34, %s6599_s1 }
0x1b1a   :  { %v6322_v16 = vpop.eup %6321 }
0x1b1b   :  { %v4950_v26 = vmul.f32 %v6322_v16, %v6320_v49 }
0x1b81   :  { %v5036_v57 = vpop.permute.xlu0 %5035 }
0x1b82   :  { %v5038_v24 = vsel %vm793_vm6, %v5036_v57, %v4950_v26 }
0x1b83   :  { %v5039_v51 = vpack.c.bf16 %v5038_v24, %v5038_v24 }
0x1b85   :  { %v4498_v25 = vpop.permute.xlu0 %4497  ;;  %5073 = vmatmul.mubr.bf16.vlgmr.msra.gmra.mrb[128].mxu1 %v5039_v51 }
0x1b86   :  { %4500 = vst.msk [vmem:[#allocation5] sm:$0xff] %vm793_vm6, %v4498_v25 }
0x1b89   :  { %v4801_v34 = vpop.permute.xlu0 %4800 }
0x1b8a   :  { %4804 = vst.msk [vmem:[#allocation5 + $0x10] sm:$0xff] %vm793_vm6, %v4801_v34 }
0x1b8d   :  { %v5109_v40 = vld [vmem:[#allocation5] sm:$0xff] }
0x1b8e   :  { %5607 = vmatmul.mubr.msk.f32.vlgmr.msra.gmra.mrb[98].mxu0 %vm793_vm6, %v5109_v40 }
0x1b8f   :  { %5609 = vmatprep.mubr.msk.f32.mxu0 %vm6601_vm15, %v6598_v23 }
0x1b91   :  { %v5111_v4 = vld [vmem:[#allocation5 + $0x10] sm:$0xff] }
0x1c58   :  { %v5074_v29 = vpop.f32.mrb[128].mxu1 }
0x1c59   :  { %v5075_v9 = vadd.f32 %v5074_v29, %v9366_v27  ;;  %v5076_v45 = vpop.f32.mrb[129].mxu1 }
0x1c5a   :  { %v5078_v41 = vpop.f32.mrb[130].mxu1  ;;  %v5077_v53 = vadd.f32 %v5076_v45, %v9370_v42 }
0x1c5b   :  { %v5499_v56 = vmul.f32 -1.442695, %v5075_v9  ;;  %v5079_v1 = vpop.f32.mrb[131].mxu1 }
0x1c5c   :  { %v5500_v0 = vmul.f32 -1.442695, %v5077_v53 }
0x1c5d   :  { %6323 = vpow2.f32 %v5499_v56 }
0x1c5e   :  { %6325 = vtanh.f32 %v5077_v53 }
0x1c61   :  { %v5210_v38 = vpop.f32.mrb[98].mxu0 }
0x1c62   :  { %v5211_v46 = vadd.f32 %v5501_v35, %v5210_v38  ;;  %v5608_v37 = vpop.f32.mrb[99].mxu0 }
0x1c64   :  { %5234 = vst [vmem:[%s9576_s19] sm:$0xff] %v5211_v46 }
0x1c67   :  { %v6324_v62 = vpop.eup %6323 }
0x1c68   :  { %v5084_v7 = vadd.f32 1.0, %v6324_v62  ;;  %v6326_v27 = vpop.eup %6325 }
0x1c6a   :  { %6327 = vrcp.f32 %v5084_v7 }
0x1c6b   :  { %6329 = vpow2.f32 %v5500_v0 }
0x1c74   :  { %v6328_v48 = vpop.eup %6327 }
0x1c75   :  { %v5095_v28 = vmul.f32 %v6328_v48, %v6326_v27  ;;  %v6330_v54 = vpop.eup %6329  ;;  %v5094_v6 = vmul.f32 %v6328_v48, %v4948_v33 }
0x1c76   :  { %v5091_v19 = vadd.f32 1.0, %v6330_v54 }
0x1c77   :  { %5097 = vrot.lane.b32.xlu1 %v5095_v28, %s6599_s1 }
0x1c78   :  { %6331 = vrcp.f32 %v5091_v19 }
0x1c7b   :  { %4648 = vrot.lane.b32.xlu1 %v9435_v11, %s6599_s1 }
0x1c7f   :  { %4952 = vrot.lane.b32.xlu1 %v4950_v26, %s6599_s1 }
0x1c82   :  { %v6332_v58 = vpop.eup %6331 }
0x1ce9   :  { %v5098_v42 = vpop.permute.xlu1 %5097 }
0x1cea   :  { %v5100_v30 = vadd.f32 %v5098_v42, %v5094_v6 }
0x1cec   :  { %6333 = vtanh.f32 %v5100_v30 }
0x1ced   :  { %v4649_v36 = vpop.permute.xlu1 %4648 }
0x1cee   :  { %4652 = vst.msk [vmem:[#allocation5 + $0x8] sm:$0xff] %vm793_vm6, %v4649_v36 }
0x1cf1   :  { %v4953_v52 = vpop.permute.xlu1 %4952 }
0x1cf2   :  { %4956 = vst.msk [vmem:[#allocation5 + $0x18] sm:$0xff] %vm793_vm6, %v4953_v52 }
0x1cf5   :  { %v5110_v14 = vld [vmem:[#allocation5 + $0x8] sm:$0xff] }
0x1cf6   :  { %v6334_v11 = vpop.eup %6333  ;;  %5610 = vmatmul.mubr.msk.f32.gmra.mrb[124].mxu0 %vm793_vm6, %v5110_v14 }
0x1cf7   :  { %5612 = vmatprep.mubr.msk.f32.mxu0 %vm6601_vm15, %v6598_v23  ;;  %v5102_v44 = vmul.f32 %v6334_v11, %v6332_v58 }
0x1cf9   :  { %5104 = vrot.lane.b32.xlu0 %v5102_v44, %s6599_s1  ;;  %v5112_v10 = vld [vmem:[#allocation5 + $0x18] sm:$0xff] }
0x1cfa   :  { %5613 = vmatmul.mubr.msk.f32.gmra.mrb[126].mxu0 %vm793_vm6, %v5111_v4 }
0x1cfb   :  { %5615 = vmatprep.mubr.msk.f32.mxu0 %vm6601_vm15, %v6598_v23 }
0x1cfe   :  { %5616 = vmatmul.mubr.msk.f32.gmra.mrb[128].mxu0 %vm793_vm6, %v5112_v10 }
0x1cff   :  { %5618 = vmatprep.mubr.msk.f32.mxu0 %vm6601_vm15, %v6598_v23 }
0x1d6b   :  { %v5105_v60 = vpop.permute.xlu0 %5104 }
0x1d6c   :  { %5108 = vst.msk [vmem:[#allocation5 + $0x20] sm:$0xff] %vm793_vm6, %v5105_v60 }
0x1d73   :  { %v5113_v12 = vld [vmem:[#allocation5 + $0x20] sm:$0xff] }
0x1d74   :  { %5619 = vmatmul.mubr.msk.f32.gmra.mrb[130].mxu0 %vm793_vm6, %v5113_v12 }
0x1dc9   :  { %v5215_v21 = vpop.f32.mrb[124].mxu0 }
0x1dca   :  { %v5216_v59 = vadd.f32 %v5501_v35, %v5215_v21  ;;  %v5611_v61 = vpop.f32.mrb[125].mxu0 }
0x1dcc   :  { %5235 = vst [vmem:[%s9576_s19 + $0x8] sm:$0xff] %v5216_v59 }
0x1dcd   :  { %v5220_v20 = vpop.f32.mrb[126].mxu0 }
0x1dce   :  { %v5221_v63 = vadd.f32 %v5501_v35, %v5220_v20  ;;  %v5614_v39 = vpop.f32.mrb[127].mxu0 }
0x1dd0   :  { %5236 = vst [vmem:[%s9576_s19 + $0x10] sm:$0xff] %v5221_v63 }
0x1dd1   :  { %v5225_v23 = vpop.f32.mrb[128].mxu0 }
0x1dd2   :  { %v5226_v5 = vadd.f32 %v5501_v35, %v5225_v23  ;;  %v5617_v8 = vpop.f32.mrb[129].mxu0 }
0x1dd4   :  { %5237 = vst [vmem:[%s9576_s19 + $0x18] sm:$0xff] %v5226_v5 }
0x1e47   :  { %v5230_v31 = vpop.f32.mrb[130].mxu0 }
0x1e48   :  { %v5231_v55 = vadd.f32 %v5501_v35, %v5230_v31  ;;  %v5620_v18 = vpop.f32.mrb[131].mxu0 }
0x1e4a   :  { %5238 = vst [vmem:[%s9576_s19 + $0x20] sm:$0xff] %v5231_v55 }
0x1e4b   :  { %5243 = vsyncpa [#allocation7], 1 }
0x1e4c   :  { %5244 = vsyncpa [#allocation9], 1 }
0x1e4d   :  { %5245 = vsyncpa [#allocation12], 1 }
0x1e4e   :  { %5246 = vsyncpa [#allocation15], 1 }
0x1e4f   :  { %5247 = vsyncpa [#allocation18], 1 }

</bundles_post_ra>
